<compile_context>
chip_gen: v6e
topology: v6e:2x2x1
jax: 0.10.0
libtpu: 0.0.40
codegen_flags: <defaults>
</compile_context>

<pallas_src>
import jax
import jax.numpy as jnp
from jax import lax
from jax.experimental import pallas as pl
from jax.experimental.pallas import tpu as pltpu


# ----------------------------------------------------------------------------
# Fused Pallas kernel
# ----------------------------------------------------------------------------
def _make_fused_kernel(H, W, C, D):
    Hp = (H - 3) // 2 + 1          # pooled height (VALID 3x3, stride 2)
    Wp = (W - 3) // 2 + 1          # pooled width

    def conv3x3(pad_ref, col_ref, w_ref, b_ref, hh, ww, cc):
        """pad_ref holds a zero-padded (hh+2, ww+2, cc) input.  Build the
        (hh, ww, 9*cc) im2col patch in col_ref and run ONE MXU matmul."""
        xp = pad_ref[...]
        for kh in range(3):
            for kw in range(3):
                t = kh * 3 + kw
                col_ref[:, :, t * cc:(t + 1) * cc] = xp[kh:kh + hh, kw:kw + ww, :]
        y = lax.dot_general(
            col_ref[...], w_ref[...],
            dimension_numbers=(((2,), (0,)), ((), ())),
            preferred_element_type=jnp.float32)
        return y + b_ref[0][None, None, :]

    def kernel(x_ref, w1_ref, b1_ref,
               w11_ref, b11_ref, w12_ref, b12_ref,
               w21_ref, b21_ref, w22_ref, b22_ref,
               out_ref,
               pad1_ref, col1_ref, pad2_ref, col2_ref, pool_ref):
        # ---- conv1: zero-pad in VMEM, single im2col matmul (K = 9*C) ----------
        pad1_ref[...] = jnp.zeros_like(pad1_ref)
        pad1_ref[1:H + 1, 1:W + 1, :] = x_ref[0].astype(jnp.float32)
        y = conv3x3(pad1_ref, col1_ref, w1_ref, b1_ref, H, W, C)        # (H, W, D)

        # ---- maxpool 3x3 / stride 2 (VALID): emit only the strided outputs ----
        y4 = y.reshape(H // 2, 2, W, D)       # free leading-dim split (H stride)
        ye = y4[:, 0]                         # rows 0,2,...   (H//2, W, D)
        yo = y4[:, 1]                         # rows 1,3,...
        hm = jnp.maximum(jnp.maximum(ye[:Hp], yo[:Hp]), ye[1:Hp + 1])    # (Hp, W, D)
        wm = jnp.maximum(jnp.maximum(hm[:, 0:W - 2], hm[:, 1:W - 1]),
                         hm[:, 2:W])                                     # (Hp, W-2, D)
        pool_ref[...] = wm
        p = pool_ref[:, pl.ds(0, Wp, 2), :]                              # (Hp, Wp, D)

        # ---- 2 residual blocks: all intermediates stay in VMEM ----------------
        pad2_ref[...] = jnp.zeros_like(pad2_ref)      # borders stay zero throughout
        for wa, ba, wb, bb in ((w11_ref, b11_ref, w12_ref, b12_ref),
                               (w21_ref, b21_ref, w22_ref, b22_ref)):
            pad2_ref[1:Hp + 1, 1:Wp + 1, :] = jnp.maximum(p, 0.0)        # relu(x)
            h1 = conv3x3(pad2_ref, col2_ref, wa, ba, Hp, Wp, D)
            pad2_ref[1:Hp + 1, 1:Wp + 1, :] = jnp.maximum(h1, 0.0)       # relu(conv1(.))
            h2 = conv3x3(pad2_ref, col2_ref, wb, bb, Hp, Wp, D)
            p = p + jnp.maximum(h2, 0.0)                                 # x + relu(conv2(.))

        out_ref[0] = p.astype(out_ref.dtype)

    return kernel, Hp, Wp


# ----------------------------------------------------------------------------
# Wrapper (glue: BlockSpecs, scratch, grid)
# ----------------------------------------------------------------------------
def _full_spec(shape):
    zeros = (0,) * len(shape)
    return pl.BlockSpec(shape, lambda n: zeros)


def conv_sequence(x, params):
    """x: (N, H, W, C) float32 NHWC; params hold (9*C, D) weights and (1, D) biases."""
    N, H, W, C = x.shape
    D = params["conv_b"].shape[-1]
    assert H % 2 == 0 and W % 2 == 0, "pooling path assumes even spatial dims"
    kernel, Hp, Wp = _make_fused_kernel(H, W, C, D)

    order = (("conv_w", "conv_b"), ("r1_w1", "r1_b1"), ("r1_w2", "r1_b2"),
             ("r2_w1", "r2_b1"), ("r2_w2", "r2_b2"))
    args = [x]
    in_specs = [pl.BlockSpec((1, H, W, C), lambda n: (n, 0, 0, 0))]
    for wname, bname in order:
        args += [params[wname], params[bname]]
        in_specs += [_full_spec(params[wname].shape), _full_spec(params[bname].shape)]

    return pl.pallas_call(
        kernel,
        out_shape=jax.ShapeDtypeStruct((N, Hp, Wp, D), jnp.float32),
        grid=(N,),
        in_specs=in_specs,
        out_specs=pl.BlockSpec((1, Hp, Wp, D), lambda n: (n, 0, 0, 0)),
        scratch_shapes=[
            pltpu.VMEM((H + 2, W + 2, C), jnp.float32),    # padded conv1 input
            pltpu.VMEM((H, W, 9 * C), jnp.float32),        # conv1 im2col patch
            pltpu.VMEM((Hp + 2, Wp + 2, D), jnp.float32),  # padded residual input
            pltpu.VMEM((Hp, Wp, 9 * D), jnp.float32),      # residual im2col patch
            pltpu.VMEM((Hp, W - 2, D), jnp.float32),       # dense-W pool rows
        ],
        compiler_params=pltpu.CompilerParams(dimension_semantics=("parallel",)),
    )(*args)


# ----------------------------------------------------------------------------
# Deterministic parameter init (PyTorch-like uniform(-1/sqrt(fan_in), +))
# ----------------------------------------------------------------------------
def _init_conv(key, c_in, c_out):
    kw, kb = jax.random.split(key)
    bound = 1.0 / jnp.sqrt(c_in * 9.0)
    w_oihw = jax.random.uniform(kw, (c_out, c_in, 3, 3), jnp.float32, -bound, bound)
    # OIHW -> (kh, kw, c, d) -> (9*C, D): tap-major, channel-minor (matches im2col)
    w_mat = jnp.transpose(w_oihw, (2, 3, 1, 0)).reshape(9 * c_in, c_out)
    b = jax.random.uniform(kb, (1, c_out), jnp.float32, -bound, bound)
    return w_mat, b, w_oihw


def _reference(x, raw):
    """Pure-JAX NHWC reference of the PyTorch forward."""
    def conv(x, w_oihw, b, relu_in=False):
        if relu_in:
            x = jnp.maximum(x, 0.0)
        w_hwio = jnp.transpose(w_oihw, (2, 3, 1, 0))
        y = lax.conv_general_dilated(
            x, w_hwio, (1, 1), "SAME",
            dimension_numbers=("NHWC", "HWIO", "NHWC"))
        return y + b[0][None, None, None, :]

    y = conv(x, raw["conv_w"], raw["conv_b"])
    y = lax.reduce_window(y, -jnp.inf, lax.max, (1, 3, 3, 1), (1, 2, 2, 1), "VALID")
    for r in ("r1", "r2"):
        h = jnp.maximum(conv(y, raw[f"{r}_w1"], raw[f"{r}_b1"], relu_in=True), 0.0)
        h = jnp.maximum(conv(h, raw[f"{r}_w2"], raw[f"{r}_b2"]), 0.0)
        y = y + h
    return y


if __name__ == "__main__":
    in_channels, depth = 4, 32
    N, H, W = 2, 16, 16

    keys = jax.random.split(jax.random.PRNGKey(0), 6)
    params, raw = {}, {}
    params["conv_w"], params["conv_b"], raw["conv_w"] = _init_conv(keys[0], in_channels, depth)
    raw["conv_b"] = params["conv_b"]
    for i, r in enumerate(("r1", "r2")):
        w1, b1, w1_raw = _init_conv(keys[1 + 2 * i], depth, depth)
        w2, b2, w2_raw = _init_conv(keys[2 + 2 * i], depth, depth)
        params[f"{r}_w1"], params[f"{r}_b1"] = w1, b1
        params[f"{r}_w2"], params[f"{r}_b2"] = w2, b2
        raw[f"{r}_w1"], raw[f"{r}_b1"] = w1_raw, b1
        raw[f"{r}_w2"], raw[f"{r}_b2"] = w2_raw, b2

    x = jax.random.normal(keys[5], (N, H, W, in_channels), jnp.float32)

    out = jax.block_until_ready(conv_sequence(x, params))
    ref = jax.block_until_ready(_reference(x, raw))

    assert out.shape == (N, 7, 7, depth), out.shape
    err = float(jnp.max(jnp.abs(out - ref)))
    assert err < 1e-3, err
    print("KERNEL_OK")
</pallas_src>

<mosaic_0001>
module attributes {stable_mosaic.version = 11 : i64} {
  func.func @kernel(%arg0: i32, %arg1: memref<1x16x16x4xf32, #tpu.memory_space<vmem>>, %arg2: memref<36x32xf32, #tpu.memory_space<vmem>>, %arg3: memref<1x32xf32, #tpu.memory_space<vmem>>, %arg4: memref<288x32xf32, #tpu.memory_space<vmem>>, %arg5: memref<1x32xf32, #tpu.memory_space<vmem>>, %arg6: memref<288x32xf32, #tpu.memory_space<vmem>>, %arg7: memref<1x32xf32, #tpu.memory_space<vmem>>, %arg8: memref<288x32xf32, #tpu.memory_space<vmem>>, %arg9: memref<1x32xf32, #tpu.memory_space<vmem>>, %arg10: memref<288x32xf32, #tpu.memory_space<vmem>>, %arg11: memref<1x32xf32, #tpu.memory_space<vmem>>, %arg12: memref<1x7x7x32xf32, #tpu.memory_space<vmem>>, %arg13: memref<18x18x4xf32, #tpu.memory_space<vmem>>, %arg14: memref<16x16x36xf32, #tpu.memory_space<vmem>>, %arg15: memref<9x9x32xf32, #tpu.memory_space<vmem>>, %arg16: memref<7x7x288xf32, #tpu.memory_space<vmem>>, %arg17: memref<7x14x32xf32, #tpu.memory_space<vmem>>) attributes {dimension_semantics = [#tpu.dimension_semantics<parallel>], iteration_bounds = array<i64: 2>, scalar_prefetch = 0 : i64, scratch_operands = 5 : i64, tpu.core_type = #tpu.core_type<tc>, window_params = [{transform_indices = @transform_0, window_bounds = array<i64: 1, 16, 16, 4>}, {pipeline_mode = #tpu.pipeline_mode<synchronous>, transform_indices = @transform_1, window_bounds = array<i64: 36, 32>}, {pipeline_mode = #tpu.pipeline_mode<synchronous>, transform_indices = @transform_2, window_bounds = array<i64: 1, 32>}, {pipeline_mode = #tpu.pipeline_mode<synchronous>, transform_indices = @transform_3, window_bounds = array<i64: 288, 32>}, {pipeline_mode = #tpu.pipeline_mode<synchronous>, transform_indices = @transform_4, window_bounds = array<i64: 1, 32>}, {pipeline_mode = #tpu.pipeline_mode<synchronous>, transform_indices = @transform_5, window_bounds = array<i64: 288, 32>}, {pipeline_mode = #tpu.pipeline_mode<synchronous>, transform_indices = @transform_6, window_bounds = array<i64: 1, 32>}, {pipeline_mode = #tpu.pipeline_mode<synchronous>, transform_indices = @transform_7, window_bounds = array<i64: 288, 32>}, {pipeline_mode = #tpu.pipeline_mode<synchronous>, transform_indices = @transform_8, window_bounds = array<i64: 1, 32>}, {pipeline_mode = #tpu.pipeline_mode<synchronous>, transform_indices = @transform_9, window_bounds = array<i64: 288, 32>}, {pipeline_mode = #tpu.pipeline_mode<synchronous>, transform_indices = @transform_10, window_bounds = array<i64: 1, 32>}, {transform_indices = @transform_11, window_bounds = array<i64: 1, 7, 7, 32>}]} {
    %cst = arith.constant 0.000000e+00 : f32
    %0 = vector.broadcast %cst : f32 to vector<18x18x4xf32>
    %c0 = arith.constant 0 : index
    %c0_0 = arith.constant 0 : index
    %c0_1 = arith.constant 0 : index
    %1 = vector.load %arg13[%c0, %c0_0, %c0_1] : memref<18x18x4xf32, #tpu.memory_space<vmem>>, vector<18x18x4xf32>
    tpu.vector_store %arg13[%c0, %c0_0, %c0_1], %0 {strides = array<i32>} : memref<18x18x4xf32, #tpu.memory_space<vmem>>, vector<18x18x4xf32>,
    %c0_2 = arith.constant 0 : index
    %c0_3 = arith.constant 0 : index
    %c0_4 = arith.constant 0 : index
    %c0_5 = arith.constant 0 : index
    %2 = vector.load %arg1[%c0_2, %c0_3, %c0_4, %c0_5] : memref<1x16x16x4xf32, #tpu.memory_space<vmem>>, vector<1x16x16x4xf32>
    %3 = vector.shape_cast %2 : vector<1x16x16x4xf32> to vector<16x16x4xf32>
    %c1 = arith.constant 1 : index
    %c1_6 = arith.constant 1 : index
    %c0_7 = arith.constant 0 : index
    %4 = vector.load %arg13[%c1, %c1_6, %c0_7] : memref<18x18x4xf32, #tpu.memory_space<vmem>>, vector<16x16x4xf32>
    tpu.vector_store %arg13[%c1, %c1_6, %c0_7], %3 {strides = array<i32>} : memref<18x18x4xf32, #tpu.memory_space<vmem>>, vector<16x16x4xf32>,
    %c0_8 = arith.constant 0 : index
    %c0_9 = arith.constant 0 : index
    %c0_10 = arith.constant 0 : index
    %5 = vector.load %arg13[%c0_8, %c0_9, %c0_10] : memref<18x18x4xf32, #tpu.memory_space<vmem>>, vector<18x18x4xf32>
    %6 = vector.extract_strided_slice %5 {offsets = [0, 0, 0], sizes = [16, 16, 4], strides = [1, 1, 1]} : vector<18x18x4xf32> to vector<16x16x4xf32>
    %c0_11 = arith.constant 0 : index
    %c0_12 = arith.constant 0 : index
    %c0_13 = arith.constant 0 : index
    %7 = vector.load %arg14[%c0_11, %c0_12, %c0_13] : memref<16x16x36xf32, #tpu.memory_space<vmem>>, vector<16x16x4xf32>
    tpu.vector_store %arg14[%c0_11, %c0_12, %c0_13], %6 {strides = array<i32>} : memref<16x16x36xf32, #tpu.memory_space<vmem>>, vector<16x16x4xf32>,
    %8 = vector.extract_strided_slice %5 {offsets = [0, 1, 0], sizes = [16, 16, 4], strides = [1, 1, 1]} : vector<18x18x4xf32> to vector<16x16x4xf32>
    %c0_14 = arith.constant 0 : index
    %c0_15 = arith.constant 0 : index
    %c4 = arith.constant 4 : index
    %9 = vector.load %arg14[%c0_14, %c0_15, %c4] : memref<16x16x36xf32, #tpu.memory_space<vmem>>, vector<16x16x4xf32>
    tpu.vector_store %arg14[%c0_14, %c0_15, %c4], %8 {strides = array<i32>} : memref<16x16x36xf32, #tpu.memory_space<vmem>>, vector<16x16x4xf32>,
    %10 = vector.extract_strided_slice %5 {offsets = [0, 2, 0], sizes = [16, 16, 4], strides = [1, 1, 1]} : vector<18x18x4xf32> to vector<16x16x4xf32>
    %c0_16 = arith.constant 0 : index
    %c0_17 = arith.constant 0 : index
    %c8 = arith.constant 8 : index
    %11 = vector.load %arg14[%c0_16, %c0_17, %c8] : memref<16x16x36xf32, #tpu.memory_space<vmem>>, vector<16x16x4xf32>
    tpu.vector_store %arg14[%c0_16, %c0_17, %c8], %10 {strides = array<i32>} : memref<16x16x36xf32, #tpu.memory_space<vmem>>, vector<16x16x4xf32>,
    %12 = vector.extract_strided_slice %5 {offsets = [1, 0, 0], sizes = [16, 16, 4], strides = [1, 1, 1]} : vector<18x18x4xf32> to vector<16x16x4xf32>
    %c0_18 = arith.constant 0 : index
    %c0_19 = arith.constant 0 : index
    %c12 = arith.constant 12 : index
    %13 = vector.load %arg14[%c0_18, %c0_19, %c12] : memref<16x16x36xf32, #tpu.memory_space<vmem>>, vector<16x16x4xf32>
    tpu.vector_store %arg14[%c0_18, %c0_19, %c12], %12 {strides = array<i32>} : memref<16x16x36xf32, #tpu.memory_space<vmem>>, vector<16x16x4xf32>,
    %14 = vector.extract_strided_slice %5 {offsets = [1, 1, 0], sizes = [16, 16, 4], strides = [1, 1, 1]} : vector<18x18x4xf32> to vector<16x16x4xf32>
    %c0_20 = arith.constant 0 : index
    %c0_21 = arith.constant 0 : index
    %c16 = arith.constant 16 : index
    %15 = vector.load %arg14[%c0_20, %c0_21, %c16] : memref<16x16x36xf32, #tpu.memory_space<vmem>>, vector<16x16x4xf32>
    tpu.vector_store %arg14[%c0_20, %c0_21, %c16], %14 {strides = array<i32>} : memref<16x16x36xf32, #tpu.memory_space<vmem>>, vector<16x16x4xf32>,
    %16 = vector.extract_strided_slice %5 {offsets = [1, 2, 0], sizes = [16, 16, 4], strides = [1, 1, 1]} : vector<18x18x4xf32> to vector<16x16x4xf32>
    %c0_22 = arith.constant 0 : index
    %c0_23 = arith.constant 0 : index
    %c20 = arith.constant 20 : index
    %17 = vector.load %arg14[%c0_22, %c0_23, %c20] : memref<16x16x36xf32, #tpu.memory_space<vmem>>, vector<16x16x4xf32>
    tpu.vector_store %arg14[%c0_22, %c0_23, %c20], %16 {strides = array<i32>} : memref<16x16x36xf32, #tpu.memory_space<vmem>>, vector<16x16x4xf32>,
    %18 = vector.extract_strided_slice %5 {offsets = [2, 0, 0], sizes = [16, 16, 4], strides = [1, 1, 1]} : vector<18x18x4xf32> to vector<16x16x4xf32>
    %c0_24 = arith.constant 0 : index
    %c0_25 = arith.constant 0 : index
    %c24 = arith.constant 24 : index
    %19 = vector.load %arg14[%c0_24, %c0_25, %c24] : memref<16x16x36xf32, #tpu.memory_space<vmem>>, vector<16x16x4xf32>
    tpu.vector_store %arg14[%c0_24, %c0_25, %c24], %18 {strides = array<i32>} : memref<16x16x36xf32, #tpu.memory_space<vmem>>, vector<16x16x4xf32>,
    %20 = vector.extract_strided_slice %5 {offsets = [2, 1, 0], sizes = [16, 16, 4], strides = [1, 1, 1]} : vector<18x18x4xf32> to vector<16x16x4xf32>
    %c0_26 = arith.constant 0 : index
    %c0_27 = arith.constant 0 : index
    %c28 = arith.constant 28 : index
    %21 = vector.load %arg14[%c0_26, %c0_27, %c28] : memref<16x16x36xf32, #tpu.memory_space<vmem>>, vector<16x16x4xf32>
    tpu.vector_store %arg14[%c0_26, %c0_27, %c28], %20 {strides = array<i32>} : memref<16x16x36xf32, #tpu.memory_space<vmem>>, vector<16x16x4xf32>,
    %22 = vector.extract_strided_slice %5 {offsets = [2, 2, 0], sizes = [16, 16, 4], strides = [1, 1, 1]} : vector<18x18x4xf32> to vector<16x16x4xf32>
    %c0_28 = arith.constant 0 : index
    %c0_29 = arith.constant 0 : index
    %c32 = arith.constant 32 : index
    %23 = vector.load %arg14[%c0_28, %c0_29, %c32] : memref<16x16x36xf32, #tpu.memory_space<vmem>>, vector<16x16x4xf32>
    tpu.vector_store %arg14[%c0_28, %c0_29, %c32], %22 {strides = array<i32>} : memref<16x16x36xf32, #tpu.memory_space<vmem>>, vector<16x16x4xf32>,
    %c0_30 = arith.constant 0 : index
    %c0_31 = arith.constant 0 : index
    %c0_32 = arith.constant 0 : index
    %24 = vector.load %arg14[%c0_30, %c0_31, %c0_32] : memref<16x16x36xf32, #tpu.memory_space<vmem>>, vector<16x16x36xf32>
    %c0_33 = arith.constant 0 : index
    %c0_34 = arith.constant 0 : index
    %25 = vector.load %arg2[%c0_33, %c0_34] : memref<36x32xf32, #tpu.memory_space<vmem>>, vector<36x32xf32>
    %cst_35 = arith.constant dense<0.000000e+00> : vector<16x16x32xf32>
    %26 = tpu.matmul %24, %25, %cst_35 {dimension_numbers = #tpu.dot_dimension_numbers<[2], [0], [0, 1], [1], [0, 0, 0, 1, 1, 1], [], []>} : vector<16x16x36xf32>, vector<36x32xf32>, vector<16x16x32xf32> -> vector<16x16x32xf32>
    %c0_36 = arith.constant 0 : index
    %c0_37 = arith.constant 0 : index
    %27 = vector.load %arg3[%c0_36, %c0_37] : memref<1x32xf32, #tpu.memory_space<vmem>>, vector<1x32xf32>
    %28 = vector.shape_cast %27 : vector<1x32xf32> to vector<32xf32>
    %29 = vector.shape_cast %28 : vector<32xf32> to vector<1x1x32xf32>
    %30 = vector.broadcast %29 : vector<1x1x32xf32> to vector<16x16x32xf32>
    %31 = arith.addf %26, %30 : vector<16x16x32xf32>
    %32 = vector.shape_cast %31 : vector<16x16x32xf32> to vector<8x2x16x32xf32>
    %33 = vector.extract_strided_slice %32 {offsets = [0, 0, 0, 0], sizes = [8, 1, 16, 32], strides = [1, 1, 1, 1]} : vector<8x2x16x32xf32> to vector<8x1x16x32xf32>
    %34 = vector.shape_cast %33 : vector<8x1x16x32xf32> to vector<8x16x32xf32>
    %35 = vector.extract_strided_slice %32 {offsets = [0, 1, 0, 0], sizes = [8, 1, 16, 32], strides = [1, 1, 1, 1]} : vector<8x2x16x32xf32> to vector<8x1x16x32xf32>
    %36 = vector.shape_cast %35 : vector<8x1x16x32xf32> to vector<8x16x32xf32>
    %37 = vector.extract_strided_slice %34 {offsets = [0, 0, 0], sizes = [7, 16, 32], strides = [1, 1, 1]} : vector<8x16x32xf32> to vector<7x16x32xf32>
    %38 = vector.extract_strided_slice %36 {offsets = [0, 0, 0], sizes = [7, 16, 32], strides = [1, 1, 1]} : vector<8x16x32xf32> to vector<7x16x32xf32>
    %39 = arith.maximumf %37, %38 : vector<7x16x32xf32>
    %40 = vector.extract_strided_slice %34 {offsets = [1, 0, 0], sizes = [7, 16, 32], strides = [1, 1, 1]} : vector<8x16x32xf32> to vector<7x16x32xf32>
    %41 = arith.maximumf %39, %40 : vector<7x16x32xf32>
    %42 = vector.extract_strided_slice %41 {offsets = [0, 0, 0], sizes = [7, 14, 32], strides = [1, 1, 1]} : vector<7x16x32xf32> to vector<7x14x32xf32>
    %43 = vector.extract_strided_slice %41 {offsets = [0, 1, 0], sizes = [7, 14, 32], strides = [1, 1, 1]} : vector<7x16x32xf32> to vector<7x14x32xf32>
    %44 = arith.maximumf %42, %43 : vector<7x14x32xf32>
    %45 = vector.extract_strided_slice %41 {offsets = [0, 2, 0], sizes = [7, 14, 32], strides = [1, 1, 1]} : vector<7x16x32xf32> to vector<7x14x32xf32>
    %46 = arith.maximumf %44, %45 : vector<7x14x32xf32>
    %c0_38 = arith.constant 0 : index
    %c0_39 = arith.constant 0 : index
    %c0_40 = arith.constant 0 : index
    %47 = vector.load %arg17[%c0_38, %c0_39, %c0_40] : memref<7x14x32xf32, #tpu.memory_space<vmem>>, vector<7x14x32xf32>
    tpu.vector_store %arg17[%c0_38, %c0_39, %c0_40], %46 {strides = array<i32>} : memref<7x14x32xf32, #tpu.memory_space<vmem>>, vector<7x14x32xf32>,
    %c0_41 = arith.constant 0 : index
    %c0_42 = arith.constant 0 : index
    %c0_43 = arith.constant 0 : index
    %48 = tpu.strided_load %arg17[%c0_41, %c0_42, %c0_43] {strides = array<i32: 1, 2, 1>} : memref<7x14x32xf32, #tpu.memory_space<vmem>>, vector<7x7x32xf32>
    %cst_44 = arith.constant 0.000000e+00 : f32
    %49 = vector.broadcast %cst_44 : f32 to vector<9x9x32xf32>
    %c0_45 = arith.constant 0 : index
    %c0_46 = arith.constant 0 : index
    %c0_47 = arith.constant 0 : index
    %50 = vector.load %arg15[%c0_45, %c0_46, %c0_47] : memref<9x9x32xf32, #tpu.memory_space<vmem>>, vector<9x9x32xf32>
    tpu.vector_store %arg15[%c0_45, %c0_46, %c0_47], %49 {strides = array<i32>} : memref<9x9x32xf32, #tpu.memory_space<vmem>>, vector<9x9x32xf32>,
    %cst_48 = arith.constant 0.000000e+00 : f32
    %51 = vector.broadcast %cst_48 : f32 to vector<7x7x32xf32>
    %52 = arith.maximumf %48, %51 : vector<7x7x32xf32>
    %c1_49 = arith.constant 1 : index
    %c1_50 = arith.constant 1 : index
    %c0_51 = arith.constant 0 : index
    %53 = vector.load %arg15[%c1_49, %c1_50, %c0_51] : memref<9x9x32xf32, #tpu.memory_space<vmem>>, vector<7x7x32xf32>
    tpu.vector_store %arg15[%c1_49, %c1_50, %c0_51], %52 {strides = array<i32>} : memref<9x9x32xf32, #tpu.memory_space<vmem>>, vector<7x7x32xf32>,
    %c0_52 = arith.constant 0 : index
    %c0_53 = arith.constant 0 : index
    %c0_54 = arith.constant 0 : index
    %54 = vector.load %arg15[%c0_52, %c0_53, %c0_54] : memref<9x9x32xf32, #tpu.memory_space<vmem>>, vector<9x9x32xf32>
    %55 = vector.extract_strided_slice %54 {offsets = [0, 0, 0], sizes = [7, 7, 32], strides = [1, 1, 1]} : vector<9x9x32xf32> to vector<7x7x32xf32>
    %c0_55 = arith.constant 0 : index
    %c0_56 = arith.constant 0 : index
    %c0_57 = arith.constant 0 : index
    %56 = vector.load %arg16[%c0_55, %c0_56, %c0_57] : memref<7x7x288xf32, #tpu.memory_space<vmem>>, vector<7x7x32xf32>
    tpu.vector_store %arg16[%c0_55, %c0_56, %c0_57], %55 {strides = array<i32>} : memref<7x7x288xf32, #tpu.memory_space<vmem>>, vector<7x7x32xf32>,
    %57 = vector.extract_strided_slice %54 {offsets = [0, 1, 0], sizes = [7, 7, 32], strides = [1, 1, 1]} : vector<9x9x32xf32> to vector<7x7x32xf32>
    %c0_58 = arith.constant 0 : index
    %c0_59 = arith.constant 0 : index
    %c32_60 = arith.constant 32 : index
    %58 = vector.load %arg16[%c0_58, %c0_59, %c32_60] : memref<7x7x288xf32, #tpu.memory_space<vmem>>, vector<7x7x32xf32>
    tpu.vector_store %arg16[%c0_58, %c0_59, %c32_60], %57 {strides = array<i32>} : memref<7x7x288xf32, #tpu.memory_space<vmem>>, vector<7x7x32xf32>,
    %59 = vector.extract_strided_slice %54 {offsets = [0, 2, 0], sizes = [7, 7, 32], strides = [1, 1, 1]} : vector<9x9x32xf32> to vector<7x7x32xf32>
    %c0_61 = arith.constant 0 : index
    %c0_62 = arith.constant 0 : index
    %c64 = arith.constant 64 : index
    %60 = vector.load %arg16[%c0_61, %c0_62, %c64] : memref<7x7x288xf32, #tpu.memory_space<vmem>>, vector<7x7x32xf32>
    tpu.vector_store %arg16[%c0_61, %c0_62, %c64], %59 {strides = array<i32>} : memref<7x7x288xf32, #tpu.memory_space<vmem>>, vector<7x7x32xf32>,
    %61 = vector.extract_strided_slice %54 {offsets = [1, 0, 0], sizes = [7, 7, 32], strides = [1, 1, 1]} : vector<9x9x32xf32> to vector<7x7x32xf32>
    %c0_63 = arith.constant 0 : index
    %c0_64 = arith.constant 0 : index
    %c96 = arith.constant 96 : index
    %62 = vector.load %arg16[%c0_63, %c0_64, %c96] : memref<7x7x288xf32, #tpu.memory_space<vmem>>, vector<7x7x32xf32>
    tpu.vector_store %arg16[%c0_63, %c0_64, %c96], %61 {strides = array<i32>} : memref<7x7x288xf32, #tpu.memory_space<vmem>>, vector<7x7x32xf32>,
    %63 = vector.extract_strided_slice %54 {offsets = [1, 1, 0], sizes = [7, 7, 32], strides = [1, 1, 1]} : vector<9x9x32xf32> to vector<7x7x32xf32>
    %c0_65 = arith.constant 0 : index
    %c0_66 = arith.constant 0 : index
    %c128 = arith.constant 128 : index
    %64 = vector.load %arg16[%c0_65, %c0_66, %c128] : memref<7x7x288xf32, #tpu.memory_space<vmem>>, vector<7x7x32xf32>
    tpu.vector_store %arg16[%c0_65, %c0_66, %c128], %63 {strides = array<i32>} : memref<7x7x288xf32, #tpu.memory_space<vmem>>, vector<7x7x32xf32>,
    %65 = vector.extract_strided_slice %54 {offsets = [1, 2, 0], sizes = [7, 7, 32], strides = [1, 1, 1]} : vector<9x9x32xf32> to vector<7x7x32xf32>
    %c0_67 = arith.constant 0 : index
    %c0_68 = arith.constant 0 : index
    %c160 = arith.constant 160 : index
    %66 = vector.load %arg16[%c0_67, %c0_68, %c160] : memref<7x7x288xf32, #tpu.memory_space<vmem>>, vector<7x7x32xf32>
    tpu.vector_store %arg16[%c0_67, %c0_68, %c160], %65 {strides = array<i32>} : memref<7x7x288xf32, #tpu.memory_space<vmem>>, vector<7x7x32xf32>,
    %67 = vector.extract_strided_slice %54 {offsets = [2, 0, 0], sizes = [7, 7, 32], strides = [1, 1, 1]} : vector<9x9x32xf32> to vector<7x7x32xf32>
    %c0_69 = arith.constant 0 : index
    %c0_70 = arith.constant 0 : index
    %c192 = arith.constant 192 : index
    %68 = vector.load %arg16[%c0_69, %c0_70, %c192] : memref<7x7x288xf32, #tpu.memory_space<vmem>>, vector<7x7x32xf32>
    tpu.vector_store %arg16[%c0_69, %c0_70, %c192], %67 {strides = array<i32>} : memref<7x7x288xf32, #tpu.memory_space<vmem>>, vector<7x7x32xf32>,
    %69 = vector.extract_strided_slice %54 {offsets = [2, 1, 0], sizes = [7, 7, 32], strides = [1, 1, 1]} : vector<9x9x32xf32> to vector<7x7x32xf32>
    %c0_71 = arith.constant 0 : index
    %c0_72 = arith.constant 0 : index
    %c224 = arith.constant 224 : index
    %70 = vector.load %arg16[%c0_71, %c0_72, %c224] : memref<7x7x288xf32, #tpu.memory_space<vmem>>, vector<7x7x32xf32>
    tpu.vector_store %arg16[%c0_71, %c0_72, %c224], %69 {strides = array<i32>} : memref<7x7x288xf32, #tpu.memory_space<vmem>>, vector<7x7x32xf32>,
    %71 = vector.extract_strided_slice %54 {offsets = [2, 2, 0], sizes = [7, 7, 32], strides = [1, 1, 1]} : vector<9x9x32xf32> to vector<7x7x32xf32>
    %c0_73 = arith.constant 0 : index
    %c0_74 = arith.constant 0 : index
    %c256 = arith.constant 256 : index
    %72 = vector.load %arg16[%c0_73, %c0_74, %c256] : memref<7x7x288xf32, #tpu.memory_space<vmem>>, vector<7x7x32xf32>
    tpu.vector_store %arg16[%c0_73, %c0_74, %c256], %71 {strides = array<i32>} : memref<7x7x288xf32, #tpu.memory_space<vmem>>, vector<7x7x32xf32>,
    %c0_75 = arith.constant 0 : index
    %c0_76 = arith.constant 0 : index
    %c0_77 = arith.constant 0 : index
    %73 = vector.load %arg16[%c0_75, %c0_76, %c0_77] : memref<7x7x288xf32, #tpu.memory_space<vmem>>, vector<7x7x288xf32>
    %c0_78 = arith.constant 0 : index
    %c0_79 = arith.constant 0 : index
    %74 = vector.load %arg4[%c0_78, %c0_79] : memref<288x32xf32, #tpu.memory_space<vmem>>, vector<288x32xf32>
    %cst_80 = arith.constant dense<0.000000e+00> : vector<7x7x32xf32>
    %75 = tpu.matmul %73, %74, %cst_80 {dimension_numbers = #tpu.dot_dimension_numbers<[2], [0], [0, 1], [1], [0, 0, 0, 1, 1, 1], [], []>} : vector<7x7x288xf32>, vector<288x32xf32>, vector<7x7x32xf32> -> vector<7x7x32xf32>
    %c0_81 = arith.constant 0 : index
    %c0_82 = arith.constant 0 : index
    %76 = vector.load %arg5[%c0_81, %c0_82] : memref<1x32xf32, #tpu.memory_space<vmem>>, vector<1x32xf32>
    %77 = vector.shape_cast %76 : vector<1x32xf32> to vector<32xf32>
    %78 = vector.shape_cast %77 : vector<32xf32> to vector<1x1x32xf32>
    %79 = vector.broadcast %78 : vector<1x1x32xf32> to vector<7x7x32xf32>
    %80 = arith.addf %75, %79 : vector<7x7x32xf32>
    %cst_83 = arith.constant 0.000000e+00 : f32
    %81 = vector.broadcast %cst_83 : f32 to vector<7x7x32xf32>
    %82 = arith.maximumf %80, %81 : vector<7x7x32xf32>
    %c1_84 = arith.constant 1 : index
    %c1_85 = arith.constant 1 : index
    %c0_86 = arith.constant 0 : index
    %83 = vector.load %arg15[%c1_84, %c1_85, %c0_86] : memref<9x9x32xf32, #tpu.memory_space<vmem>>, vector<7x7x32xf32>
    tpu.vector_store %arg15[%c1_84, %c1_85, %c0_86], %82 {strides = array<i32>} : memref<9x9x32xf32, #tpu.memory_space<vmem>>, vector<7x7x32xf32>,
    %c0_87 = arith.constant 0 : index
    %c0_88 = arith.constant 0 : index
    %c0_89 = arith.constant 0 : index
    %84 = vector.load %arg15[%c0_87, %c0_88, %c0_89] : memref<9x9x32xf32, #tpu.memory_space<vmem>>, vector<9x9x32xf32>
    %85 = vector.extract_strided_slice %84 {offsets = [0, 0, 0], sizes = [7, 7, 32], strides = [1, 1, 1]} : vector<9x9x32xf32> to vector<7x7x32xf32>
    %c0_90 = arith.constant 0 : index
    %c0_91 = arith.constant 0 : index
    %c0_92 = arith.constant 0 : index
    %86 = vector.load %arg16[%c0_90, %c0_91, %c0_92] : memref<7x7x288xf32, #tpu.memory_space<vmem>>, vector<7x7x32xf32>
    tpu.vector_store %arg16[%c0_90, %c0_91, %c0_92], %85 {strides = array<i32>} : memref<7x7x288xf32, #tpu.memory_space<vmem>>, vector<7x7x32xf32>,
    %87 = vector.extract_strided_slice %84 {offsets = [0, 1, 0], sizes = [7, 7, 32], strides = [1, 1, 1]} : vector<9x9x32xf32> to vector<7x7x32xf32>
    %c0_93 = arith.constant 0 : index
    %c0_94 = arith.constant 0 : index
    %c32_95 = arith.constant 32 : index
    %88 = vector.load %arg16[%c0_93, %c0_94, %c32_95] : memref<7x7x288xf32, #tpu.memory_space<vmem>>, vector<7x7x32xf32>
    tpu.vector_store %arg16[%c0_93, %c0_94, %c32_95], %87 {strides = array<i32>} : memref<7x7x288xf32, #tpu.memory_space<vmem>>, vector<7x7x32xf32>,
    %89 = vector.extract_strided_slice %84 {offsets = [0, 2, 0], sizes = [7, 7, 32], strides = [1, 1, 1]} : vector<9x9x32xf32> to vector<7x7x32xf32>
    %c0_96 = arith.constant 0 : index
    %c0_97 = arith.constant 0 : index
    %c64_98 = arith.constant 64 : index
    %90 = vector.load %arg16[%c0_96, %c0_97, %c64_98] : memref<7x7x288xf32, #tpu.memory_space<vmem>>, vector<7x7x32xf32>
    tpu.vector_store %arg16[%c0_96, %c0_97, %c64_98], %89 {strides = array<i32>} : memref<7x7x288xf32, #tpu.memory_space<vmem>>, vector<7x7x32xf32>,
    %91 = vector.extract_strided_slice %84 {offsets = [1, 0, 0], sizes = [7, 7, 32], strides = [1, 1, 1]} : vector<9x9x32xf32> to vector<7x7x32xf32>
    %c0_99 = arith.constant 0 : index
    %c0_100 = arith.constant 0 : index
    %c96_101 = arith.constant 96 : index
    %92 = vector.load %arg16[%c0_99, %c0_100, %c96_101] : memref<7x7x288xf32, #tpu.memory_space<vmem>>, vector<7x7x32xf32>
    tpu.vector_store %arg16[%c0_99, %c0_100, %c96_101], %91 {strides = array<i32>} : memref<7x7x288xf32, #tpu.memory_space<vmem>>, vector<7x7x32xf32>,
    %93 = vector.extract_strided_slice %84 {offsets = [1, 1, 0], sizes = [7, 7, 32], strides = [1, 1, 1]} : vector<9x9x32xf32> to vector<7x7x32xf32>
    %c0_102 = arith.constant 0 : index
    %c0_103 = arith.constant 0 : index
    %c128_104 = arith.constant 128 : index
    %94 = vector.load %arg16[%c0_102, %c0_103, %c128_104] : memref<7x7x288xf32, #tpu.memory_space<vmem>>, vector<7x7x32xf32>
    tpu.vector_store %arg16[%c0_102, %c0_103, %c128_104], %93 {strides = array<i32>} : memref<7x7x288xf32, #tpu.memory_space<vmem>>, vector<7x7x32xf32>,
    %95 = vector.extract_strided_slice %84 {offsets = [1, 2, 0], sizes = [7, 7, 32], strides = [1, 1, 1]} : vector<9x9x32xf32> to vector<7x7x32xf32>
    %c0_105 = arith.constant 0 : index
    %c0_106 = arith.constant 0 : index
    %c160_107 = arith.constant 160 : index
    %96 = vector.load %arg16[%c0_105, %c0_106, %c160_107] : memref<7x7x288xf32, #tpu.memory_space<vmem>>, vector<7x7x32xf32>
    tpu.vector_store %arg16[%c0_105, %c0_106, %c160_107], %95 {strides = array<i32>} : memref<7x7x288xf32, #tpu.memory_space<vmem>>, vector<7x7x32xf32>,
    %97 = vector.extract_strided_slice %84 {offsets = [2, 0, 0], sizes = [7, 7, 32], strides = [1, 1, 1]} : vector<9x9x32xf32> to vector<7x7x32xf32>
    %c0_108 = arith.constant 0 : index
    %c0_109 = arith.constant 0 : index
    %c192_110 = arith.constant 192 : index
    %98 = vector.load %arg16[%c0_108, %c0_109, %c192_110] : memref<7x7x288xf32, #tpu.memory_space<vmem>>, vector<7x7x32xf32>
    tpu.vector_store %arg16[%c0_108, %c0_109, %c192_110], %97 {strides = array<i32>} : memref<7x7x288xf32, #tpu.memory_space<vmem>>, vector<7x7x32xf32>,
    %99 = vector.extract_strided_slice %84 {offsets = [2, 1, 0], sizes = [7, 7, 32], strides = [1, 1, 1]} : vector<9x9x32xf32> to vector<7x7x32xf32>
    %c0_111 = arith.constant 0 : index
    %c0_112 = arith.constant 0 : index
    %c224_113 = arith.constant 224 : index
    %100 = vector.load %arg16[%c0_111, %c0_112, %c224_113] : memref<7x7x288xf32, #tpu.memory_space<vmem>>, vector<7x7x32xf32>
    tpu.vector_store %arg16[%c0_111, %c0_112, %c224_113], %99 {strides = array<i32>} : memref<7x7x288xf32, #tpu.memory_space<vmem>>, vector<7x7x32xf32>,
    %101 = vector.extract_strided_slice %84 {offsets = [2, 2, 0], sizes = [7, 7, 32], strides = [1, 1, 1]} : vector<9x9x32xf32> to vector<7x7x32xf32>
    %c0_114 = arith.constant 0 : index
    %c0_115 = arith.constant 0 : index
    %c256_116 = arith.constant 256 : index
    %102 = vector.load %arg16[%c0_114, %c0_115, %c256_116] : memref<7x7x288xf32, #tpu.memory_space<vmem>>, vector<7x7x32xf32>
    tpu.vector_store %arg16[%c0_114, %c0_115, %c256_116], %101 {strides = array<i32>} : memref<7x7x288xf32, #tpu.memory_space<vmem>>, vector<7x7x32xf32>,
    %c0_117 = arith.constant 0 : index
    %c0_118 = arith.constant 0 : index
    %c0_119 = arith.constant 0 : index
    %103 = vector.load %arg16[%c0_117, %c0_118, %c0_119] : memref<7x7x288xf32, #tpu.memory_space<vmem>>, vector<7x7x288xf32>
    %c0_120 = arith.constant 0 : index
    %c0_121 = arith.constant 0 : index
    %104 = vector.load %arg6[%c0_120, %c0_121] : memref<288x32xf32, #tpu.memory_space<vmem>>, vector<288x32xf32>
    %cst_122 = arith.constant dense<0.000000e+00> : vector<7x7x32xf32>
    %105 = tpu.matmul %103, %104, %cst_122 {dimension_numbers = #tpu.dot_dimension_numbers<[2], [0], [0, 1], [1], [0, 0, 0, 1, 1, 1], [], []>} : vector<7x7x288xf32>, vector<288x32xf32>, vector<7x7x32xf32> -> vector<7x7x32xf32>
    %c0_123 = arith.constant 0 : index
    %c0_124 = arith.constant 0 : index
    %106 = vector.load %arg7[%c0_123, %c0_124] : memref<1x32xf32, #tpu.memory_space<vmem>>, vector<1x32xf32>
    %107 = vector.shape_cast %106 : vector<1x32xf32> to vector<32xf32>
    %108 = vector.shape_cast %107 : vector<32xf32> to vector<1x1x32xf32>
    %109 = vector.broadcast %108 : vector<1x1x32xf32> to vector<7x7x32xf32>
    %110 = arith.addf %105, %109 : vector<7x7x32xf32>
    %cst_125 = arith.constant 0.000000e+00 : f32
    %111 = vector.broadcast %cst_125 : f32 to vector<7x7x32xf32>
    %112 = arith.maximumf %110, %111 : vector<7x7x32xf32>
    %113 = arith.addf %48, %112 : vector<7x7x32xf32>
    %cst_126 = arith.constant 0.000000e+00 : f32
    %114 = vector.broadcast %cst_126 : f32 to vector<7x7x32xf32>
    %115 = arith.maximumf %113, %114 : vector<7x7x32xf32>
    %c1_127 = arith.constant 1 : index
    %c1_128 = arith.constant 1 : index
    %c0_129 = arith.constant 0 : index
    %116 = vector.load %arg15[%c1_127, %c1_128, %c0_129] : memref<9x9x32xf32, #tpu.memory_space<vmem>>, vector<7x7x32xf32>
    tpu.vector_store %arg15[%c1_127, %c1_128, %c0_129], %115 {strides = array<i32>} : memref<9x9x32xf32, #tpu.memory_space<vmem>>, vector<7x7x32xf32>,
    %c0_130 = arith.constant 0 : index
    %c0_131 = arith.constant 0 : index
    %c0_132 = arith.constant 0 : index
    %117 = vector.load %arg15[%c0_130, %c0_131, %c0_132] : memref<9x9x32xf32, #tpu.memory_space<vmem>>, vector<9x9x32xf32>
    %118 = vector.extract_strided_slice %117 {offsets = [0, 0, 0], sizes = [7, 7, 32], strides = [1, 1, 1]} : vector<9x9x32xf32> to vector<7x7x32xf32>
    %c0_133 = arith.constant 0 : index
    %c0_134 = arith.constant 0 : index
    %c0_135 = arith.constant 0 : index
    %119 = vector.load %arg16[%c0_133, %c0_134, %c0_135] : memref<7x7x288xf32, #tpu.memory_space<vmem>>, vector<7x7x32xf32>
    tpu.vector_store %arg16[%c0_133, %c0_134, %c0_135], %118 {strides = array<i32>} : memref<7x7x288xf32, #tpu.memory_space<vmem>>, vector<7x7x32xf32>,
    %120 = vector.extract_strided_slice %117 {offsets = [0, 1, 0], sizes = [7, 7, 32], strides = [1, 1, 1]} : vector<9x9x32xf32> to vector<7x7x32xf32>
    %c0_136 = arith.constant 0 : index
    %c0_137 = arith.constant 0 : index
    %c32_138 = arith.constant 32 : index
    %121 = vector.load %arg16[%c0_136, %c0_137, %c32_138] : memref<7x7x288xf32, #tpu.memory_space<vmem>>, vector<7x7x32xf32>
    tpu.vector_store %arg16[%c0_136, %c0_137, %c32_138], %120 {strides = array<i32>} : memref<7x7x288xf32, #tpu.memory_space<vmem>>, vector<7x7x32xf32>,
    %122 = vector.extract_strided_slice %117 {offsets = [0, 2, 0], sizes = [7, 7, 32], strides = [1, 1, 1]} : vector<9x9x32xf32> to vector<7x7x32xf32>
    %c0_139 = arith.constant 0 : index
    %c0_140 = arith.constant 0 : index
    %c64_141 = arith.constant 64 : index
    %123 = vector.load %arg16[%c0_139, %c0_140, %c64_141] : memref<7x7x288xf32, #tpu.memory_space<vmem>>, vector<7x7x32xf32>
    tpu.vector_store %arg16[%c0_139, %c0_140, %c64_141], %122 {strides = array<i32>} : memref<7x7x288xf32, #tpu.memory_space<vmem>>, vector<7x7x32xf32>,
    %124 = vector.extract_strided_slice %117 {offsets = [1, 0, 0], sizes = [7, 7, 32], strides = [1, 1, 1]} : vector<9x9x32xf32> to vector<7x7x32xf32>
    %c0_142 = arith.constant 0 : index
    %c0_143 = arith.constant 0 : index
    %c96_144 = arith.constant 96 : index
    %125 = vector.load %arg16[%c0_142, %c0_143, %c96_144] : memref<7x7x288xf32, #tpu.memory_space<vmem>>, vector<7x7x32xf32>
    tpu.vector_store %arg16[%c0_142, %c0_143, %c96_144], %124 {strides = array<i32>} : memref<7x7x288xf32, #tpu.memory_space<vmem>>, vector<7x7x32xf32>,
    %126 = vector.extract_strided_slice %117 {offsets = [1, 1, 0], sizes = [7, 7, 32], strides = [1, 1, 1]} : vector<9x9x32xf32> to vector<7x7x32xf32>
    %c0_145 = arith.constant 0 : index
    %c0_146 = arith.constant 0 : index
    %c128_147 = arith.constant 128 : index
    %127 = vector.load %arg16[%c0_145, %c0_146, %c128_147] : memref<7x7x288xf32, #tpu.memory_space<vmem>>, vector<7x7x32xf32>
    tpu.vector_store %arg16[%c0_145, %c0_146, %c128_147], %126 {strides = array<i32>} : memref<7x7x288xf32, #tpu.memory_space<vmem>>, vector<7x7x32xf32>,
    %128 = vector.extract_strided_slice %117 {offsets = [1, 2, 0], sizes = [7, 7, 32], strides = [1, 1, 1]} : vector<9x9x32xf32> to vector<7x7x32xf32>
    %c0_148 = arith.constant 0 : index
    %c0_149 = arith.constant 0 : index
    %c160_150 = arith.constant 160 : index
    %129 = vector.load %arg16[%c0_148, %c0_149, %c160_150] : memref<7x7x288xf32, #tpu.memory_space<vmem>>, vector<7x7x32xf32>
    tpu.vector_store %arg16[%c0_148, %c0_149, %c160_150], %128 {strides = array<i32>} : memref<7x7x288xf32, #tpu.memory_space<vmem>>, vector<7x7x32xf32>,
    %130 = vector.extract_strided_slice %117 {offsets = [2, 0, 0], sizes = [7, 7, 32], strides = [1, 1, 1]} : vector<9x9x32xf32> to vector<7x7x32xf32>
    %c0_151 = arith.constant 0 : index
    %c0_152 = arith.constant 0 : index
    %c192_153 = arith.constant 192 : index
    %131 = vector.load %arg16[%c0_151, %c0_152, %c192_153] : memref<7x7x288xf32, #tpu.memory_space<vmem>>, vector<7x7x32xf32>
    tpu.vector_store %arg16[%c0_151, %c0_152, %c192_153], %130 {strides = array<i32>} : memref<7x7x288xf32, #tpu.memory_space<vmem>>, vector<7x7x32xf32>,
    %132 = vector.extract_strided_slice %117 {offsets = [2, 1, 0], sizes = [7, 7, 32], strides = [1, 1, 1]} : vector<9x9x32xf32> to vector<7x7x32xf32>
    %c0_154 = arith.constant 0 : index
    %c0_155 = arith.constant 0 : index
    %c224_156 = arith.constant 224 : index
    %133 = vector.load %arg16[%c0_154, %c0_155, %c224_156] : memref<7x7x288xf32, #tpu.memory_space<vmem>>, vector<7x7x32xf32>
    tpu.vector_store %arg16[%c0_154, %c0_155, %c224_156], %132 {strides = array<i32>} : memref<7x7x288xf32, #tpu.memory_space<vmem>>, vector<7x7x32xf32>,
    %134 = vector.extract_strided_slice %117 {offsets = [2, 2, 0], sizes = [7, 7, 32], strides = [1, 1, 1]} : vector<9x9x32xf32> to vector<7x7x32xf32>
    %c0_157 = arith.constant 0 : index
    %c0_158 = arith.constant 0 : index
    %c256_159 = arith.constant 256 : index
    %135 = vector.load %arg16[%c0_157, %c0_158, %c256_159] : memref<7x7x288xf32, #tpu.memory_space<vmem>>, vector<7x7x32xf32>
    tpu.vector_store %arg16[%c0_157, %c0_158, %c256_159], %134 {strides = array<i32>} : memref<7x7x288xf32, #tpu.memory_space<vmem>>, vector<7x7x32xf32>,
    %c0_160 = arith.constant 0 : index
    %c0_161 = arith.constant 0 : index
    %c0_162 = arith.constant 0 : index
    %136 = vector.load %arg16[%c0_160, %c0_161, %c0_162] : memref<7x7x288xf32, #tpu.memory_space<vmem>>, vector<7x7x288xf32>
    %c0_163 = arith.constant 0 : index
    %c0_164 = arith.constant 0 : index
    %137 = vector.load %arg8[%c0_163, %c0_164] : memref<288x32xf32, #tpu.memory_space<vmem>>, vector<288x32xf32>
    %cst_165 = arith.constant dense<0.000000e+00> : vector<7x7x32xf32>
    %138 = tpu.matmul %136, %137, %cst_165 {dimension_numbers = #tpu.dot_dimension_numbers<[2], [0], [0, 1], [1], [0, 0, 0, 1, 1, 1], [], []>} : vector<7x7x288xf32>, vector<288x32xf32>, vector<7x7x32xf32> -> vector<7x7x32xf32>
    %c0_166 = arith.constant 0 : index
    %c0_167 = arith.constant 0 : index
    %139 = vector.load %arg9[%c0_166, %c0_167] : memref<1x32xf32, #tpu.memory_space<vmem>>, vector<1x32xf32>
    %140 = vector.shape_cast %139 : vector<1x32xf32> to vector<32xf32>
    %141 = vector.shape_cast %140 : vector<32xf32> to vector<1x1x32xf32>
    %142 = vector.broadcast %141 : vector<1x1x32xf32> to vector<7x7x32xf32>
    %143 = arith.addf %138, %142 : vector<7x7x32xf32>
    %cst_168 = arith.constant 0.000000e+00 : f32
    %144 = vector.broadcast %cst_168 : f32 to vector<7x7x32xf32>
    %145 = arith.maximumf %143, %144 : vector<7x7x32xf32>
    %c1_169 = arith.constant 1 : index
    %c1_170 = arith.constant 1 : index
    %c0_171 = arith.constant 0 : index
    %146 = vector.load %arg15[%c1_169, %c1_170, %c0_171] : memref<9x9x32xf32, #tpu.memory_space<vmem>>, vector<7x7x32xf32>
    tpu.vector_store %arg15[%c1_169, %c1_170, %c0_171], %145 {strides = array<i32>} : memref<9x9x32xf32, #tpu.memory_space<vmem>>, vector<7x7x32xf32>,
    %c0_172 = arith.constant 0 : index
    %c0_173 = arith.constant 0 : index
    %c0_174 = arith.constant 0 : index
    %147 = vector.load %arg15[%c0_172, %c0_173, %c0_174] : memref<9x9x32xf32, #tpu.memory_space<vmem>>, vector<9x9x32xf32>
    %148 = vector.extract_strided_slice %147 {offsets = [0, 0, 0], sizes = [7, 7, 32], strides = [1, 1, 1]} : vector<9x9x32xf32> to vector<7x7x32xf32>
    %c0_175 = arith.constant 0 : index
    %c0_176 = arith.constant 0 : index
    %c0_177 = arith.constant 0 : index
    %149 = vector.load %arg16[%c0_175, %c0_176, %c0_177] : memref<7x7x288xf32, #tpu.memory_space<vmem>>, vector<7x7x32xf32>
    tpu.vector_store %arg16[%c0_175, %c0_176, %c0_177], %148 {strides = array<i32>} : memref<7x7x288xf32, #tpu.memory_space<vmem>>, vector<7x7x32xf32>,
    %150 = vector.extract_strided_slice %147 {offsets = [0, 1, 0], sizes = [7, 7, 32], strides = [1, 1, 1]} : vector<9x9x32xf32> to vector<7x7x32xf32>
    %c0_178 = arith.constant 0 : index
    %c0_179 = arith.constant 0 : index
    %c32_180 = arith.constant 32 : index
    %151 = vector.load %arg16[%c0_178, %c0_179, %c32_180] : memref<7x7x288xf32, #tpu.memory_space<vmem>>, vector<7x7x32xf32>
    tpu.vector_store %arg16[%c0_178, %c0_179, %c32_180], %150 {strides = array<i32>} : memref<7x7x288xf32, #tpu.memory_space<vmem>>, vector<7x7x32xf32>,
    %152 = vector.extract_strided_slice %147 {offsets = [0, 2, 0], sizes = [7, 7, 32], strides = [1, 1, 1]} : vector<9x9x32xf32> to vector<7x7x32xf32>
    %c0_181 = arith.constant 0 : index
    %c0_182 = arith.constant 0 : index
    %c64_183 = arith.constant 64 : index
    %153 = vector.load %arg16[%c0_181, %c0_182, %c64_183] : memref<7x7x288xf32, #tpu.memory_space<vmem>>, vector<7x7x32xf32>
    tpu.vector_store %arg16[%c0_181, %c0_182, %c64_183], %152 {strides = array<i32>} : memref<7x7x288xf32, #tpu.memory_space<vmem>>, vector<7x7x32xf32>,
    %154 = vector.extract_strided_slice %147 {offsets = [1, 0, 0], sizes = [7, 7, 32], strides = [1, 1, 1]} : vector<9x9x32xf32> to vector<7x7x32xf32>
    %c0_184 = arith.constant 0 : index
    %c0_185 = arith.constant 0 : index
    %c96_186 = arith.constant 96 : index
    %155 = vector.load %arg16[%c0_184, %c0_185, %c96_186] : memref<7x7x288xf32, #tpu.memory_space<vmem>>, vector<7x7x32xf32>
    tpu.vector_store %arg16[%c0_184, %c0_185, %c96_186], %154 {strides = array<i32>} : memref<7x7x288xf32, #tpu.memory_space<vmem>>, vector<7x7x32xf32>,
    %156 = vector.extract_strided_slice %147 {offsets = [1, 1, 0], sizes = [7, 7, 32], strides = [1, 1, 1]} : vector<9x9x32xf32> to vector<7x7x32xf32>
    %c0_187 = arith.constant 0 : index
    %c0_188 = arith.constant 0 : index
    %c128_189 = arith.constant 128 : index
    %157 = vector.load %arg16[%c0_187, %c0_188, %c128_189] : memref<7x7x288xf32, #tpu.memory_space<vmem>>, vector<7x7x32xf32>
    tpu.vector_store %arg16[%c0_187, %c0_188, %c128_189], %156 {strides = array<i32>} : memref<7x7x288xf32, #tpu.memory_space<vmem>>, vector<7x7x32xf32>,
    %158 = vector.extract_strided_slice %147 {offsets = [1, 2, 0], sizes = [7, 7, 32], strides = [1, 1, 1]} : vector<9x9x32xf32> to vector<7x7x32xf32>
    %c0_190 = arith.constant 0 : index
    %c0_191 = arith.constant 0 : index
    %c160_192 = arith.constant 160 : index
    %159 = vector.load %arg16[%c0_190, %c0_191, %c160_192] : memref<7x7x288xf32, #tpu.memory_space<vmem>>, vector<7x7x32xf32>
    tpu.vector_store %arg16[%c0_190, %c0_191, %c160_192], %158 {strides = array<i32>} : memref<7x7x288xf32, #tpu.memory_space<vmem>>, vector<7x7x32xf32>,
    %160 = vector.extract_strided_slice %147 {offsets = [2, 0, 0], sizes = [7, 7, 32], strides = [1, 1, 1]} : vector<9x9x32xf32> to vector<7x7x32xf32>
    %c0_193 = arith.constant 0 : index
    %c0_194 = arith.constant 0 : index
    %c192_195 = arith.constant 192 : index
    %161 = vector.load %arg16[%c0_193, %c0_194, %c192_195] : memref<7x7x288xf32, #tpu.memory_space<vmem>>, vector<7x7x32xf32>
    tpu.vector_store %arg16[%c0_193, %c0_194, %c192_195], %160 {strides = array<i32>} : memref<7x7x288xf32, #tpu.memory_space<vmem>>, vector<7x7x32xf32>,
    %162 = vector.extract_strided_slice %147 {offsets = [2, 1, 0], sizes = [7, 7, 32], strides = [1, 1, 1]} : vector<9x9x32xf32> to vector<7x7x32xf32>
    %c0_196 = arith.constant 0 : index
    %c0_197 = arith.constant 0 : index
    %c224_198 = arith.constant 224 : index
    %163 = vector.load %arg16[%c0_196, %c0_197, %c224_198] : memref<7x7x288xf32, #tpu.memory_space<vmem>>, vector<7x7x32xf32>
    tpu.vector_store %arg16[%c0_196, %c0_197, %c224_198], %162 {strides = array<i32>} : memref<7x7x288xf32, #tpu.memory_space<vmem>>, vector<7x7x32xf32>,
    %164 = vector.extract_strided_slice %147 {offsets = [2, 2, 0], sizes = [7, 7, 32], strides = [1, 1, 1]} : vector<9x9x32xf32> to vector<7x7x32xf32>
    %c0_199 = arith.constant 0 : index
    %c0_200 = arith.constant 0 : index
    %c256_201 = arith.constant 256 : index
    %165 = vector.load %arg16[%c0_199, %c0_200, %c256_201] : memref<7x7x288xf32, #tpu.memory_space<vmem>>, vector<7x7x32xf32>
    tpu.vector_store %arg16[%c0_199, %c0_200, %c256_201], %164 {strides = array<i32>} : memref<7x7x288xf32, #tpu.memory_space<vmem>>, vector<7x7x32xf32>,
    %c0_202 = arith.constant 0 : index
    %c0_203 = arith.constant 0 : index
    %c0_204 = arith.constant 0 : index
    %166 = vector.load %arg16[%c0_202, %c0_203, %c0_204] : memref<7x7x288xf32, #tpu.memory_space<vmem>>, vector<7x7x288xf32>
    %c0_205 = arith.constant 0 : index
    %c0_206 = arith.constant 0 : index
    %167 = vector.load %arg10[%c0_205, %c0_206] : memref<288x32xf32, #tpu.memory_space<vmem>>, vector<288x32xf32>
    %cst_207 = arith.constant dense<0.000000e+00> : vector<7x7x32xf32>
    %168 = tpu.matmul %166, %167, %cst_207 {dimension_numbers = #tpu.dot_dimension_numbers<[2], [0], [0, 1], [1], [0, 0, 0, 1, 1, 1], [], []>} : vector<7x7x288xf32>, vector<288x32xf32>, vector<7x7x32xf32> -> vector<7x7x32xf32>
    %c0_208 = arith.constant 0 : index
    %c0_209 = arith.constant 0 : index
    %169 = vector.load %arg11[%c0_208, %c0_209] : memref<1x32xf32, #tpu.memory_space<vmem>>, vector<1x32xf32>
    %170 = vector.shape_cast %169 : vector<1x32xf32> to vector<32xf32>
    %171 = vector.shape_cast %170 : vector<32xf32> to vector<1x1x32xf32>
    %172 = vector.broadcast %171 : vector<1x1x32xf32> to vector<7x7x32xf32>
    %173 = arith.addf %168, %172 : vector<7x7x32xf32>
    %cst_210 = arith.constant 0.000000e+00 : f32
    %174 = vector.broadcast %cst_210 : f32 to vector<7x7x32xf32>
    %175 = arith.maximumf %173, %174 : vector<7x7x32xf32>
    %176 = arith.addf %113, %175 : vector<7x7x32xf32>
    %c0_211 = arith.constant 0 : index
    %c0_212 = arith.constant 0 : index
    %c0_213 = arith.constant 0 : index
    %c0_214 = arith.constant 0 : index
    %177 = vector.load %arg12[%c0_211, %c0_212, %c0_213, %c0_214] : memref<1x7x7x32xf32, #tpu.memory_space<vmem>>, vector<1x7x7x32xf32>
    %178 = vector.shape_cast %177 : vector<1x7x7x32xf32> to vector<7x7x32xf32>
    %179 = vector.shape_cast %176 : vector<7x7x32xf32> to vector<1x7x7x32xf32>
    tpu.vector_store %arg12[%c0_211, %c0_212, %c0_213, %c0_214], %179 {strides = array<i32>} : memref<1x7x7x32xf32, #tpu.memory_space<vmem>>, vector<1x7x7x32xf32>,
    return
  }
  func.func @transform_0(%arg0: i32) -> (i32, i32, i32, i32) {
    %c0_i32 = arith.constant 0 : i32
    %c0_i32_0 = arith.constant 0 : i32
    %c0_i32_1 = arith.constant 0 : i32
    %c0_i32_2 = arith.constant 0 : i32
    return %arg0, %c0_i32, %c0_i32_0, %c0_i32_1 : i32, i32, i32, i32
  }
  func.func @transform_1(%arg0: i32) -> (i32, i32) {
    %c0_i32 = arith.constant 0 : i32
    %c0_i32_0 = arith.constant 0 : i32
    %c0_i32_1 = arith.constant 0 : i32
    return %c0_i32, %c0_i32_0 : i32, i32
  }
  func.func @transform_2(%arg0: i32) -> (i32, i32) {
    %c0_i32 = arith.constant 0 : i32
    %c0_i32_0 = arith.constant 0 : i32
    %c0_i32_1 = arith.constant 0 : i32
    return %c0_i32, %c0_i32_0 : i32, i32
  }
  func.func @transform_3(%arg0: i32) -> (i32, i32) {
    %c0_i32 = arith.constant 0 : i32
    %c0_i32_0 = arith.constant 0 : i32
    %c0_i32_1 = arith.constant 0 : i32
    return %c0_i32, %c0_i32_0 : i32, i32
  }
  func.func @transform_4(%arg0: i32) -> (i32, i32) {
    %c0_i32 = arith.constant 0 : i32
    %c0_i32_0 = arith.constant 0 : i32
    %c0_i32_1 = arith.constant 0 : i32
    return %c0_i32, %c0_i32_0 : i32, i32
  }
  func.func @transform_5(%arg0: i32) -> (i32, i32) {
    %c0_i32 = arith.constant 0 : i32
    %c0_i32_0 = arith.constant 0 : i32
    %c0_i32_1 = arith.constant 0 : i32
    return %c0_i32, %c0_i32_0 : i32, i32
  }
  func.func @transform_6(%arg0: i32) -> (i32, i32) {
    %c0_i32 = arith.constant 0 : i32
    %c0_i32_0 = arith.constant 0 : i32
    %c0_i32_1 = arith.constant 0 : i32
    return %c0_i32, %c0_i32_0 : i32, i32
  }
  func.func @transform_7(%arg0: i32) -> (i32, i32) {
    %c0_i32 = arith.constant 0 : i32
    %c0_i32_0 = arith.constant 0 : i32
    %c0_i32_1 = arith.constant 0 : i32
    return %c0_i32, %c0_i32_0 : i32, i32
  }
  func.func @transform_8(%arg0: i32) -> (i32, i32) {
    %c0_i32 = arith.constant 0 : i32
    %c0_i32_0 = arith.constant 0 : i32
    %c0_i32_1 = arith.constant 0 : i32
    return %c0_i32, %c0_i32_0 : i32, i32
  }
  func.func @transform_9(%arg0: i32) -> (i32, i32) {
    %c0_i32 = arith.constant 0 : i32
    %c0_i32_0 = arith.constant 0 : i32
    %c0_i32_1 = arith.constant 0 : i32
    return %c0_i32, %c0_i32_0 : i32, i32
  }
  func.func @transform_10(%arg0: i32) -> (i32, i32) {
    %c0_i32 = arith.constant 0 : i32
    %c0_i32_0 = arith.constant 0 : i32
    %c0_i32_1 = arith.constant 0 : i32
    return %c0_i32, %c0_i32_0 : i32, i32
  }
  func.func @transform_11(%arg0: i32) -> (i32, i32, i32, i32) {
    %c0_i32 = arith.constant 0 : i32
    %c0_i32_0 = arith.constant 0 : i32
    %c0_i32_1 = arith.constant 0 : i32
    %c0_i32_2 = arith.constant 0 : i32
    return %arg0, %c0_i32, %c0_i32_0, %c0_i32_1 : i32, i32, i32, i32
  }
}

</mosaic_0001>

<bundles_post_ra>
// kernel: tpu_custom_call.1
= control target key start
LH: loop header
LB: loop body
LE: loop exit
PB: predicated region body
PF: predicated region fallthrough
CT: control target
= control target key end

     0   :  { %s13355_s17 = smov 0   ;;  %s17494_s0 = inlined_call_operand.vmem [shape: f32[2,16,16,4], index: 0, kind: input, shape index: {}]   ;;  %s17495_s1 = inlined_call_operand.vmem [shape: f32[36,32], index: 1, kind: input, shape index: {}]   ;;  %s17496_s2 = inlined_call_operand.vmem [shape: f32[1,32], index: 2, kind: input, shape index: {}]   ;;  %s17497_s3 = inlined_call_operand.vmem [shape: f32[288,32], index: 3, kind: input, shape index: {}]   ;;  %s17498_s4 = inlined_call_operand.vmem [shape: f32[1,32], index: 4, kind: input, shape index: {}]   ;;  %s17499_s5 = inlined_call_operand.vmem [shape: f32[288,32], index: 5, kind: input, shape index: {}]   ;;  %s17500_s6 = inlined_call_operand.vmem [shape: f32[1,32], index: 6, kind: input, shape index: {}]   ;;  %s17501_s7 = inlined_call_operand.vmem [shape: f32[288,32], index: 7, kind: input, shape index: {}]   ;;  %s17502_s8 = inlined_call_operand.vmem [shape: f32[1,32], index: 8, kind: input, shape index: {}]   ;;  %s17503_s9 = inlined_call_operand.vmem [shape: f32[288,32], index: 9, kind: input, shape index: {}]   ;;  %s17504_s10 = inlined_call_operand.vmem [shape: f32[1,32], index: 10, kind: input, shape index: {}]   ;;  %s17505_s11 = inlined_call_operand.vmem [shape: f32[2,7,7,32], index: 11, kind: output, shape index: {}]  }
   0x1 LB: > { %s12621_s18 = sadd.s32 4294967295, %s13280_s17   ;;  %p12625_p0 = scmp.ge.s32.totalorder %s13280_s17, 1  ;;  %s13280_s17 = sphi %s13355_s17, %s21_s17  }
   0x2   : > { %p337_p1 = scmp.lt.s32.totalorder %s13280_s17, 3 }
   0x4   : > { %p338_p2 = pnand %p12625_p0, %p337_p1 }
   0x5   : > { %p377_p3 = scmp.lt.s32.totalorder (!%p338_p2), %s12621_s18, 1  ;;  %s13283_s23 = smov (!%p338_p2), 4  }
   0x6   : > { %341 = sbr.rel (%p338_p2) target bundleno = 2783 (0xadf), region = 64  ;;  %s13284_s24 = smov (!%p338_p2), 8  }
   0x7   : > { %s13285_s25 = smov (!%p338_p2), 12   ;;  %s13286_s26 = smov (!%p338_p2), 16  }
   0x8   : > { %s13287_s27 = smov (!%p338_p2), 20   ;;  %s13288_s28 = smov (!%p338_p2), 24  }
   0x9   : > { %s17520_s29 = smov (!%p338_p2), 28   ;;  %s13290_s30 = smov (!%p338_p2), 32  }
   0xa   : > { %s13292_s16 = smov (!%p338_p2), 96  }
   0xb   : > { %vm390_vm0 = vcmask 25600   ;;  %vm387_vm1 = vcmask 31744   ;;  %v13282_v0 = vmov 0.0   ;;  %s17783_s18 = smov (!%p377_p3, %s12621_s18), 1  ;;  %v2112_v26 = vld [vmem:[%s17495_s1 + $0x20] sm:$0xf] }
   0xc   : > { %391 = vst.msk [vmem:[#allocation2 + $0x10] sm:$0x3] %vm390_vm0, %v13282_v0  ;;  %394 = vst.msk [vmem:[#allocation2 + $0x28] sm:$0x3] %vm390_vm0, %v13282_v0  ;;  %s12717_s19 = sshll.u32 %s17783_s18, 8  ;;  %vm2217_vm2 = vcmask 1043456  }
   0xd   : > { %397 = vst.msk [vmem:[#allocation2 + $0x40] sm:$0x3] %vm390_vm0, %v13282_v0  ;;  %400 = vst.msk [vmem:[#allocation2 + $0x58] sm:$0x3] %vm390_vm0, %v13282_v0  ;;  %s13481_s22 = scalar_lea.vmem %s17494_s0, %s12717_s19  ;;  %13011 = vmatprep.subr.msk.mxu0 %vm2217_vm2, %v2112_v26  ;;  %v2111_v27 = vld [vmem:[%s17495_s1 + $0x18] sm:$0xff]  ;;  %v2110_v28 = vld [vmem:[%s17495_s1 + $0x10] sm:$0xff] }
   0xe   : > { %403 = vst.msk [vmem:[#allocation2 + $0x70] sm:$0x3] %vm390_vm0, %v13282_v0  ;;  %406 = vst.msk [vmem:[#allocation2 + $0x88] sm:$0x3] %vm390_vm0, %v13282_v0  ;;  %v443_v1 = vld [vmem:[%s13481_s22] sm:$0xff]  ;;  %v444_v2 = vld [vmem:[%s13481_s22 + $0x8] sm:$0xff]  ;;  %13012 = vmatpush3.msk.msra.mxu0 %vm2217_vm2, %v2112_v26 }
   0xf   : > { %409 = vst.msk [vmem:[#allocation2 + $0xa0] sm:$0x3] %vm390_vm0, %v13282_v0  ;;  %412 = vst.msk [vmem:[#allocation2 + $0xb8] sm:$0x3] %vm390_vm0, %v13282_v0  ;;  %v445_v3 = vld [vmem:[%s13481_s22 + $0x10] sm:$0xff]  ;;  %v446_v7 = vld [vmem:[%s13481_s22 + $0x18] sm:$0xff]  ;;  %13013 = vmatprep.subr.mxu0 %v2111_v27 }
  0x10   : > { %415 = vst.msk [vmem:[#allocation2 + $0xd0] sm:$0x3] %vm390_vm0, %v13282_v0  ;;  %418 = vst.msk [vmem:[#allocation2 + $0xe8] sm:$0x3] %vm390_vm0, %v13282_v0  ;;  %v447_v8 = vld [vmem:[%s13481_s22 + $0x20] sm:$0xff]  ;;  %v448_v9 = vld [vmem:[%s13481_s22 + $0x28] sm:$0xff]  ;;  %13014 = vmatpush3.msra.mxu0 %v2111_v27 }
  0x11   : > { %421 = vst.msk [vmem:[#allocation2 + $0x100] sm:$0x3] %vm390_vm0, %v13282_v0  ;;  %424 = vst.msk [vmem:[#allocation2 + $0x118] sm:$0x3] %vm390_vm0, %v13282_v0  ;;  %v449_v10 = vld [vmem:[%s13481_s22 + $0x30] sm:$0xff]  ;;  %v450_v11 = vld [vmem:[%s13481_s22 + $0x38] sm:$0xff]  ;;  %13015 = vmatprep.subr.mxu0 %v2110_v28 }
  0x12   : > { %427 = vst.msk [vmem:[#allocation2 + $0x130] sm:$0x3] %vm390_vm0, %v13282_v0  ;;  %430 = vst.msk [vmem:[#allocation2 + $0x148] sm:$0x3] %vm390_vm0, %v13282_v0  ;;  %v451_v21 = vld [vmem:[%s13481_s22 + $0x40] sm:$0xff]  ;;  %v452_v22 = vld [vmem:[%s13481_s22 + $0x48] sm:$0xff]  ;;  %13016 = vmatpush3.msra.mxu0 %v2110_v28 }
  0x13   : > { %433 = vst.msk [vmem:[#allocation2 + $0x160] sm:$0x3] %vm390_vm0, %v13282_v0  ;;  %436 = vst.msk [vmem:[#allocation2 + $0x178] sm:$0x3] %vm390_vm0, %v13282_v0  ;;  %v510_v4 = vld [vmem:[#allocation2 + $0x10] sm:$0x3] }
  0x14   : > { %439 = vst.msk [vmem:[#allocation2 + $0x190] sm:$0x3] %vm390_vm0, %v13282_v0  ;;  %442 = vst.msk [vmem:[#allocation2 + $0x1a8] sm:$0x3] %vm390_vm0, %v13282_v0  ;;  %646 = vrot.lane.b32.xlu1 %v510_v4, %s13283_s23  ;;  %v2109_v29 = vld [vmem:[%s17495_s1 + $0x8] sm:$0xff]  ;;  %v2108_v30 = vld [vmem:[%s17495_s1] sm:$0xff] }
  0x15   : > { %388 = vst.msk [vmem:[#allocation2] sm:$0xff] %vm387_vm1, %v13282_v0  ;;  %389 = vst.msk [vmem:[#allocation2 + $0x8] sm:$0xff] %vm387_vm1, %v13282_v0  ;;  %13017 = vmatprep.subr.mxu0 %v2109_v29  ;;  %v453_v31 = vld [vmem:[%s13481_s22 + $0x50] sm:$0xff]  ;;  %v454_v32 = vld [vmem:[%s13481_s22 + $0x58] sm:$0xff]  ;;  %vm17511_vm3 = vcmask 57376   ;;  %vm17522_vm4 = vcmask 64545  }
  0x16   : > { %392 = vst.msk [vmem:[#allocation2 + $0x18] sm:$0xff] %vm387_vm1, %v13282_v0  ;;  %393 = vst.msk [vmem:[#allocation2 + $0x20] sm:$0xff] %vm387_vm1, %v13282_v0  ;;  %13018 = vmatpush3.msra.mxu0 %v2109_v29  ;;  %vm17513_vm5 = vcmask 97346   ;;  %vm788_vm6 = vcmask 64544   ;;  %vm17523_vm7 = vcmask 91200   ;;  %vm17515_vm8 = vcmask 97344  }
  0x17   : > { %395 = vst.msk [vmem:[#allocation2 + $0x30] sm:$0xff] %vm387_vm1, %v13282_v0  ;;  %396 = vst.msk [vmem:[#allocation2 + $0x38] sm:$0xff] %vm387_vm1, %v13282_v0  ;;  %13019 = vmatprep.subr.mxu0 %v2108_v30  ;;  %v455_v42 = vld [vmem:[%s13481_s22 + $0x60] sm:$0xff]  ;;  %v456_v43 = vld [vmem:[%s13481_s22 + $0x68] sm:$0xff]  ;;  %vm17514_vm9 = vcmask 130144   ;;  %vm17509_vm10 = vcmask 162944  }
  0x18   : > { %398 = vst.msk [vmem:[#allocation2 + $0x48] sm:$0xff] %vm387_vm1, %v13282_v0  ;;  %399 = vst.msk [vmem:[#allocation2 + $0x50] sm:$0xff] %vm387_vm1, %v13282_v0  ;;  %13020 = vmatpush3.msra.mxu0 %v2108_v30  ;;  %vm17508_vm11 = vcmask 162945   ;;  %vm1312_vm12 = vcmask 155776   ;;  %vm1505_vm13 = vcmask 195744   ;;  %vm1503_vm14 = vcmask 195746  }
  0x19   : > { %401 = vst.msk [vmem:[#allocation2 + $0x60] sm:$0xff] %vm387_vm1, %v13282_v0  ;;  %402 = vst.msk [vmem:[#allocation2 + $0x68] sm:$0xff] %vm387_vm1, %v13282_v0  ;;  %vm1507_vm15 = vcmask 189600   ;;  %vm17506_vm0 = vcmask 228544   ;;  %vm17507_vm2 = vcmask 261344  }
  0x1a   : > { %404 = vst.msk [vmem:[#allocation2 + $0x78] sm:$0xff] %vm387_vm1, %v13282_v0  ;;  %405 = vst.msk [vmem:[#allocation2 + $0x80] sm:$0xff] %vm387_vm1, %v13282_v0 }
  0x1b   : > { %407 = vst.msk [vmem:[#allocation2 + $0x90] sm:$0xff] %vm387_vm1, %v13282_v0  ;;  %408 = vst.msk [vmem:[#allocation2 + $0x98] sm:$0xff] %vm387_vm1, %v13282_v0 }
  0x1c   : > { %410 = vst.msk [vmem:[#allocation2 + $0xa8] sm:$0xff] %vm387_vm1, %v13282_v0  ;;  %411 = vst.msk [vmem:[#allocation2 + $0xb0] sm:$0xff] %vm387_vm1, %v13282_v0  ;;  %v508_v5 = vld [vmem:[#allocation2] sm:$0xff]  ;;  %v509_v6 = vld [vmem:[#allocation2 + $0x8] sm:$0xff] }
  0x1d   : > { %413 = vst.msk [vmem:[#allocation2 + $0xc0] sm:$0xff] %vm387_vm1, %v13282_v0  ;;  %414 = vst.msk [vmem:[#allocation2 + $0xc8] sm:$0xff] %vm387_vm1, %v13282_v0  ;;  %642 = vrot.lane.b32.xlu0 %v508_v5, %s13283_s23  ;;  %837 = vrot.lane.b32.xlu1 %v508_v5, %s13284_s24 }
  0x1e   : > { %416 = vst.msk [vmem:[#allocation2 + $0xd8] sm:$0xff] %vm387_vm1, %v13282_v0  ;;  %417 = vst.msk [vmem:[#allocation2 + $0xe0] sm:$0xff] %vm387_vm1, %v13282_v0 }
  0x1f   : > { %419 = vst.msk [vmem:[#allocation2 + $0xf0] sm:$0xff] %vm387_vm1, %v13282_v0  ;;  %420 = vst.msk [vmem:[#allocation2 + $0xf8] sm:$0xff] %vm387_vm1, %v13282_v0 }
  0x20   : > { %422 = vst.msk [vmem:[#allocation2 + $0x108] sm:$0xff] %vm387_vm1, %v13282_v0  ;;  %423 = vst.msk [vmem:[#allocation2 + $0x110] sm:$0xff] %vm387_vm1, %v13282_v0 }
  0x21   : > { %425 = vst.msk [vmem:[#allocation2 + $0x120] sm:$0xff] %vm387_vm1, %v13282_v0  ;;  %426 = vst.msk [vmem:[#allocation2 + $0x128] sm:$0xff] %vm387_vm1, %v13282_v0  ;;  %644 = vrot.lane.b32.xlu0 %v509_v6, %s13283_s23  ;;  %841 = vrot.lane.b32.xlu1 %v510_v4, %s13284_s24 }
  0x22   : > { %428 = vst.msk [vmem:[#allocation2 + $0x138] sm:$0xff] %vm387_vm1, %v13282_v0  ;;  %429 = vst.msk [vmem:[#allocation2 + $0x140] sm:$0xff] %vm387_vm1, %v13282_v0 }
  0x23   : > { %431 = vst.msk [vmem:[#allocation2 + $0x150] sm:$0xff] %vm387_vm1, %v13282_v0  ;;  %432 = vst.msk [vmem:[#allocation2 + $0x158] sm:$0xff] %vm387_vm1, %v13282_v0 }
  0x24   : > { %434 = vst.msk [vmem:[#allocation2 + $0x168] sm:$0xff] %vm387_vm1, %v13282_v0  ;;  %435 = vst.msk [vmem:[#allocation2 + $0x170] sm:$0xff] %vm387_vm1, %v13282_v0 }
  0x25   : > { %437 = vst.msk [vmem:[#allocation2 + $0x180] sm:$0xff] %vm387_vm1, %v13282_v0  ;;  %438 = vst.msk [vmem:[#allocation2 + $0x188] sm:$0xff] %vm387_vm1, %v13282_v0  ;;  %839 = vrot.lane.b32.xlu0 %v509_v6, %s13284_s24 }
  0x26   : > { %440 = vst.msk [vmem:[#allocation2 + $0x198] sm:$0xff] %vm387_vm1, %v13282_v0  ;;  %441 = vst.msk [vmem:[#allocation2 + $0x1a0] sm:$0xff] %vm387_vm1, %v13282_v0 }
  0x27   : > { %476 = vst.msk [vmem:[#allocation2 + $0x19] sm:$0xff] %vm387_vm1, %v443_v1  ;;  %477 = vst.msk [vmem:[#allocation2 + $0x21] sm:$0xff] %vm387_vm1, %v444_v2 }
  0x28   : > { %478 = vst.msk [vmem:[#allocation2 + $0x31] sm:$0xff] %vm387_vm1, %v445_v3  ;;  %562 = vst.msk [vmem:[#allocation3] sm:$0xff] %vm387_vm1, %v508_v5 }
  0x29   : > { %563 = vst.msk [vmem:[#allocation3 + $0x8] sm:$0xff] %vm387_vm1, %v509_v6  ;;  %479 = vst.msk [vmem:[#allocation2 + $0x39] sm:$0xff] %vm387_vm1, %v446_v7  ;;  %v457_v6 = vld [vmem:[%s13481_s22 + $0x70] sm:$0xff]  ;;  %v458_v7 = vld [vmem:[%s13481_s22 + $0x78] sm:$0xff] }
  0x2a   : > { %480 = vst.msk [vmem:[#allocation2 + $0x49] sm:$0xff] %vm387_vm1, %v447_v8  ;;  %481 = vst.msk [vmem:[#allocation2 + $0x51] sm:$0xff] %vm387_vm1, %v448_v9 }
  0x2b   : > { %482 = vst.msk [vmem:[#allocation2 + $0x61] sm:$0xff] %vm387_vm1, %v449_v10  ;;  %483 = vst.msk [vmem:[#allocation2 + $0x69] sm:$0xff] %vm387_vm1, %v450_v11 }
  0x2c   : > { %484 = vst.msk [vmem:[#allocation2 + $0x79] sm:$0xff] %vm387_vm1, %v451_v21  ;;  %485 = vst.msk [vmem:[#allocation2 + $0x81] sm:$0xff] %vm387_vm1, %v452_v22 }
  0x2d   : > { %486 = vst.msk [vmem:[#allocation2 + $0x91] sm:$0xff] %vm387_vm1, %v453_v31  ;;  %487 = vst.msk [vmem:[#allocation2 + $0x99] sm:$0xff] %vm387_vm1, %v454_v32 }
  0x2e   : > { %v512_v12 = vld [vmem:[#allocation2 + $0x20] sm:$0xff]  ;;  %v511_v13 = vld [vmem:[#allocation2 + $0x18] sm:$0xff]  ;;  %v513_v20 = vld [vmem:[#allocation2 + $0x28] sm:$0x3]  ;;  %488 = vst.msk [vmem:[#allocation2 + $0xa9] sm:$0xff] %vm387_vm1, %v455_v42 }
  0x2f   : > { %565 = vst.msk [vmem:[#allocation3 + $0x18] sm:$0xff] %vm387_vm1, %v512_v12  ;;  %564 = vst.msk [vmem:[#allocation3 + $0x10] sm:$0xff] %vm387_vm1, %v511_v13  ;;  %v13507_v14 = vld [vmem:[#allocation2 + $0x30] sm:$0xff]  ;;  %1036 = vrot.lane.b32.xlu1 %v512_v12, %s13285_s25  ;;  %1034 = vrot.lane.b32.xlu0 %v511_v13, %s13285_s25 }
  0x30   : > { %v13511_v15 = vld [vmem:[#allocation2 + $0x38] sm:$0xff]  ;;  %566 = vst.msk [vmem:[#allocation3 + $0x20] sm:$0xff] %vm387_vm1, %v13507_v14  ;;  %v516_v25 = vld [vmem:[#allocation2 + $0x40] sm:$0x3]  ;;  %489 = vst.msk [vmem:[#allocation2 + $0xb1] sm:$0xff] %vm387_vm1, %v456_v43 }
  0x31   : > { %v13515_v16 = vld [vmem:[#allocation2 + $0x48] sm:$0xff]  ;;  %567 = vst.msk [vmem:[#allocation3 + $0x28] sm:$0xff] %vm387_vm1, %v13511_v15  ;;  %v13519_v17 = vld [vmem:[#allocation2 + $0x50] sm:$0xff]  ;;  %v519_v35 = vld [vmem:[#allocation2 + $0x58] sm:$0x3] }
  0x32   : > { %568 = vst.msk [vmem:[#allocation3 + $0x30] sm:$0xff] %vm387_vm1, %v13515_v16  ;;  %v13523_v18 = vld [vmem:[#allocation2 + $0x68] sm:$0xff]  ;;  %569 = vst.msk [vmem:[#allocation3 + $0x38] sm:$0xff] %vm387_vm1, %v13519_v17  ;;  %v13529_v19 = vld [vmem:[#allocation2 + $0x60] sm:$0xff] }
  0x33   : > { %571 = vst.msk [vmem:[#allocation3 + $0x48] sm:$0xff] %vm387_vm1, %v13523_v18  ;;  %570 = vst.msk [vmem:[#allocation3 + $0x40] sm:$0xff] %vm387_vm1, %v13529_v19  ;;  %1166 = vrot.lane.b32.xlu1 %v512_v12, %s13286_s26  ;;  %1164 = vrot.lane.b32.xlu0 %v511_v13, %s13286_s26  ;;  %v13555_v23 = vld [vmem:[#allocation2 + $0x80] sm:$0xff]  ;;  %v13557_v24 = vld [vmem:[#allocation2 + $0x78] sm:$0xff] }
  0x34   : > { %573 = vst.msk [vmem:[#allocation3 + $0x58] sm:$0xff] %vm387_vm1, %v13555_v23  ;;  %572 = vst.msk [vmem:[#allocation3 + $0x50] sm:$0xff] %vm387_vm1, %v13557_v24  ;;  %v13620_v33 = vld [vmem:[#allocation2 + $0x98] sm:$0xff]  ;;  %v13622_v34 = vld [vmem:[#allocation2 + $0x90] sm:$0xff] }
  0x35   : > { %575 = vst.msk [vmem:[#allocation3 + $0x68] sm:$0xff] %vm387_vm1, %v13620_v33  ;;  %574 = vst.msk [vmem:[#allocation3 + $0x60] sm:$0xff] %vm387_vm1, %v13622_v34  ;;  %v13682_v49 = vld [vmem:[#allocation2 + $0xa8] sm:$0xff]  ;;  %v522_v54 = vld [vmem:[#allocation2 + $0x70] sm:$0x3] }
  0x36   : > { %576 = vst.msk [vmem:[#allocation3 + $0x70] sm:$0xff] %vm387_vm1, %v13682_v49  ;;  %490 = vst.msk [vmem:[#allocation2 + $0xc1] sm:$0xff] %vm387_vm1, %v457_v6  ;;  %v462_v6 = vld [vmem:[%s13481_s22 + $0x98] sm:$0xff] }
  0x37   : > { %648 = vrot.lane.b32.xlu1 %v511_v13, %s13283_s23  ;;  %1168 = vrot.lane.b32.xlu0 %v513_v20, %s13286_s26  ;;  %v13680_v48 = vld [vmem:[#allocation2 + $0xb0] sm:$0xff]  ;;  %491 = vst.msk [vmem:[#allocation2 + $0xc9] sm:$0xff] %vm387_vm1, %v458_v7  ;;  %495 = vst.msk [vmem:[#allocation2 + $0xf9] sm:$0xff] %vm387_vm1, %v462_v6 }
  0x38   : > { %577 = vst.msk [vmem:[#allocation3 + $0x78] sm:$0xff] %vm387_vm1, %v13680_v48 }
  0x3b   : > { %652 = vrot.lane.b32.xlu1 %v513_v20, %s13283_s23  ;;  %650 = vrot.lane.b32.xlu0 %v512_v12, %s13283_s23 }
  0x3f   : > { %1361 = vrot.lane.b32.xlu1 %v512_v12, %s13287_s27  ;;  %1359 = vrot.lane.b32.xlu0 %v511_v13, %s13287_s27 }
  0x43   : > { %843 = vrot.lane.b32.xlu1 %v511_v13, %s13284_s24  ;;  %1363 = vrot.lane.b32.xlu0 %v513_v20, %s13287_s27  ;;  %v13754_v13 = vld [vmem:[#allocation2 + $0xc0] sm:$0xff] }
  0x44   : > { %578 = vst.msk [vmem:[#allocation3 + $0x80] sm:$0xff] %vm387_vm1, %v13754_v13 }
  0x47   : > { %847 = vrot.lane.b32.xlu1 %v513_v20, %s13284_s24  ;;  %845 = vrot.lane.b32.xlu0 %v512_v12, %s13284_s24  ;;  %v13752_v12 = vld [vmem:[#allocation2 + $0xc8] sm:$0xff] }
  0x48   : > { %579 = vst.msk [vmem:[#allocation3 + $0x88] sm:$0xff] %vm387_vm1, %v13752_v12 }
  0x4b   : > { %1558 = vrot.lane.b32.xlu1 %v13511_v15, %s13288_s28  ;;  %1556 = vrot.lane.b32.xlu0 %v13507_v14, %s13288_s28 }
  0x4f   : > { %1040 = vrot.lane.b32.xlu1 %v13511_v15, %s13285_s25  ;;  %1038 = vrot.lane.b32.xlu0 %v13507_v14, %s13285_s25 }
  0x53   : > { %1688 = vrot.lane.b32.xlu1 %v13511_v15, %s17520_s29  ;;  %1686 = vrot.lane.b32.xlu0 %v13507_v14, %s17520_s29 }
  0x57   : > { %1172 = vrot.lane.b32.xlu1 %v13511_v15, %s13286_s26  ;;  %1170 = vrot.lane.b32.xlu0 %v13507_v14, %s13286_s26 }
  0x5b   : > { %1690 = vrot.lane.b32.xlu1 %v516_v25, %s17520_s29  ;;  %1174 = vrot.lane.b32.xlu0 %v516_v25, %s13286_s26 }
  0x5f   : > { %1883 = vrot.lane.b32.xlu1 %v13511_v15, %s13290_s30  ;;  %1881 = vrot.lane.b32.xlu0 %v13507_v14, %s13290_s30 }
  0x63   : > { %656 = vrot.lane.b32.xlu1 %v13511_v15, %s13283_s23  ;;  %654 = vrot.lane.b32.xlu0 %v13507_v14, %s13283_s23 }
  0x67   : > { %1365 = vrot.lane.b32.xlu1 %v13507_v14, %s13287_s27  ;;  %658 = vrot.lane.b32.xlu0 %v516_v25, %s13283_s23 }
  0x6b   : > { %1369 = vrot.lane.b32.xlu1 %v516_v25, %s13287_s27  ;;  %1367 = vrot.lane.b32.xlu0 %v13511_v15, %s13287_s27 }
  0x6f   : > { %849 = vrot.lane.b32.xlu1 %v13507_v14, %s13284_s24  ;;  %1885 = vrot.lane.b32.xlu0 %v516_v25, %s13290_s30 }
  0x73   : > { %853 = vrot.lane.b32.xlu1 %v516_v25, %s13284_s24  ;;  %851 = vrot.lane.b32.xlu0 %v13511_v15, %s13284_s24 }
  0x77   : > { %1562 = vrot.lane.b32.xlu1 %v13519_v17, %s13288_s28  ;;  %1560 = vrot.lane.b32.xlu0 %v13515_v16, %s13288_s28 }
  0x7b   : > { %1044 = vrot.lane.b32.xlu1 %v13519_v17, %s13285_s25  ;;  %1042 = vrot.lane.b32.xlu0 %v13515_v16, %s13285_s25 }
  0x7f   : > { %1694 = vrot.lane.b32.xlu1 %v13519_v17, %s17520_s29  ;;  %1692 = vrot.lane.b32.xlu0 %v13515_v16, %s17520_s29 }
  0x83   : > { %1178 = vrot.lane.b32.xlu1 %v13519_v17, %s13286_s26  ;;  %1176 = vrot.lane.b32.xlu0 %v13515_v16, %s13286_s26 }
  0x86   : > { %v647_v36 = vpop.permute.xlu1 %646 }
  0x87   : > { %1696 = vrot.lane.b32.xlu1 %v519_v35, %s17520_s29  ;;  %1180 = vrot.lane.b32.xlu0 %v519_v35, %s13286_s26  ;;  %791 = vst.msk [vmem:[#allocation3 + $0xf] sm:$0x1] %vm17511_vm3, %v647_v36 }
  0x8b   : > { %1889 = vrot.lane.b32.xlu1 %v13519_v17, %s13290_s30  ;;  %1887 = vrot.lane.b32.xlu0 %v13515_v16, %s13290_s30 }
  0x8f   : > { %662 = vrot.lane.b32.xlu1 %v13519_v17, %s13283_s23  ;;  %660 = vrot.lane.b32.xlu0 %v13515_v16, %s13283_s23  ;;  %v643_v37 = vpop.permute.xlu0 %642  ;;  %v838_v38 = vpop.permute.xlu1 %837 }
  0x90   : > { %787 = vst.msk [vmem:[#allocation3 - $0x1] sm:$0xfe] %vm17522_vm4, %v643_v37 }
  0x91   : > { %982 = vst.msk [vmem:[#allocation3 - $0x2] sm:$0xfc] %vm17513_vm5, %v838_v38 }
  0x93   : > { %1371 = vrot.lane.b32.xlu1 %v13515_v16, %s13287_s27  ;;  %664 = vrot.lane.b32.xlu0 %v519_v35, %s13283_s23  ;;  %v645_v39 = vpop.permute.xlu0 %644  ;;  %v842_v40 = vpop.permute.xlu1 %841 }
  0x94   : > { %789 = vst.msk [vmem:[#allocation3 + $0x7] sm:$0xff] %vm788_vm6, %v645_v39  ;;  %v459_v39 = vld [vmem:[%s13481_s22 + $0x80] sm:$0xff] }
  0x95   : > { %986 = vst.msk [vmem:[#allocation3 + $0xe] sm:$0x3] %vm17523_vm7, %v842_v40  ;;  %v460_v40 = vld [vmem:[%s13481_s22 + $0x88] sm:$0xff] }
  0x96   : > { %492 = vst.msk [vmem:[#allocation2 + $0xd9] sm:$0xff] %vm387_vm1, %v459_v39  ;;  %493 = vst.msk [vmem:[#allocation2 + $0xe1] sm:$0xff] %vm387_vm1, %v460_v40  ;;  %v464_v39 = vld [vmem:[%s13481_s22 + $0xa8] sm:$0xff] }
  0x97   : > { %1375 = vrot.lane.b32.xlu1 %v519_v35, %s13287_s27  ;;  %1373 = vrot.lane.b32.xlu0 %v13519_v17, %s13287_s27  ;;  %v840_v41 = vpop.permute.xlu0 %839  ;;  %497 = vst.msk [vmem:[#allocation2 + $0x111] sm:$0xff] %vm387_vm1, %v464_v39 }
  0x98   : > { %984 = vst.msk [vmem:[#allocation3 + $0x6] sm:$0xff] %vm17515_vm8, %v840_v41 }
  0x9b   : > { %855 = vrot.lane.b32.xlu1 %v13515_v16, %s13284_s24  ;;  %1891 = vrot.lane.b32.xlu0 %v519_v35, %s13290_s30 }
  0x9f   : > { %859 = vrot.lane.b32.xlu1 %v519_v35, %s13284_s24  ;;  %857 = vrot.lane.b32.xlu0 %v13519_v17, %s13284_s24 }
  0xa1   : > { %v1037_v44 = vpop.permute.xlu1 %1036  ;;  %v1035_v45 = vpop.permute.xlu0 %1034 }
  0xa2   : > { %1132 = vst.msk [vmem:[#allocation3 + $0x8] sm:$0xff] %vm17514_vm9, %v1037_v44  ;;  %1131 = vst.msk [vmem:[#allocation3] sm:$0xff] %vm17514_vm9, %v1035_v45  ;;  %v13828_v44 = vld [vmem:[#allocation2 + $0xd8] sm:$0xff] }
  0xa3   : > { %1566 = vrot.lane.b32.xlu1 %v13523_v18, %s13288_s28  ;;  %1564 = vrot.lane.b32.xlu0 %v13529_v19, %s13288_s28  ;;  %580 = vst.msk [vmem:[#allocation3 + $0x90] sm:$0xff] %vm387_vm1, %v13828_v44 }
  0xa5   : > { %v1167_v46 = vpop.permute.xlu1 %1166  ;;  %v1165_v47 = vpop.permute.xlu0 %1164 }
  0xa6   : > { %1311 = vst.msk [vmem:[#allocation3 + $0x7] sm:$0xff] %vm17509_vm10, %v1167_v46 }
  0xa7   : > { %1309 = vst.msk [vmem:[#allocation3 - $0x1] sm:$0xfe] %vm17508_vm11, %v1165_v47  ;;  %1048 = vrot.lane.b32.xlu1 %v13523_v18, %s13285_s25  ;;  %1046 = vrot.lane.b32.xlu0 %v13529_v19, %s13285_s25 }
  0xa9   : > { %v649_v50 = vpop.permute.xlu1 %648  ;;  %v1169_v51 = vpop.permute.xlu0 %1168 }
  0xaa   : > { %792 = vst.msk [vmem:[#allocation3 + $0xf] sm:$0xfe] %vm17522_vm4, %v649_v50 }
  0xab   : > { %1313 = vst.msk [vmem:[#allocation3 + $0xf] sm:$0x1] %vm1312_vm12, %v1169_v51  ;;  %1700 = vrot.lane.b32.xlu1 %v13523_v18, %s17520_s29  ;;  %1698 = vrot.lane.b32.xlu0 %v13529_v19, %s17520_s29 }
  0xad   : > { %v653_v52 = vpop.permute.xlu1 %652  ;;  %v651_v53 = vpop.permute.xlu0 %650 }
  0xae   : > { %794 = vst.msk [vmem:[#allocation3 + $0x1f] sm:$0x1] %vm17511_vm3, %v653_v52  ;;  %v528_v52 = vld [vmem:[#allocation2 + $0xa0] sm:$0x3] }
  0xaf   : > { %793 = vst.msk [vmem:[#allocation3 + $0x17] sm:$0xff] %vm788_vm6, %v651_v53  ;;  %1184 = vrot.lane.b32.xlu1 %v13523_v18, %s13286_s26  ;;  %1182 = vrot.lane.b32.xlu0 %v13529_v19, %s13286_s26 }
  0xb1   : > { %v1362_v55 = vpop.permute.xlu1 %1361  ;;  %v1360_v56 = vpop.permute.xlu0 %1359 }
  0xb2   : > { %1506 = vst.msk [vmem:[#allocation3 + $0x6] sm:$0xff] %vm1505_vm13, %v1362_v55 }
  0xb3   : > { %1504 = vst.msk [vmem:[#allocation3 - $0x2] sm:$0xfc] %vm1503_vm14, %v1360_v56  ;;  %1702 = vrot.lane.b32.xlu1 %v522_v54, %s17520_s29  ;;  %1186 = vrot.lane.b32.xlu0 %v522_v54, %s13286_s26 }
  0xb5   : > { %v844_v57 = vpop.permute.xlu1 %843  ;;  %v1364_v58 = vpop.permute.xlu0 %1363 }
  0xb6   : > { %987 = vst.msk [vmem:[#allocation3 + $0xe] sm:$0xfc] %vm17513_vm5, %v844_v57 }
  0xb7   : > { %1508 = vst.msk [vmem:[#allocation3 + $0xe] sm:$0x3] %vm1507_vm15, %v1364_v58  ;;  %1895 = vrot.lane.b32.xlu1 %v13523_v18, %s13290_s30  ;;  %1893 = vrot.lane.b32.xlu0 %v13529_v19, %s13290_s30 }
  0xb9   : > { %v848_v59 = vpop.permute.xlu1 %847  ;;  %v846_v60 = vpop.permute.xlu0 %845 }
  0xba   : > { %989 = vst.msk [vmem:[#allocation3 + $0x1e] sm:$0x3] %vm17523_vm7, %v848_v59 }
  0xbb   : > { %988 = vst.msk [vmem:[#allocation3 + $0x16] sm:$0xff] %vm17515_vm8, %v846_v60  ;;  %668 = vrot.lane.b32.xlu1 %v13523_v18, %s13283_s23  ;;  %666 = vrot.lane.b32.xlu0 %v13529_v19, %s13283_s23 }
  0xbd   : > { %v1559_v61 = vpop.permute.xlu1 %1558  ;;  %v1557_v62 = vpop.permute.xlu0 %1556 }
  0xbe   : > { %1654 = vst.msk [vmem:[#allocation3 + $0x8] sm:$0xff] %vm17506_vm0, %v1559_v61  ;;  %1653 = vst.msk [vmem:[#allocation3] sm:$0xff] %vm17506_vm0, %v1557_v62  ;;  %vm1830_vm0 = vcmask 261345  }
  0xbf   : > { %1377 = vrot.lane.b32.xlu1 %v13529_v19, %s13287_s27  ;;  %670 = vrot.lane.b32.xlu0 %v522_v54, %s13283_s23 }
  0xc1   : > { %v1041_v63 = vpop.permute.xlu1 %1040  ;;  %v1039_v1 = vpop.permute.xlu0 %1038 }
  0xc2   : > { %1134 = vst.msk [vmem:[#allocation3 + $0x18] sm:$0xff] %vm17514_vm9, %v1041_v63  ;;  %1133 = vst.msk [vmem:[#allocation3 + $0x10] sm:$0xff] %vm17514_vm9, %v1039_v1 }
  0xc3   : > { %1381 = vrot.lane.b32.xlu1 %v522_v54, %s13287_s27  ;;  %1379 = vrot.lane.b32.xlu0 %v13523_v18, %s13287_s27 }
  0xc5   : > { %v1689_v2 = vpop.permute.xlu1 %1688  ;;  %v1687_v3 = vpop.permute.xlu0 %1686 }
  0xc6   : > { %1833 = vst.msk [vmem:[#allocation3 + $0x7] sm:$0xff] %vm17507_vm2, %v1689_v2  ;;  %vm1834_vm2 = vcmask 254176  }
  0xc7   : > { %1831 = vst.msk [vmem:[#allocation3 - $0x1] sm:$0xfe] %vm1830_vm0, %v1687_v3  ;;  %861 = vrot.lane.b32.xlu1 %v13529_v19, %s13284_s24  ;;  %1897 = vrot.lane.b32.xlu0 %v522_v54, %s13290_s30  ;;  %v525_v19 = vld [vmem:[#allocation2 + $0x88] sm:$0x3] }
  0xc9   : > { %v1173_v4 = vpop.permute.xlu1 %1172  ;;  %v1171_v5 = vpop.permute.xlu0 %1170 }
  0xca   : > { %1315 = vst.msk [vmem:[#allocation3 + $0x17] sm:$0xff] %vm17509_vm10, %v1173_v4  ;;  %vm17510_vm10 = vcmask 294146  }
  0xcb   : > { %1314 = vst.msk [vmem:[#allocation3 + $0xf] sm:$0xfe] %vm17508_vm11, %v1171_v5  ;;  %865 = vrot.lane.b32.xlu1 %v522_v54, %s13284_s24  ;;  %863 = vrot.lane.b32.xlu0 %v13523_v18, %s13284_s24  ;;  %vm17525_vm11 = vcmask 294144   ;;  %v461_v5 = vld [vmem:[%s13481_s22 + $0x90] sm:$0xff] }
  0xcc   : > { %494 = vst.msk [vmem:[#allocation2 + $0xf1] sm:$0xff] %vm387_vm1, %v461_v5  ;;  %v466_v5 = vld [vmem:[%s13481_s22 + $0xb8] sm:$0xff] }
  0xcd   : > { %v1691_v8 = vpop.permute.xlu1 %1690  ;;  %v1175_v9 = vpop.permute.xlu0 %1174  ;;  %499 = vst.msk [vmem:[#allocation2 + $0x129] sm:$0xff] %vm387_vm1, %v466_v5 }
  0xce   : > { %1835 = vst.msk [vmem:[#allocation3 + $0xf] sm:$0x1] %vm1834_vm2, %v1691_v8 }
  0xcf   : > { %1316 = vst.msk [vmem:[#allocation3 + $0x1f] sm:$0x1] %vm1312_vm12, %v1175_v9  ;;  %1570 = vrot.lane.b32.xlu1 %v13555_v23, %s13288_s28  ;;  %1568 = vrot.lane.b32.xlu0 %v13557_v24, %s13288_s28 }
  0xd1   : > { %v1884_v10 = vpop.permute.xlu1 %1883  ;;  %v1882_v11 = vpop.permute.xlu0 %1881 }
  0xd2   : > { %2028 = vst.msk [vmem:[#allocation3 + $0x6] sm:$0xff] %vm17525_vm11, %v1884_v10 }
  0xd3   : > { %2026 = vst.msk [vmem:[#allocation3 - $0x2] sm:$0xfc] %vm17510_vm10, %v1882_v11  ;;  %1052 = vrot.lane.b32.xlu1 %v13555_v23, %s13285_s25  ;;  %1050 = vrot.lane.b32.xlu0 %v13557_v24, %s13285_s25  ;;  %vm17524_vm10 = vcmask 293888   ;;  %v13902_v10 = vld [vmem:[#allocation2 + $0xf0] sm:$0xff] }
  0xd4   : > { %582 = vst.msk [vmem:[#allocation3 + $0xa0] sm:$0xff] %vm387_vm1, %v13902_v10 }
  0xd5   : > { %v657_v14 = vpop.permute.xlu1 %656  ;;  %v655_v15 = vpop.permute.xlu0 %654 }
  0xd6   : > { %796 = vst.msk [vmem:[#allocation3 + $0x27] sm:$0xff] %vm788_vm6, %v657_v14 }
  0xd7   : > { %795 = vst.msk [vmem:[#allocation3 + $0x1f] sm:$0xfe] %vm17522_vm4, %v655_v15  ;;  %1706 = vrot.lane.b32.xlu1 %v13555_v23, %s17520_s29  ;;  %1704 = vrot.lane.b32.xlu0 %v13557_v24, %s17520_s29 }
  0xd9   : > { %v1366_v16 = vpop.permute.xlu1 %1365  ;;  %v659_v17 = vpop.permute.xlu0 %658 }
  0xda   : > { %v2076_v18 = vld [vmem:[#allocation3] sm:$0xff]  ;;  %1509 = vst.msk [vmem:[#allocation3 + $0xe] sm:$0xfc] %vm1503_vm14, %v1366_v16 }
  0xdb   : > { %797 = vst.msk [vmem:[#allocation3 + $0x2f] sm:$0x1] %vm17511_vm3, %v659_v17  ;;  %13021 = vmatprep.mubr.msk.f32.mxu0 %vm17524_vm10, %v2076_v18  ;;  %1190 = vrot.lane.b32.xlu1 %v13555_v23, %s13286_s26  ;;  %vm17512_vm3 = vcmask 288000   ;;  %v531_v18 = vld [vmem:[#allocation2 + $0xb8] sm:$0x3] }
  0xdc   : > { %1188 = vrot.lane.b32.xlu0 %v13557_v24, %s13286_s26 }
  0xdd   : > { %v1370_v20 = vpop.permute.xlu1 %1369  ;;  %v1368_v21 = vpop.permute.xlu0 %1367 }
  0xde   : > { %1511 = vst.msk [vmem:[#allocation3 + $0x1e] sm:$0x3] %vm1507_vm15, %v1370_v20 }
  0xdf   : > { %1510 = vst.msk [vmem:[#allocation3 + $0x16] sm:$0xff] %vm1505_vm13, %v1368_v21  ;;  %1708 = vrot.lane.b32.xlu1 %v525_v19, %s17520_s29 }
  0xe0   : > { %1192 = vrot.lane.b32.xlu0 %v525_v19, %s13286_s26 }
  0xe1   : > { %v850_v22 = vpop.permute.xlu1 %849  ;;  %v1886_v25 = vpop.permute.xlu0 %1885 }
  0xe2   : > { %990 = vst.msk [vmem:[#allocation3 + $0x1e] sm:$0xfc] %vm17513_vm5, %v850_v22 }
  0xe3   : > { %2030 = vst.msk [vmem:[#allocation3 + $0xe] sm:$0x3] %vm17512_vm3, %v1886_v25  ;;  %1901 = vrot.lane.b32.xlu1 %v13555_v23, %s13290_s30  ;;  %vm17526_vm3 = vcmask 228544  }
  0xe4   : > { %1899 = vrot.lane.b32.xlu0 %v13557_v24, %s13290_s30  ;;  %vm17527_vm5 = vmmov %vm17526_vm3 }
  0xe5   : > { %v854_v26 = vpop.permute.xlu1 %853  ;;  %v852_v27 = vpop.permute.xlu0 %851 }
  0xe6   : > { %992 = vst.msk [vmem:[#allocation3 + $0x2e] sm:$0x3] %vm17523_vm7, %v854_v26 }
  0xe7   : > { %991 = vst.msk [vmem:[#allocation3 + $0x26] sm:$0xff] %vm17515_vm8, %v852_v27  ;;  %674 = vrot.lane.b32.xlu1 %v13555_v23, %s13283_s23 }
  0xe8   : > { %672 = vrot.lane.b32.xlu0 %v13557_v24, %s13283_s23 }
  0xe9   : > { %v1563_v28 = vpop.permute.xlu1 %1562  ;;  %v1561_v29 = vpop.permute.xlu0 %1560 }
  0xea   : > { %v2077_v30 = vld [vmem:[#allocation3 + $0x8] sm:$0xff]  ;;  %1656 = vst.msk [vmem:[#allocation3 + $0x18] sm:$0xff] %vm17526_vm3, %v1563_v28  ;;  %vm17528_vm3 = vcmask 261344  }
  0xeb   : > { %1655 = vst.msk [vmem:[#allocation3 + $0x10] sm:$0xff] %vm17527_vm5, %v1561_v29  ;;  %13022 = vmatmul.mubr.msk.f32.vlgmr.msra.gmra.mxu0 %vm17524_vm10, %v2077_v30  ;;  %1383 = vrot.lane.b32.xlu1 %v13557_v24, %s13287_s27  ;;  %vm17529_vm5 = vcmask 162944  }
  0xec   : > { %676 = vrot.lane.b32.xlu0 %v525_v19, %s13283_s23 }
  0xed   : > { %v1045_v31 = vpop.permute.xlu1 %1044  ;;  %v1043_v32 = vpop.permute.xlu0 %1042 }
  0xee   : > { %1136 = vst.msk [vmem:[#allocation3 + $0x28] sm:$0xff] %vm17514_vm9, %v1045_v31  ;;  %1135 = vst.msk [vmem:[#allocation3 + $0x20] sm:$0xff] %vm17514_vm9, %v1043_v32  ;;  %vm17530_vm9 = vcmask 162945  }
  0xef   : > { %1387 = vrot.lane.b32.xlu1 %v525_v19, %s13287_s27 }
  0xf0   : > { %1385 = vrot.lane.b32.xlu0 %v13555_v23, %s13287_s27 }
  0xf1   : > { %v1695_v35 = vpop.permute.xlu1 %1694  ;;  %v1693_v36 = vpop.permute.xlu0 %1692 }
  0xf2   : > { %1837 = vst.msk [vmem:[#allocation3 + $0x17] sm:$0xff] %vm17528_vm3, %v1695_v35  ;;  %vm17532_vm3 = vcmask 57376  }
  0xf3   : > { %1836 = vst.msk [vmem:[#allocation3 + $0xf] sm:$0xfe] %vm1830_vm0, %v1693_v36  ;;  %867 = vrot.lane.b32.xlu1 %v13557_v24, %s13284_s24 }
  0xf4   : > { %1903 = vrot.lane.b32.xlu0 %v525_v19, %s13290_s30 }
  0xf5   : > { %v1179_v37 = vpop.permute.xlu1 %1178  ;;  %v1177_v38 = vpop.permute.xlu0 %1176 }
  0xf6   : > { %1318 = vst.msk [vmem:[#allocation3 + $0x27] sm:$0xff] %vm17529_vm5, %v1179_v37  ;;  %vm17533_vm5 = vcmask 97346  }
  0xf7   : > { %1317 = vst.msk [vmem:[#allocation3 + $0x1f] sm:$0xfe] %vm17530_vm9, %v1177_v38  ;;  %871 = vrot.lane.b32.xlu1 %v525_v19, %s13284_s24  ;;  %vm17531_vm9 = vcmask 294146   ;;  %v463_v38 = vld [vmem:[%s13481_s22 + $0xa0] sm:$0xff] }
  0xf8   : > { %869 = vrot.lane.b32.xlu0 %v13555_v23, %s13284_s24  ;;  %v13826_v23 = vld [vmem:[#allocation2 + $0xe0] sm:$0xff]  ;;  %496 = vst.msk [vmem:[#allocation2 + $0x109] sm:$0xff] %vm387_vm1, %v463_v38  ;;  %v468_v38 = vld [vmem:[%s13481_s22 + $0xc8] sm:$0xff] }
  0xf9   : > { %v1697_v24 = vpop.permute.xlu1 %1696  ;;  %v1181_v41 = vpop.permute.xlu0 %1180  ;;  %581 = vst.msk [vmem:[#allocation3 + $0x98] sm:$0xff] %vm387_vm1, %v13826_v23  ;;  %501 = vst.msk [vmem:[#allocation2 + $0x141] sm:$0xff] %vm387_vm1, %v468_v38 }
  0xfa   : > { %1838 = vst.msk [vmem:[#allocation3 + $0x1f] sm:$0x1] %vm1834_vm2, %v1697_v24 }
  0xfb   : > { %1319 = vst.msk [vmem:[#allocation3 + $0x2f] sm:$0x1] %vm1312_vm12, %v1181_v41  ;;  %1574 = vrot.lane.b32.xlu1 %v13620_v33, %s13288_s28 }
  0xfc   : > { %1572 = vrot.lane.b32.xlu0 %v13622_v34, %s13288_s28 }
  0xfd   : > { %v1890_v42 = vpop.permute.xlu1 %1889  ;;  %v1888_v43 = vpop.permute.xlu0 %1887 }
  0xfe   : > { %2032 = vst.msk [vmem:[#allocation3 + $0x16] sm:$0xff] %vm17525_vm11, %v1890_v42 }
  0xff   : > { %2031 = vst.msk [vmem:[#allocation3 + $0xe] sm:$0xfc] %vm17531_vm9, %v1888_v43  ;;  %1056 = vrot.lane.b32.xlu1 %v13620_v33, %s13285_s25  ;;  %vm17534_vm9 = vcmask 288000   ;;  %v13976_v42 = vld [vmem:[#allocation2 + $0x108] sm:$0xff] }
 0x100   : > { %1054 = vrot.lane.b32.xlu0 %v13622_v34, %s13285_s25  ;;  %584 = vst.msk [vmem:[#allocation3 + $0xb0] sm:$0xff] %vm387_vm1, %v13976_v42 }
 0x101   : > { %v663_v45 = vpop.permute.xlu1 %662  ;;  %v661_v46 = vpop.permute.xlu0 %660 }
 0x102   : > { %799 = vst.msk [vmem:[#allocation3 + $0x37] sm:$0xff] %vm788_vm6, %v663_v45 }
 0x103   : > { %798 = vst.msk [vmem:[#allocation3 + $0x2f] sm:$0xfe] %vm17522_vm4, %v661_v46  ;;  %1712 = vrot.lane.b32.xlu1 %v13620_v33, %s17520_s29 }
 0x104   : > { %1710 = vrot.lane.b32.xlu0 %v13622_v34, %s17520_s29 }
 0x105   : > { %v1372_v47 = vpop.permute.xlu1 %1371  ;;  %v665_v50 = vpop.permute.xlu0 %664 }
 0x106   : > { %v2078_v51 = vld [vmem:[#allocation3 + $0x10] sm:$0xff]  ;;  %1512 = vst.msk [vmem:[#allocation3 + $0x1e] sm:$0xfc] %vm1503_vm14, %v1372_v47 }
 0x107   : > { %800 = vst.msk [vmem:[#allocation3 + $0x3f] sm:$0x1] %vm17532_vm3, %v665_v50  ;;  %13024 = vmatprep.mubr.msk.f32.mxu0 %vm17524_vm10, %v2078_v51  ;;  %1196 = vrot.lane.b32.xlu1 %v13620_v33, %s13286_s26  ;;  %vm17535_vm3 = vcmask 228544   ;;  %v534_v51 = vld [vmem:[#allocation2 + $0xd0] sm:$0x3] }
 0x108   : > { %1194 = vrot.lane.b32.xlu0 %v13622_v34, %s13286_s26 }
 0x109   : > { %v1376_v53 = vpop.permute.xlu1 %1375  ;;  %v1374_v54 = vpop.permute.xlu0 %1373 }
 0x10a   : > { %1514 = vst.msk [vmem:[#allocation3 + $0x2e] sm:$0x3] %vm1507_vm15, %v1376_v53 }
 0x10b   : > { %1513 = vst.msk [vmem:[#allocation3 + $0x26] sm:$0xff] %vm1505_vm13, %v1374_v54  ;;  %1714 = vrot.lane.b32.xlu1 %v528_v52, %s17520_s29 }
 0x10c   : > { %1198 = vrot.lane.b32.xlu0 %v528_v52, %s13286_s26 }
 0x10d   : > { %v856_v55 = vpop.permute.xlu1 %855  ;;  %v1892_v56 = vpop.permute.xlu0 %1891 }
 0x10e   : > { %993 = vst.msk [vmem:[#allocation3 + $0x2e] sm:$0xfc] %vm17533_vm5, %v856_v55  ;;  %vm17536_vm5 = vmmov %vm17535_vm3 }
 0x10f   : > { %2033 = vst.msk [vmem:[#allocation3 + $0x1e] sm:$0x3] %vm17534_vm9, %v1892_v56  ;;  %1907 = vrot.lane.b32.xlu1 %v13620_v33, %s13290_s30  ;;  %vm17537_vm9 = vcmask 130144  }
 0x110   : > { %1905 = vrot.lane.b32.xlu0 %v13622_v34, %s13290_s30 }
 0x111   : > { %v860_v57 = vpop.permute.xlu1 %859  ;;  %v858_v58 = vpop.permute.xlu0 %857 }
 0x112   : > { %995 = vst.msk [vmem:[#allocation3 + $0x3e] sm:$0x3] %vm17523_vm7, %v860_v57 }
 0x113   : > { %994 = vst.msk [vmem:[#allocation3 + $0x36] sm:$0xff] %vm17515_vm8, %v858_v58  ;;  %680 = vrot.lane.b32.xlu1 %v13620_v33, %s13283_s23  ;;  %vm17538_vm8 = vmmov %vm17537_vm9 }
 0x114   : > { %678 = vrot.lane.b32.xlu0 %v13622_v34, %s13283_s23 }
 0x115   : > { %v1567_v59 = vpop.permute.xlu1 %1566  ;;  %v1565_v60 = vpop.permute.xlu0 %1564 }
 0x116   : > { %v2079_v61 = vld [vmem:[#allocation3 + $0x18] sm:$0xff]  ;;  %1658 = vst.msk [vmem:[#allocation3 + $0x28] sm:$0xff] %vm17535_vm3, %v1567_v59  ;;  %vm17539_vm3 = vcmask 261344  }
 0x117   : > { %1657 = vst.msk [vmem:[#allocation3 + $0x20] sm:$0xff] %vm17536_vm5, %v1565_v60  ;;  %13025 = vmatmul.mubr.msk.f32.gmra.mxu0 %vm17524_vm10, %v2079_v61  ;;  %1389 = vrot.lane.b32.xlu1 %v13622_v34, %s13287_s27  ;;  %vm17540_vm5 = vcmask 162944  }
 0x118   : > { %682 = vrot.lane.b32.xlu0 %v528_v52, %s13283_s23 }
 0x119   : > { %v1049_v62 = vpop.permute.xlu1 %1048  ;;  %v1047_v63 = vpop.permute.xlu0 %1046 }
 0x11a   : > { %1138 = vst.msk [vmem:[#allocation3 + $0x38] sm:$0xff] %vm17537_vm9, %v1049_v62  ;;  %vm17542_vm9 = vcmask 294146  }
 0x11b   : > { %1137 = vst.msk [vmem:[#allocation3 + $0x30] sm:$0xff] %vm17538_vm8, %v1047_v63  ;;  %1393 = vrot.lane.b32.xlu1 %v528_v52, %s13287_s27  ;;  %vm17541_vm8 = vcmask 162945  }
 0x11c   : > { %1391 = vrot.lane.b32.xlu0 %v13620_v33, %s13287_s27 }
 0x11d   : > { %v1701_v1 = vpop.permute.xlu1 %1700  ;;  %v1699_v2 = vpop.permute.xlu0 %1698 }
 0x11e   : > { %1840 = vst.msk [vmem:[#allocation3 + $0x27] sm:$0xff] %vm17539_vm3, %v1701_v1  ;;  %vm17543_vm3 = vcmask 57376  }
 0x11f   : > { %1839 = vst.msk [vmem:[#allocation3 + $0x1f] sm:$0xfe] %vm1830_vm0, %v1699_v2  ;;  %873 = vrot.lane.b32.xlu1 %v13622_v34, %s13284_s24 }
 0x120   : > { %1909 = vrot.lane.b32.xlu0 %v528_v52, %s13290_s30 }
 0x121   : > { %v1185_v3 = vpop.permute.xlu1 %1184  ;;  %v1183_v4 = vpop.permute.xlu0 %1182 }
 0x122   : > { %1321 = vst.msk [vmem:[#allocation3 + $0x37] sm:$0xff] %vm17540_vm5, %v1185_v3  ;;  %vm17544_vm5 = vcmask 97346  }
 0x123   : > { %1320 = vst.msk [vmem:[#allocation3 + $0x2f] sm:$0xfe] %vm17541_vm8, %v1183_v4  ;;  %877 = vrot.lane.b32.xlu1 %v528_v52, %s13284_s24  ;;  %vm17545_vm8 = vcmask 288000   ;;  %v465_v4 = vld [vmem:[%s13481_s22 + $0xb0] sm:$0xff] }
 0x124   : > { %875 = vrot.lane.b32.xlu0 %v13620_v33, %s13284_s24  ;;  %v13900_v33 = vld [vmem:[#allocation2 + $0xf8] sm:$0xff]  ;;  %498 = vst.msk [vmem:[#allocation2 + $0x121] sm:$0xff] %vm387_vm1, %v465_v4 }
 0x125   : > { %v1703_v34 = vpop.permute.xlu1 %1702  ;;  %v1187_v7 = vpop.permute.xlu0 %1186  ;;  %583 = vst.msk [vmem:[#allocation3 + $0xa8] sm:$0xff] %vm387_vm1, %v13900_v33  ;;  %v470_v4 = vld [vmem:[%s13481_s22 + $0xd8] sm:$0xff] }
 0x126   : > { %1841 = vst.msk [vmem:[#allocation3 + $0x2f] sm:$0x1] %vm1834_vm2, %v1703_v34 }
 0x127   : > { %1322 = vst.msk [vmem:[#allocation3 + $0x3f] sm:$0x1] %vm1312_vm12, %v1187_v7  ;;  %1578 = vrot.lane.b32.xlu1 %v13680_v48, %s13288_s28 }
 0x128   : > { %1576 = vrot.lane.b32.xlu0 %v13682_v49, %s13288_s28  ;;  %503 = vst.msk [vmem:[#allocation2 + $0x159] sm:$0xff] %vm387_vm1, %v470_v4 }
 0x129   : > { %v1896_v8 = vpop.permute.xlu1 %1895  ;;  %v1894_v9 = vpop.permute.xlu0 %1893 }
 0x12a   : > { %2035 = vst.msk [vmem:[#allocation3 + $0x26] sm:$0xff] %vm17525_vm11, %v1896_v8 }
 0x12b   : > { %2034 = vst.msk [vmem:[#allocation3 + $0x1e] sm:$0xfc] %vm17542_vm9, %v1894_v9  ;;  %1060 = vrot.lane.b32.xlu1 %v13680_v48, %s13285_s25  ;;  %vm17546_vm9 = vcmask 97344   ;;  %v14050_v8 = vld [vmem:[#allocation2 + $0x120] sm:$0xff] }
 0x12c   : > { %1058 = vrot.lane.b32.xlu0 %v13682_v49, %s13285_s25  ;;  %586 = vst.msk [vmem:[#allocation3 + $0xc0] sm:$0xff] %vm387_vm1, %v14050_v8 }
 0x12d   : > { %v669_v11 = vpop.permute.xlu1 %668  ;;  %v667_v14 = vpop.permute.xlu0 %666 }
 0x12e   : > { %802 = vst.msk [vmem:[#allocation3 + $0x47] sm:$0xff] %vm788_vm6, %v669_v11 }
 0x12f   : > { %801 = vst.msk [vmem:[#allocation3 + $0x3f] sm:$0xfe] %vm17522_vm4, %v667_v14  ;;  %1718 = vrot.lane.b32.xlu1 %v13680_v48, %s17520_s29 }
 0x130   : > { %1716 = vrot.lane.b32.xlu0 %v13682_v49, %s17520_s29 }
 0x131   : > { %v1378_v15 = vpop.permute.xlu1 %1377  ;;  %v671_v16 = vpop.permute.xlu0 %670 }
 0x132   : > { %v2080_v17 = vld [vmem:[#allocation3 + $0x20] sm:$0xff]  ;;  %1515 = vst.msk [vmem:[#allocation3 + $0x2e] sm:$0xfc] %vm1503_vm14, %v1378_v15 }
 0x133   : > { %803 = vst.msk [vmem:[#allocation3 + $0x4f] sm:$0x1] %vm17543_vm3, %v671_v16  ;;  %13027 = vmatprep.mubr.msk.f32.mxu0 %vm17524_vm10, %v2080_v17  ;;  %1202 = vrot.lane.b32.xlu1 %v13680_v48, %s13286_s26  ;;  %vm17547_vm3 = vcmask 228544   ;;  %v14073_v17 = vld [vmem:[#allocation2 + $0xe8] sm:$0x3] }
 0x134   : > { %1200 = vrot.lane.b32.xlu0 %v13682_v49, %s13286_s26 }
 0x135   : > { %v1382_v19 = vpop.permute.xlu1 %1381  ;;  %v1380_v20 = vpop.permute.xlu0 %1379 }
 0x136   : > { %1517 = vst.msk [vmem:[#allocation3 + $0x3e] sm:$0x3] %vm1507_vm15, %v1382_v19 }
 0x137   : > { %1516 = vst.msk [vmem:[#allocation3 + $0x36] sm:$0xff] %vm1505_vm13, %v1380_v20  ;;  %1720 = vrot.lane.b32.xlu1 %v531_v18, %s17520_s29 }
 0x138   : > { %1204 = vrot.lane.b32.xlu0 %v531_v18, %s13286_s26 }
 0x139   : > { %v862_v21 = vpop.permute.xlu1 %861  ;;  %v1898_v22 = vpop.permute.xlu0 %1897 }
 0x13a   : > { %996 = vst.msk [vmem:[#allocation3 + $0x3e] sm:$0xfc] %vm17544_vm5, %v862_v21  ;;  %vm17548_vm5 = vmmov %vm17547_vm3 }
 0x13b   : > { %2036 = vst.msk [vmem:[#allocation3 + $0x2e] sm:$0x3] %vm17545_vm8, %v1898_v22  ;;  %1913 = vrot.lane.b32.xlu1 %v13680_v48, %s13290_s30  ;;  %vm17549_vm8 = vcmask 130144  }
 0x13c   : > { %1911 = vrot.lane.b32.xlu0 %v13682_v49, %s13290_s30 }
 0x13d   : > { %v866_v25 = vpop.permute.xlu1 %865  ;;  %v864_v26 = vpop.permute.xlu0 %863 }
 0x13e   : > { %998 = vst.msk [vmem:[#allocation3 + $0x4e] sm:$0x3] %vm17523_vm7, %v866_v25 }
 0x13f   : > { %997 = vst.msk [vmem:[#allocation3 + $0x46] sm:$0xff] %vm17546_vm9, %v864_v26  ;;  %686 = vrot.lane.b32.xlu1 %v13680_v48, %s13283_s23  ;;  %vm17550_vm9 = vmmov %vm17549_vm8 }
 0x140   : > { %684 = vrot.lane.b32.xlu0 %v13682_v49, %s13283_s23 }
 0x141   : > { %v1571_v27 = vpop.permute.xlu1 %1570  ;;  %v1569_v28 = vpop.permute.xlu0 %1568 }
 0x142   : > { %v2081_v29 = vld [vmem:[#allocation3 + $0x28] sm:$0xff]  ;;  %1660 = vst.msk [vmem:[#allocation3 + $0x38] sm:$0xff] %vm17547_vm3, %v1571_v27  ;;  %vm17551_vm3 = vcmask 261344  }
 0x143   : > { %1659 = vst.msk [vmem:[#allocation3 + $0x30] sm:$0xff] %vm17548_vm5, %v1569_v28  ;;  %13028 = vmatmul.mubr.msk.f32.gmra.mxu0 %vm17524_vm10, %v2081_v29  ;;  %1395 = vrot.lane.b32.xlu1 %v13682_v49, %s13287_s27  ;;  %vm17552_vm5 = vcmask 162944  }
 0x144   : > { %688 = vrot.lane.b32.xlu0 %v531_v18, %s13283_s23 }
 0x145   : > { %v1053_v30 = vpop.permute.xlu1 %1052  ;;  %v1051_v31 = vpop.permute.xlu0 %1050 }
 0x146   : > { %1140 = vst.msk [vmem:[#allocation3 + $0x48] sm:$0xff] %vm17549_vm8, %v1053_v30  ;;  %vm17553_vm8 = vcmask 162945  }
 0x147   : > { %1139 = vst.msk [vmem:[#allocation3 + $0x40] sm:$0xff] %vm17550_vm9, %v1051_v31  ;;  %1399 = vrot.lane.b32.xlu1 %v531_v18, %s13287_s27  ;;  %vm17554_vm9 = vcmask 294146  }
 0x148   : > { %1397 = vrot.lane.b32.xlu0 %v13680_v48, %s13287_s27 }
 0x149   : > { %v1707_v32 = vpop.permute.xlu1 %1706  ;;  %v1705_v35 = vpop.permute.xlu0 %1704 }
 0x14a   : > { %1843 = vst.msk [vmem:[#allocation3 + $0x37] sm:$0xff] %vm17551_vm3, %v1707_v32  ;;  %vm17555_vm3 = vcmask 57376  }
 0x14b   : > { %1842 = vst.msk [vmem:[#allocation3 + $0x2f] sm:$0xfe] %vm1830_vm0, %v1705_v35  ;;  %879 = vrot.lane.b32.xlu1 %v13682_v49, %s13284_s24 }
 0x14c   : > { %1915 = vrot.lane.b32.xlu0 %v531_v18, %s13290_s30 }
 0x14d   : > { %v1191_v36 = vpop.permute.xlu1 %1190 }
 0x14e   : > { %v1189_v37 = vpop.permute.xlu0 %1188  ;;  %1324 = vst.msk [vmem:[#allocation3 + $0x47] sm:$0xff] %vm17552_vm5, %v1191_v36  ;;  %vm17556_vm5 = vcmask 97346  }
 0x14f   : > { %1323 = vst.msk [vmem:[#allocation3 + $0x3f] sm:$0xfe] %vm17553_vm8, %v1189_v37  ;;  %883 = vrot.lane.b32.xlu1 %v531_v18, %s13284_s24  ;;  %vm17557_vm8 = vcmask 288000   ;;  %v467_v37 = vld [vmem:[%s13481_s22 + $0xc0] sm:$0xff] }
 0x150   : > { %881 = vrot.lane.b32.xlu0 %v13680_v48, %s13284_s24  ;;  %v13974_v48 = vld [vmem:[#allocation2 + $0x110] sm:$0xff]  ;;  %500 = vst.msk [vmem:[#allocation2 + $0x139] sm:$0xff] %vm387_vm1, %v467_v37 }
 0x151   : > { %v1709_v49 = vpop.permute.xlu1 %1708  ;;  %585 = vst.msk [vmem:[#allocation3 + $0xb8] sm:$0xff] %vm387_vm1, %v13974_v48 }
 0x152   : > { %v1193_v40 = vpop.permute.xlu0 %1192  ;;  %1844 = vst.msk [vmem:[#allocation3 + $0x3f] sm:$0x1] %vm1834_vm2, %v1709_v49 }
 0x153   : > { %1325 = vst.msk [vmem:[#allocation3 + $0x4f] sm:$0x1] %vm1312_vm12, %v1193_v40  ;;  %1582 = vrot.lane.b32.xlu1 %v13752_v12, %s13288_s28 }
 0x154   : > { %1580 = vrot.lane.b32.xlu0 %v13754_v13, %s13288_s28 }
 0x155   : > { %v1902_v24 = vpop.permute.xlu1 %1901 }
 0x156   : > { %v1900_v41 = vpop.permute.xlu0 %1899  ;;  %2038 = vst.msk [vmem:[#allocation3 + $0x36] sm:$0xff] %vm17525_vm11, %v1902_v24 }
 0x157   : > { %2037 = vst.msk [vmem:[#allocation3 + $0x2e] sm:$0xfc] %vm17554_vm9, %v1900_v41  ;;  %1064 = vrot.lane.b32.xlu1 %v13752_v12, %s13285_s25  ;;  %vm17558_vm9 = vcmask 97344   ;;  %v14159_v24 = vld [vmem:[#allocation2 + $0x138] sm:$0xff] }
 0x158   : > { %1062 = vrot.lane.b32.xlu0 %v13754_v13, %s13285_s25  ;;  %588 = vst.msk [vmem:[#allocation3 + $0xd0] sm:$0xff] %vm387_vm1, %v14159_v24 }
 0x159   : > { %v675_v43 = vpop.permute.xlu1 %674 }
 0x15a   : > { %v673_v45 = vpop.permute.xlu0 %672  ;;  %805 = vst.msk [vmem:[#allocation3 + $0x57] sm:$0xff] %vm788_vm6, %v675_v43 }
 0x15b   : > { %804 = vst.msk [vmem:[#allocation3 + $0x4f] sm:$0xfe] %vm17522_vm4, %v673_v45  ;;  %1724 = vrot.lane.b32.xlu1 %v13752_v12, %s17520_s29 }
 0x15c   : > { %1722 = vrot.lane.b32.xlu0 %v13754_v13, %s17520_s29 }
 0x15d   : > { %v1384_v46 = vpop.permute.xlu1 %1383 }
 0x15e   : > { %v677_v47 = vpop.permute.xlu0 %676  ;;  %v2082_v50 = vld [vmem:[#allocation3 + $0x30] sm:$0xff]  ;;  %1518 = vst.msk [vmem:[#allocation3 + $0x3e] sm:$0xfc] %vm1503_vm14, %v1384_v46 }
 0x15f   : > { %806 = vst.msk [vmem:[#allocation3 + $0x5f] sm:$0x1] %vm17555_vm3, %v677_v47  ;;  %13030 = vmatprep.mubr.msk.f32.mxu0 %vm17524_vm10, %v2082_v50  ;;  %1208 = vrot.lane.b32.xlu1 %v13752_v12, %s13286_s26  ;;  %vm17559_vm3 = vcmask 228544   ;;  %v540_v50 = vld [vmem:[#allocation2 + $0x100] sm:$0x3] }
 0x160   : > { %1206 = vrot.lane.b32.xlu0 %v13754_v13, %s13286_s26 }
 0x161   : > { %v1388_v52 = vpop.permute.xlu1 %1387 }
 0x162   : > { %v1386_v53 = vpop.permute.xlu0 %1385  ;;  %1520 = vst.msk [vmem:[#allocation3 + $0x4e] sm:$0x3] %vm1507_vm15, %v1388_v52 }
 0x163   : > { %1519 = vst.msk [vmem:[#allocation3 + $0x46] sm:$0xff] %vm1505_vm13, %v1386_v53  ;;  %1726 = vrot.lane.b32.xlu1 %v534_v51, %s17520_s29 }
 0x164   : > { %1210 = vrot.lane.b32.xlu0 %v534_v51, %s13286_s26 }
 0x165   : > { %v868_v54 = vpop.permute.xlu1 %867 }
 0x166   : > { %v1904_v55 = vpop.permute.xlu0 %1903  ;;  %999 = vst.msk [vmem:[#allocation3 + $0x4e] sm:$0xfc] %vm17556_vm5, %v868_v54  ;;  %vm17560_vm5 = vmmov %vm17559_vm3 }
 0x167   : > { %2039 = vst.msk [vmem:[#allocation3 + $0x3e] sm:$0x3] %vm17557_vm8, %v1904_v55  ;;  %1919 = vrot.lane.b32.xlu1 %v13752_v12, %s13290_s30  ;;  %vm17561_vm8 = vcmask 130144  }
 0x168   : > { %1917 = vrot.lane.b32.xlu0 %v13754_v13, %s13290_s30 }
 0x169   : > { %v872_v56 = vpop.permute.xlu1 %871 }
 0x16a   : > { %v870_v57 = vpop.permute.xlu0 %869  ;;  %1001 = vst.msk [vmem:[#allocation3 + $0x5e] sm:$0x3] %vm17523_vm7, %v872_v56 }
 0x16b   : > { %1000 = vst.msk [vmem:[#allocation3 + $0x56] sm:$0xff] %vm17558_vm9, %v870_v57  ;;  %692 = vrot.lane.b32.xlu1 %v13752_v12, %s13283_s23  ;;  %vm17562_vm9 = vmmov %vm17561_vm8 }
 0x16c   : > { %690 = vrot.lane.b32.xlu0 %v13754_v13, %s13283_s23 }
 0x16d   : > { %v1575_v58 = vpop.permute.xlu1 %1574 }
 0x16e   : > { %v1573_v59 = vpop.permute.xlu0 %1572  ;;  %v2083_v60 = vld [vmem:[#allocation3 + $0x38] sm:$0xff]  ;;  %1662 = vst.msk [vmem:[#allocation3 + $0x48] sm:$0xff] %vm17559_vm3, %v1575_v58  ;;  %vm17563_vm3 = vcmask 261344  }
 0x16f   : > { %1661 = vst.msk [vmem:[#allocation3 + $0x40] sm:$0xff] %vm17560_vm5, %v1573_v59  ;;  %13031 = vmatmul.mubr.msk.f32.gmra.mxu0 %vm17524_vm10, %v2083_v60  ;;  %1401 = vrot.lane.b32.xlu1 %v13754_v13, %s13287_s27  ;;  %vm17564_vm5 = vcmask 162944  }
 0x170   : > { %694 = vrot.lane.b32.xlu0 %v534_v51, %s13283_s23 }
 0x171   : > { %v1057_v61 = vpop.permute.xlu1 %1056 }
 0x172   : > { %v1055_v62 = vpop.permute.xlu0 %1054  ;;  %1142 = vst.msk [vmem:[#allocation3 + $0x58] sm:$0xff] %vm17561_vm8, %v1057_v61  ;;  %vm17565_vm8 = vcmask 162945  }
 0x173   : > { %1141 = vst.msk [vmem:[#allocation3 + $0x50] sm:$0xff] %vm17562_vm9, %v1055_v62  ;;  %1405 = vrot.lane.b32.xlu1 %v534_v51, %s13287_s27  ;;  %vm17566_vm9 = vcmask 294146  }
 0x174   : > { %1403 = vrot.lane.b32.xlu0 %v13752_v12, %s13287_s27 }
 0x175   : > { %v1713_v63 = vpop.permute.xlu1 %1712 }
 0x176   : > { %v1711_v1 = vpop.permute.xlu0 %1710  ;;  %1846 = vst.msk [vmem:[#allocation3 + $0x47] sm:$0xff] %vm17563_vm3, %v1713_v63  ;;  %vm17567_vm3 = vcmask 57376  }
 0x177   : > { %1845 = vst.msk [vmem:[#allocation3 + $0x3f] sm:$0xfe] %vm1830_vm0, %v1711_v1  ;;  %885 = vrot.lane.b32.xlu1 %v13754_v13, %s13284_s24 }
 0x178   : > { %1921 = vrot.lane.b32.xlu0 %v534_v51, %s13290_s30 }
 0x179   : > { %v1197_v2 = vpop.permute.xlu1 %1196 }
 0x17a   : > { %v1195_v3 = vpop.permute.xlu0 %1194  ;;  %1327 = vst.msk [vmem:[#allocation3 + $0x57] sm:$0xff] %vm17564_vm5, %v1197_v2  ;;  %vm17516_vm5 = vcmask 261120  }
 0x17b   : > { %1326 = vst.msk [vmem:[#allocation3 + $0x4f] sm:$0xfe] %vm17565_vm8, %v1195_v3  ;;  %889 = vrot.lane.b32.xlu1 %v534_v51, %s13284_s24  ;;  %vm17568_vm8 = vcmask 97346   ;;  %v469_v3 = vld [vmem:[%s13481_s22 + $0xd0] sm:$0xff] }
 0x17c   : > { %887 = vrot.lane.b32.xlu0 %v13752_v12, %s13284_s24  ;;  %v14048_v12 = vld [vmem:[#allocation2 + $0x128] sm:$0xff]  ;;  %2618 = vst.msk [vmem:[#allocation4 + $0x10] sm:$0xff] %vm17516_vm5, %v13282_v0  ;;  %2615 = vst.msk [vmem:[#allocation4] sm:$0xff] %vm17516_vm5, %v13282_v0 }
 0x17d   : > { %v1715_v13 = vpop.permute.xlu1 %1714  ;;  %587 = vst.msk [vmem:[#allocation3 + $0xc8] sm:$0xff] %vm387_vm1, %v14048_v12  ;;  %502 = vst.msk [vmem:[#allocation2 + $0x151] sm:$0xff] %vm387_vm1, %v469_v3 }
 0x17e   : > { %v1199_v6 = vpop.permute.xlu0 %1198  ;;  %1847 = vst.msk [vmem:[#allocation3 + $0x4f] sm:$0x1] %vm1834_vm2, %v1715_v13 }
 0x17f   : > { %1328 = vst.msk [vmem:[#allocation3 + $0x5f] sm:$0x1] %vm1312_vm12, %v1199_v6  ;;  %1586 = vrot.lane.b32.xlu1 %v13826_v23, %s13288_s28 }
 0x180   : > { %1584 = vrot.lane.b32.xlu0 %v13828_v44, %s13288_s28  ;;  %2620 = vst.msk [vmem:[#allocation4 + $0x20] sm:$0xff] %vm17516_vm5, %v13282_v0  ;;  %2622 = vst.msk [vmem:[#allocation4 + $0x30] sm:$0xff] %vm17516_vm5, %v13282_v0 }
 0x181   : > { %v1908_v34 = vpop.permute.xlu1 %1907  ;;  %2624 = vst.msk [vmem:[#allocation4 + $0x40] sm:$0xff] %vm17516_vm5, %v13282_v0  ;;  %2626 = vst.msk [vmem:[#allocation4 + $0x50] sm:$0xff] %vm17516_vm5, %v13282_v0 }
 0x182   : > { %v1906_v7 = vpop.permute.xlu0 %1905  ;;  %2041 = vst.msk [vmem:[#allocation3 + $0x46] sm:$0xff] %vm17525_vm11, %v1908_v34 }
 0x183   : > { %2040 = vst.msk [vmem:[#allocation3 + $0x3e] sm:$0xfc] %vm17566_vm9, %v1906_v7  ;;  %1068 = vrot.lane.b32.xlu1 %v13826_v23, %s13285_s25  ;;  %vm17569_vm9 = vcmask 288000  }
 0x184   : > { %1066 = vrot.lane.b32.xlu0 %v13828_v44, %s13285_s25  ;;  %2628 = vst.msk [vmem:[#allocation4 + $0x60] sm:$0xff] %vm17516_vm5, %v13282_v0  ;;  %2630 = vst.msk [vmem:[#allocation4 + $0x70] sm:$0xff] %vm17516_vm5, %v13282_v0  ;;  %v14233_v34 = vld [vmem:[#allocation2 + $0x150] sm:$0xff] }
 0x185   : > { %v681_v9 = vpop.permute.xlu1 %680  ;;  %2632 = vst.msk [vmem:[#allocation4 + $0x80] sm:$0xff] %vm17516_vm5, %v13282_v0 }
 0x186   : > { %v679_v11 = vpop.permute.xlu0 %678  ;;  %808 = vst.msk [vmem:[#allocation3 + $0x67] sm:$0xff] %vm788_vm6, %v681_v9 }
 0x187   : > { %807 = vst.msk [vmem:[#allocation3 + $0x5f] sm:$0xfe] %vm17522_vm4, %v679_v11  ;;  %1730 = vrot.lane.b32.xlu1 %v13826_v23, %s17520_s29 }
 0x188   : > { %1728 = vrot.lane.b32.xlu0 %v13828_v44, %s17520_s29  ;;  %590 = vst.msk [vmem:[#allocation3 + $0xe0] sm:$0xff] %vm387_vm1, %v14233_v34 }
 0x189   : > { %v1390_v14 = vpop.permute.xlu1 %1389 }
 0x18a   : > { %v683_v15 = vpop.permute.xlu0 %682  ;;  %v2084_v16 = vld [vmem:[#allocation3 + $0x40] sm:$0xff]  ;;  %1521 = vst.msk [vmem:[#allocation3 + $0x4e] sm:$0xfc] %vm1503_vm14, %v1390_v14 }
 0x18b   : > { %809 = vst.msk [vmem:[#allocation3 + $0x6f] sm:$0x1] %vm17567_vm3, %v683_v15  ;;  %13033 = vmatprep.mubr.msk.f32.mxu0 %vm17524_vm10, %v2084_v16  ;;  %1214 = vrot.lane.b32.xlu1 %v13826_v23, %s13286_s26  ;;  %vm17570_vm3 = vcmask 97344   ;;  %v543_v16 = vld [vmem:[#allocation2 + $0x118] sm:$0x3] }
 0x18c   : > { %1212 = vrot.lane.b32.xlu0 %v13828_v44, %s13286_s26 }
 0x18d   : > { %v1394_v18 = vpop.permute.xlu1 %1393 }
 0x18e   : > { %v1392_v19 = vpop.permute.xlu0 %1391  ;;  %1523 = vst.msk [vmem:[#allocation3 + $0x5e] sm:$0x3] %vm1507_vm15, %v1394_v18 }
 0x18f   : > { %1522 = vst.msk [vmem:[#allocation3 + $0x56] sm:$0xff] %vm1505_vm13, %v1392_v19  ;;  %1732 = vrot.lane.b32.xlu1 %v14073_v17, %s17520_s29 }
 0x190   : > { %1216 = vrot.lane.b32.xlu0 %v14073_v17, %s13286_s26 }
 0x191   : > { %v874_v20 = vpop.permute.xlu1 %873 }
 0x192   : > { %v1910_v21 = vpop.permute.xlu0 %1909  ;;  %1002 = vst.msk [vmem:[#allocation3 + $0x5e] sm:$0xfc] %vm17568_vm8, %v874_v20  ;;  %vm2616_vm8 = vcmask 253952  }
 0x193   : > { %2042 = vst.msk [vmem:[#allocation3 + $0x4e] sm:$0x3] %vm17569_vm9, %v1910_v21  ;;  %1925 = vrot.lane.b32.xlu1 %v13826_v23, %s13290_s30  ;;  %vm17571_vm9 = vcmask 228544  }
 0x194   : > { %1923 = vrot.lane.b32.xlu0 %v13828_v44, %s13290_s30  ;;  %vm17572_vm5 = vmmov %vm17571_vm9  ;;  %2619 = vst.msk [vmem:[#allocation4 + $0x18] sm:$0x1] %vm2616_vm8, %v13282_v0 }
 0x195   : > { %v878_v22 = vpop.permute.xlu1 %877  ;;  %2617 = vst.msk [vmem:[#allocation4 + $0x8] sm:$0x1] %vm2616_vm8, %v13282_v0  ;;  %2621 = vst.msk [vmem:[#allocation4 + $0x28] sm:$0x1] %vm2616_vm8, %v13282_v0 }
 0x196   : > { %v876_v25 = vpop.permute.xlu0 %875  ;;  %1004 = vst.msk [vmem:[#allocation3 + $0x6e] sm:$0x3] %vm17523_vm7, %v878_v22 }
 0x197   : > { %1003 = vst.msk [vmem:[#allocation3 + $0x66] sm:$0xff] %vm17570_vm3, %v876_v25  ;;  %698 = vrot.lane.b32.xlu1 %v13826_v23, %s13283_s23 }
 0x198   : > { %696 = vrot.lane.b32.xlu0 %v13828_v44, %s13283_s23  ;;  %2623 = vst.msk [vmem:[#allocation4 + $0x38] sm:$0x1] %vm2616_vm8, %v13282_v0  ;;  %2625 = vst.msk [vmem:[#allocation4 + $0x48] sm:$0x1] %vm2616_vm8, %v13282_v0 }
 0x199   : > { %v1579_v26 = vpop.permute.xlu1 %1578  ;;  %2627 = vst.msk [vmem:[#allocation4 + $0x58] sm:$0x1] %vm2616_vm8, %v13282_v0  ;;  %2629 = vst.msk [vmem:[#allocation4 + $0x68] sm:$0x1] %vm2616_vm8, %v13282_v0 }
 0x19a   : > { %v1577_v27 = vpop.permute.xlu0 %1576  ;;  %v2085_v28 = vld [vmem:[#allocation3 + $0x48] sm:$0xff]  ;;  %1664 = vst.msk [vmem:[#allocation3 + $0x58] sm:$0xff] %vm17571_vm9, %v1579_v26  ;;  %vm17576_vm9 = vcmask 162944  }
 0x19b   : > { %1663 = vst.msk [vmem:[#allocation3 + $0x50] sm:$0xff] %vm17572_vm5, %v1577_v27  ;;  %13034 = vmatmul.mubr.msk.f32.gmra.mxu0 %vm17524_vm10, %v2085_v28  ;;  %1407 = vrot.lane.b32.xlu1 %v13828_v44, %s13287_s27  ;;  %vm17573_vm5 = vcmask 130144  }
 0x19c   : > { %2631 = vst.msk [vmem:[#allocation4 + $0x78] sm:$0x1] %vm2616_vm8, %v13282_v0  ;;  %2633 = vst.msk [vmem:[#allocation4 + $0x88] sm:$0x1] %vm2616_vm8, %v13282_v0  ;;  %700 = vrot.lane.b32.xlu0 %v14073_v17, %s13283_s23  ;;  %vm17575_vm8 = vcmask 261344  }
 0x19d   : > { %v1061_v29 = vpop.permute.xlu1 %1060  ;;  %vm17574_vm3 = vmmov %vm17573_vm5 }
 0x19e   : > { %v1059_v30 = vpop.permute.xlu0 %1058  ;;  %1144 = vst.msk [vmem:[#allocation3 + $0x68] sm:$0xff] %vm17573_vm5, %v1061_v29  ;;  %vm17577_vm5 = vcmask 162945  }
 0x19f   : > { %1143 = vst.msk [vmem:[#allocation3 + $0x60] sm:$0xff] %vm17574_vm3, %v1059_v30  ;;  %1411 = vrot.lane.b32.xlu1 %v14073_v17, %s13287_s27  ;;  %vm17578_vm3 = vcmask 294146  }
 0x1a0   : > { %1409 = vrot.lane.b32.xlu0 %v13826_v23, %s13287_s27 }
 0x1a1   : > { %v1719_v31 = vpop.permute.xlu1 %1718 }
 0x1a2   : > { %v1717_v32 = vpop.permute.xlu0 %1716  ;;  %1849 = vst.msk [vmem:[#allocation3 + $0x57] sm:$0xff] %vm17575_vm8, %v1719_v31  ;;  %vm17579_vm8 = vcmask 57376  }
 0x1a3   : > { %1848 = vst.msk [vmem:[#allocation3 + $0x4f] sm:$0xfe] %vm1830_vm0, %v1717_v32  ;;  %891 = vrot.lane.b32.xlu1 %v13828_v44, %s13284_s24 }
 0x1a4   : > { %1927 = vrot.lane.b32.xlu0 %v14073_v17, %s13290_s30 }
 0x1a5   : > { %v1203_v35 = vpop.permute.xlu1 %1202 }
 0x1a6   : > { %v1201_v36 = vpop.permute.xlu0 %1200  ;;  %1330 = vst.msk [vmem:[#allocation3 + $0x67] sm:$0xff] %vm17576_vm9, %v1203_v35  ;;  %vm17580_vm9 = vcmask 97346  }
 0x1a7   : > { %1329 = vst.msk [vmem:[#allocation3 + $0x5f] sm:$0xfe] %vm17577_vm5, %v1201_v36  ;;  %895 = vrot.lane.b32.xlu1 %v14073_v17, %s13284_s24  ;;  %vm17581_vm5 = vcmask 288000  }
 0x1a8   : > { %893 = vrot.lane.b32.xlu0 %v13826_v23, %s13284_s24  ;;  %v14157_v23 = vld [vmem:[#allocation2 + $0x140] sm:$0xff] }
 0x1a9   : > { %v1721_v44 = vpop.permute.xlu1 %1720  ;;  %589 = vst.msk [vmem:[#allocation3 + $0xd8] sm:$0xff] %vm387_vm1, %v14157_v23 }
 0x1aa   : > { %v1205_v39 = vpop.permute.xlu0 %1204  ;;  %1850 = vst.msk [vmem:[#allocation3 + $0x5f] sm:$0x1] %vm1834_vm2, %v1721_v44  ;;  %v14291_v44 = vld [vmem:[%s17496_s2] ss:$0 sm:$0xff] }
 0x1ab   : > { %1331 = vst.msk [vmem:[#allocation3 + $0x6f] sm:$0x1] %vm1312_vm12, %v1205_v39  ;;  %1590 = vrot.lane.b32.xlu1 %v13900_v33, %s13288_s28  ;;  %v13023_v28 = vpop.f32.mrf.mxu0 }
 0x1ac   : > { %1588 = vrot.lane.b32.xlu0 %v13902_v10, %s13288_s28 }
 0x1ad   : > { %v1914_v49 = vpop.permute.xlu1 %1913  ;;  %v2287_v31 = vpop.f32.mrf.mxu0 }
 0x1ae   : > { %v1912_v40 = vpop.permute.xlu0 %1911  ;;  %2044 = vst.msk [vmem:[#allocation3 + $0x56] sm:$0xff] %vm17525_vm11, %v1914_v49  ;;  %v471_v49 = vld [vmem:[%s13481_s22 + $0xe0] sm:$0xff] }
 0x1af   : > { %2043 = vst.msk [vmem:[#allocation3 + $0x4e] sm:$0xfc] %vm17578_vm3, %v1912_v40  ;;  %1072 = vrot.lane.b32.xlu1 %v13900_v33, %s13285_s25  ;;  %vm17582_vm3 = vcmask 97344   ;;  %v472_v40 = vld [vmem:[%s13481_s22 + $0xe8] sm:$0xff] }
 0x1b0   : > { %1070 = vrot.lane.b32.xlu0 %v13902_v10, %s13285_s25  ;;  %504 = vst.msk [vmem:[#allocation2 + $0x169] sm:$0xff] %vm387_vm1, %v471_v49  ;;  %505 = vst.msk [vmem:[#allocation2 + $0x171] sm:$0xff] %vm387_vm1, %v472_v40 }
 0x1b1   : > { %v687_v41 = vpop.permute.xlu1 %686 }
 0x1b2   : > { %v685_v43 = vpop.permute.xlu0 %684  ;;  %811 = vst.msk [vmem:[#allocation3 + $0x77] sm:$0xff] %vm788_vm6, %v687_v41 }
 0x1b3   : > { %810 = vst.msk [vmem:[#allocation3 + $0x6f] sm:$0xfe] %vm17522_vm4, %v685_v43  ;;  %1736 = vrot.lane.b32.xlu1 %v13900_v33, %s17520_s29 }
 0x1b4   : > { %1734 = vrot.lane.b32.xlu0 %v13902_v10, %s17520_s29 }
 0x1b5   : > { %v1396_v45 = vpop.permute.xlu1 %1395 }
 0x1b6   : > { %v689_v46 = vpop.permute.xlu0 %688  ;;  %v2086_v47 = vld [vmem:[#allocation3 + $0x50] sm:$0xff]  ;;  %1524 = vst.msk [vmem:[#allocation3 + $0x5e] sm:$0xfc] %vm1503_vm14, %v1396_v45 }
 0x1b7   : > { %812 = vst.msk [vmem:[#allocation3 + $0x7f] sm:$0x1] %vm17579_vm8, %v689_v46  ;;  %13036 = vmatprep.mubr.msk.f32.mxu0 %vm17524_vm10, %v2086_v47  ;;  %1220 = vrot.lane.b32.xlu1 %v13900_v33, %s13286_s26  ;;  %vm17583_vm8 = vcmask 228544  }
 0x1b8   : > { %1218 = vrot.lane.b32.xlu0 %v13902_v10, %s13286_s26 }
 0x1b9   : > { %v1400_v51 = vpop.permute.xlu1 %1399 }
 0x1ba   : > { %v1398_v52 = vpop.permute.xlu0 %1397  ;;  %1526 = vst.msk [vmem:[#allocation3 + $0x6e] sm:$0x3] %vm1507_vm15, %v1400_v51 }
 0x1bb   : > { %1525 = vst.msk [vmem:[#allocation3 + $0x66] sm:$0xff] %vm1505_vm13, %v1398_v52  ;;  %1738 = vrot.lane.b32.xlu1 %v540_v50, %s17520_s29 }
 0x1bc   : > { %1222 = vrot.lane.b32.xlu0 %v540_v50, %s13286_s26 }
 0x1bd   : > { %v880_v53 = vpop.permute.xlu1 %879 }
 0x1be   : > { %v1916_v54 = vpop.permute.xlu0 %1915  ;;  %1005 = vst.msk [vmem:[#allocation3 + $0x6e] sm:$0xfc] %vm17580_vm9, %v880_v53  ;;  %vm17584_vm9 = vmmov %vm17583_vm8 }
 0x1bf   : > { %2045 = vst.msk [vmem:[#allocation3 + $0x5e] sm:$0x3] %vm17581_vm5, %v1916_v54  ;;  %1931 = vrot.lane.b32.xlu1 %v13900_v33, %s13290_s30  ;;  %vm17585_vm5 = vcmask 130144  }
 0x1c0   : > { %1929 = vrot.lane.b32.xlu0 %v13902_v10, %s13290_s30 }
 0x1c1   : > { %v884_v55 = vpop.permute.xlu1 %883 }
 0x1c2   : > { %v882_v56 = vpop.permute.xlu0 %881  ;;  %1007 = vst.msk [vmem:[#allocation3 + $0x7e] sm:$0x3] %vm17523_vm7, %v884_v55 }
 0x1c3   : > { %1006 = vst.msk [vmem:[#allocation3 + $0x76] sm:$0xff] %vm17582_vm3, %v882_v56  ;;  %704 = vrot.lane.b32.xlu1 %v13900_v33, %s13283_s23  ;;  %vm17586_vm3 = vmmov %vm17585_vm5 }
 0x1c4   : > { %702 = vrot.lane.b32.xlu0 %v13902_v10, %s13283_s23 }
 0x1c5   : > { %v1583_v57 = vpop.permute.xlu1 %1582 }
 0x1c6   : > { %v1581_v58 = vpop.permute.xlu0 %1580  ;;  %v2087_v59 = vld [vmem:[#allocation3 + $0x58] sm:$0xff]  ;;  %1666 = vst.msk [vmem:[#allocation3 + $0x68] sm:$0xff] %vm17583_vm8, %v1583_v57  ;;  %vm17587_vm8 = vcmask 261344  }
 0x1c7   : > { %1665 = vst.msk [vmem:[#allocation3 + $0x60] sm:$0xff] %vm17584_vm9, %v1581_v58  ;;  %13037 = vmatmul.mubr.msk.f32.gmra.mxu0 %vm17524_vm10, %v2087_v59  ;;  %1413 = vrot.lane.b32.xlu1 %v13902_v10, %s13287_s27  ;;  %vm17588_vm9 = vcmask 162944   ;;  %v14321_v58 = vld [vmem:[#allocation2 + $0x170] sm:$0xff]  ;;  %v14323_v59 = vld [vmem:[#allocation2 + $0x168] sm:$0xff] }
 0x1c8   : > { %706 = vrot.lane.b32.xlu0 %v540_v50, %s13283_s23  ;;  %593 = vst.msk [vmem:[#allocation3 + $0xf8] sm:$0xff] %vm387_vm1, %v14321_v58  ;;  %592 = vst.msk [vmem:[#allocation3 + $0xf0] sm:$0xff] %vm387_vm1, %v14323_v59 }
 0x1c9   : > { %v1065_v60 = vpop.permute.xlu1 %1064 }
 0x1ca   : > { %v1063_v61 = vpop.permute.xlu0 %1062  ;;  %1146 = vst.msk [vmem:[#allocation3 + $0x78] sm:$0xff] %vm17585_vm5, %v1065_v60  ;;  %vm17589_vm5 = vcmask 162945  }
 0x1cb   : > { %1145 = vst.msk [vmem:[#allocation3 + $0x70] sm:$0xff] %vm17586_vm3, %v1063_v61  ;;  %1417 = vrot.lane.b32.xlu1 %v540_v50, %s13287_s27  ;;  %vm17590_vm3 = vcmask 294146  }
 0x1cc   : > { %1415 = vrot.lane.b32.xlu0 %v13900_v33, %s13287_s27 }
 0x1cd   : > { %v1725_v62 = vpop.permute.xlu1 %1724 }
 0x1ce   : > { %v1723_v63 = vpop.permute.xlu0 %1722  ;;  %1852 = vst.msk [vmem:[#allocation3 + $0x67] sm:$0xff] %vm17587_vm8, %v1725_v62  ;;  %vm17591_vm8 = vcmask 57376  }
 0x1cf   : > { %1851 = vst.msk [vmem:[#allocation3 + $0x5f] sm:$0xfe] %vm1830_vm0, %v1723_v63  ;;  %897 = vrot.lane.b32.xlu1 %v13902_v10, %s13284_s24 }
 0x1d0   : > { %1933 = vrot.lane.b32.xlu0 %v540_v50, %s13290_s30 }
 0x1d1   : > { %v1209_v1 = vpop.permute.xlu1 %1208 }
 0x1d2   : > { %v1207_v2 = vpop.permute.xlu0 %1206  ;;  %1333 = vst.msk [vmem:[#allocation3 + $0x77] sm:$0xff] %vm17588_vm9, %v1209_v1  ;;  %vm17592_vm9 = vcmask 97346  }
 0x1d3   : > { %1332 = vst.msk [vmem:[#allocation3 + $0x6f] sm:$0xfe] %vm17589_vm5, %v1207_v2  ;;  %901 = vrot.lane.b32.xlu1 %v540_v50, %s13284_s24  ;;  %vm17593_vm5 = vcmask 288000   ;;  %v2288_v50 = vadd.f32 %v14291_v44, %v2287_v31 }
 0x1d4   : > { %899 = vrot.lane.b32.xlu0 %v13900_v33, %s13284_s24  ;;  %v14231_v33 = vld [vmem:[#allocation2 + $0x158] sm:$0xff] }
 0x1d5   : > { %v1727_v10 = vpop.permute.xlu1 %1726  ;;  %591 = vst.msk [vmem:[#allocation3 + $0xe8] sm:$0xff] %vm387_vm1, %v14231_v33 }
 0x1d6   : > { %v1211_v5 = vpop.permute.xlu0 %1210  ;;  %1853 = vst.msk [vmem:[#allocation3 + $0x6f] sm:$0x1] %vm1834_vm2, %v1727_v10 }
 0x1d7   : > { %1334 = vst.msk [vmem:[#allocation3 + $0x7f] sm:$0x1] %vm1312_vm12, %v1211_v5  ;;  %1594 = vrot.lane.b32.xlu1 %v13974_v48, %s13288_s28  ;;  %v13026_v36 = vpop.f32.mrf.mxu0 }
 0x1d8   : > { %1592 = vrot.lane.b32.xlu0 %v13976_v42, %s13288_s28  ;;  %v2303_v41 = vadd.f32 %v13026_v36, %v14291_v44 }
 0x1d9   : > { %v1920_v13 = vpop.permute.xlu1 %1919  ;;  %v2297_v39 = vpop.f32.mrf.mxu0 }
 0x1da   : > { %v1918_v6 = vpop.permute.xlu0 %1917  ;;  %2047 = vst.msk [vmem:[#allocation3 + $0x66] sm:$0xff] %vm17525_vm11, %v1920_v13  ;;  %v2298_v43 = vadd.f32 %v14291_v44, %v2297_v39 }
 0x1db   : > { %2046 = vst.msk [vmem:[#allocation3 + $0x5e] sm:$0xfc] %vm17590_vm3, %v1918_v6  ;;  %1076 = vrot.lane.b32.xlu1 %v13974_v48, %s13285_s25  ;;  %vm17594_vm3 = vcmask 97344  }
 0x1dc   : > { %1074 = vrot.lane.b32.xlu0 %v13976_v42, %s13285_s25  ;;  %v2444_v53 = vmax.f32 %v2288_v50, %v2298_v43 }
 0x1dd   : > { %v693_v7 = vpop.permute.xlu1 %692 }
 0x1de   : > { %v691_v9 = vpop.permute.xlu0 %690  ;;  %814 = vst.msk [vmem:[#allocation3 + $0x87] sm:$0xff] %vm788_vm6, %v693_v7 }
 0x1df   : > { %813 = vst.msk [vmem:[#allocation3 + $0x7f] sm:$0xfe] %vm17522_vm4, %v691_v9  ;;  %1742 = vrot.lane.b32.xlu1 %v13974_v48, %s17520_s29 }
 0x1e0   : > { %1740 = vrot.lane.b32.xlu0 %v13976_v42, %s17520_s29 }
 0x1e1   : > { %v1402_v11 = vpop.permute.xlu1 %1401 }
 0x1e2   : > { %v695_v14 = vpop.permute.xlu0 %694  ;;  %v2088_v15 = vld [vmem:[#allocation3 + $0x60] sm:$0xff]  ;;  %1527 = vst.msk [vmem:[#allocation3 + $0x6e] sm:$0xfc] %vm1503_vm14, %v1402_v11 }
 0x1e3   : > { %815 = vst.msk [vmem:[#allocation3 + $0x8f] sm:$0x1] %vm17591_vm8, %v695_v14  ;;  %13039 = vmatprep.mubr.msk.f32.mxu0 %vm17524_vm10, %v2088_v15  ;;  %1226 = vrot.lane.b32.xlu1 %v13974_v48, %s13286_s26  ;;  %vm17595_vm8 = vcmask 228544   ;;  %v546_v15 = vld [vmem:[#allocation2 + $0x130] sm:$0x3] }
 0x1e4   : > { %1224 = vrot.lane.b32.xlu0 %v13976_v42, %s13286_s26 }
 0x1e5   : > { %v1406_v17 = vpop.permute.xlu1 %1405 }
 0x1e6   : > { %v1404_v18 = vpop.permute.xlu0 %1403  ;;  %1529 = vst.msk [vmem:[#allocation3 + $0x7e] sm:$0x3] %vm1507_vm15, %v1406_v17 }
 0x1e7   : > { %1528 = vst.msk [vmem:[#allocation3 + $0x76] sm:$0xff] %vm1505_vm13, %v1404_v18  ;;  %1744 = vrot.lane.b32.xlu1 %v543_v16, %s17520_s29 }
 0x1e8   : > { %1228 = vrot.lane.b32.xlu0 %v543_v16, %s13286_s26 }
 0x1e9   : > { %v886_v19 = vpop.permute.xlu1 %885 }
 0x1ea   : > { %v1922_v20 = vpop.permute.xlu0 %1921  ;;  %1008 = vst.msk [vmem:[#allocation3 + $0x7e] sm:$0xfc] %vm17592_vm9, %v886_v19  ;;  %vm17596_vm9 = vmmov %vm17595_vm8 }
 0x1eb   : > { %2048 = vst.msk [vmem:[#allocation3 + $0x6e] sm:$0x3] %vm17593_vm5, %v1922_v20  ;;  %1937 = vrot.lane.b32.xlu1 %v13974_v48, %s13290_s30  ;;  %vm17597_vm5 = vcmask 130144  }
 0x1ec   : > { %1935 = vrot.lane.b32.xlu0 %v13976_v42, %s13290_s30 }
 0x1ed   : > { %v890_v21 = vpop.permute.xlu1 %889 }
 0x1ee   : > { %v888_v22 = vpop.permute.xlu0 %887  ;;  %1010 = vst.msk [vmem:[#allocation3 + $0x8e] sm:$0x3] %vm17523_vm7, %v890_v21 }
 0x1ef   : > { %1009 = vst.msk [vmem:[#allocation3 + $0x86] sm:$0xff] %vm17594_vm3, %v888_v22  ;;  %710 = vrot.lane.b32.xlu1 %v13974_v48, %s13283_s23  ;;  %vm17598_vm3 = vmmov %vm17597_vm5 }
 0x1f0   : > { %708 = vrot.lane.b32.xlu0 %v13976_v42, %s13283_s23 }
 0x1f1   : > { %v1587_v25 = vpop.permute.xlu1 %1586 }
 0x1f2   : > { %v1585_v26 = vpop.permute.xlu0 %1584  ;;  %v2089_v27 = vld [vmem:[#allocation3 + $0x68] sm:$0xff]  ;;  %1668 = vst.msk [vmem:[#allocation3 + $0x78] sm:$0xff] %vm17595_vm8, %v1587_v25  ;;  %vm17599_vm8 = vcmask 261344  }
 0x1f3   : > { %1667 = vst.msk [vmem:[#allocation3 + $0x70] sm:$0xff] %vm17596_vm9, %v1585_v26  ;;  %13040 = vmatmul.mubr.msk.f32.gmra.mxu0 %vm17524_vm10, %v2089_v27  ;;  %1419 = vrot.lane.b32.xlu1 %v13976_v42, %s13287_s27  ;;  %vm17600_vm9 = vcmask 162944  }
 0x1f4   : > { %712 = vrot.lane.b32.xlu0 %v543_v16, %s13283_s23 }
 0x1f5   : > { %v1069_v29 = vpop.permute.xlu1 %1068 }
 0x1f6   : > { %v1067_v30 = vpop.permute.xlu0 %1066  ;;  %1148 = vst.msk [vmem:[#allocation3 + $0x88] sm:$0xff] %vm17597_vm5, %v1069_v29  ;;  %vm17601_vm5 = vcmask 162945   ;;  %v473_v29 = vld [vmem:[%s13481_s22 + $0xf0] sm:$0xff] }
 0x1f7   : > { %1147 = vst.msk [vmem:[#allocation3 + $0x80] sm:$0xff] %vm17598_vm3, %v1067_v30  ;;  %1423 = vrot.lane.b32.xlu1 %v543_v16, %s13287_s27  ;;  %vm17602_vm3 = vcmask 294146   ;;  %v474_v30 = vld [vmem:[%s13481_s22 + $0xf8] sm:$0xff]  ;;  %s13291_s22 = smov 64  }
 0x1f8   : > { %1421 = vrot.lane.b32.xlu0 %v13974_v48, %s13287_s27  ;;  %506 = vst.msk [vmem:[#allocation2 + $0x181] sm:$0xff] %vm387_vm1, %v473_v29  ;;  %507 = vst.msk [vmem:[#allocation2 + $0x189] sm:$0xff] %vm387_vm1, %v474_v30  ;;  %vm17612_vm1 = vcmask 261344  }
 0x1f9   : > { %v1731_v32 = vpop.permute.xlu1 %1730 }
 0x1fa   : > { %v1729_v35 = vpop.permute.xlu0 %1728  ;;  %1855 = vst.msk [vmem:[#allocation3 + $0x77] sm:$0xff] %vm17599_vm8, %v1731_v32  ;;  %vm17517_vm8 = vcmask 1046528  }
 0x1fb   : > { %1854 = vst.msk [vmem:[#allocation3 + $0x6f] sm:$0xfe] %vm1830_vm0, %v1729_v35  ;;  %903 = vrot.lane.b32.xlu1 %v13976_v42, %s13284_s24  ;;  %v2293_v42 = vadd.f32 %v13023_v28, %v14291_v44 }
 0x1fc   : > { %1939 = vrot.lane.b32.xlu0 %v543_v16, %s13290_s30 }
 0x1fd   : > { %v1215_v37 = vpop.permute.xlu1 %1214  ;;  %v2445_v51 = vmax.f32 %v2293_v42, %v2303_v41 }
 0x1fe   : > { %v1213_v38 = vpop.permute.xlu0 %1212  ;;  %1336 = vst.msk [vmem:[#allocation3 + $0x87] sm:$0xff] %vm17600_vm9, %v1215_v37  ;;  %vm17518_vm9 = vcmask 259072  }
 0x1ff   : > { %1335 = vst.msk [vmem:[#allocation3 + $0x7f] sm:$0xfe] %vm17601_vm5, %v1213_v38  ;;  %907 = vrot.lane.b32.xlu1 %v543_v16, %s13284_s24  ;;  %vm17519_vm5 = vcmask 1045504  }
 0x200   : > { %905 = vrot.lane.b32.xlu0 %v13974_v48, %s13284_s24 }
 0x201   : > { %v1733_v45 = vpop.permute.xlu1 %1732 }
 0x202   : > { %v1217_v46 = vpop.permute.xlu0 %1216  ;;  %1856 = vst.msk [vmem:[#allocation3 + $0x7f] sm:$0x1] %vm1834_vm2, %v1733_v45 }
 0x203   : > { %1337 = vst.msk [vmem:[#allocation3 + $0x8f] sm:$0x1] %vm1312_vm12, %v1217_v46  ;;  %v13029_v47 = vpop.f32.mrf.mxu0  ;;  %1598 = vrot.lane.b32.xlu1 %v14048_v12, %s13288_s28 }
 0x204   : > { %v14309_v48 = vadd.f32 %v13029_v47, %v14291_v44  ;;  %1596 = vrot.lane.b32.xlu0 %v14050_v8, %s13288_s28 }
 0x205   : > { %v2307_v52 = vpop.f32.mrf.mxu0  ;;  %v1926_v56 = vpop.permute.xlu1 %1925 }
 0x206   : > { %v2459_v54 = vmax.f32 %v2445_v51, %v14309_v48  ;;  %v14317_v55 = vadd.f32 %v14291_v44, %v2307_v52  ;;  %v1924_v57 = vpop.permute.xlu0 %1923  ;;  %2050 = vst.msk [vmem:[#allocation3 + $0x76] sm:$0xff] %vm17525_vm11, %v1926_v56  ;;  %v549_v51 = vld [vmem:[#allocation2 + $0x148] sm:$0x3] }
 0x207   : > { %2049 = vst.msk [vmem:[#allocation3 + $0x6e] sm:$0xfc] %vm17602_vm3, %v1924_v57  ;;  %1080 = vrot.lane.b32.xlu1 %v14048_v12, %s13285_s25  ;;  %vm17603_vm3 = vcmask 57376  }
 0x208   : > { %v2488_v60 = vrot.slane %v2459_v54, 1  ;;  %v2458_v61 = vmax.f32 %v2444_v53, %v14317_v55  ;;  %1078 = vrot.lane.b32.xlu0 %v14050_v8, %s13285_s25  ;;  %v2538_v63 = vrot.slane %v2459_v54, 2 }
 0x209   : > { %v699_v3 = vpop.permute.xlu1 %698 }
 0x20a   : > { %v2523_v62 = vmax.f32 %v2459_v54, %v2488_v60  ;;  %v2487_v1 = vrot.slane %v2458_v61, 1  ;;  %v2537_v2 = vrot.slane %v2458_v61, 2  ;;  %v697_v4 = vpop.permute.xlu0 %696  ;;  %817 = vst.msk [vmem:[#allocation3 + $0x97] sm:$0xff] %vm788_vm6, %v699_v3 }
 0x20b   : > { %816 = vst.msk [vmem:[#allocation3 + $0x8f] sm:$0xfe] %vm17522_vm4, %v697_v4  ;;  %1748 = vrot.lane.b32.xlu1 %v14048_v12, %s17520_s29 }
 0x20c   : > { %v2573_v10 = vmax.f32 %v2523_v62, %v2538_v63  ;;  %v2489_v5 = vsel %vm17517_vm8, %v2487_v1, %v2488_v60  ;;  %1746 = vrot.lane.b32.xlu0 %v14050_v8, %s17520_s29  ;;  %v2539_v6 = vsel %vm17519_vm5, %v2537_v2, %v2538_v63  ;;  %vm17604_vm8 = vcmask 261120  }
 0x20d   : > { %v2522_v13 = vmax.f32 %v2458_v61, %v2489_v5  ;;  %v1408_v7 = vpop.permute.xlu1 %1407  ;;  %vm2642_vm5 = vcmask 260096  }
 0x20e   : > { %2589 = vst.msk [vmem:[#allocation6 + $0x8] sm:$0x3f] %vm17518_vm9, %v2573_v10  ;;  %v701_v9 = vpop.permute.xlu0 %700  ;;  %v2090_v11 = vld [vmem:[#allocation3 + $0x70] sm:$0xff]  ;;  %vm17606_vm9 = vcmask 288000  }
 0x20f   : > { %v2572_v14 = vmax.f32 %v2522_v13, %v2539_v6  ;;  %1530 = vst.msk [vmem:[#allocation3 + $0x7e] sm:$0xfc] %vm1503_vm14, %v1408_v7  ;;  %13042 = vmatprep.mubr.msk.f32.mxu0 %vm17524_vm10, %v2090_v11  ;;  %1232 = vrot.lane.b32.xlu1 %v14048_v12, %s13286_s26 }
 0x210   : > { %818 = vst.msk [vmem:[#allocation3 + $0x9f] sm:$0x1] %vm17603_vm3, %v701_v9  ;;  %1230 = vrot.lane.b32.xlu0 %v14050_v8, %s13286_s26  ;;  %vm17605_vm3 = vcmask 97346  }
 0x211   : > { %2587 = vst.msk [vmem:[#allocation6] sm:$0xff] %vm17604_vm8, %v2572_v14  ;;  %v1412_v16 = vpop.permute.xlu1 %1411  ;;  %vm17607_vm8 = vcmask 97344  }
 0x212   : > { %v1410_v17 = vpop.permute.xlu0 %1409  ;;  %1532 = vst.msk [vmem:[#allocation3 + $0x8e] sm:$0x3] %vm1507_vm15, %v1412_v16 }
 0x213   : > { %1531 = vst.msk [vmem:[#allocation3 + $0x86] sm:$0xff] %vm1505_vm13, %v1410_v17  ;;  %1750 = vrot.lane.b32.xlu1 %v546_v15, %s17520_s29 }
 0x214   : > { %1234 = vrot.lane.b32.xlu0 %v546_v15, %s13286_s26 }
 0x215   : > { %v892_v18 = vpop.permute.xlu1 %891 }
 0x216   : > { %v1928_v19 = vpop.permute.xlu0 %1927  ;;  %1011 = vst.msk [vmem:[#allocation3 + $0x8e] sm:$0xfc] %vm17605_vm3, %v892_v18 }
 0x217   : > { %2051 = vst.msk [vmem:[#allocation3 + $0x7e] sm:$0x3] %vm17606_vm9, %v1928_v19  ;;  %1943 = vrot.lane.b32.xlu1 %v14048_v12, %s13290_s30  ;;  %vm17608_vm9 = vcmask 228544  }
 0x218   : > { %v2602_v20 = vld [vmem:[#allocation6] ss:$2 sm:$0x7f]  ;;  %1941 = vrot.lane.b32.xlu0 %v14050_v8, %s13290_s30  ;;  %vm17609_vm3 = vmmov %vm17608_vm9 }
 0x219   : > { %v2634_v21 = vmax.f32 %v2602_v20, 0.0  ;;  %v896_v22 = vpop.permute.xlu1 %895 }
 0x21a   : > { %v894_v25 = vpop.permute.xlu0 %893  ;;  %1013 = vst.msk [vmem:[#allocation3 + $0x9e] sm:$0x3] %vm17523_vm7, %v896_v22 }
 0x21b   : > { %2643 = vst.msk [vmem:[#allocation4 + $0x11] sm:$0x7f] %vm2642_vm5, %v2634_v21  ;;  %716 = vrot.lane.b32.xlu1 %v14048_v12, %s13283_s23 }
 0x21c   : > { %1012 = vst.msk [vmem:[#allocation3 + $0x96] sm:$0xff] %vm17607_vm8, %v894_v25  ;;  %714 = vrot.lane.b32.xlu0 %v14050_v8, %s13283_s23  ;;  %vm17610_vm8 = vcmask 130144  }
 0x21d   : > { %v1591_v26 = vpop.permute.xlu1 %1590 }
 0x21e   : > { %v1589_v27 = vpop.permute.xlu0 %1588  ;;  %v2091_v28 = vld [vmem:[#allocation3 + $0x78] sm:$0xff]  ;;  %1670 = vst.msk [vmem:[#allocation3 + $0x88] sm:$0xff] %vm17608_vm9, %v1591_v26  ;;  %vm17611_vm9 = vmmov %vm17610_vm8 }
 0x21f   : > { %1669 = vst.msk [vmem:[#allocation3 + $0x80] sm:$0xff] %vm17609_vm3, %v1589_v27  ;;  %13043 = vmatmul.mubr.msk.f32.gmra.mxu0 %vm17524_vm10, %v2091_v28  ;;  %1425 = vrot.lane.b32.xlu1 %v14050_v8, %s13287_s27  ;;  %vm17613_vm3 = vcmask 162944  }
 0x220   : > { %718 = vrot.lane.b32.xlu0 %v546_v15, %s13283_s23 }
 0x221   : > { %v1073_v31 = vpop.permute.xlu1 %1072 }
 0x222   : > { %v1071_v32 = vpop.permute.xlu0 %1070  ;;  %v14378_v35 = vld [vmem:[#allocation4 + $0x10] sm:$0xff]  ;;  %1150 = vst.msk [vmem:[#allocation3 + $0x98] sm:$0xff] %vm17610_vm8, %v1073_v31  ;;  %vm17614_vm8 = vcmask 162945  }
 0x223   : > { %1149 = vst.msk [vmem:[#allocation3 + $0x90] sm:$0xff] %vm17611_vm9, %v1071_v32  ;;  %v2683_v36 = vrot.slane %v14378_v35, 1  ;;  %1429 = vrot.lane.b32.xlu1 %v546_v15, %s13287_s27  ;;  %vm17615_vm9 = vcmask 294146  }
 0x224   : > { %2669 = vst.msk [vmem:[#allocation5 + $0x18] sm:$0x7f] %vm2642_vm5, %v14378_v35  ;;  %1427 = vrot.lane.b32.xlu0 %v14048_v12, %s13287_s27 }
 0x225   : > { %2813 = vst.msk [vmem:[#allocation5 + $0x8] sm:$0x7f] %vm2642_vm5, %v2683_v36  ;;  %v1737_v37 = vpop.permute.xlu1 %1736 }
 0x226   : > { %v1735_v38 = vpop.permute.xlu0 %1734  ;;  %1858 = vst.msk [vmem:[#allocation3 + $0x87] sm:$0xff] %vm17612_vm1, %v1737_v37  ;;  %vm17616_vm1 = vcmask 57376  }
 0x227   : > { %1857 = vst.msk [vmem:[#allocation3 + $0x7f] sm:$0xfe] %vm1830_vm0, %v1735_v38  ;;  %909 = vrot.lane.b32.xlu1 %v14050_v8, %s13284_s24 }
 0x228   : > { %1945 = vrot.lane.b32.xlu0 %v546_v15, %s13290_s30 }
 0x229   : > { %v1221_v39 = vpop.permute.xlu1 %1220 }
 0x22a   : > { %v1219_v49 = vpop.permute.xlu0 %1218  ;;  %1339 = vst.msk [vmem:[#allocation3 + $0x97] sm:$0xff] %vm17613_vm3, %v1221_v39  ;;  %vm17617_vm3 = vcmask 97346  }
 0x22b   : > { %1338 = vst.msk [vmem:[#allocation3 + $0x8f] sm:$0xfe] %vm17614_vm8, %v1219_v49  ;;  %913 = vrot.lane.b32.xlu1 %v546_v15, %s13284_s24  ;;  %vm17618_vm8 = vcmask 288000  }
 0x22c   : > { %911 = vrot.lane.b32.xlu0 %v14048_v12, %s13284_s24  ;;  %v14413_v12 = vld [vmem:[#allocation4] sm:$0xff] }
 0x22d   : > { %v1739_v40 = vpop.permute.xlu1 %1738  ;;  %2668 = vst.msk [vmem:[#allocation5] sm:$0x7f] %vm2642_vm5, %v14413_v12 }
 0x22e   : > { %v1223_v41 = vpop.permute.xlu0 %1222  ;;  %1859 = vst.msk [vmem:[#allocation3 + $0x8f] sm:$0x1] %vm1834_vm2, %v1739_v40 }
 0x22f   : > { %1340 = vst.msk [vmem:[#allocation3 + $0x9f] sm:$0x1] %vm1312_vm12, %v1223_v41  ;;  %1602 = vrot.lane.b32.xlu1 %v14157_v23, %s13288_s28  ;;  %v13032_v10 = vpop.f32.mrf.mxu0  ;;  %v552_v41 = vld [vmem:[#allocation2 + $0x160] sm:$0x3] }
 0x230   : > { %1600 = vrot.lane.b32.xlu0 %v14159_v24, %s13288_s28  ;;  %v2323_v7 = vadd.f32 %v13032_v10, %v14291_v44 }
 0x231   : > { %v1932_v8 = vpop.permute.xlu1 %1931  ;;  %v2317_v6 = vpop.f32.mrf.mxu0 }
 0x232   : > { %v1930_v42 = vpop.permute.xlu0 %1929  ;;  %2053 = vst.msk [vmem:[#allocation3 + $0x86] sm:$0xff] %vm17525_vm11, %v1932_v8  ;;  %v2318_v9 = vadd.f32 %v14291_v44, %v2317_v6  ;;  %v2447_v15 = vmax.f32 %v14309_v48, %v2323_v7 }
 0x233   : > { %2052 = vst.msk [vmem:[#allocation3 + $0x7e] sm:$0xfc] %vm17615_vm9, %v1930_v42  ;;  %1084 = vrot.lane.b32.xlu1 %v14157_v23, %s13285_s25  ;;  %vm17619_vm9 = vcmask 97344  }
 0x234   : > { %1082 = vrot.lane.b32.xlu0 %v14159_v24, %s13285_s25  ;;  %v2446_v17 = vmax.f32 %v14317_v55, %v2318_v9 }
 0x235   : > { %v705_v43 = vpop.permute.xlu1 %704 }
 0x236   : > { %v703_v45 = vpop.permute.xlu0 %702  ;;  %820 = vst.msk [vmem:[#allocation3 + $0xa7] sm:$0xff] %vm788_vm6, %v705_v43 }
 0x237   : > { %819 = vst.msk [vmem:[#allocation3 + $0x9f] sm:$0xfe] %vm17522_vm4, %v703_v45  ;;  %1754 = vrot.lane.b32.xlu1 %v14157_v23, %s17520_s29 }
 0x238   : > { %1752 = vrot.lane.b32.xlu0 %v14159_v24, %s17520_s29 }
 0x239   : > { %v1414_v46 = vpop.permute.xlu1 %1413 }
 0x23a   : > { %v707_v47 = vpop.permute.xlu0 %706  ;;  %v2092_v50 = vld [vmem:[#allocation3 + $0x80] sm:$0xff]  ;;  %1533 = vst.msk [vmem:[#allocation3 + $0x8e] sm:$0xfc] %vm1503_vm14, %v1414_v46 }
 0x23b   : > { %821 = vst.msk [vmem:[#allocation3 + $0xaf] sm:$0x1] %vm17616_vm1, %v707_v47  ;;  %13045 = vmatprep.mubr.msk.f32.mxu0 %vm17524_vm10, %v2092_v50  ;;  %1238 = vrot.lane.b32.xlu1 %v14157_v23, %s13286_s26  ;;  %vm17620_vm1 = vcmask 228544  }
 0x23c   : > { %1236 = vrot.lane.b32.xlu0 %v14159_v24, %s13286_s26 }
 0x23d   : > { %v1418_v52 = vpop.permute.xlu1 %1417 }
 0x23e   : > { %v1416_v53 = vpop.permute.xlu0 %1415  ;;  %1535 = vst.msk [vmem:[#allocation3 + $0x9e] sm:$0x3] %vm1507_vm15, %v1418_v52 }
 0x23f   : > { %1534 = vst.msk [vmem:[#allocation3 + $0x96] sm:$0xff] %vm1505_vm13, %v1416_v53  ;;  %1756 = vrot.lane.b32.xlu1 %v549_v51, %s17520_s29 }
 0x240   : > { %1240 = vrot.lane.b32.xlu0 %v549_v51, %s13286_s26 }
 0x241   : > { %v898_v54 = vpop.permute.xlu1 %897 }
 0x242   : > { %v1934_v56 = vpop.permute.xlu0 %1933  ;;  %1014 = vst.msk [vmem:[#allocation3 + $0x9e] sm:$0xfc] %vm17617_vm3, %v898_v54  ;;  %vm17621_vm3 = vmmov %vm17620_vm1 }
 0x243   : > { %2054 = vst.msk [vmem:[#allocation3 + $0x8e] sm:$0x3] %vm17618_vm8, %v1934_v56  ;;  %1949 = vrot.lane.b32.xlu1 %v14157_v23, %s13290_s30  ;;  %vm17622_vm8 = vcmask 130144   ;;  %v2655_v56 = vld [vmem:[#allocation4 + $0x28] sm:$0x1] }
 0x244   : > { %1947 = vrot.lane.b32.xlu0 %v14159_v24, %s13290_s30 }
 0x245   : > { %v902_v57 = vpop.permute.xlu1 %901 }
 0x246   : > { %v900_v60 = vpop.permute.xlu0 %899  ;;  %1016 = vst.msk [vmem:[#allocation3 + $0xae] sm:$0x3] %vm17523_vm7, %v902_v57  ;;  %v2732_v57 = vrot.slane %v2655_v56, 2  ;;  %v2725_v56 = vrot.slane %v14413_v12, 2 }
 0x247   : > { %1015 = vst.msk [vmem:[#allocation3 + $0xa6] sm:$0xff] %vm17619_vm9, %v900_v60  ;;  %722 = vrot.lane.b32.xlu1 %v14157_v23, %s13283_s23  ;;  %vm17623_vm9 = vmmov %vm17622_vm8 }
 0x248   : > { %720 = vrot.lane.b32.xlu0 %v14159_v24, %s13283_s23 }
 0x249   : > { %v1595_v61 = vpop.permute.xlu1 %1594 }
 0x24a   : > { %v1593_v62 = vpop.permute.xlu0 %1592  ;;  %v2093_v63 = vld [vmem:[#allocation3 + $0x88] sm:$0xff]  ;;  %1672 = vst.msk [vmem:[#allocation3 + $0x98] sm:$0xff] %vm17620_vm1, %v1595_v61  ;;  %vm17624_vm1 = vcmask 261344  }
 0x24b   : > { %1671 = vst.msk [vmem:[#allocation3 + $0x90] sm:$0xff] %vm17621_vm3, %v1593_v62  ;;  %13046 = vmatmul.mubr.msk.f32.gmra.mxu0 %vm17524_vm10, %v2093_v63  ;;  %1431 = vrot.lane.b32.xlu1 %v14159_v24, %s13287_s27  ;;  %vm17625_vm3 = vcmask 162944  }
 0x24c   : > { %724 = vrot.lane.b32.xlu0 %v549_v51, %s13283_s23 }
 0x24d   : > { %v1077_v1 = vpop.permute.xlu1 %1076 }
 0x24e   : > { %v1075_v2 = vpop.permute.xlu0 %1074  ;;  %1152 = vst.msk [vmem:[#allocation3 + $0xa8] sm:$0xff] %vm17622_vm8, %v1077_v1  ;;  %vm17626_vm8 = vcmask 162945  }
 0x24f   : > { %1151 = vst.msk [vmem:[#allocation3 + $0xa0] sm:$0xff] %vm17623_vm9, %v1075_v2  ;;  %1435 = vrot.lane.b32.xlu1 %v549_v51, %s13287_s27  ;;  %vm17627_vm9 = vcmask 294146  }
 0x250   : > { %1433 = vrot.lane.b32.xlu0 %v14157_v23, %s13287_s27 }
 0x251   : > { %v1743_v3 = vpop.permute.xlu1 %1742 }
 0x252   : > { %v1741_v4 = vpop.permute.xlu0 %1740  ;;  %1861 = vst.msk [vmem:[#allocation3 + $0x97] sm:$0xff] %vm17624_vm1, %v1743_v3  ;;  %vm17628_vm1 = vcmask 1046528  }
 0x253   : > { %1860 = vst.msk [vmem:[#allocation3 + $0x8f] sm:$0xfe] %vm1830_vm0, %v1741_v4  ;;  %915 = vrot.lane.b32.xlu1 %v14159_v24, %s13284_s24 }
 0x254   : > { %1951 = vrot.lane.b32.xlu0 %v549_v51, %s13290_s30 }
 0x255   : > { %v1227_v5 = vpop.permute.xlu1 %1226 }
 0x256   : > { %v1225_v13 = vpop.permute.xlu0 %1224  ;;  %1342 = vst.msk [vmem:[#allocation3 + $0xa7] sm:$0xff] %vm17625_vm3, %v1227_v5  ;;  %vm17629_vm3 = vcmask 1045504  }
 0x257   : > { %1341 = vst.msk [vmem:[#allocation3 + $0x9f] sm:$0xfe] %vm17626_vm8, %v1225_v13  ;;  %919 = vrot.lane.b32.xlu1 %v549_v51, %s13284_s24  ;;  %vm17630_vm8 = vcmask 259072  }
 0x258   : > { %917 = vrot.lane.b32.xlu0 %v14157_v23, %s13284_s24 }
 0x259   : > { %v1745_v11 = vpop.permute.xlu1 %1744 }
 0x25a   : > { %v1229_v24 = vpop.permute.xlu0 %1228  ;;  %1862 = vst.msk [vmem:[#allocation3 + $0x9f] sm:$0x1] %vm1834_vm2, %v1745_v11 }
 0x25b   : > { %1343 = vst.msk [vmem:[#allocation3 + $0xaf] sm:$0x1] %vm1312_vm12, %v1229_v24  ;;  %v13035_v14 = vpop.f32.mrf.mxu0  ;;  %1606 = vrot.lane.b32.xlu1 %v14231_v33, %s13288_s28 }
 0x25c   : > { %v14473_v16 = vadd.f32 %v13035_v14, %v14291_v44  ;;  %1604 = vrot.lane.b32.xlu0 %v14233_v34, %s13288_s28 }
 0x25d   : > { %v2327_v23 = vpop.f32.mrf.mxu0  ;;  %v1938_v20 = vpop.permute.xlu1 %1937 }
 0x25e   : > { %v2461_v18 = vmax.f32 %v2447_v15, %v14473_v16  ;;  %v14482_v19 = vadd.f32 %v14291_v44, %v2327_v23  ;;  %v1936_v21 = vpop.permute.xlu0 %1935  ;;  %2056 = vst.msk [vmem:[#allocation3 + $0x96] sm:$0xff] %vm17525_vm11, %v1938_v20  ;;  %v555_v15 = vld [vmem:[#allocation2 + $0x178] sm:$0x3] }
 0x25f   : > { %2055 = vst.msk [vmem:[#allocation3 + $0x8e] sm:$0xfc] %vm17627_vm9, %v1936_v21  ;;  %1088 = vrot.lane.b32.xlu1 %v14231_v33, %s13285_s25  ;;  %vm17631_vm9 = vcmask 57376  }
 0x260   : > { %v2491_v48 = vrot.slane %v2461_v18, 1  ;;  %v2460_v22 = vmax.f32 %v2446_v17, %v14482_v19  ;;  %1086 = vrot.lane.b32.xlu0 %v14233_v34, %s13285_s25  ;;  %v2541_v25 = vrot.slane %v2461_v18, 2 }
 0x261   : > { %v711_v28 = vpop.permute.xlu1 %710 }
 0x262   : > { %v2525_v55 = vmax.f32 %v2461_v18, %v2491_v48  ;;  %v2490_v26 = vrot.slane %v2460_v22, 1  ;;  %v2540_v27 = vrot.slane %v2460_v22, 2  ;;  %v709_v29 = vpop.permute.xlu0 %708  ;;  %823 = vst.msk [vmem:[#allocation3 + $0xb7] sm:$0xff] %vm788_vm6, %v711_v28 }
 0x263   : > { %822 = vst.msk [vmem:[#allocation3 + $0xaf] sm:$0xfe] %vm17522_vm4, %v709_v29  ;;  %1760 = vrot.lane.b32.xlu1 %v14231_v33, %s17520_s29 }
 0x264   : > { %v2575_v30 = vmax.f32 %v2525_v55, %v2541_v25  ;;  %v2492_v31 = vsel %vm17628_vm1, %v2490_v26, %v2491_v48  ;;  %v2542_v32 = vsel %vm17629_vm3, %v2540_v27, %v2541_v25  ;;  %1758 = vrot.lane.b32.xlu0 %v14233_v34, %s17520_s29  ;;  %vm17632_vm1 = vcmask 261120   ;;  %v557_v26 = vld [vmem:[#allocation2 + $0x188] sm:$0xff]  ;;  %v556_v27 = vld [vmem:[#allocation2 + $0x180] sm:$0xff] }
 0x265   : > { %v2524_v37 = vmax.f32 %v2460_v22, %v2492_v31  ;;  %v1420_v38 = vpop.permute.xlu1 %1419  ;;  %vm17633_vm3 = vcmask 97346  }
 0x266   : > { %2591 = vst.msk [vmem:[#allocation6 + $0x18] sm:$0x3f] %vm17630_vm8, %v2575_v30  ;;  %v713_v39 = vpop.permute.xlu0 %712  ;;  %v2094_v49 = vld [vmem:[#allocation3 + $0x90] sm:$0xff]  ;;  %vm17634_vm8 = vcmask 288000  }
 0x267   : > { %v2574_v40 = vmax.f32 %v2524_v37, %v2542_v32  ;;  %1536 = vst.msk [vmem:[#allocation3 + $0x9e] sm:$0xfc] %vm1503_vm14, %v1420_v38  ;;  %13048 = vmatprep.mubr.msk.f32.mxu0 %vm17524_vm10, %v2094_v49  ;;  %1244 = vrot.lane.b32.xlu1 %v14231_v33, %s13286_s26  ;;  %v558_v37 = vld [vmem:[#allocation2 + $0x190] sm:$0x3] }
 0x268   : > { %824 = vst.msk [vmem:[#allocation3 + $0xbf] sm:$0x1] %vm17631_vm9, %v713_v39  ;;  %1242 = vrot.lane.b32.xlu0 %v14233_v34, %s13286_s26  ;;  %vm17635_vm9 = vcmask 97344  }
 0x269   : > { %2590 = vst.msk [vmem:[#allocation6 + $0x10] sm:$0xff] %vm17632_vm1, %v2574_v40  ;;  %v1424_v8 = vpop.permute.xlu1 %1423  ;;  %vm17636_vm1 = vcmask 228544  }
 0x26a   : > { %v1422_v42 = vpop.permute.xlu0 %1421  ;;  %1538 = vst.msk [vmem:[#allocation3 + $0xae] sm:$0x3] %vm1507_vm15, %v1424_v8 }
 0x26b   : > { %1537 = vst.msk [vmem:[#allocation3 + $0xa6] sm:$0xff] %vm1505_vm13, %v1422_v42  ;;  %1762 = vrot.lane.b32.xlu1 %v552_v41, %s17520_s29 }
 0x26c   : > { %1246 = vrot.lane.b32.xlu0 %v552_v41, %s13286_s26 }
 0x26d   : > { %v904_v43 = vpop.permute.xlu1 %903 }
 0x26e   : > { %v1940_v45 = vpop.permute.xlu0 %1939  ;;  %1017 = vst.msk [vmem:[#allocation3 + $0xae] sm:$0xfc] %vm17633_vm3, %v904_v43  ;;  %vm17637_vm3 = vmmov %vm17636_vm1 }
 0x26f   : > { %2057 = vst.msk [vmem:[#allocation3 + $0x9e] sm:$0x3] %vm17634_vm8, %v1940_v45  ;;  %1955 = vrot.lane.b32.xlu1 %v14231_v33, %s13290_s30  ;;  %vm17638_vm8 = vcmask 130144   ;;  %v2651_v45 = vld [vmem:[#allocation4 + $0x8] sm:$0x1] }
 0x270   : > { %v2604_v46 = vld [vmem:[#allocation6 + $0x10] ss:$2 sm:$0x7f]  ;;  %1953 = vrot.lane.b32.xlu0 %v14233_v34, %s13290_s30 }
 0x271   : > { %v2635_v47 = vmax.f32 %v2604_v46, 0.0  ;;  %v908_v50 = vpop.permute.xlu1 %907 }
 0x272   : > { %v906_v51 = vpop.permute.xlu0 %905  ;;  %1019 = vst.msk [vmem:[#allocation3 + $0xbe] sm:$0x3] %vm17523_vm7, %v908_v50 }
 0x273   : > { %2644 = vst.msk [vmem:[#allocation4 + $0x21] sm:$0x7f] %vm2642_vm5, %v2635_v47  ;;  %728 = vrot.lane.b32.xlu1 %v14231_v33, %s13283_s23  ;;  %v2728_v47 = vrot.slane %v14378_v35, 2 }
 0x274   : > { %1018 = vst.msk [vmem:[#allocation3 + $0xb6] sm:$0xff] %vm17635_vm9, %v906_v51  ;;  %726 = vrot.lane.b32.xlu0 %v14233_v34, %s13283_s23  ;;  %vm17639_vm9 = vmmov %vm17638_vm8 }
 0x275   : > { %v1599_v52 = vpop.permute.xlu1 %1598 }
 0x276   : > { %v1597_v53 = vpop.permute.xlu0 %1596  ;;  %v2095_v54 = vld [vmem:[#allocation3 + $0x98] sm:$0xff]  ;;  %1674 = vst.msk [vmem:[#allocation3 + $0xa8] sm:$0xff] %vm17636_vm1, %v1599_v52  ;;  %vm17640_vm1 = vcmask 1045504  }
 0x277   : > { %1673 = vst.msk [vmem:[#allocation3 + $0xa0] sm:$0xff] %vm17637_vm3, %v1597_v53  ;;  %13049 = vmatmul.mubr.msk.f32.gmra.mxu0 %vm17524_vm10, %v2095_v54  ;;  %1437 = vrot.lane.b32.xlu1 %v14233_v34, %s13287_s27  ;;  %vm17641_vm3 = vcmask 261344   ;;  %v2682_v53 = vrot.slane %v14413_v12, 1 }
 0x278   : > { %730 = vrot.lane.b32.xlu0 %v552_v41, %s13283_s23 }
 0x279   : > { %v1081_v60 = vpop.permute.xlu1 %1080 }
 0x27a   : > { %v1079_v61 = vpop.permute.xlu0 %1078  ;;  %v14531_v62 = vld [vmem:[#allocation4 + $0x20] sm:$0xff]  ;;  %1154 = vst.msk [vmem:[#allocation3 + $0xb8] sm:$0xff] %vm17638_vm8, %v1081_v60  ;;  %vm17642_vm8 = vcmask 162944  }
 0x27b   : > { %1153 = vst.msk [vmem:[#allocation3 + $0xb0] sm:$0xff] %vm17639_vm9, %v1079_v61  ;;  %v14538_v63 = vrot.slane %v14531_v62, 1  ;;  %v2731_v1 = vrot.slane %v14531_v62, 2  ;;  %1441 = vrot.lane.b32.xlu1 %v552_v41, %s13287_s27  ;;  %vm17643_vm9 = vcmask 162945  }
 0x27c   : > { %2670 = vst.msk [vmem:[#allocation5 + $0x30] sm:$0x7f] %vm2642_vm5, %v14531_v62  ;;  %1439 = vrot.lane.b32.xlu0 %v14231_v33, %s13287_s27 }
 0x27d   : > { %2814 = vst.msk [vmem:[#allocation5 + $0x20] sm:$0x7f] %vm2642_vm5, %v14538_v63  ;;  %v14547_v2 = vsel %vm17640_vm1, %v2731_v1, %v2732_v57  ;;  %v1749_v3 = vpop.permute.xlu1 %1748  ;;  %vm17644_vm1 = vcmask 294146   ;;  %v2726_v57 = vrot.slane %v2651_v45, 2 }
 0x27e   : > { %v1747_v4 = vpop.permute.xlu0 %1746  ;;  %2921 = vst.msk [vmem:[#allocation5 + $0x10] sm:$0x7f] %vm2642_vm5, %v14547_v2 }
 0x27f   : > { %1864 = vst.msk [vmem:[#allocation3 + $0xa7] sm:$0xff] %vm17641_vm3, %v1749_v3  ;;  %921 = vrot.lane.b32.xlu1 %v14233_v34, %s13284_s24  ;;  %vm17645_vm3 = vcmask 57376  }
 0x280   : > { %1863 = vst.msk [vmem:[#allocation3 + $0x9f] sm:$0xfe] %vm1830_vm0, %v1747_v4  ;;  %1957 = vrot.lane.b32.xlu0 %v552_v41, %s13290_s30 }
 0x281   : > { %v1233_v10 = vpop.permute.xlu1 %1232 }
 0x282   : > { %v1231_v5 = vpop.permute.xlu0 %1230  ;;  %1345 = vst.msk [vmem:[#allocation3 + $0xb7] sm:$0xff] %vm17642_vm8, %v1233_v10  ;;  %vm17646_vm8 = vcmask 97346  }
 0x283   : > { %1344 = vst.msk [vmem:[#allocation3 + $0xaf] sm:$0xfe] %vm17643_vm9, %v1231_v5  ;;  %925 = vrot.lane.b32.xlu1 %v552_v41, %s13284_s24  ;;  %vm17647_vm9 = vcmask 288000   ;;  %v2653_v41 = vld [vmem:[#allocation4 + $0x18] sm:$0x1] }
 0x284   : > { %923 = vrot.lane.b32.xlu0 %v14231_v33, %s13284_s24  ;;  %v2729_v50 = vrot.slane %v2653_v41, 2 }
 0x285   : > { %v1751_v13 = vpop.permute.xlu1 %1750 }
 0x286   : > { %v1235_v6 = vpop.permute.xlu0 %1234  ;;  %1865 = vst.msk [vmem:[#allocation3 + $0xaf] sm:$0x1] %vm1834_vm2, %v1751_v13 }
 0x287   : > { %1346 = vst.msk [vmem:[#allocation3 + $0xbf] sm:$0x1] %vm1312_vm12, %v1235_v6  ;;  %1610 = vrot.lane.b32.xlu1 %v14321_v58, %s13288_s28  ;;  %v13038_v32 = vpop.f32.mrf.mxu0 }
 0x288   : > { %1608 = vrot.lane.b32.xlu0 %v14323_v59, %s13288_s28  ;;  %v2343_v40 = vadd.f32 %v13038_v32, %v14291_v44  ;;  %v2977_v32 = vld [vmem:[%s17497_s3 + $0xe0] sm:$0xff] }
 0x289   : > { %v1944_v34 = vpop.permute.xlu1 %1943  ;;  %v2337_v49 = vpop.f32.mrf.mxu0 }
 0x28a   : > { %v1942_v7 = vpop.permute.xlu0 %1941  ;;  %2059 = vst.msk [vmem:[#allocation3 + $0xa6] sm:$0xff] %vm17525_vm11, %v1944_v34  ;;  %v2338_v8 = vadd.f32 %v14291_v44, %v2337_v49  ;;  %v2449_v51 = vmax.f32 %v14473_v16, %v2343_v40 }
 0x28b   : > { %2058 = vst.msk [vmem:[#allocation3 + $0x9e] sm:$0xfc] %vm17644_vm1, %v1942_v7  ;;  %1092 = vrot.lane.b32.xlu1 %v14321_v58, %s13285_s25  ;;  %vm17648_vm1 = vcmask 97344  }
 0x28c   : > { %1090 = vrot.lane.b32.xlu0 %v14323_v59, %s13285_s25  ;;  %v2448_v60 = vmax.f32 %v14482_v19, %v2338_v8  ;;  %v2657_v8 = vld [vmem:[#allocation4 + $0x38] sm:$0x1] }
 0x28d   : > { %v717_v33 = vpop.permute.xlu1 %716  ;;  %v2735_v45 = vrot.slane %v2657_v8, 2 }
 0x28e   : > { %v715_v9 = vpop.permute.xlu0 %714  ;;  %826 = vst.msk [vmem:[#allocation3 + $0xc7] sm:$0xff] %vm788_vm6, %v717_v33 }
 0x28f   : > { %825 = vst.msk [vmem:[#allocation3 + $0xbf] sm:$0xfe] %vm17522_vm4, %v715_v9  ;;  %1766 = vrot.lane.b32.xlu1 %v14321_v58, %s17520_s29 }
 0x290   : > { %1764 = vrot.lane.b32.xlu0 %v14323_v59, %s17520_s29 }
 0x291   : > { %v1426_v11 = vpop.permute.xlu1 %1425 }
 0x292   : > { %v719_v24 = vpop.permute.xlu0 %718  ;;  %v2096_v14 = vld [vmem:[#allocation3 + $0xa0] sm:$0xff]  ;;  %1539 = vst.msk [vmem:[#allocation3 + $0xae] sm:$0xfc] %vm1503_vm14, %v1426_v11 }
 0x293   : > { %827 = vst.msk [vmem:[#allocation3 + $0xcf] sm:$0x1] %vm17645_vm3, %v719_v24  ;;  %13051 = vmatprep.mubr.msk.f32.mxu0 %vm17524_vm10, %v2096_v14  ;;  %1250 = vrot.lane.b32.xlu1 %v14321_v58, %s13286_s26  ;;  %vm17649_vm3 = vcmask 228544  }
 0x294   : > { %1248 = vrot.lane.b32.xlu0 %v14323_v59, %s13286_s26 }
 0x295   : > { %v1430_v23 = vpop.permute.xlu1 %1429 }
 0x296   : > { %v1428_v17 = vpop.permute.xlu0 %1427  ;;  %1541 = vst.msk [vmem:[#allocation3 + $0xbe] sm:$0x3] %vm1507_vm15, %v1430_v23 }
 0x297   : > { %1540 = vst.msk [vmem:[#allocation3 + $0xb6] sm:$0xff] %vm1505_vm13, %v1428_v17  ;;  %1768 = vrot.lane.b32.xlu1 %v555_v15, %s17520_s29 }
 0x298   : > { %1252 = vrot.lane.b32.xlu0 %v555_v15, %s13286_s26 }
 0x299   : > { %v910_v18 = vpop.permute.xlu1 %909 }
 0x29a   : > { %v1946_v20 = vpop.permute.xlu0 %1945  ;;  %1020 = vst.msk [vmem:[#allocation3 + $0xbe] sm:$0xfc] %vm17646_vm8, %v910_v18  ;;  %vm17650_vm8 = vmmov %vm17649_vm3 }
 0x29b   : > { %2060 = vst.msk [vmem:[#allocation3 + $0xae] sm:$0x3] %vm17647_vm9, %v1946_v20  ;;  %1961 = vrot.lane.b32.xlu1 %v14321_v58, %s13290_s30  ;;  %vm17651_vm9 = vcmask 130144  }
 0x29c   : > { %1959 = vrot.lane.b32.xlu0 %v14323_v59, %s13290_s30 }
 0x29d   : > { %v914_v21 = vpop.permute.xlu1 %913 }
 0x29e   : > { %v912_v48 = vpop.permute.xlu0 %911  ;;  %1022 = vst.msk [vmem:[#allocation3 + $0xce] sm:$0x3] %vm17523_vm7, %v914_v21 }
 0x29f   : > { %1021 = vst.msk [vmem:[#allocation3 + $0xc6] sm:$0xff] %vm17648_vm1, %v912_v48  ;;  %1445 = vrot.lane.b32.xlu1 %v14321_v58, %s13287_s27  ;;  %vm17652_vm1 = vmmov %vm17651_vm9  ;;  %v2980_v48 = vld [vmem:[%s17497_s3 + $0xf8] sm:$0xff] }
 0x2a0   : > { %1443 = vrot.lane.b32.xlu0 %v14323_v59, %s13287_s27  ;;  %12755 = vmatprep.subr.mxu1 %v2980_v48  ;;  %v2949_v48 = vld [vmem:[%s17497_s3] sm:$0xff] }
 0x2a1   : > { %v1603_v22 = vpop.permute.xlu1 %1602 }
 0x2a2   : > { %v1601_v55 = vpop.permute.xlu0 %1600  ;;  %v2097_v25 = vld [vmem:[#allocation3 + $0xa8] sm:$0xff]  ;;  %1676 = vst.msk [vmem:[#allocation3 + $0xb8] sm:$0xff] %vm17649_vm3, %v1603_v22  ;;  %vm17653_vm3 = vcmask 261344  }
 0x2a3   : > { %1675 = vst.msk [vmem:[#allocation3 + $0xb0] sm:$0xff] %vm17650_vm8, %v1601_v55  ;;  %13052 = vmatmul.mubr.msk.f32.gmra.mxu0 %vm17524_vm10, %v2097_v25  ;;  %1963 = vrot.lane.b32.xlu1 %v555_v15, %s13290_s30  ;;  %vm17654_vm8 = vcmask 162944   ;;  %v2979_v55 = vld [vmem:[%s17497_s3 + $0xf0] sm:$0xff] }
 0x2a4   : > { %1447 = vrot.lane.b32.xlu0 %v555_v15, %s13287_s27  ;;  %v2963_v25 = vld [vmem:[%s17497_s3 + $0x70] sm:$0xff] }
 0x2a5   : > { %v1085_v28 = vpop.permute.xlu1 %1084 }
 0x2a6   : > { %v1083_v29 = vpop.permute.xlu0 %1082  ;;  %1156 = vst.msk [vmem:[#allocation3 + $0xc8] sm:$0xff] %vm17651_vm9, %v1085_v28  ;;  %vm17655_vm9 = vcmask 162945  }
 0x2a7   : > { %1155 = vst.msk [vmem:[#allocation3 + $0xc0] sm:$0xff] %vm17652_vm1, %v1083_v29  ;;  %1614 = vrot.lane.b32.xlu1 %v557_v26, %s13288_s28  ;;  %vm17656_vm1 = vcmask 294146   ;;  %v2962_v29 = vld [vmem:[%s17497_s3 + $0x68] sm:$0xff] }
 0x2a8   : > { %1612 = vrot.lane.b32.xlu0 %v556_v27, %s13288_s28 }
 0x2a9   : > { %v1755_v30 = vpop.permute.xlu1 %1754 }
 0x2aa   : > { %v1753_v31 = vpop.permute.xlu0 %1752  ;;  %1867 = vst.msk [vmem:[#allocation3 + $0xb7] sm:$0xff] %vm17653_vm3, %v1755_v30  ;;  %vm17657_vm3 = vcmask 1045504  }
 0x2ab   : > { %1866 = vst.msk [vmem:[#allocation3 + $0xaf] sm:$0xfe] %vm1830_vm0, %v1753_v31  ;;  %1772 = vrot.lane.b32.xlu1 %v557_v26, %s17520_s29  ;;  %v2730_v4 = vsel %vm17657_vm3, %v2728_v47, %v2729_v50  ;;  %v2973_v47 = vld [vmem:[%s17497_s3 + $0xc0] sm:$0xff] }
 0x2ac   : > { %1770 = vrot.lane.b32.xlu0 %v556_v27, %s17520_s29  ;;  %v2957_v50 = vld [vmem:[%s17497_s3 + $0x40] sm:$0xff] }
 0x2ad   : > { %v1239_v38 = vpop.permute.xlu1 %1238 }
 0x2ae   : > { %v1237_v39 = vpop.permute.xlu0 %1236  ;;  %1348 = vst.msk [vmem:[#allocation3 + $0xc7] sm:$0xff] %vm17654_vm8, %v1239_v38  ;;  %vm17658_vm8 = vmmov %vm17657_vm3  ;;  %v2976_v38 = vld [vmem:[%s17497_s3 + $0xd8] sm:$0xff] }
 0x2af   : > { %1347 = vst.msk [vmem:[#allocation3 + $0xbf] sm:$0xfe] %vm17655_vm9, %v1237_v39  ;;  %1965 = vrot.lane.b32.xlu1 %v556_v27, %s13290_s30  ;;  %vm17659_vm9 = vcmask 1046528   ;;  %v2960_v39 = vld [vmem:[%s17497_s3 + $0x58] sm:$0xff] }
 0x2b0   : > { %1774 = vrot.lane.b32.xlu0 %v558_v37, %s17520_s29 }
 0x2b1   : > { %v1757_v42 = vpop.permute.xlu1 %1756 }
 0x2b2   : > { %v1241_v43 = vpop.permute.xlu0 %1240  ;;  %1868 = vst.msk [vmem:[#allocation3 + $0xbf] sm:$0x1] %vm1834_vm2, %v1757_v42  ;;  %v2975_v42 = vld [vmem:[%s17497_s3 + $0xd0] sm:$0xff] }
 0x2b3   : > { %1349 = vst.msk [vmem:[#allocation3 + $0xcf] sm:$0x1] %vm1312_vm12, %v1241_v43  ;;  %v13041_v46 = vpop.f32.mrf.mxu0  ;;  %1969 = vrot.lane.b32.xlu1 %v558_v37, %s13290_s30  ;;  %v2961_v37 = vld [vmem:[%s17497_s3 + $0x60] sm:$0xff]  ;;  %v2974_v43 = vld [vmem:[%s17497_s3 + $0xc8] sm:$0xff] }
 0x2b4   : > { %v14626_v52 = vadd.f32 %v13041_v46, %v14291_v44  ;;  %1967 = vrot.lane.b32.xlu0 %v557_v26, %s13290_s30  ;;  %v2978_v26 = vld [vmem:[%s17497_s3 + $0xe8] sm:$0xff] }
 0x2b5   : > { %v2347_v54 = vpop.f32.mrf.mxu0  ;;  %v1950_v16 = vpop.permute.xlu1 %1949  ;;  %v2958_v46 = vld [vmem:[%s17497_s3 + $0x48] sm:$0xff] }
 0x2b6   : > { %v2463_v61 = vmax.f32 %v2449_v51, %v14626_v52  ;;  %v14635_v1 = vadd.f32 %v14291_v44, %v2347_v54  ;;  %v1948_v3 = vpop.permute.xlu0 %1947  ;;  %2062 = vst.msk [vmem:[#allocation3 + $0xb6] sm:$0xff] %vm17525_vm11, %v1950_v16  ;;  %v2727_v44 = vsel %vm17658_vm8, %v2725_v56, %v2726_v57  ;;  %vm17662_vm8 = vcmask 57376   ;;  %v2972_v57 = vld [vmem:[%s17497_s3 + $0xb8] sm:$0xff] }
 0x2b7   : > { %2061 = vst.msk [vmem:[#allocation3 + $0xae] sm:$0xfc] %vm17656_vm1, %v1948_v3  ;;  %2824 = vrot.lane.b32.xlu1 %v2730_v4, %s13290_s30  ;;  %vm17660_vm1 = vmmov %vm17657_vm3  ;;  %vm17661_vm3 = vcmask 259072   ;;  %v2956_v16 = vld [vmem:[%s17497_s3 + $0x38] sm:$0xff]  ;;  %v2971_v3 = vld [vmem:[%s17497_s3 + $0xb0] sm:$0xff] }
 0x2b8   : > { %v2494_v10 = vrot.slane %v2463_v61, 1  ;;  %v2462_v5 = vmax.f32 %v2448_v60, %v14635_v1  ;;  %2689 = vrot.lane.b32.xlu0 %v2682_v53, %s13290_s30  ;;  %v2544_v13 = vrot.slane %v2463_v61, 2 }
 0x2b9   : > { %v723_v7 = vpop.permute.xlu1 %722 }
 0x2ba   : > { %v2527_v19 = vmax.f32 %v2463_v61, %v2494_v10  ;;  %v2493_v6 = vrot.slane %v2462_v5, 1  ;;  %v2543_v34 = vrot.slane %v2462_v5, 2  ;;  %v721_v33 = vpop.permute.xlu0 %720  ;;  %829 = vst.msk [vmem:[#allocation3 + $0xd7] sm:$0xff] %vm788_vm6, %v723_v7 }
 0x2bb   : > { %828 = vst.msk [vmem:[#allocation3 + $0xcf] sm:$0xfe] %vm17522_vm4, %v721_v33  ;;  %2853 = vrot.lane.b32.xlu1 %v14531_v62, %s13291_s22  ;;  %v2968_v33 = vld [vmem:[%s17497_s3 + $0x98] sm:$0xff] }
 0x2bc   : > { %v2577_v9 = vmax.f32 %v2527_v19, %v2544_v13  ;;  %v2495_v11 = vsel %vm17659_vm9, %v2493_v6, %v2494_v10  ;;  %v2545_v24 = vsel %vm17660_vm1, %v2543_v34, %v2544_v13  ;;  %2746 = vrot.lane.b32.xlu0 %v2727_v44, %s13291_s22  ;;  %vm17663_vm9 = vcmask 261120   ;;  %v2955_v10 = vld [vmem:[%s17497_s3 + $0x30] sm:$0xff]  ;;  %v2954_v19 = vld [vmem:[%s17497_s3 + $0x28] sm:$0xff]  ;;  %v2969_v13 = vld [vmem:[%s17497_s3 + $0xa0] sm:$0xff] }
 0x2bd   : > { %v2526_v14 = vmax.f32 %v2462_v5, %v2495_v11  ;;  %v1432_v15 = vpop.permute.xlu1 %1431  ;;  %vm17664_vm1 = vcmask 97346   ;;  %v2953_v6 = vld [vmem:[%s17497_s3 + $0x20] sm:$0xff]  ;;  %v2967_v11 = vld [vmem:[%s17497_s3 + $0x90] sm:$0xff] }
 0x2be   : > { %2593 = vst.msk [vmem:[#allocation6 + $0x28] sm:$0x3f] %vm17661_vm3, %v2577_v9  ;;  %v725_v23 = vpop.permute.xlu0 %724  ;;  %v2098_v17 = vld [vmem:[#allocation3 + $0xb0] sm:$0xff]  ;;  %vm17665_vm3 = vcmask 288000   ;;  %v2952_v9 = vld [vmem:[%s17497_s3 + $0x18] sm:$0xff] }
 0x2bf   : > { %v2576_v18 = vmax.f32 %v2526_v14, %v2545_v24  ;;  %1542 = vst.msk [vmem:[#allocation3 + $0xbe] sm:$0xfc] %vm1503_vm14, %v1432_v15  ;;  %13054 = vmatprep.mubr.msk.f32.mxu0 %vm17524_vm10, %v2098_v17  ;;  %2776 = vrot.lane.b32.xlu1 %v14378_v35, %s13292_s16  ;;  %v2964_v35 = vld [vmem:[%s17497_s3 + $0x78] sm:$0xff]  ;;  %v2951_v24 = vld [vmem:[%s17497_s3 + $0x10] sm:$0xff]  ;;  %v2950_v17 = vld [vmem:[%s17497_s3 + $0x8] sm:$0xff] }
 0x2c0   : > { %830 = vst.msk [vmem:[#allocation3 + $0xdf] sm:$0x1] %vm17662_vm8, %v725_v23  ;;  %2691 = vrot.lane.b32.xlu0 %v2683_v36, %s13290_s30  ;;  %12756 = vmatpush3.msra.mxu1 %v2964_v35  ;;  %vm17666_vm8 = vcmask 97344   ;;  %v2966_v23 = vld [vmem:[%s17497_s3 + $0x88] sm:$0xff] }
 0x2c1   : > { %2592 = vst.msk [vmem:[#allocation6 + $0x20] sm:$0xff] %vm17663_vm9, %v2576_v18  ;;  %v1436_v20 = vpop.permute.xlu1 %1435  ;;  %12757 = vmatprep.subr.mxu1 %v2979_v55  ;;  %vm17667_vm9 = vcmask 228544  }
 0x2c2   : > { %v1434_v21 = vpop.permute.xlu0 %1433  ;;  %1544 = vst.msk [vmem:[#allocation3 + $0xce] sm:$0x3] %vm1507_vm15, %v1436_v20  ;;  %12758 = vmatpush3.msra.mxu1 %v2963_v25 }
 0x2c3   : > { %1543 = vst.msk [vmem:[#allocation3 + $0xc6] sm:$0xff] %vm1505_vm13, %v1434_v21  ;;  %2882 = vrot.lane.b32.xlu1 %v14538_v63, %s13292_s16  ;;  %12759 = vmatprep.subr.mxu1 %v2978_v26  ;;  %v2965_v21 = vld [vmem:[%s17497_s3 + $0x80] sm:$0xff] }
 0x2c4   : > { %2826 = vrot.lane.b32.xlu0 %v14547_v2, %s13290_s30  ;;  %12760 = vmatpush3.msra.mxu1 %v2962_v29 }
 0x2c5   : > { %v916_v36 = vpop.permute.xlu1 %915  ;;  %12761 = vmatprep.subr.mxu1 %v2977_v32 }
 0x2c6   : > { %v1952_v22 = vpop.permute.xlu0 %1951  ;;  %1023 = vst.msk [vmem:[#allocation3 + $0xce] sm:$0xfc] %vm17664_vm1, %v916_v36  ;;  %12762 = vmatpush3.msra.mxu1 %v2961_v37  ;;  %vm17668_vm1 = vmmov %vm17667_vm9 }
 0x2c7   : > { %2063 = vst.msk [vmem:[#allocation3 + $0xbe] sm:$0x3] %vm17665_vm3, %v1952_v22  ;;  %12763 = vmatprep.subr.mxu1 %v2976_v38  ;;  %vm17669_vm3 = vcmask 130144  }
 0x2c8   : > { %v2606_v27 = vld [vmem:[#allocation6 + $0x20] ss:$2 sm:$0x7f]  ;;  %2748 = vrot.lane.b32.xlu0 %v2730_v4, %s13291_s22  ;;  %12764 = vmatpush3.msra.mxu1 %v2960_v39 }
 0x2c9   : > { %v2636_v28 = vmax.f32 %v2606_v27, 0.0  ;;  %v920_v30 = vpop.permute.xlu1 %919  ;;  %12765 = vmatprep.subr.mxu1 %v2975_v42 }
 0x2ca   : > { %v918_v31 = vpop.permute.xlu0 %917  ;;  %1025 = vst.msk [vmem:[#allocation3 + $0xde] sm:$0x3] %vm17523_vm7, %v920_v30 }
 0x2cb   : > { %2645 = vst.msk [vmem:[#allocation4 + $0x31] sm:$0x7f] %vm2642_vm5, %v2636_v28 }
 0x2cc   : > { %1024 = vst.msk [vmem:[#allocation3 + $0xd6] sm:$0xff] %vm17666_vm8, %v918_v31  ;;  %2778 = vrot.lane.b32.xlu0 %v14531_v62, %s13292_s16  ;;  %v2959_v62 = vld [vmem:[%s17497_s3 + $0x50] sm:$0xff]  ;;  %vm17670_vm8 = vmmov %vm17669_vm3 }
 0x2cd   : > { %v1607_v49 = vpop.permute.xlu1 %1606  ;;  %12766 = vmatpush3.msra.mxu1 %v2959_v62 }
 0x2ce   : > { %v1605_v40 = vpop.permute.xlu0 %1604  ;;  %v2099_v41 = vld [vmem:[#allocation3 + $0xb8] sm:$0xff]  ;;  %1678 = vst.msk [vmem:[#allocation3 + $0xc8] sm:$0xff] %vm17667_vm9, %v1607_v49  ;;  %12767 = vmatprep.subr.mxu1 %v2974_v43  ;;  %vm17671_vm9 = vcmask 1045504  }
 0x2cf   : > { %1677 = vst.msk [vmem:[#allocation3 + $0xc0] sm:$0xff] %vm17668_vm1, %v1605_v40  ;;  %13055 = vmatmul.mubr.msk.f32.gmra.mxu0 %vm17524_vm10, %v2099_v41  ;;  %12768 = vmatpush3.msra.mxu1 %v2958_v46  ;;  %vm17672_vm1 = vcmask 261344  }
 0x2d0   : > { %2693 = vrot.lane.b32.xlu0 %v14538_v63, %s13290_s30  ;;  %12769 = vmatprep.subr.mxu1 %v2973_v47 }
 0x2d1   : > { %v1089_v63 = vpop.permute.xlu1 %1088  ;;  %12770 = vmatpush3.msra.mxu1 %v2957_v50 }
 0x2d2   : > { %v1087_v51 = vpop.permute.xlu0 %1086  ;;  %v14732_v54 = vld [vmem:[#allocation4 + $0x30] sm:$0xff]  ;;  %1158 = vst.msk [vmem:[#allocation3 + $0xd8] sm:$0xff] %vm17669_vm3, %v1089_v63  ;;  %12771 = vmatprep.subr.mxu1 %v2972_v57  ;;  %vm17673_vm3 = vcmask 162944  }
 0x2d3   : > { %1157 = vst.msk [vmem:[#allocation3 + $0xd0] sm:$0xff] %vm17670_vm8, %v1087_v51  ;;  %2855 = vrot.lane.b32.xlu1 %v14732_v54, %s13291_s22  ;;  %v2685_v60 = vrot.slane %v14732_v54, 1  ;;  %v2734_v61 = vrot.slane %v14732_v54, 2  ;;  %12772 = vmatpush3.msra.mxu1 %v2956_v16  ;;  %vm17674_vm8 = vcmask 162945  }
 0x2d4   : > { %2671 = vst.msk [vmem:[#allocation5 + $0x48] sm:$0x7f] %vm2642_vm5, %v14732_v54  ;;  %2750 = vrot.lane.b32.xlu0 %v14547_v2, %s13291_s22  ;;  %v2970_v2 = vld [vmem:[%s17497_s3 + $0xa8] sm:$0xff]  ;;  %12773 = vmatprep.subr.mxu1 %v2971_v3 }
 0x2d5   : > { %2815 = vst.msk [vmem:[#allocation5 + $0x38] sm:$0x7f] %vm2642_vm5, %v2685_v60  ;;  %v14755_v4 = vsel %vm17671_vm9, %v2734_v61, %v2735_v45  ;;  %v1761_v5 = vpop.permute.xlu1 %1760  ;;  %12774 = vmatpush3.msra.mxu1 %v2955_v10  ;;  %vm17675_vm9 = vcmask 294146   ;;  %v14834_v45 = vld [vmem:[%s17496_s2] ss:$0 sm:$0xff] }
 0x2d6   : > { %v1759_v44 = vpop.permute.xlu0 %1758  ;;  %2922 = vst.msk [vmem:[#allocation5 + $0x28] sm:$0x7f] %vm2642_vm5, %v14755_v4  ;;  %12775 = vmatprep.subr.mxu1 %v2970_v2 }
 0x2d7   : > { %1870 = vst.msk [vmem:[#allocation3 + $0xc7] sm:$0xff] %vm17672_vm1, %v1761_v5  ;;  %2884 = vrot.lane.b32.xlu1 %v2685_v60, %s13292_s16  ;;  %12776 = vmatpush3.msra.mxu1 %v2954_v19  ;;  %vm17676_vm1 = vcmask 57376  }
 0x2d8   : > { %1869 = vst.msk [vmem:[#allocation3 + $0xbf] sm:$0xfe] %vm1830_vm0, %v1759_v44  ;;  %2695 = vrot.lane.b32.xlu0 %v2685_v60, %s13290_s30  ;;  %12777 = vmatprep.subr.mxu1 %v2969_v13 }
 0x2d9   : > { %v1245_v34 = vpop.permute.xlu1 %1244  ;;  %12778 = vmatpush3.msra.mxu1 %v2953_v6 }
 0x2da   : > { %v1243_v7 = vpop.permute.xlu0 %1242  ;;  %1351 = vst.msk [vmem:[#allocation3 + $0xd7] sm:$0xff] %vm17673_vm3, %v1245_v34  ;;  %12779 = vmatprep.subr.mxu1 %v2968_v33  ;;  %vm17677_vm3 = vcmask 97346  }
 0x2db   : > { %1350 = vst.msk [vmem:[#allocation3 + $0xcf] sm:$0xfe] %vm17674_vm8, %v1243_v7  ;;  %2828 = vrot.lane.b32.xlu1 %v14755_v4, %s13290_s30  ;;  %12780 = vmatpush3.msra.mxu1 %v2952_v9  ;;  %vm17678_vm8 = vcmask 288000  }
 0x2dc   : > { %12781 = vmatprep.subr.mxu1 %v2967_v11 }
 0x2dd   : > { %v1763_v14 = vpop.permute.xlu1 %1762  ;;  %12782 = vmatpush3.msra.mxu1 %v2951_v24 }
 0x2de   : > { %v1247_v15 = vpop.permute.xlu0 %1246  ;;  %1871 = vst.msk [vmem:[#allocation3 + $0xcf] sm:$0x1] %vm1834_vm2, %v1763_v14  ;;  %12783 = vmatprep.subr.mxu1 %v2966_v23 }
 0x2df   : > { %1352 = vst.msk [vmem:[#allocation3 + $0xdf] sm:$0x1] %vm1312_vm12, %v1247_v15  ;;  %12784 = vmatpush3.msra.mxu1 %v2950_v17  ;;  %v13044_v8 = vpop.f32.mrf.mxu0 }
 0x2e0   : > { %12785 = vmatprep.subr.mxu1 %v2965_v21  ;;  %v2363_v46 = vadd.f32 %v14834_v45, %v13044_v8 }
 0x2e1   : > { %v1956_v18 = vpop.permute.xlu1 %1955  ;;  %12786 = vmatpush3.msra.mxu1 %v2949_v48  ;;  %v2357_v43 = vpop.f32.mrf.mxu0 }
 0x2e2   : > { %v1954_v20 = vpop.permute.xlu0 %1953  ;;  %2065 = vst.msk [vmem:[#allocation3 + $0xc6] sm:$0xff] %vm17525_vm11, %v1956_v18  ;;  %13069 = vmatprep.subr.mxu1 %v13282_v0  ;;  %v2358_v47 = vadd.f32 %v14834_v45, %v2357_v43  ;;  %v2451_v57 = vmax.f32 %v14626_v52, %v2363_v46 }
 0x2e3   : > { %2064 = vst.msk [vmem:[#allocation3 + $0xbe] sm:$0xfc] %vm17675_vm9, %v1954_v20  ;;  %vm17679_vm9 = vcmask 97344  }
 0x2e4   : > { %v2450_v16 = vmax.f32 %v14635_v1, %v2358_v47 }
 0x2e5   : > { %v729_v35 = vpop.permute.xlu1 %728 }
 0x2e6   : > { %v727_v36 = vpop.permute.xlu0 %726  ;;  %832 = vst.msk [vmem:[#allocation3 + $0xe7] sm:$0xff] %vm788_vm6, %v729_v35 }
 0x2e7   : > { %831 = vst.msk [vmem:[#allocation3 + $0xdf] sm:$0xfe] %vm17522_vm4, %v727_v36 }
 0x2e9   : > { %v1438_v22 = vpop.permute.xlu1 %1437 }
 0x2ea   : > { %v731_v55 = vpop.permute.xlu0 %730  ;;  %v2100_v25 = vld [vmem:[#allocation3 + $0xc0] sm:$0xff]  ;;  %1545 = vst.msk [vmem:[#allocation3 + $0xce] sm:$0xfc] %vm1503_vm14, %v1438_v22 }
 0x2eb   : > { %833 = vst.msk [vmem:[#allocation3 + $0xef] sm:$0x1] %vm17676_vm1, %v731_v55  ;;  %13057 = vmatprep.mubr.msk.f32.mxu0 %vm17524_vm10, %v2100_v25  ;;  %vm17680_vm1 = vcmask 228544  }
 0x2ec   : > { %vm17681_vm4 = vmmov %vm17680_vm1 }
 0x2ed   : > { %v1442_v26 = vpop.permute.xlu1 %1441 }
 0x2ee   : > { %v1440_v27 = vpop.permute.xlu0 %1439  ;;  %1547 = vst.msk [vmem:[#allocation3 + $0xde] sm:$0x3] %vm1507_vm15, %v1442_v26 }
 0x2ef   : > { %1546 = vst.msk [vmem:[#allocation3 + $0xd6] sm:$0xff] %vm1505_vm13, %v1440_v27 }
 0x2f1   : > { %v922_v28 = vpop.permute.xlu1 %921 }
 0x2f2   : > { %v1958_v29 = vpop.permute.xlu0 %1957  ;;  %1026 = vst.msk [vmem:[#allocation3 + $0xde] sm:$0xfc] %vm17677_vm3, %v922_v28  ;;  %vm17682_vm3 = vcmask 130144   ;;  %v2659_v28 = vld [vmem:[#allocation4 + $0x48] sm:$0x1] }
 0x2f3   : > { %2066 = vst.msk [vmem:[#allocation3 + $0xce] sm:$0x3] %vm17678_vm8, %v1958_v29  ;;  %vm17683_vm8 = vmmov %vm17682_vm3  ;;  %v2738_v29 = vrot.slane %v2659_v28, 2 }
 0x2f5   : > { %v926_v30 = vpop.permute.xlu1 %925 }
 0x2f6   : > { %v924_v31 = vpop.permute.xlu0 %923  ;;  %1028 = vst.msk [vmem:[#allocation3 + $0xee] sm:$0x3] %vm17523_vm7, %v926_v30  ;;  %vm17684_vm7 = vcmask 261344  }
 0x2f7   : > { %1027 = vst.msk [vmem:[#allocation3 + $0xe6] sm:$0xff] %vm17679_vm9, %v924_v31  ;;  %vm17685_vm9 = vcmask 162944  }
 0x2f9   : > { %v1611_v32 = vpop.permute.xlu1 %1610 }
 0x2fa   : > { %v1609_v37 = vpop.permute.xlu0 %1608  ;;  %v2101_v38 = vld [vmem:[#allocation3 + $0xc8] sm:$0xff]  ;;  %1680 = vst.msk [vmem:[#allocation3 + $0xd8] sm:$0xff] %vm17680_vm1, %v1611_v32  ;;  %vm17688_vm1 = vcmask 1046528  }
 0x2fb   : > { %1679 = vst.msk [vmem:[#allocation3 + $0xd0] sm:$0xff] %vm17681_vm4, %v1609_v37  ;;  %13058 = vmatmul.mubr.msk.f32.gmra.mxu0 %vm17524_vm10, %v2101_v38  ;;  %vm17686_vm4 = vcmask 162945  }
 0x2fd   : > { %v1093_v39 = vpop.permute.xlu1 %1092 }
 0x2fe   : > { %v1091_v49 = vpop.permute.xlu0 %1090  ;;  %1160 = vst.msk [vmem:[#allocation3 + $0xe8] sm:$0xff] %vm17682_vm3, %v1093_v39  ;;  %vm17689_vm3 = vcmask 1045504  }
 0x2ff   : > { %1159 = vst.msk [vmem:[#allocation3 + $0xe0] sm:$0xff] %vm17683_vm8, %v1091_v49  ;;  %vm17690_vm8 = vcmask 259072  }
 0x301   : > { %v1767_v40 = vpop.permute.xlu1 %1766 }
 0x302   : > { %v1765_v41 = vpop.permute.xlu0 %1764  ;;  %1873 = vst.msk [vmem:[#allocation3 + $0xd7] sm:$0xff] %vm17684_vm7, %v1767_v40  ;;  %vm17687_vm7 = vcmask 294146  }
 0x303   : > { %1872 = vst.msk [vmem:[#allocation3 + $0xcf] sm:$0xfe] %vm1830_vm0, %v1765_v41 }
 0x305   : > { %v1251_v42 = vpop.permute.xlu1 %1250 }
 0x306   : > { %v1249_v62 = vpop.permute.xlu0 %1248  ;;  %1354 = vst.msk [vmem:[#allocation3 + $0xe7] sm:$0xff] %vm17685_vm9, %v1251_v42  ;;  %vm17691_vm9 = vcmask 288000  }
 0x307   : > { %1353 = vst.msk [vmem:[#allocation3 + $0xdf] sm:$0xfe] %vm17686_vm4, %v1249_v62  ;;  %vm17692_vm4 = vcmask 261120  }
 0x309   : > { %v1769_v50 = vpop.permute.xlu1 %1768 }
 0x30a   : > { %v1253_v63 = vpop.permute.xlu0 %1252  ;;  %1874 = vst.msk [vmem:[#allocation3 + $0xdf] sm:$0x1] %vm1834_vm2, %v1769_v50 }
 0x30b   : > { %1355 = vst.msk [vmem:[#allocation3 + $0xef] sm:$0x1] %vm1312_vm12, %v1253_v63  ;;  %v13047_v51 = vpop.f32.mrf.mxu0  ;;  %v3018_v63 = vlaneseq }
 0x30c   : > { %v14842_v60 = vadd.f32 %v14834_v45, %v13047_v51 }
 0x30d   : > { %v2367_v61 = vpop.f32.mrf.mxu0  ;;  %v1962_v5 = vpop.permute.xlu1 %1961 }
 0x30e   : > { %v2465_v3 = vmax.f32 %v2451_v57, %v14842_v60  ;;  %v14847_v10 = vadd.f32 %v14834_v45, %v2367_v61  ;;  %v1960_v44 = vpop.permute.xlu0 %1959  ;;  %2068 = vst.msk [vmem:[#allocation3 + $0xd6] sm:$0xff] %vm17525_vm11, %v1962_v5 }
 0x30f   : > { %2067 = vst.msk [vmem:[#allocation3 + $0xce] sm:$0xfc] %vm17687_vm7, %v1960_v44  ;;  %vm17693_vm7 = vcmask 228544  }
 0x310   : > { %v2497_v2 = vrot.slane %v2465_v3, 1  ;;  %v2464_v52 = vmax.f32 %v2450_v16, %v14847_v10  ;;  %v2547_v13 = vrot.slane %v2465_v3, 2  ;;  %v3019_v16 = vshrl.u32 %v3018_v63, 7 }
 0x311   : > { %v1446_v7 = vpop.permute.xlu1 %1445 }
 0x312   : > { %v2529_v19 = vmax.f32 %v2465_v3, %v2497_v2  ;;  %v2496_v6 = vrot.slane %v2464_v52, 1  ;;  %v2546_v34 = vrot.slane %v2464_v52, 2  ;;  %v1444_v1 = vpop.permute.xlu0 %1443  ;;  %1549 = vst.msk [vmem:[#allocation3 + $0xe6] sm:$0xff] %vm1505_vm13, %v1446_v7 }
 0x313   : > { %1548 = vst.msk [vmem:[#allocation3 + $0xde] sm:$0xfc] %vm1503_vm14, %v1444_v1 }
 0x314   : > { %v2579_v33 = vmax.f32 %v2529_v19, %v2547_v13  ;;  %v2498_v9 = vsel %vm17688_vm1, %v2496_v6, %v2497_v2  ;;  %v2548_v11 = vsel %vm17689_vm3, %v2546_v34, %v2547_v13  ;;  %vm17694_vm1 = vmmov %vm17693_vm7  ;;  %vm17695_vm3 = vcmask 261344   ;;  %v2930_v19 = vld [vmem:[#allocation5 + $0x10] sm:$0x7f] }
 0x315   : > { %v2528_v24 = vmax.f32 %v2464_v52, %v2498_v9  ;;  %v1964_v14 = vpop.permute.xlu1 %1963 }
 0x316   : > { %2595 = vst.msk [vmem:[#allocation6 + $0x38] sm:$0x3f] %vm17690_vm8, %v2579_v33  ;;  %v1448_v15 = vpop.permute.xlu0 %1447  ;;  %v2102_v23 = vld [vmem:[#allocation3 + $0xd0] sm:$0xff]  ;;  %vm17696_vm8 = vcmask 294146   ;;  %v3014_v33 = vcombine.high %v2930_v19, %v2930_v19 }
 0x317   : > { %v2578_v17 = vmax.f32 %v2528_v24, %v2548_v11  ;;  %2069 = vst.msk [vmem:[#allocation3 + $0xde] sm:$0x3] %vm17691_vm9, %v1964_v14  ;;  %13060 = vmatprep.mubr.msk.f32.mxu0 %vm17524_vm10, %v2102_v23  ;;  %v2933_v24 = vld [vmem:[#allocation5 + $0x28] sm:$0x7f] }
 0x318   : > { %1550 = vst.msk [vmem:[#allocation3 + $0xee] sm:$0x3] %vm1507_vm15, %v1448_v15 }
 0x319   : > { %2594 = vst.msk [vmem:[#allocation6 + $0x30] sm:$0xff] %vm17692_vm4, %v2578_v17  ;;  %v1615_v18 = vpop.permute.xlu1 %1614  ;;  %vm2710_vm4 = vcmask 522496  }
 0x31a   : > { %v1613_v20 = vpop.permute.xlu0 %1612  ;;  %1682 = vst.msk [vmem:[#allocation3 + $0xe8] sm:$0xff] %vm17693_vm7, %v1615_v18  ;;  %vm2767_vm7 = vcmask 784896  }
 0x31b   : > { %1681 = vst.msk [vmem:[#allocation3 + $0xe0] sm:$0xff] %vm17694_vm1, %v1613_v20  ;;  %vm17697_vm1 = vcmask 1045504   ;;  %v3080_v20 = vcombine.high %v2933_v24, %v2933_v24 }
 0x31d   : > { %v1773_v21 = vpop.permute.xlu1 %1772 }
 0x31e   : > { %v1771_v48 = vpop.permute.xlu0 %1770  ;;  %v2103_v35 = vld [vmem:[#allocation3 + $0xd8] sm:$0xff]  ;;  %1876 = vst.msk [vmem:[#allocation3 + $0xe7] sm:$0xff] %vm17695_vm3, %v1773_v21  ;;  %vm2797_vm3 = vcmask 1047296  }
 0x31f   : > { %1875 = vst.msk [vmem:[#allocation3 + $0xdf] sm:$0xfe] %vm1830_vm0, %v1771_v48  ;;  %13061 = vmatmul.mubr.msk.f32.gmra.mxu0 %vm17524_vm10, %v2103_v35 }
 0x320   : > { %v2608_v36 = vld [vmem:[#allocation6 + $0x30] ss:$2 sm:$0x7f] }
 0x321   : > { %v2637_v22 = vmax.f32 %v2608_v36, 0.0  ;;  %v1966_v55 = vpop.permute.xlu1 %1965 }
 0x322   : > { %v1775_v25 = vpop.permute.xlu0 %1774  ;;  %2070 = vst.msk [vmem:[#allocation3 + $0xde] sm:$0xfc] %vm17696_vm8, %v1966_v55  ;;  %vm17698_vm8 = vcmask 1046528  }
 0x323   : > { %2646 = vst.msk [vmem:[#allocation4 + $0x41] sm:$0x7f] %vm2642_vm5, %v2637_v22 }
 0x324   : > { %1877 = vst.msk [vmem:[#allocation3 + $0xef] sm:$0x1] %vm1834_vm2, %v1775_v25 }
 0x325   : > { %v1970_v26 = vpop.permute.xlu1 %1969 }
 0x326   : > { %v1968_v27 = vpop.permute.xlu0 %1967  ;;  %2072 = vst.msk [vmem:[#allocation3 + $0xee] sm:$0x3] %vm17691_vm9, %v1970_v26  ;;  %vm17699_vm9 = vmmov %vm17697_vm1 }
 0x327   : > { %2071 = vst.msk [vmem:[#allocation3 + $0xe6] sm:$0xff] %vm17525_vm11, %v1968_v27 }
 0x329   : > { %v2825_v31 = vpop.permute.xlu1 %2824 }
 0x32a   : > { %v2690_v30 = vpop.permute.xlu0 %2689  ;;  %v2658_v32 = vld [vmem:[#allocation4 + $0x40] sm:$0xff]  ;;  %2845 = vst.msk [vmem:[#allocation5 + $0x8] sm:$0x7f] %vm2710_vm4, %v2825_v31 }
 0x32b   : > { %2711 = vst.msk [vmem:[#allocation5] sm:$0x7f] %vm2710_vm4, %v2690_v30  ;;  %2857 = vrot.lane.b32.xlu1 %v2658_v32, %s13291_s22  ;;  %v2737_v37 = vrot.slane %v2658_v32, 2  ;;  %v2686_v38 = vrot.slane %v2658_v32, 1 }
 0x32c   : > { %2672 = vst.msk [vmem:[#allocation5 + $0x60] sm:$0x7f] %vm2642_vm5, %v2658_v32 }
 0x32d   : > { %v2739_v39 = vsel %vm17697_vm1, %v2737_v37, %v2738_v29  ;;  %2816 = vst.msk [vmem:[#allocation5 + $0x50] sm:$0x7f] %vm2642_vm5, %v2686_v38  ;;  %v2854_v40 = vpop.permute.xlu1 %2853  ;;  %vm17700_vm1 = vcmask 259072  }
 0x32e   : > { %v2747_v49 = vpop.permute.xlu0 %2746  ;;  %2923 = vst.msk [vmem:[#allocation5 + $0x40] sm:$0x7f] %vm2642_vm5, %v2739_v39  ;;  %2830 = vrot.lane.b32.xlu0 %v2739_v39, %s13290_s30  ;;  %v2104_v41 = vld [vmem:[#allocation3 + $0xe0] sm:$0xff]  ;;  %v2105_v8 = vld [vmem:[#allocation3 + $0xe8] sm:$0xff] }
 0x32f   : > { %2768 = vst.msk [vmem:[#allocation5] sm:$0x7f] %vm2767_vm7, %v2747_v49  ;;  %2874 = vst.msk [vmem:[#allocation5 + $0x8] sm:$0x7f] %vm2767_vm7, %v2854_v40  ;;  %13063 = vmatprep.mubr.msk.f32.mxu0 %vm17524_vm10, %v2104_v41  ;;  %2780 = vrot.lane.b32.xlu1 %v14732_v54, %s13292_s16 }
 0x330   : > { %13064 = vmatmul.mubr.msk.f32.gmra.mxu0 %vm17524_vm10, %v2105_v8  ;;  %vm17701_vm10 = vcmask 261120  }
 0x331   : > { %v2777_v42 = vpop.permute.xlu1 %2776 }
 0x332   : > { %2752 = vrot.lane.b32.xlu0 %v14755_v4, %s13291_s22  ;;  %v2692_v62 = vpop.permute.xlu0 %2691  ;;  %2798 = vst.msk [vmem:[#allocation5] sm:$0x7f] %vm2797_vm3, %v2777_v42  ;;  %v13293_v4 = vmov 1966171168  }
 0x333   : > { %2712 = vst.msk [vmem:[#allocation5 + $0x18] sm:$0x7f] %vm2710_vm4, %v2692_v62  ;;  %2886 = vrot.lane.b32.xlu1 %v2686_v38, %s13292_s16  ;;  %v3016_v50 = vunpack.c.l.s4 %v13293_v4 }
 0x335   : > { %v2883_v43 = vpop.permute.xlu1 %2882  ;;  %v3017_v61 = vunpack.c.0.s8 %v3016_v50 }
 0x336   : > { %2782 = vrot.lane.b32.xlu0 %v2658_v32, %s13292_s16  ;;  %v2827_v46 = vpop.permute.xlu0 %2826  ;;  %2903 = vst.msk [vmem:[#allocation5 + $0x8] sm:$0x7f] %vm2797_vm3, %v2883_v43 }
 0x337   : > { %2846 = vst.msk [vmem:[#allocation5 + $0x20] sm:$0x7f] %vm2710_vm4, %v2827_v46  ;;  %v14900_v2 = vsub.s32 %v3017_v61, %v3019_v16  ;;  %v13050_v4 = vpop.f32.mrf.mxu0 }
 0x339   : > { %v2928_v54 = vld [vmem:[#allocation5] sm:$0x7f]  ;;  %v3035_v7 = vrot.slane %v2930_v19, %v14900_v2  ;;  %v3042_v23 = vrot.slane %v3014_v33, %v14900_v2  ;;  %v3101_v25 = vrot.slane %v2933_v24, %v14900_v2  ;;  %v14915_v28 = vrot.slane %v3080_v20, %v14900_v2 }
 0x33a   : > { %2697 = vrot.lane.b32.xlu0 %v2686_v38, %s13290_s30  ;;  %v2749_v47 = vpop.permute.xlu0 %2748  ;;  %5144 = vst.msk [vmem:[#allocation5] sm:$0x7f] %vm2642_vm5, %v14413_v12  ;;  %v2383_v19 = vadd.f32 %v14834_v45, %v13050_v4 }
 0x33b   : > { %2769 = vst.msk [vmem:[#allocation5 + $0x18] sm:$0x7f] %vm2767_vm7, %v2749_v47 }
 0x33d   : > { %v2929_v57 = vld [vmem:[#allocation5 + $0x8] sm:$0x7f] }
 0x33e   : > { %2754 = vrot.lane.b32.xlu0 %v2739_v39, %s13291_s22  ;;  %v2779_v51 = vpop.permute.xlu0 %2778  ;;  %v3012_v5 = vcombine.low %v2928_v54, %v2929_v57  ;;  %v3013_v6 = vcombine.high %v2928_v54, %v2929_v57 }
 0x33f   : > { %2799 = vst.msk [vmem:[#allocation5 + $0x18] sm:$0x7f] %vm2797_vm3, %v2779_v51 }
 0x340   : > { %v3021_v13 = vrot.slane %v3012_v5, %v14900_v2  ;;  %v3028_v14 = vrot.slane %v3013_v6, %v14900_v2 }
 0x342   : > { %v2694_v3 = vpop.permute.xlu0 %2693  ;;  %v3043_v9 = vcombine.low %v3021_v13, %v3035_v7  ;;  %v3044_v11 = vcombine.high %v3021_v13, %v3035_v7  ;;  %v3045_v21 = vcombine.low %v3028_v14, %v3042_v23  ;;  %v3046_v48 = vcombine.high %v3028_v14, %v3042_v23  ;;  %v2377_v13 = vpop.f32.mrf.mxu0 }
 0x343   : > { %2713 = vst.msk [vmem:[#allocation5 + $0x30] sm:$0x7f] %vm2710_vm4, %v2694_v3 }
 0x344   : > { %v3053_v17 = vrot.slane %v3043_v9, %v14900_v2  ;;  %v3067_v18 = vrot.slane %v3044_v11, %v14900_v2  ;;  %v3060_v29 = vrot.slane %v3045_v21, %v14900_v2  ;;  %v3074_v30 = vrot.slane %v3046_v48, %v14900_v2 }
 0x345   : > { %v2856_v44 = vpop.permute.xlu1 %2855  ;;  %v2378_v11 = vadd.f32 %v14834_v45, %v2377_v13  ;;  %v15008_v13 = vld [vmem:[#allocation5 + $0x40] sm:$0x7f] }
 0x346   : > { %2875 = vst.msk [vmem:[#allocation5 + $0x20] sm:$0x7f] %vm2767_vm7, %v2856_v44  ;;  %v2751_v52 = vpop.permute.xlu0 %2750  ;;  %v2931_v35 = vld [vmem:[#allocation5 + $0x18] sm:$0x7f]  ;;  %v3522_v26 = vcombine.low %v3053_v17, %v3067_v18  ;;  %v12664_v27 = vcombine.high %v3053_v17, %v3067_v18  ;;  %v3076_v41 = vcombine.high %v3060_v29, %v3060_v29  ;;  %v3524_v42 = vcombine.low %v3060_v29, %v3074_v30 }
 0x347   : > { %2770 = vst.msk [vmem:[#allocation5 + $0x30] sm:$0x7f] %vm2767_vm7, %v2751_v52  ;;  %v2453_v17 = vmax.f32 %v14842_v60, %v2383_v19  ;;  %v2452_v21 = vmax.f32 %v14847_v10, %v2378_v11 }
 0x348   : > { %v3532_v49 = vrot.slane %v3522_v26, %v14900_v2  ;;  %v3539_v40 = vrot.slane %v12664_v27, %v14900_v2  ;;  %v3546_v51 = vrot.slane %v3524_v42, %v14900_v2 }
 0x349   : > { %v2885_v34 = vpop.permute.xlu1 %2884 }
 0x34a   : > { %2904 = vst.msk [vmem:[#allocation5 + $0x20] sm:$0x7f] %vm2797_vm3, %v2885_v34  ;;  %v2696_v1 = vpop.permute.xlu0 %2695  ;;  %v3555_v50 = vcombine.high %v3532_v49, %v3539_v40  ;;  %v3554_v63 = vcombine.low %v3532_v49, %v3539_v40 }
 0x34b   : > { %2714 = vst.msk [vmem:[#allocation5 + $0x48] sm:$0x7f] %vm2710_vm4, %v2696_v1 }
 0x34c   : > { %v3571_v6 = vrot.slane %v3555_v50, %v14900_v2  ;;  %v14944_v34 = vrot.slane %v3554_v63, %v14900_v2 }
 0x34d   : > { %v2829_v15 = vpop.permute.xlu1 %2828 }
 0x34e   : > { %2847 = vst.msk [vmem:[#allocation5 + $0x38] sm:$0x7f] %vm2710_vm4, %v2829_v15 }
 0x351   : > { %v2932_v36 = vld [vmem:[#allocation5 + $0x20] sm:$0x7f] }
 0x352   : > { %v3078_v22 = vcombine.low %v2931_v35, %v2932_v36  ;;  %v3079_v55 = vcombine.high %v2931_v35, %v2932_v36 }
 0x354   : > { %v3087_v31 = vrot.slane %v3078_v22, %v14900_v2  ;;  %v14921_v32 = vrot.slane %v3079_v55, %v14900_v2 }
 0x356   : > { %v3109_v37 = vcombine.low %v3087_v31, %v3101_v25  ;;  %v3110_v38 = vcombine.high %v3087_v31, %v3101_v25  ;;  %v3111_v39 = vcombine.low %v14921_v32, %v14915_v28 }
 0x358   : > { %v3119_v8 = vrot.slane %v3109_v37, %v14900_v2  ;;  %v3133_v62 = vrot.slane %v3110_v38, %v14900_v2  ;;  %v14930_v54 = vrot.slane %v3111_v39, %v14900_v2  ;;  %v2661_v39 = vld [vmem:[#allocation4 + $0x58] sm:$0x1] }
 0x359   : > { %v2741_v49 = vrot.slane %v2661_v39, 2 }
 0x35a   : > { %v3141_v43 = vcombine.high %v3119_v8, %v3119_v8  ;;  %v3525_v46 = vcombine.low %v3076_v41, %v3119_v8  ;;  %v3143_v47 = vcombine.high %v3133_v62, %v3133_v62 }
 0x35c   : > { %v3553_v57 = vrot.slane %v3525_v46, %v14900_v2  ;;  %v3589_v61 = vcombine.low %v3133_v62, %v3141_v43  ;;  %v3590_v16 = vcombine.low %v3143_v47, %v14930_v54  ;;  %v14992_v62 = vld [vmem:[#allocation4 + $0x80] sm:$0xff]  ;;  %v2667_v43 = vld [vmem:[#allocation4 + $0x88] sm:$0x1] }
 0x35d   : > { %v2911_v46 = vrot.slane %v14992_v62, 2  ;;  %v2912_v47 = vrot.slane %v2667_v43, 2 }
 0x35e   : > { %v3557_v3 = vcombine.high %v3546_v51, %v3553_v57  ;;  %v3556_v5 = vcombine.low %v3546_v51, %v3553_v57  ;;  %v14936_v44 = vrot.slane %v3589_v61, %v14900_v2  ;;  %v14939_v52 = vrot.slane %v3590_v16, %v14900_v2 }
 0x360   : > { %v3585_v7 = vrot.slane %v3557_v3, %v14900_v2  ;;  %v14948_v1 = vrot.slane %v3556_v5, %v14900_v2  ;;  %v3622_v33 = vcombine.high %v14936_v44, %v14939_v52  ;;  %v3621_v9 = vcombine.low %v14936_v44, %v14939_v52 }
 0x362   : > { %v3588_v24 = vcombine.low %v3571_v6, %v3585_v7  ;;  %v3586_v14 = vcombine.low %v14944_v34, %v14948_v1  ;;  %v3587_v15 = vcombine.high %v14944_v34, %v14948_v1  ;;  %v3112_v6 = vcombine.high %v14921_v32, %v14915_v28 }
 0x363   : > { %v13053_v23 = vpop.f32.mrf.mxu0 }
 0x364   : > { %v14961_v18 = vadd.f32 %v14834_v45, %v13053_v23  ;;  %4178 = vmatprep.mubr.f32.mxu1 %v3588_v24  ;;  %v3142_v24 = vcombine.high %v14930_v54, %v14930_v54  ;;  %v3167_v23 = vrot.slane %v15008_v13, %v14900_v2 }
 0x365   : > { %v2387_v20 = vpop.f32.mrf.mxu0  ;;  %4179 = vmatmul.mubr.f32.vlgmr.msra.gmra.mxu1 %v3586_v14 }
 0x366   : > { %v2467_v48 = vmax.f32 %v2453_v17, %v14961_v18  ;;  %v14966_v35 = vadd.f32 %v14834_v45, %v2387_v20  ;;  %v3140_v20 = vrot.slane %v3112_v6, %v14900_v2 }
 0x368   : > { %v2500_v36 = vrot.slane %v2467_v48, 1  ;;  %v2466_v22 = vmax.f32 %v2452_v21, %v14966_v35  ;;  %v2550_v25 = vrot.slane %v2467_v48, 2 }
 0x36a   : > { %v2531_v55 = vmax.f32 %v2467_v48, %v2500_v36  ;;  %v2499_v26 = vrot.slane %v2466_v22, 1  ;;  %v2549_v60 = vrot.slane %v2466_v22, 2 }
 0x36c   : > { %v2581_v27 = vmax.f32 %v2531_v55, %v2550_v25  ;;  %v2501_v29 = vsel %vm17698_vm8, %v2499_v26, %v2500_v36  ;;  %v2551_v30 = vsel %vm17699_vm9, %v2549_v60, %v2550_v25  ;;  %vm17703_vm8 = vmmov %vm17699_vm9  ;;  %v3591_v36 = vcombine.low %v3140_v20, %v3142_v24 }
 0x36d   : > { %v2530_v31 = vmax.f32 %v2466_v22, %v2501_v29  ;;  %v2913_v4 = vsel %vm17703_vm8, %v2911_v46, %v2912_v47 }
 0x36e   : > { %2597 = vst.msk [vmem:[#allocation6 + $0x48] sm:$0x3f] %vm17700_vm1, %v2581_v27  ;;  %v3613_v26 = vrot.slane %v3591_v36, %v14900_v2  ;;  %vm17705_vm1 = vmmov %vm17703_vm8  ;;  %vm17707_vm8 = vcmask 261120  }
 0x36f   : > { %v2580_v10 = vmax.f32 %v2530_v31, %v2551_v30  ;;  %2927 = vst.msk [vmem:[#allocation5 + $0xa0] sm:$0x7f] %vm2642_vm5, %v2913_v4 }
 0x371   : > { %2596 = vst.msk [vmem:[#allocation6 + $0x40] sm:$0xff] %vm17701_vm10, %v2580_v10  ;;  %vm17702_vm10 = vmmov %vm17699_vm9  ;;  %v3638_v10 = vrot.slane %v3622_v33, %v14900_v2  ;;  %vm17704_vm9 = vcmask 1046528  }
 0x378   : > { %v2610_v37 = vld [vmem:[#allocation6 + $0x40] ss:$2 sm:$0x7f] }
 0x379   : > { %v2638_v38 = vmax.f32 %v2610_v37, 0.0  ;;  %v15043_v37 = vrot.slane %v3621_v9, %v14900_v2 }
 0x37b   : > { %2647 = vst.msk [vmem:[#allocation4 + $0x51] sm:$0x7f] %vm2642_vm5, %v2638_v38 }
 0x382   : > { %v14974_v40 = vld [vmem:[#allocation4 + $0x50] sm:$0xff] }
 0x383   : > { %2859 = vrot.lane.b32.xlu1 %v14974_v40, %s13291_s22  ;;  %2673 = vst.msk [vmem:[#allocation5 + $0x78] sm:$0x7f] %vm2642_vm5, %v14974_v40  ;;  %v2687_v41 = vrot.slane %v14974_v40, 1  ;;  %v2740_v8 = vrot.slane %v14974_v40, 2 }
 0x385   : > { %2699 = vrot.lane.b32.xlu0 %v2687_v41, %s13290_s30  ;;  %2817 = vst.msk [vmem:[#allocation5 + $0x68] sm:$0x7f] %vm2642_vm5, %v2687_v41  ;;  %v14985_v42 = vsel %vm17702_vm10, %v2740_v8, %v2741_v49  ;;  %vm17706_vm10 = vcmask 259072  }
 0x386   : > { %2924 = vst.msk [vmem:[#allocation5 + $0x58] sm:$0x7f] %vm2642_vm5, %v14985_v42 }
 0x387   : > { %2888 = vrot.lane.b32.xlu1 %v2687_v41, %s13292_s16 }
 0x38b   : > { %2832 = vrot.lane.b32.xlu1 %v14985_v42, %s13290_s30 }
 0x38f   : > { %v13056_v17 = vpop.f32.mrf.mxu0 }
 0x390   : > { %v2403_v25 = vadd.f32 %v14834_v45, %v13056_v17 }
 0x391   : > { %v2397_v54 = vpop.f32.mrf.mxu0 }
 0x392   : > { %v2398_v27 = vadd.f32 %v14834_v45, %v2397_v54  ;;  %v2455_v38 = vmax.f32 %v14961_v18, %v2403_v25 }
 0x394   : > { %v2454_v8 = vmax.f32 %v14966_v35, %v2398_v27 }
 0x39d   : > { %v2858_v50 = vpop.permute.xlu1 %2857 }
 0x39e   : > { %2876 = vst.msk [vmem:[#allocation5 + $0x38] sm:$0x7f] %vm2767_vm7, %v2858_v50 }
 0x3a0   : > { %v2831_v63 = vpop.permute.xlu0 %2830 }
 0x3a1   : > { %2848 = vst.msk [vmem:[#allocation5 + $0x50] sm:$0x7f] %vm2710_vm4, %v2831_v63  ;;  %v2781_v51 = vpop.permute.xlu1 %2780 }
 0x3a2   : > { %2800 = vst.msk [vmem:[#allocation5 + $0x30] sm:$0x7f] %vm2797_vm3, %v2781_v51 }
 0x3a4   : > { %v2753_v57 = vpop.permute.xlu0 %2752 }
 0x3a5   : > { %2771 = vst.msk [vmem:[#allocation5 + $0x48] sm:$0x7f] %vm2767_vm7, %v2753_v57  ;;  %v2887_v61 = vpop.permute.xlu1 %2886 }
 0x3a6   : > { %2905 = vst.msk [vmem:[#allocation5 + $0x38] sm:$0x7f] %vm2797_vm3, %v2887_v61 }
 0x3a8   : > { %v2783_v16 = vpop.permute.xlu0 %2782 }
 0x3a9   : > { %2801 = vst.msk [vmem:[#allocation5 + $0x48] sm:$0x7f] %vm2797_vm3, %v2783_v16  ;;  %v15003_v5 = vld [vmem:[#allocation5 + $0x30] sm:$0x7f] }
 0x3ac   : > { %v2698_v3 = vpop.permute.xlu0 %2697 }
 0x3ad   : > { %v15005_v19 = vld [vmem:[#allocation5 + $0x38] sm:$0x7f]  ;;  %2715 = vst.msk [vmem:[#allocation5 + $0x60] sm:$0x7f] %vm2710_vm4, %v2698_v3 }
 0x3ae   : > { %v3144_v7 = vcombine.low %v15003_v5, %v15005_v19 }
 0x3b0   : > { %v2755_v11 = vpop.permute.xlu0 %2754  ;;  %v3153_v14 = vrot.slane %v3144_v7, %v14900_v2 }
 0x3b1   : > { %2772 = vst.msk [vmem:[#allocation5 + $0x60] sm:$0x7f] %vm2767_vm7, %v2755_v11  ;;  %v2663_v11 = vld [vmem:[#allocation4 + $0x68] sm:$0x1] }
 0x3b2   : > { %v3175_v21 = vcombine.low %v3153_v14, %v3167_v23  ;;  %v3176_v48 = vcombine.high %v3153_v14, %v3167_v23  ;;  %v2744_v24 = vrot.slane %v2663_v11, 2 }
 0x3b4   : > { %v15022_v28 = vrot.slane %v3175_v21, %v14900_v2  ;;  %v15025_v32 = vrot.slane %v3176_v48, %v14900_v2 }
 0x3b6   : > { %v3592_v22 = vcombine.low %v15022_v28, %v15025_v32  ;;  %v12665_v55 = vcombine.high %v15022_v28, %v15025_v32 }
 0x3b8   : > { %v3620_v60 = vrot.slane %v3592_v22, %v14900_v2 }
 0x3ba   : > { %v3624_v29 = vcombine.high %v3613_v26, %v3620_v60  ;;  %v3623_v30 = vcombine.low %v3613_v26, %v3620_v60 }
 0x3bb   : > { %v13059_v31 = vpop.f32.mrf.mxu0 }
 0x3bc   : > { %v2413_v39 = vadd.f32 %v14834_v45, %v13059_v31  ;;  %v3652_v49 = vrot.slane %v3624_v29, %v14900_v2  ;;  %v15049_v41 = vrot.slane %v3623_v30, %v14900_v2 }
 0x3bd   : > { %v2407_v43 = vpop.f32.mrf.mxu0 }
 0x3be   : > { %v2469_v46 = vmax.f32 %v2455_v38, %v2413_v39  ;;  %v2408_v33 = vadd.f32 %v14834_v45, %v2407_v43  ;;  %v3655_v47 = vcombine.low %v3638_v10, %v3652_v49  ;;  %v3653_v44 = vcombine.low %v15043_v37, %v15049_v41 }
 0x3bf   : > { %v3654_v52 = vcombine.high %v15043_v37, %v15049_v41  ;;  %v3145_v10 = vcombine.high %v15003_v5, %v15005_v19  ;;  %v3146_v38 = vcombine.high %v15008_v13, %v15008_v13  ;;  %v5127_v37 = vld [vmem:[#allocation4 + $0x8] sm:$0x1] }
 0x3c0   : > { %v2503_v9 = vrot.slane %v2469_v46, 1  ;;  %v2468_v18 = vmax.f32 %v2454_v8, %v2408_v33  ;;  %4183 = vmatprep.mubr.f32.mxu1 %v3655_v47  ;;  %v2553_v50 = vrot.slane %v2469_v46, 2  ;;  %v5201_v41 = vrot.slane %v5127_v37, 2 }
 0x3c1   : > { %4184 = vmatmul.mubr.f32.gmra.mxu1 %v3653_v44  ;;  %v3160_v44 = vrot.slane %v3145_v10, %v14900_v2  ;;  %v3174_v19 = vrot.slane %v3146_v38, %v14900_v2 }
 0x3c2   : > { %v2533_v4 = vmax.f32 %v2469_v46, %v2503_v9  ;;  %v2502_v63 = vrot.slane %v2468_v18, 1  ;;  %v2552_v51 = vrot.slane %v2468_v18, 2 }
 0x3c4   : > { %v2583_v35 = vmax.f32 %v2533_v4, %v2553_v50  ;;  %v2504_v57 = vsel %vm17704_vm9, %v2502_v63, %v2503_v9  ;;  %v2554_v61 = vsel %vm17705_vm1, %v2552_v51, %v2553_v50  ;;  %vm17708_vm9 = vmmov %vm17705_vm1  ;;  %vm17709_vm1 = vcmask 1046528   ;;  %v15094_v63 = vld [vmem:[#allocation5 + $0x48] sm:$0x7f] }
 0x3c5   : > { %v2532_v16 = vmax.f32 %v2468_v18, %v2504_v57  ;;  %v3177_v4 = vcombine.low %v3160_v44, %v3174_v19  ;;  %v3178_v50 = vcombine.high %v3160_v44, %v3174_v19  ;;  %v2881_v44 = vrot.slane %v14992_v62, 1  ;;  %v15166_v19 = vld [vmem:[#allocation2 + $0x188] sm:$0xff] }
 0x3c6   : > { %2599 = vst.msk [vmem:[#allocation6 + $0x58] sm:$0x3f] %vm17706_vm10, %v2583_v35  ;;  %v15098_v35 = vld [vmem:[#allocation5 + $0x58] sm:$0x7f] }
 0x3c7   : > { %v2582_v3 = vmax.f32 %v2532_v16, %v2554_v61  ;;  %v3192_v57 = vrot.slane %v3177_v4, %v14900_v2  ;;  %v3206_v61 = vrot.slane %v3178_v50, %v14900_v2 }
 0x3c9   : > { %2598 = vst.msk [vmem:[#allocation6 + $0x50] sm:$0xff] %vm17707_vm8, %v2582_v3  ;;  %vm17710_vm8 = vmmov %vm17708_vm9  ;;  %v3657_v11 = vcombine.low %v3192_v57, %v3206_v61 }
 0x3d0   : > { %v2612_v6 = vld [vmem:[#allocation6 + $0x50] ss:$2 sm:$0x7f] }
 0x3d1   : > { %v2639_v7 = vmax.f32 %v2612_v6, 0.0  ;;  %v3233_v6 = vrot.slane %v15098_v35, %v14900_v2 }
 0x3d3   : > { %2648 = vst.msk [vmem:[#allocation4 + $0x61] sm:$0x7f] %vm2642_vm5, %v2639_v7 }
 0x3da   : > { %v2662_v14 = vld [vmem:[#allocation4 + $0x60] sm:$0xff] }
 0x3db   : > { %2861 = vrot.lane.b32.xlu1 %v2662_v14, %s13291_s22  ;;  %2674 = vst.msk [vmem:[#allocation5 + $0x90] sm:$0x7f] %vm2642_vm5, %v2662_v14  ;;  %v2743_v23 = vrot.slane %v2662_v14, 2  ;;  %v2688_v17 = vrot.slane %v2662_v14, 1 }
 0x3dd   : > { %v2745_v20 = vsel %vm17708_vm9, %v2743_v23, %v2744_v24  ;;  %2818 = vst.msk [vmem:[#allocation5 + $0x80] sm:$0x7f] %vm2642_vm5, %v2688_v17  ;;  %vm17711_vm9 = vcmask 261120  }
 0x3de   : > { %2925 = vst.msk [vmem:[#allocation5 + $0x70] sm:$0x7f] %vm2642_vm5, %v2745_v20  ;;  %2834 = vrot.lane.b32.xlu0 %v2745_v20, %s13290_s30 }
 0x3df   : > { %2784 = vrot.lane.b32.xlu1 %v14974_v40, %s13292_s16  ;;  %v13062_v21 = vpop.f32.mrf.mxu0 }
 0x3e0   : > { %v2423_v36 = vadd.f32 %v14834_v45, %v13062_v21  ;;  %v3666_v21 = vrot.slane %v12665_v55, %v14900_v2 }
 0x3e1   : > { %v2417_v48 = vpop.f32.mrf.mxu0 }
 0x3e2   : > { %2756 = vrot.lane.b32.xlu0 %v14985_v42, %s13291_s22  ;;  %v2418_v54 = vadd.f32 %v14834_v45, %v2417_v48  ;;  %v2457_v25 = vmax.f32 %v2413_v39, %v2423_v36  ;;  %v3673_v48 = vrot.slane %v3657_v11, %v14900_v2 }
 0x3e3   : > { %2890 = vrot.lane.b32.xlu1 %v2688_v17, %s13292_s16 }
 0x3e4   : > { %v2456_v42 = vmax.f32 %v2408_v33, %v2418_v54 }
 0x3e6   : > { %2786 = vrot.lane.b32.xlu0 %v2662_v14, %s13292_s16 }
 0x3ea   : > { %2701 = vrot.lane.b32.xlu0 %v2688_v17, %s13290_s30  ;;  %v3208_v17 = vcombine.high %v3192_v57, %v3192_v57  ;;  %v3212_v57 = vcombine.high %v15098_v35, %v15098_v35 }
 0x3ee   : > { %2758 = vrot.lane.b32.xlu0 %v2745_v20, %s13291_s22 }
 0x3f0   : > { %v13065_v22 = vpop.f32.mrf.mxu0 }
 0x3f1   : > { %v2433_v40 = vadd.f32 %v14834_v45, %v13065_v22 }
 0x3f2   : > { %v2427_v26 = vpop.f32.mrf.mxu0 }
 0x3f3   : > { %v2471_v60 = vmax.f32 %v2457_v25, %v2433_v40  ;;  %v2428_v27 = vadd.f32 %v14834_v45, %v2427_v26  ;;  %v2665_v25 = vld [vmem:[#allocation4 + $0x78] sm:$0x1]  ;;  %v3689_v26 = vcombine.high %v3666_v21, %v3673_v48 }
 0x3f5   : > { %v2506_v29 = vrot.slane %v2471_v60, 1  ;;  %v2470_v30 = vmax.f32 %v2456_v42, %v2428_v27  ;;  %v2860_v31 = vpop.permute.xlu1 %2859  ;;  %v2556_v39 = vrot.slane %v2471_v60, 2  ;;  %v3688_v27 = vcombine.low %v3666_v21, %v3673_v48  ;;  %v2942_v48 = vld [vmem:[#allocation5 + $0x70] sm:$0x7f] }
 0x3f6   : > { %2877 = vst.msk [vmem:[#allocation5 + $0x50] sm:$0x7f] %vm2767_vm7, %v2860_v31  ;;  %v3705_v10 = vrot.slane %v3689_v26, %v14900_v2  ;;  %v3299_v26 = vrot.slane %v2942_v48, %v14900_v2 }
 0x3f7   : > { %v2535_v49 = vmax.f32 %v2471_v60, %v2506_v29  ;;  %v2505_v8 = vrot.slane %v2470_v30, 1  ;;  %v2555_v43 = vrot.slane %v2470_v30, 2  ;;  %v2700_v46 = vpop.permute.xlu0 %2699 }
 0x3f8   : > { %2716 = vst.msk [vmem:[#allocation5 + $0x78] sm:$0x7f] %vm2710_vm4, %v2700_v46 }
 0x3f9   : > { %v2585_v33 = vmax.f32 %v2535_v49, %v2556_v39  ;;  %v2507_v45 = vsel %vm17709_vm1, %v2505_v8, %v2506_v29  ;;  %v2889_v47 = vpop.permute.xlu1 %2888  ;;  %v2557_v5 = vsel %vm17710_vm8, %v2555_v43, %v2556_v39  ;;  %v2822_v29 = vrot.slane %v2665_v25, 2  ;;  %vm17712_vm1 = vmmov %vm17710_vm8 }
 0x3fa   : > { %v2534_v9 = vmax.f32 %v2470_v30, %v2507_v45  ;;  %2906 = vst.msk [vmem:[#allocation5 + $0x50] sm:$0x7f] %vm2797_vm3, %v2889_v47  ;;  %v15126_v49 = vrot.slane %v3688_v27, %v14900_v2  ;;  %v2984_v45 = vld [vmem:[%s17497_s3 + $0x118] sm:$0xff]  ;;  %v2983_v47 = vld [vmem:[%s17497_s3 + $0x110] sm:$0xff]  ;;  %vm17713_vm8 = vmmov %vm17711_vm9 }
 0x3fb   : > { %2601 = vst.msk [vmem:[#allocation6 + $0x68] sm:$0x3f] %vm17706_vm10, %v2585_v33  ;;  %13070 = vmatpush3.msra.mxu1 %v2984_v45  ;;  %vm13294_vm10 = vmmov 0  }
 0x3fc   : > { %v2584_v13 = vmax.f32 %v2534_v9, %v2557_v5  ;;  %13071 = vmatprep.subr.mxu1 %v13282_v0  ;;  %v2982_v9 = vld [vmem:[%s17497_s3 + $0x108] sm:$0xff]  ;;  %v2981_v5 = vld [vmem:[%s17497_s3 + $0x100] sm:$0xff] }
 0x3fd   : > { %v2833_v18 = vpop.permute.xlu1 %2832  ;;  %13072 = vmatpush3.msra.mxu1 %v2983_v47 }
 0x3fe   : > { %2600 = vst.msk [vmem:[#allocation6 + $0x60] sm:$0xff] %vm17711_vm9, %v2584_v13  ;;  %13073 = vmatprep.subr.mxu1 %v13282_v0  ;;  %v15173_v13 = vld [vmem:[#allocation2 + $0x180] sm:$0xff]  ;;  %vm17714_vm9 = vmmov %vm17713_vm8 }
 0x3ff   : > { %2849 = vst.msk [vmem:[#allocation5 + $0x68] sm:$0x7f] %vm2710_vm4, %v2833_v18  ;;  %13074 = vmatpush3.msra.mxu1 %v2982_v9  ;;  %v15177_v18 = vld [vmem:[#allocation2 + $0x190] sm:$0x3] }
 0x400   : > { %13075 = vmatprep.subr.mxu1 %v13282_v0 }
 0x401   : > { %v15096_v51 = vld [vmem:[#allocation5 + $0x50] sm:$0x7f]  ;;  %13076 = vmatpush3.msra.mxu1 %v2981_v5 }
 0x402   : > { %v3210_v16 = vcombine.low %v15094_v63, %v15096_v51  ;;  %13098 = vmatprep.subr.mxu1 %v13282_v0  ;;  %v3211_v4 = vcombine.high %v15094_v63, %v15096_v51 }
 0x404   : > { %v3219_v3 = vrot.slane %v3210_v16, %v14900_v2  ;;  %v3226_v16 = vrot.slane %v3211_v4, %v14900_v2 }
 0x405   : > { %v2614_v7 = vld [vmem:[#allocation6 + $0x60] ss:$2 sm:$0x7f] }
 0x406   : > { %v2640_v24 = vmax.f32 %v2614_v7, 0.0  ;;  %v3241_v14 = vcombine.low %v3219_v3, %v3233_v6  ;;  %v3242_v23 = vcombine.high %v3219_v3, %v3233_v6  ;;  %v3240_v6 = vrot.slane %v3212_v57, %v14900_v2 }
 0x408   : > { %2649 = vst.msk [vmem:[#allocation4 + $0x71] sm:$0x7f] %vm2642_vm5, %v2640_v24  ;;  %v3251_v20 = vrot.slane %v3241_v14, %v14900_v2  ;;  %v15115_v36 = vrot.slane %v3242_v23, %v14900_v2  ;;  %v3243_v11 = vcombine.low %v3226_v16, %v3240_v6  ;;  %v3244_v24 = vcombine.high %v3226_v16, %v3240_v6 }
 0x40a   : > { %v3273_v54 = vcombine.high %v3251_v20, %v3251_v20  ;;  %v3658_v22 = vcombine.low %v3208_v17, %v3251_v20  ;;  %v3258_v35 = vrot.slane %v3243_v11, %v14900_v2  ;;  %v3275_v17 = vcombine.high %v15115_v36, %v15115_v36 }
 0x40c   : > { %v3659_v40 = vcombine.low %v15115_v36, %v3273_v54  ;;  %v3680_v42 = vrot.slane %v3658_v22, %v14900_v2  ;;  %v3274_v23 = vcombine.high %v3258_v35, %v3258_v35  ;;  %v3272_v54 = vrot.slane %v3244_v24, %v14900_v2 }
 0x40e   : > { %v3687_v60 = vrot.slane %v3659_v40, %v14900_v2 }
 0x40f   : > { %v2664_v30 = vld [vmem:[#allocation4 + $0x70] sm:$0xff] }
 0x410   : > { %2863 = vrot.lane.b32.xlu1 %v2664_v30, %s13291_s22  ;;  %2788 = vrot.lane.b32.xlu0 %v2664_v30, %s13292_s16  ;;  %v2805_v28 = vrot.slane %v2664_v30, 1  ;;  %v3691_v32 = vcombine.high %v3680_v42, %v3687_v60  ;;  %v3690_v55 = vcombine.low %v3680_v42, %v3687_v60  ;;  %v2821_v31 = vrot.slane %v2664_v30, 2 }
 0x411   : > { %v3723_v42 = vcombine.low %v3275_v17, %v3258_v35  ;;  %v3724_v60 = vcombine.low %v3272_v54, %v3274_v23 }
 0x412   : > { %2819 = vst.msk [vmem:[#allocation5 + $0x98] sm:$0x7f] %vm2642_vm5, %v2805_v28  ;;  %v3719_v38 = vrot.slane %v3691_v32, %v14900_v2  ;;  %v15129_v39 = vrot.slane %v3690_v55, %v14900_v2  ;;  %v2823_v8 = vsel %vm17712_vm1, %v2821_v31, %v2822_v29  ;;  %vm17715_vm1 = vmmov %vm17713_vm8 }
 0x413   : > { %2926 = vst.msk [vmem:[#allocation5 + $0x88] sm:$0x7f] %vm2642_vm5, %v2823_v8  ;;  %v3740_v32 = vrot.slane %v3724_v60, %v14900_v2  ;;  %vm17718_vm11 = vmmov %vm17715_vm1 }
 0x414   : > { %2892 = vrot.lane.b32.xlu1 %v2805_v28, %s13292_s16  ;;  %v3722_v43 = vcombine.low %v3705_v10, %v3719_v38  ;;  %v3720_v46 = vcombine.low %v15126_v49, %v15129_v39  ;;  %v3721_v33 = vcombine.high %v15126_v49, %v15129_v39  ;;  %v3733_v28 = vrot.slane %v3723_v42, %v14900_v2 }
 0x415   : > { %5165 = vrot.lane.b32.xlu0 %v2682_v53, %s13290_s30 }
 0x416   : > { %4188 = vmatprep.mubr.f32.mxu1 %v3722_v43  ;;  %v3755_v43 = vcombine.low %v3733_v28, %v3740_v32 }
 0x417   : > { %4189 = vmatmul.mubr.f32.gmra.mxu1 %v3720_v46 }
 0x418   : > { %2836 = vrot.lane.b32.xlu1 %v2823_v8, %s13290_s30  ;;  %v3756_v8 = vcombine.high %v3733_v28, %v3740_v32  ;;  %v15210_v9 = vrot.slane %v3755_v43, %v14900_v2 }
 0x41a   : > { %v3772_v47 = vrot.slane %v3756_v8, %v14900_v2  ;;  %v2945_v11 = vld [vmem:[#allocation5 + $0x88] sm:$0x7f] }
 0x41b   : > { %v3344_v24 = vcombine.high %v2945_v11, %v2945_v11 }
 0x41c   : > { %2865 = vrot.lane.b32.xlu1 %v14992_v62, %s13291_s22  ;;  %v15159_v62 = vld [vmem:[#allocation2 + $0x178] sm:$0x3] }
 0x420   : > { %2894 = vrot.lane.b32.xlu1 %v2881_v44, %s13292_s16 }
 0x424   : > { %734 = vrot.lane.b32.xlu1 %v14321_v58, %s13283_s23 }
 0x425   : > { %v12787_v12 = vpop.f32.mrf.mxu1 }
 0x428   : > { %927 = vrot.lane.b32.xlu1 %v14323_v59, %s13284_s24 }
 0x42c   : > { %931 = vrot.lane.b32.xlu1 %v15159_v62, %s13284_s24 }
 0x430   : > { %1096 = vrot.lane.b32.xlu1 %v15166_v19, %s13285_s25 }
 0x434   : > { %1256 = vrot.lane.b32.xlu1 %v15166_v19, %s13286_s26 }
 0x438   : > { %1449 = vrot.lane.b32.xlu1 %v15173_v13, %s13287_s27 }
 0x43c   : > { %1453 = vrot.lane.b32.xlu1 %v15177_v18, %s13287_s27 }
 0x44d   : > { %v2862_v50 = vpop.permute.xlu1 %2861 }
 0x44e   : > { %2878 = vst.msk [vmem:[#allocation5 + $0x68] sm:$0x7f] %vm2767_vm7, %v2862_v50 }
 0x450   : > { %v2835_v61 = vpop.permute.xlu0 %2834 }
 0x451   : > { %2850 = vst.msk [vmem:[#allocation5 + $0x80] sm:$0x7f] %vm2710_vm4, %v2835_v61  ;;  %v2785_v3 = vpop.permute.xlu1 %2784 }
 0x452   : > { %2802 = vst.msk [vmem:[#allocation5 + $0x60] sm:$0x7f] %vm2797_vm3, %v2785_v3 }
 0x454   : > { %v2757_v7 = vpop.permute.xlu0 %2756 }
 0x455   : > { %2773 = vst.msk [vmem:[#allocation5 + $0x78] sm:$0x7f] %vm2767_vm7, %v2757_v7  ;;  %v2891_v63 = vpop.permute.xlu1 %2890  ;;  %v3278_v7 = vcombine.high %v2942_v48, %v2942_v48  ;;  %v3365_v48 = vrot.slane %v2945_v11, %v14900_v2 }
 0x456   : > { %2907 = vst.msk [vmem:[#allocation5 + $0x68] sm:$0x7f] %vm2797_vm3, %v2891_v63 }
 0x457   : > { %v3306_v35 = vrot.slane %v3278_v7, %v14900_v2 }
 0x458   : > { %v2787_v51 = vpop.permute.xlu0 %2786 }
 0x459   : > { %2803 = vst.msk [vmem:[#allocation5 + $0x78] sm:$0x7f] %vm2797_vm3, %v2787_v51  ;;  %v2940_v20 = vld [vmem:[#allocation5 + $0x60] sm:$0x7f] }
 0x45c   : > { %v2702_v14 = vpop.permute.xlu0 %2701 }
 0x45d   : > { %v2941_v21 = vld [vmem:[#allocation5 + $0x68] sm:$0x7f]  ;;  %2717 = vst.msk [vmem:[#allocation5 + $0x90] sm:$0x7f] %vm2710_vm4, %v2702_v14 }
 0x45e   : > { %v3276_v22 = vcombine.low %v2940_v20, %v2941_v21  ;;  %v3277_v3 = vcombine.high %v2940_v20, %v2941_v21 }
 0x460   : > { %v2759_v25 = vpop.permute.xlu0 %2758  ;;  %v3285_v40 = vrot.slane %v3276_v22, %v14900_v2  ;;  %v3292_v63 = vrot.slane %v3277_v3, %v14900_v2  ;;  %v2943_v17 = vld [vmem:[#allocation5 + $0x78] sm:$0x7f] }
 0x461   : > { %2774 = vst.msk [vmem:[#allocation5 + $0x90] sm:$0x7f] %vm2767_vm7, %v2759_v25  ;;  %v3372_v25 = vrot.slane %v3344_v24, %v14900_v2 }
 0x462   : > { %v3307_v27 = vcombine.low %v3285_v40, %v3299_v26  ;;  %v3308_v29 = vcombine.high %v3285_v40, %v3299_v26  ;;  %v3309_v14 = vcombine.low %v3292_v63, %v3306_v35  ;;  %v3310_v23 = vcombine.high %v3292_v63, %v3306_v35 }
 0x464   : > { %v3317_v36 = vrot.slane %v3307_v27, %v14900_v2  ;;  %v3331_v30 = vrot.slane %v3308_v29, %v14900_v2  ;;  %v3324_v40 = vrot.slane %v3309_v14, %v14900_v2  ;;  %v3338_v26 = vrot.slane %v3310_v23, %v14900_v2 }
 0x466   : > { %v3725_v55 = vcombine.low %v3317_v36, %v3331_v30  ;;  %v12666_v31 = vcombine.high %v3317_v36, %v3331_v30  ;;  %v3340_v28 = vcombine.high %v3324_v40, %v3324_v40 }
 0x468   : > { %v3747_v10 = vrot.slane %v3725_v55, %v14900_v2  ;;  %v3754_v38 = vrot.slane %v12666_v31, %v14900_v2  ;;  %v3790_v31 = vcombine.low %v3324_v40, %v3338_v26 }
 0x46a   : > { %v3758_v46 = vcombine.high %v3747_v10, %v3754_v38  ;;  %v3757_v45 = vcombine.low %v3747_v10, %v3754_v38  ;;  %v2948_v10 = vld [vmem:[#allocation5 + $0xa0] sm:$0x7f] }
 0x46b   : > { %v3431_v24 = vrot.slane %v2948_v10, %v14900_v2 }
 0x46c   : > { %v3786_v44 = vrot.slane %v3758_v46, %v14900_v2  ;;  %v15213_v5 = vrot.slane %v3757_v45, %v14900_v2  ;;  %v3410_v45 = vcombine.high %v2948_v10, %v2948_v10 }
 0x46e   : > { %v3789_v4 = vcombine.low %v3772_v47, %v3786_v44  ;;  %v3787_v50 = vcombine.low %v15210_v9, %v15213_v5  ;;  %v3788_v57 = vcombine.high %v15210_v9, %v15213_v5  ;;  %v3438_v14 = vrot.slane %v3410_v45, %v14900_v2 }
 0x470   : > { %4193 = vmatprep.mubr.f32.mxu1 %v3789_v4  ;;  %v3800_v4 = vrot.slane %v3790_v31, %v14900_v2 }
 0x471   : > { %4194 = vmatmul.mubr.f32.gmra.mxu1 %v3787_v50 }
 0x482   : > { %v2864_v61 = vpop.permute.xlu1 %2863  ;;  %v2789_v16 = vpop.permute.xlu0 %2788 }
 0x483   : > { %2879 = vst.msk [vmem:[#allocation5 + $0x80] sm:$0x7f] %vm2767_vm7, %v2864_v61 }
 0x484   : > { %2804 = vst.msk [vmem:[#allocation5 + $0x90] sm:$0x7f] %vm2797_vm3, %v2789_v16 }
 0x486   : > { %v2893_v6 = vpop.permute.xlu1 %2892 }
 0x487   : > { %2908 = vst.msk [vmem:[#allocation5 + $0x80] sm:$0x7f] %vm2797_vm3, %v2893_v6 }
 0x48a   : > { %v2837_v51 = vpop.permute.xlu1 %2836 }
 0x48b   : > { %2851 = vst.msk [vmem:[#allocation5 + $0x98] sm:$0x7f] %vm2710_vm4, %v2837_v51  ;;  %v2946_v3 = vld [vmem:[#allocation5 + $0x90] sm:$0x7f] }
 0x48e   : > { %v2944_v54 = vld [vmem:[#allocation5 + $0x80] sm:$0x7f]  ;;  %v2866_v22 = vpop.permute.xlu1 %2865 }
 0x48f   : > { %2880 = vst.msk [vmem:[#allocation5 + $0x98] sm:$0x7f] %vm2767_vm7, %v2866_v22  ;;  %v3342_v20 = vcombine.low %v2943_v17, %v2944_v54  ;;  %v3343_v21 = vcombine.high %v2943_v17, %v2944_v54 }
 0x491   : > { %v3351_v42 = vrot.slane %v3342_v20, %v14900_v2  ;;  %v3358_v60 = vrot.slane %v3343_v21, %v14900_v2 }
 0x492   : > { %v2895_v27 = vpop.permute.xlu1 %2894 }
 0x493   : > { %2909 = vst.msk [vmem:[#allocation5 + $0x98] sm:$0x7f] %vm2797_vm3, %v2895_v27  ;;  %v3373_v29 = vcombine.low %v3351_v42, %v3365_v48  ;;  %v3374_v36 = vcombine.high %v3351_v42, %v3365_v48  ;;  %v3375_v30 = vcombine.low %v3358_v60, %v3372_v25  ;;  %v3376_v16 = vcombine.high %v3358_v60, %v3372_v25 }
 0x495   : > { %v3383_v32 = vrot.slane %v3373_v29, %v14900_v2  ;;  %v3397_v55 = vrot.slane %v3374_v36, %v14900_v2  ;;  %v3390_v38 = vrot.slane %v3375_v30, %v14900_v2  ;;  %v3404_v22 = vrot.slane %v3376_v16, %v14900_v2 }
 0x497   : > { %v3405_v8 = vcombine.high %v3383_v32, %v3383_v32  ;;  %v3407_v43 = vcombine.high %v3397_v55, %v3397_v55  ;;  %v3791_v46 = vcombine.low %v3340_v28, %v3383_v32  ;;  %v3406_v54 = vcombine.high %v3390_v38, %v3390_v38 }
 0x499   : > { %v3792_v47 = vcombine.low %v3397_v55, %v3405_v8  ;;  %v3793_v44 = vcombine.low %v3407_v43, %v3390_v38  ;;  %v3807_v50 = vrot.slane %v3791_v46, %v14900_v2  ;;  %v3857_v28 = vcombine.low %v3404_v22, %v3406_v54 }
 0x49a   : > { %v2947_v61 = vld [vmem:[#allocation5 + $0x98] sm:$0x7f] }
 0x49b   : > { %v3814_v6 = vrot.slane %v3792_v47, %v14900_v2  ;;  %v3821_v7 = vrot.slane %v3793_v44, %v14900_v2  ;;  %v3823_v11 = vcombine.high %v3800_v4, %v3807_v50  ;;  %v3822_v63 = vcombine.low %v3800_v4, %v3807_v50 }
 0x49c   : > { %v3408_v51 = vcombine.low %v2946_v3, %v2947_v61  ;;  %v3409_v35 = vcombine.high %v2946_v3, %v2947_v61  ;;  %v3867_v45 = vrot.slane %v3857_v28, %v14900_v2 }
 0x49d   : > { %v3825_v23 = vcombine.high %v3814_v6, %v3821_v7  ;;  %v3824_v17 = vcombine.low %v3814_v6, %v3821_v7  ;;  %v3839_v48 = vrot.slane %v3823_v11, %v14900_v2  ;;  %v3832_v40 = vrot.slane %v3822_v63, %v14900_v2 }
 0x49e   : > { %v3417_v20 = vrot.slane %v3408_v51, %v14900_v2  ;;  %v3424_v21 = vrot.slane %v3409_v35, %v14900_v2 }
 0x49f   : > { %v3853_v25 = vrot.slane %v3825_v23, %v14900_v2  ;;  %v3846_v26 = vrot.slane %v3824_v17, %v14900_v2 }
 0x4a0   : > { %v3439_v42 = vcombine.low %v3417_v20, %v3431_v24  ;;  %v3440_v60 = vcombine.high %v3417_v20, %v3431_v24  ;;  %v3441_v27 = vcombine.low %v3424_v21, %v3438_v14  ;;  %v3442_v29 = vcombine.high %v3424_v21, %v3438_v14 }
 0x4a1   : > { %v3856_v36 = vcombine.low %v3839_v48, %v3853_v25  ;;  %v3854_v30 = vcombine.low %v3832_v40, %v3846_v26  ;;  %v3855_v34 = vcombine.high %v3832_v40, %v3846_v26 }
 0x4a2   : > { %v3449_v32 = vrot.slane %v3439_v42, %v14900_v2  ;;  %v3456_v55 = vrot.slane %v3441_v27, %v14900_v2  ;;  %v3463_v31 = vrot.slane %v3440_v60, %v14900_v2  ;;  %v3470_v10 = vrot.slane %v3442_v29, %v14900_v2 }
 0x4a3   : > { %4198 = vmatprep.mubr.f32.mxu1 %v3856_v36 }
 0x4a4   : > { %4199 = vmatmul.mubr.f32.gmra.mxu1 %v3854_v30  ;;  %v3858_v38 = vcombine.low %v3449_v32, %v3463_v31  ;;  %v12667_v8 = vcombine.high %v3449_v32, %v3463_v31  ;;  %v3860_v43 = vcombine.low %v3456_v55, %v3470_v10  ;;  %v3472_v46 = vcombine.high %v3456_v55, %v3456_v55 }
 0x4a6   : > { %v3874_v47 = vrot.slane %v3858_v38, %v14900_v2  ;;  %v3881_v44 = vrot.slane %v12667_v8, %v14900_v2  ;;  %v3888_v4 = vrot.slane %v3860_v43, %v14900_v2  ;;  %v3930_v50 = vrot.slane %v3472_v46, %v14900_v2 }
 0x4a8   : > { %v3890_v61 = vcombine.high %v3867_v45, %v3874_v47  ;;  %v3892_v16 = vcombine.high %v3881_v44, %v3888_v4  ;;  %v3889_v3 = vcombine.low %v3867_v45, %v3874_v47  ;;  %v3891_v6 = vcombine.low %v3881_v44, %v3888_v4 }
 0x4a9   : > { %v3931_v7 = vcombine.high %v3930_v50, %v3930_v50  ;;  %v3938_v17 = vrot.slane %v3930_v50, %v14900_v2 }
 0x4aa   : > { %v3906_v11 = vrot.slane %v3890_v61, %v14900_v2  ;;  %v3920_v63 = vrot.slane %v3892_v16, %v14900_v2  ;;  %v3899_v51 = vrot.slane %v3889_v3, %v14900_v2  ;;  %v3913_v35 = vrot.slane %v3891_v6, %v14900_v2 }
 0x4ab   : > { %v3945_v23 = vrot.slane %v3931_v7, %v14900_v2 }
 0x4ac   : > { %v3923_v24 = vcombine.low %v3906_v11, %v3920_v63  ;;  %v3921_v14 = vcombine.low %v3899_v51, %v3913_v35  ;;  %v3922_v1 = vcombine.high %v3899_v51, %v3913_v35 }
 0x4ae   : > { %4203 = vmatprep.mubr.f32.mxu1 %v3923_v24 }
 0x4af   : > { %4204 = vmatmul.mubr.f32.gmra.mxu1 %v3921_v14 }
 0x4b0   : > { %4208 = vmatprep.mubr.f32.mxu1 %v3945_v23 }
 0x4b3   : > { %4209 = vmatmul.mubr.f32.gmra.mxu1 %v3938_v17 }
 0x4b4   : > { %13077 = vmatprep.mubr.msk.f32.mxu1 %vm13294_vm10, %v13282_v0 }
 0x4b7   : > { %13078 = vmatmul.mubr.msk.f32.vlgmr.msra.gmra.mxu1 %vm17713_vm8, %v3587_v15  ;;  %vm17716_vm8 = vmmov %vm17715_vm1  ;;  %v3946_v15 = vcombine.high %v3938_v17, %v3938_v17 }
 0x4b8   : > { %13080 = vmatprep.mubr.msk.f32.mxu1 %vm13294_vm10, %v13282_v0 }
 0x4bb   : > { %13081 = vmatmul.mubr.msk.f32.gmra.mxu1 %vm17714_vm9, %v3654_v52  ;;  %vm17717_vm9 = vmmov %vm17715_vm1 }
 0x4bc   : > { %13083 = vmatprep.mubr.msk.f32.mxu1 %vm13294_vm10, %v13282_v0 }
 0x4bf   : > { %13084 = vmatmul.mubr.msk.f32.gmra.mxu1 %vm17715_vm1, %v3721_v33 }
 0x4c0   : > { %13086 = vmatprep.mubr.msk.f32.mxu1 %vm13294_vm10, %v13282_v0 }
 0x4c3   : > { %13087 = vmatmul.mubr.msk.f32.gmra.mxu1 %vm17716_vm8, %v3788_v57  ;;  %vm17719_vm8 = vcmask 1045504  }
 0x4c4   : > { %13089 = vmatprep.mubr.msk.f32.mxu1 %vm13294_vm10, %v13282_v0  ;;  %v5202_v52 = vsel %vm17719_vm8, %v2725_v56, %v5201_v41  ;;  %v12788_v56 = vpop.f32.mrf.mxu1  ;;  %vm17724_vm8 = vcmask 97344  }
 0x4c5   : > { %5221 = vrot.lane.b32.xlu0 %v5202_v52, %s13291_s22  ;;  %v12789_v51 = vadd.f32 %v12788_v56, %v12787_v12 }
 0x4c6   : > { %v12790_v39 = vpop.f32.mrf.mxu1 }
 0x4c7   : > { %13090 = vmatmul.mubr.msk.f32.gmra.mxu1 %vm17717_vm9, %v3855_v34  ;;  %vm17722_vm9 = vcmask 57376  }
 0x4c8   : > { %13092 = vmatprep.mubr.msk.f32.mxu1 %vm13294_vm10, %v13282_v0 }
 0x4c9   : > { %732 = vrot.lane.b32.xlu0 %v14323_v59, %s13283_s23  ;;  %v12663_v59 = vld [vmem:[%s17498_s4] ss:$0 sm:$0xff] }
 0x4ca   : > { %v3474_v53 = vcombine.high %v12663_v59, %v12663_v59 }
 0x4cb   : > { %13093 = vmatmul.mubr.msk.f32.gmra.mxu1 %vm17718_vm11, %v3922_v1  ;;  %vm17721_vm11 = vcmask 97346  }
 0x4cc   : > { %13095 = vmatprep.mubr.msk.f32.mxu1 %vm13294_vm10, %v13282_v0  ;;  %v3488_v49 = vrot.slane %v3474_v53, %v14900_v2 }
 0x4cd   : > { %736 = vrot.lane.b32.xlu0 %v15159_v62, %s13283_s23 }
 0x4ce   : > { %v3490_v62 = vcombine.high %v3488_v49, %v3488_v49 }
 0x4cf   : > { %13096 = vmatmul.mubr.msk.f32.gmra.mxu1 %vm17715_vm1, %v3946_v15  ;;  %vm17723_vm1 = vcmask 91200  }
 0x4d0   : > { %13106 = vmatprep.mubr.msk.f32.mxu1 %vm13294_vm10, %v13282_v0  ;;  %v3518_v57 = vrot.slane %v3490_v62, %v14900_v2  ;;  %v15351_v62 = vld [vmem:[#allocation4 + $0x28] sm:$0x1] }
 0x4d1   : > { %929 = vrot.lane.b32.xlu0 %v14321_v58, %s13284_s24  ;;  %v3481_v58 = vrot.slane %v12663_v59, %v14900_v2  ;;  %s17737_s24 = smov 28  }
 0x4d3   : > { %v3489_v33 = vcombine.high %v3481_v58, %v3481_v58 }
 0x4d5   : > { %1094 = vrot.lane.b32.xlu0 %v15173_v13, %s13285_s25  ;;  %v3511_v5 = vrot.slane %v3489_v33, %v14900_v2  ;;  %v15349_v33 = vld [vmem:[#allocation4 + $0x18] sm:$0x1] }
 0x4d7   : > { %v3521_v20 = vcombine.high %v3511_v5, %v3511_v5 }
 0x4d9   : > { %1254 = vrot.lane.b32.xlu0 %v15173_v13, %s13286_s26  ;;  %v3504_v13 = vrot.slane %v3488_v49, %v14900_v2 }
 0x4db   : > { %v15329_v54 = vcombine.high %v3504_v13, %v3504_v13  ;;  %v3963_v40 = vcombine.low %v3504_v13, %v3518_v57  ;;  %v4011_v27 = vcombine.low %v3521_v20, %v3504_v13  ;;  %v15353_v13 = vld [vmem:[#allocation4 + $0x38] sm:$0x1] }
 0x4dd   : > { %1258 = vrot.lane.b32.xlu0 %v15177_v18, %s13286_s26  ;;  %v12791_v18 = vpop.f32.mrf.mxu1  ;;  %v4012_v29 = vcombine.low %v3518_v57, %v15329_v54  ;;  %v3985_v28 = vrot.slane %v3963_v40, %v14900_v2  ;;  %v4026_v10 = vrot.slane %v4011_v27, %v14900_v2  ;;  %v4085_v59 = vrot.slane %v15329_v54, %v14900_v2 }
 0x4de   : > { %v12792_v34 = vadd.f32 %v12791_v18, %v12790_v39 }
 0x4df   : > { %v12793_v9 = vpop.f32.mrf.mxu1  ;;  %v4033_v38 = vrot.slane %v4012_v29, %v14900_v2  ;;  %v15359_v20 = vrot.slane %v4085_v59, %v14900_v2 }
 0x4e1   : > { %1451 = vrot.lane.b32.xlu0 %v15166_v19, %s13287_s27  ;;  %v3497_v19 = vrot.slane %v3481_v58, %v14900_v2  ;;  %v12794_v21 = vpop.f32.mrf.mxu1  ;;  %v4068_v6 = vcombine.low %v4026_v10, %v4033_v38 }
 0x4e2   : > { %v12795_v37 = vadd.f32 %v12794_v21, %v12793_v9  ;;  %v15361_v21 = vld [vmem:[#allocation4 + $0x48] sm:$0x1] }
 0x4e3   : > { %v3519_v22 = vcombine.high %v3497_v19, %v3497_v19  ;;  %v3961_v48 = vcombine.low %v3497_v19, %v3511_v5  ;;  %v12668_v25 = vcombine.high %v3497_v19, %v3511_v5  ;;  %v3964_v26 = vcombine.low %v15329_v54, %v3497_v19 }
 0x4e4   : > { %v4075_v17 = vrot.slane %v4068_v6, %v14900_v2 }
 0x4e5   : > { %v4010_v60 = vcombine.low %v3511_v5, %v3519_v22  ;;  %v3971_v36 = vrot.slane %v3961_v48, %v14900_v2  ;;  %v3978_v30 = vrot.slane %v12668_v25, %v14900_v2  ;;  %v3992_v32 = vrot.slane %v3964_v26, %v14900_v2  ;;  %v15363_v48 = vld [vmem:[#allocation4 + $0x58] sm:$0x1] }
 0x4e6   : > { %v5204_v26 = vrot.slane %v15349_v33, 2 }
 0x4e7   : > { %v4019_v31 = vrot.slane %v4010_v60, %v14900_v2  ;;  %v3993_v43 = vcombine.low %v3971_v36, %v3978_v30  ;;  %v3994_v46 = vcombine.low %v3985_v28, %v3992_v32  ;;  %v4035_v47 = vcombine.low %v4033_v38, %v3971_v36  ;;  %v5166_v38 = vpop.permute.xlu0 %5165 }
 0x4e8   : > { %v4051_v61 = vcombine.low %v3978_v30, %v3985_v28  ;;  %v5210_v60 = vrot.slane %v15353_v13, 2  ;;  %5186 = vst.msk [vmem:[#allocation5] sm:$0x7f] %vm2710_vm4, %v5166_v38 }
 0x4e9   : > { %v4034_v45 = vcombine.low %v4019_v31, %v4026_v10  ;;  %v4001_v4 = vrot.slane %v3993_v43, %v14900_v2  ;;  %v4008_v50 = vrot.slane %v3994_v46, %v14900_v2  ;;  %v4052_v16 = vcombine.low %v3992_v32, %v4019_v31 }
 0x4ea   : > { %v4049_v11 = vrot.slane %v4035_v47, %v14900_v2  ;;  %v4059_v24 = vrot.slane %v4051_v61, %v14900_v2  ;;  %v5213_v31 = vrot.slane %v15361_v21, 2  ;;  %v5216_v10 = vrot.slane %v15363_v48, 2 }
 0x4eb   : > { %v4042_v7 = vrot.slane %v4034_v45, %v14900_v2  ;;  %v4009_v35 = vcombine.low %v4001_v4, %v4008_v50  ;;  %v4066_v14 = vrot.slane %v4052_v16, %v14900_v2  ;;  %v4076_v12 = vcombine.low %v4075_v17, %v4001_v4 }
 0x4ec   : > { %v4078_v5 = vcombine.low %v4049_v11, %v4059_v24 }
 0x4ed   : > { %v4050_v1 = vcombine.low %v4042_v7, %v4049_v11  ;;  %v4181_v41 = vadd.f32 %v12789_v51, %v4009_v35  ;;  %v4067_v52 = vcombine.low %v4059_v24, %v4066_v14  ;;  %v4077_v9 = vcombine.low %v4008_v50, %v4042_v7 }
 0x4ef   : > { %v4186_v49 = vadd.f32 %v12792_v34, %v4050_v1  ;;  %v15356_v54 = vadd.f32 %v12795_v37, %v4067_v52 }
 0x531   : > { %v12796_v42 = vpop.f32.mrf.mxu1 }
 0x533   : > { %v12797_v55 = vpop.f32.mrf.mxu1 }
 0x534   : > { %v12798_v53 = vadd.f32 %v12797_v55, %v12796_v42  ;;  %v5207_v42 = vrot.slane %v15351_v62, 2  ;;  %v15545_v62 = vld [vmem:[#allocation4 + $0x80] sm:$0xff] }
 0x536   : > { %v15365_v40 = vadd.f32 %v12798_v53, %v4076_v12 }
 0x537   : > { %v5222_v14 = vpop.permute.xlu0 %5221 }
 0x538   : > { %5242 = vst.msk [vmem:[#allocation5] sm:$0x7f] %vm2767_vm7, %v5222_v14 }
 0x564   : > { %v12799_v8 = vpop.f32.mrf.mxu1 }
 0x566   : > { %v12800_v44 = vpop.f32.mrf.mxu1 }
 0x567   : > { %v12801_v39 = vadd.f32 %v12800_v44, %v12799_v8 }
 0x569   : > { %v15372_v32 = vadd.f32 %v12801_v39, %v4077_v9 }
 0x56f   : > { %v12802_v3 = vpop.f32.mrf.mxu1 }
 0x571   : > { %v12803_v63 = vpop.f32.mrf.mxu1 }
 0x572   : > { %v12804_v18 = vadd.f32 %v12803_v63, %v12802_v3 }
 0x573   : > { %v12805_v23 = vpop.f32.mrf.mxu1 }
 0x574   : > { %v15374_v55 = vadd.f32 %v12804_v18, %v4078_v5 }
 0x575   : > { %v12806_v15 = vpop.f32.mrf.mxu1 }
 0x576   : > { %v15381_v47 = vadd.f32 %v12806_v15, %v12805_v23  ;;  %v735_v15 = vpop.permute.xlu1 %734 }
 0x577   : > { %v4280_v58 = vpop.f32.mrf.mxu1  ;;  %835 = vst.msk [vmem:[#allocation3 + $0xf7] sm:$0xff] %vm788_vm6, %v735_v15  ;;  %vm17720_vm6 = vcmask 64545  }
 0x578   : > { %v4281_v56 = vadd.f32 %v4280_v58, %v4181_v41 }
 0x579   : > { %v13079_v19 = vpop.f32.mrf.mxu1 }
 0x57a   : > { %v4321_v57 = vcombine.high %v4281_v56, %v4281_v56  ;;  %v4328_v22 = vrot.slane %v4281_v56, %v14900_v2 }
 0x57b   : > { %v4285_v25 = vpop.f32.mrf.mxu1 }
 0x57c   : > { %v4335_v27 = vrot.slane %v4321_v57, %v14900_v2  ;;  %v4336_v29 = vcombine.high %v4328_v22, %v4328_v22  ;;  %v4344_v36 = vrot.slane %v4328_v22, %v14900_v2  ;;  %v4286_v30 = vadd.f32 %v4285_v25, %v4186_v49  ;;  %v733_v57 = vpop.permute.xlu0 %732 }
 0x57d   : > { %v13082_v28 = vpop.f32.mrf.mxu1  ;;  %834 = vst.msk [vmem:[#allocation3 + $0xef] sm:$0xfe] %vm17720_vm6, %v733_v57  ;;  %vm17725_vm6 = vcmask 130144  }
 0x57e   : > { %v4337_v8 = vcombine.high %v4335_v27, %v4335_v27  ;;  %v4351_v43 = vrot.slane %v4335_v27, %v14900_v2  ;;  %v4358_v46 = vrot.slane %v4336_v29, %v14900_v2  ;;  %v4366_v45 = vcombine.high %v4344_v36, %v4344_v36 }
 0x57f   : > { %v4678_v44 = vmax.f32 %v4344_v36, 0.0  ;;  %v4370_v4 = vcombine.high %v4286_v30, %v4286_v30  ;;  %v4377_v50 = vrot.slane %v4286_v30, %v14900_v2  ;;  %v15384_v61 = vpop.f32.mrf.mxu1  ;;  %v928_v36 = vpop.permute.xlu1 %927 }
 0x580   : > { %v4365_v16 = vrot.slane %v4337_v8, %v14900_v2  ;;  %v4367_v3 = vcombine.high %v4351_v43, %v4351_v43  ;;  %v4368_v6 = vcombine.high %v4358_v46, %v4358_v46  ;;  %v4679_v7 = vmax.f32 %v4358_v46, 0.0  ;;  %1029 = vst.msk [vmem:[#allocation3 + $0xee] sm:$0xfc] %vm17721_vm11, %v928_v36  ;;  %vm17726_vm11 = vmmov %vm17725_vm6 }
 0x581   : > { %v4680_v11 = vmax.f32 %v4366_v45, 0.0  ;;  %v4682_v63 = vmax.f32 %v4351_v43, 0.0  ;;  %v4384_v51 = vrot.slane %v4370_v4, %v14900_v2  ;;  %v4385_v35 = vcombine.high %v4377_v50, %v4377_v50  ;;  %v13085_v24 = vpop.f32.mrf.mxu1 }
 0x582   : > { %v4369_v23 = vcombine.high %v4365_v16, %v4365_v16  ;;  %v4681_v17 = vmax.f32 %v4368_v6, 0.0  ;;  %v4683_v34 = vmax.f32 %v4365_v16, 0.0  ;;  %v4684_v1 = vmax.f32 %v4367_v3, 0.0 }
 0x583   : > { %v4776_v37 = vcombine.low %v4678_v44, %v4679_v7  ;;  %v4386_v41 = vcombine.high %v4384_v51, %v4384_v51  ;;  %v4393_v52 = vrot.slane %v4377_v50, %v14900_v2  ;;  %v4400_v59 = vrot.slane %v4384_v51, %v14900_v2  ;;  %v4295_v53 = vpop.f32.mrf.mxu1  ;;  %v932_v14 = vpop.permute.xlu1 %931 }
 0x584   : > { %v4777_v58 = vcombine.low %v4680_v11, %v4681_v17  ;;  %v4778_v12 = vcombine.low %v4682_v63, %v4683_v34  ;;  %v4806_v56 = vrot.slane %v4684_v1, %v14900_v2  ;;  %v4407_v49 = vrot.slane %v4385_v35, %v14900_v2  ;;  %v737_v11 = vpop.permute.xlu0 %736 }
 0x585   : > { %v4785_v39 = vrot.slane %v4776_v37, %v14900_v2  ;;  %v4414_v18 = vrot.slane %v4386_v41, %v14900_v2  ;;  %v4415_v19 = vcombine.high %v4393_v52, %v4393_v52  ;;  %v4416_v9 = vcombine.high %v4400_v59, %v4400_v59  ;;  %v13088_v5 = vpop.f32.mrf.mxu1  ;;  %836 = vst.msk [vmem:[#allocation3 + $0xff] sm:$0x1] %vm17722_vm9, %v737_v11 }
 0x586   : > { %v4792_v22 = vrot.slane %v4777_v58, %v14900_v2  ;;  %v4799_v25 = vrot.slane %v4778_v12, %v14900_v2  ;;  %v4417_v27 = vcombine.high %v4407_v49, %v4407_v49  ;;  %v4685_v29 = vmax.f32 %v4369_v23, 0.0  ;;  %1031 = vst.msk [vmem:[#allocation3 + $0xfe] sm:$0x3] %vm17723_vm1, %v932_v14 }
 0x587   : > { %v4418_v30 = vcombine.high %v4414_v18, %v4414_v18  ;;  %v4686_v28 = vmax.f32 %v4393_v52, 0.0  ;;  %v4687_v38 = vmax.f32 %v4407_v49, 0.0  ;;  %v4688_v8 = vmax.f32 %v4415_v19, 0.0  ;;  %v4300_v43 = vpop.f32.mrf.mxu1 }
 0x588   : > { %v4807_v46 = vcombine.low %v4785_v39, %v4792_v22  ;;  %v4808_v45 = vcombine.low %v4799_v25, %v4806_v56  ;;  %v4689_v44 = vmax.f32 %v4417_v27, 0.0  ;;  %v4690_v4 = vmax.f32 %v4400_v59, 0.0 }
 0x589   : > { %v4691_v50 = vmax.f32 %v4414_v18, 0.0  ;;  %v4692_v16 = vmax.f32 %v4416_v9, 0.0  ;;  %v4693_v3 = vmax.f32 %v4418_v30, 0.0  ;;  %v4824_v6 = vcombine.low %v4685_v29, %v4686_v28  ;;  %v13091_v7 = vpop.f32.mrf.mxu1 }
 0x58a   : > { %v4815_v63 = vrot.slane %v4807_v46, %v14900_v2  ;;  %v4822_v51 = vrot.slane %v4808_v45, %v14900_v2  ;;  %v4825_v35 = vcombine.low %v4687_v38, %v4688_v8  ;;  %v4826_v24 = vcombine.low %v4689_v44, %v4690_v4 }
 0x58b   : > { %v4833_v23 = vrot.slane %v4824_v6, %v14900_v2  ;;  %v4854_v17 = vrot.slane %v4691_v50, %v14900_v2  ;;  %v4872_v34 = vcombine.low %v4692_v16, %v4693_v3  ;;  %v4291_v1 = vadd.f32 %v15384_v61, %v15356_v54  ;;  %v15407_v15 = vpop.f32.mrf.mxu1  ;;  %v930_v61 = vpop.permute.xlu0 %929 }
 0x58c   : > { %v4823_v37 = vcombine.low %v4815_v63, %v4822_v51  ;;  %v4840_v41 = vrot.slane %v4825_v35, %v14900_v2  ;;  %v4847_v52 = vrot.slane %v4826_v24, %v14900_v2  ;;  %v4296_v59 = vadd.f32 %v4295_v53, %v15365_v40  ;;  %1030 = vst.msk [vmem:[#allocation3 + $0xf6] sm:$0xff] %vm17724_vm8, %v930_v61  ;;  %v1097_v40 = vpop.permute.xlu1 %1096 }
 0x58d   : > { %v15414_v58 = vrot.slane %v4872_v34, %v14900_v2  ;;  %v4419_v12 = vcombine.high %v4291_v1, %v4291_v1  ;;  %v4426_v56 = vrot.slane %v4291_v1, %v14900_v2  ;;  %v15418_v49 = vadd.f32 %v4300_v43, %v15372_v32  ;;  %v13094_v54 = vpop.f32.mrf.mxu1  ;;  %1162 = vst.msk [vmem:[#allocation3 + $0xf8] sm:$0xff] %vm17725_vm6, %v1097_v40 }
 0x58e   : > { %5119 = vst.msk [vmem:[#allocation4 + $0x11] sm:$0x7f] %vm2642_vm5, %v4823_v37  ;;  %v4855_v39 = vcombine.low %v4833_v23, %v4840_v41  ;;  %v4856_v18 = vcombine.low %v4847_v52, %v4854_v17  ;;  %v4468_v19 = vcombine.high %v4296_v59, %v4296_v59  ;;  %v4475_v9 = vrot.slane %v4296_v59, %v14900_v2 }
 0x58f   : > { %v4433_v53 = vrot.slane %v4419_v12, %v14900_v2  ;;  %v4434_v5 = vcombine.high %v4426_v56, %v4426_v56  ;;  %v4442_v57 = vrot.slane %v4426_v56, %v14900_v2  ;;  %v4517_v32 = vcombine.high %v15418_v49, %v15418_v49  ;;  %v15427_v22 = vpop.f32.mrf.mxu1  ;;  %v1095_v46 = vpop.permute.xlu0 %1094 }
 0x590   : > { %v4863_v25 = vrot.slane %v4855_v39, %v14900_v2  ;;  %v4870_v27 = vrot.slane %v4856_v18, %v14900_v2  ;;  %v4482_v29 = vrot.slane %v4468_v19, %v14900_v2  ;;  %v4483_v36 = vcombine.high %v4475_v9, %v4475_v9  ;;  %1161 = vst.msk [vmem:[#allocation3 + $0xf0] sm:$0xff] %vm17726_vm11, %v1095_v46  ;;  %v1257_v16 = vpop.permute.xlu1 %1256 }
 0x591   : > { %v4435_v30 = vcombine.high %v4433_v53, %v4433_v53  ;;  %v4449_v28 = vrot.slane %v4433_v53, %v14900_v2  ;;  %v4456_v38 = vrot.slane %v4434_v5, %v14900_v2  ;;  %v4464_v8 = vcombine.high %v4442_v57, %v4442_v57  ;;  %v13097_v43 = vpop.f32.mrf.mxu1 }
 0x592   : > { %v4871_v45 = vcombine.low %v4863_v25, %v4870_v27  ;;  %v4694_v44 = vmax.f32 %v4442_v57, 0.0  ;;  %v4484_v4 = vcombine.high %v4482_v29, %v4482_v29  ;;  %v4491_v50 = vrot.slane %v4475_v9, %v14900_v2 }
 0x593   : > { %v4463_v3 = vrot.slane %v4435_v30, %v14900_v2  ;;  %v4465_v6 = vcombine.high %v4449_v28, %v4449_v28  ;;  %v4466_v7 = vcombine.high %v4456_v38, %v4456_v38  ;;  %v4695_v11 = vmax.f32 %v4456_v38, 0.0  ;;  %v1255_v37 = vpop.permute.xlu0 %1254 }
 0x594   : > { %vm17727_vm9 = vcmask 162944   ;;  %5120 = vst.msk [vmem:[#allocation4 + $0x21] sm:$0x7f] %vm2642_vm5, %v4871_v45  ;;  %v4696_v63 = vmax.f32 %v4464_v8, 0.0  ;;  %v4698_v51 = vmax.f32 %v4449_v28, 0.0  ;;  %v4498_v35 = vrot.slane %v4482_v29, %v14900_v2  ;;  %v1450_v56 = vpop.permute.xlu1 %1449 }
 0x595   : > { %1357 = vst.msk [vmem:[#allocation3 + $0xf7] sm:$0xff] %vm17727_vm9, %v1257_v16  ;;  %v4505_v24 = vrot.slane %v4483_v36, %v14900_v2  ;;  %v4467_v14 = vcombine.high %v4463_v3, %v4463_v3  ;;  %v4697_v23 = vmax.f32 %v4466_v7, 0.0  ;;  %v4699_v17 = vmax.f32 %v4463_v3, 0.0  ;;  %v15442_v1 = vld [vmem:[#allocation4 + $0x10] sm:$0xff] }
 0x596   : > { %v4700_v34 = vmax.f32 %v4465_v6, 0.0  ;;  %v4873_v41 = vcombine.low %v4694_v44, %v4695_v11  ;;  %v4902_v52 = vrot.slane %v4698_v51, %v14900_v2  ;;  %v4512_v59 = vrot.slane %v4484_v4, %v14900_v2  ;;  %5250 = vrot.lane.b32.xlu1 %v15442_v1, %s13292_s16  ;;  %5145 = vst.msk [vmem:[#allocation5 + $0x18] sm:$0x7f] %vm2642_vm5, %v15442_v1 }
 0x597   : > { %v4513_v12 = vcombine.high %v4491_v50, %v4491_v50  ;;  %vm17728_vm1 = vcmask 162945   ;;  %v4874_v54 = vcombine.low %v4696_v63, %v4697_v23  ;;  %v4514_v39 = vcombine.high %v4498_v35, %v4498_v35  ;;  %v1259_v29 = vpop.permute.xlu0 %1258 }
 0x598   : > { %1356 = vst.msk [vmem:[#allocation3 + $0xef] sm:$0xfe] %vm17728_vm1, %v1255_v37  ;;  %v4920_v61 = vcombine.low %v4699_v17, %v4700_v34  ;;  %v4515_v18 = vcombine.high %v4505_v24, %v4505_v24  ;;  %v4888_v19 = vrot.slane %v4873_v41, %v14900_v2  ;;  %v4516_v9 = vcombine.high %v4512_v59, %v4512_v59  ;;  %v1454_v8 = vpop.permute.xlu1 %1453 }
 0x599   : > { %1551 = vst.msk [vmem:[#allocation3 + $0xee] sm:$0xfc] %vm1503_vm14, %v1450_v56  ;;  %v4701_v40 = vmax.f32 %v4467_v14, 0.0  ;;  %v4702_v53 = vmax.f32 %v4491_v50, 0.0  ;;  %v4895_v5 = vrot.slane %v4874_v54, %v14900_v2  ;;  %v4703_v25 = vmax.f32 %v4505_v24, 0.0 }
 0x59a   : > { %v4929_v57 = vrot.slane %v4920_v61, %v14900_v2  ;;  %v4704_v27 = vmax.f32 %v4513_v12, 0.0  ;;  %v4903_v36 = vcombine.low %v15414_v58, %v4888_v19  ;;  %v4705_v30 = vmax.f32 %v4515_v18, 0.0  ;;  %1358 = vst.msk [vmem:[#allocation3 + $0xff] sm:$0x1] %vm1312_vm12, %v1259_v29 }
 0x59b   : > { %v4706_v28 = vmax.f32 %v4498_v35, 0.0  ;;  %v4707_v38 = vmax.f32 %v4512_v59, 0.0  ;;  %v4904_v43 = vcombine.low %v4895_v5, %v4902_v52  ;;  %v4708_v46 = vmax.f32 %v4514_v39, 0.0  ;;  %v15457_v4 = vld [vmem:[#allocation4 + $0x20] sm:$0xff]  ;;  %1553 = vst.msk [vmem:[#allocation3 + $0xfe] sm:$0x3] %vm1507_vm15, %v1454_v8  ;;  %v1452_v51 = vpop.permute.xlu0 %1451 }
 0x59c   : > { %v4709_v45 = vmax.f32 %v4516_v9, 0.0  ;;  %v4921_v44 = vcombine.low %v4701_v40, %v4702_v53  ;;  %v4911_v50 = vrot.slane %v4903_v36, %v14900_v2  ;;  %v4922_v16 = vcombine.low %v4703_v25, %v4704_v27  ;;  %5146 = vst.msk [vmem:[#allocation5 + $0x30] sm:$0x7f] %vm2642_vm5, %v15457_v4 }
 0x59d   : > { %v4950_v3 = vrot.slane %v4705_v30, %v14900_v2  ;;  %v4968_v58 = vcombine.low %v4706_v28, %v4707_v38  ;;  %v4918_v6 = vrot.slane %v4904_v43, %v14900_v2  ;;  %v4524_v63 = vrot.slane %v15418_v49, %v14900_v2  ;;  %1552 = vst.msk [vmem:[#allocation3 + $0xf6] sm:$0xff] %vm1505_vm13, %v1452_v51 }
 0x59e   : > { %v4936_v7 = vrot.slane %v4921_v44, %v14900_v2  ;;  %v4969_v11 = vcombine.low %v4708_v46, %v4709_v45  ;;  %v4943_v35 = vrot.slane %v4922_v16, %v14900_v2  ;;  %v4531_v14 = vrot.slane %v4517_v32, %v14900_v2 }
 0x59f   : > { %v4977_v24 = vrot.slane %v4968_v58, %v14900_v2  ;;  %v4306_v23 = vadd.f32 %v15407_v15, %v15374_v55  ;;  %v4919_v17 = vcombine.low %v4911_v50, %v4918_v6  ;;  %v4532_v41 = vcombine.high %v4524_v63, %v4524_v63 }
 0x5a0   : > { %v4951_v34 = vcombine.low %v4929_v57, %v4936_v7  ;;  %v4984_v37 = vrot.slane %v4969_v11, %v14900_v2  ;;  %v4952_v52 = vcombine.low %v4943_v35, %v4950_v3  ;;  %v4533_v59 = vcombine.high %v4531_v14, %v4531_v14 }
 0x5a1   : > { %v4540_v12 = vrot.slane %v4524_v63, %v14900_v2  ;;  %v4547_v56 = vrot.slane %v4531_v14, %v14900_v2  ;;  %5121 = vst.msk [vmem:[#allocation4 + $0x31] sm:$0x7f] %vm2642_vm5, %v4919_v17  ;;  %v4554_v55 = vrot.slane %v4532_v41, %v14900_v2  ;;  %v4566_v15 = vcombine.high %v4306_v23, %v4306_v23 }
 0x5a2   : > { %v4959_v49 = vrot.slane %v4951_v34, %v14900_v2  ;;  %v4999_v32 = vcombine.low %v4977_v24, %v4984_v37  ;;  %v4966_v54 = vrot.slane %v4952_v52, %v14900_v2  ;;  %v4561_v61 = vrot.slane %v4533_v59, %v14900_v2 }
 0x5a3   : > { %v4562_v39 = vcombine.high %v4540_v12, %v4540_v12  ;;  %v4563_v18 = vcombine.high %v4547_v56, %v4547_v56  ;;  %v4564_v19 = vcombine.high %v4554_v55, %v4554_v55  ;;  %v4710_v9 = vmax.f32 %v4540_v12, 0.0 }
 0x5a4   : > { %v4711_v40 = vmax.f32 %v4554_v55, 0.0  ;;  %v4211_v53 = vadd.f32 %v15381_v47, %v15359_v20  ;;  %v4967_v5 = vcombine.low %v4959_v49, %v4966_v54  ;;  %v4565_v57 = vcombine.high %v4561_v61, %v4561_v61 }
 0x5a5   : > { %v4712_v25 = vmax.f32 %v4562_v39, 0.0  ;;  %v4714_v27 = vmax.f32 %v4547_v56, 0.0  ;;  %v4713_v29 = vmax.f32 %v4564_v19, 0.0  ;;  %v4715_v36 = vmax.f32 %v4561_v61, 0.0 }
 0x5a6   : > { %v4716_v30 = vmax.f32 %v4563_v18, 0.0  ;;  %v4970_v28 = vcombine.low %v4710_v9, %v4711_v40  ;;  %v5007_v38 = vrot.slane %v4999_v32, %v14900_v2  ;;  %5122 = vst.msk [vmem:[#allocation4 + $0x41] sm:$0x7f] %vm2642_vm5, %v4967_v5  ;;  %v4573_v43 = vrot.slane %v4306_v23, %v14900_v2 }
 0x5a7   : > { %v4998_v8 = vrot.slane %v4712_v25, %v14900_v2  ;;  %v4580_v46 = vrot.slane %v4566_v15, %v14900_v2  ;;  %v5016_v47 = vcombine.low %v4713_v29, %v4714_v27  ;;  %v4311_v44 = vadd.f32 %v15427_v22, %v4211_v53 }
 0x5a8   : > { %v4991_v20 = vrot.slane %v4970_v28, %v14900_v2  ;;  %v5017_v45 = vcombine.low %v4715_v36, %v4716_v30  ;;  %v4581_v50 = vcombine.high %v4573_v43, %v4573_v43  ;;  %v4589_v3 = vrot.slane %v4573_v43, %v14900_v2  ;;  %v15496_v6 = vld [vmem:[#allocation4 + $0x30] sm:$0xff] }
 0x5a9   : > { %v4582_v16 = vcombine.high %v4580_v46, %v4580_v46  ;;  %v4596_v58 = vrot.slane %v4580_v46, %v14900_v2  ;;  %v5025_v11 = vrot.slane %v5016_v47, %v14900_v2  ;;  %v4717_v51 = vmax.f32 %v4565_v57, 0.0  ;;  %5147 = vst.msk [vmem:[#allocation5 + $0x48] sm:$0x7f] %vm2642_vm5, %v15496_v6  ;;  %v5143_v46 = vld [vmem:[#allocation4 + $0x88] sm:$0x1] }
 0x5aa   : > { %v5000_v7 = vcombine.low %v4991_v20, %v4998_v8  ;;  %v5032_v63 = vrot.slane %v5017_v45, %v14900_v2  ;;  %v4603_v35 = vrot.slane %v4581_v50, %v14900_v2  ;;  %v4611_v24 = vcombine.high %v4589_v3, %v4589_v3 }
 0x5ab   : > { %v4610_v22 = vrot.slane %v4582_v16, %v14900_v2  ;;  %v4612_v14 = vcombine.high %v4596_v58, %v4596_v58  ;;  %v4718_v34 = vmax.f32 %v4589_v3, 0.0  ;;  %v4621_v37 = vrot.slane %v4311_v44, %v14900_v2 }
 0x5ac   : > { %v5014_v23 = vrot.slane %v5000_v7, %v14900_v2  ;;  %v5047_v17 = vcombine.low %v5025_v11, %v5032_v63  ;;  %v4613_v41 = vcombine.high %v4603_v35, %v4603_v35  ;;  %v4719_v59 = vmax.f32 %v4603_v35, 0.0 }
 0x5ad   : > { %v4614_v52 = vcombine.high %v4610_v22, %v4610_v22  ;;  %v4722_v12 = vmax.f32 %v4596_v58, 0.0  ;;  %v4720_v49 = vmax.f32 %v4611_v24, 0.0  ;;  %v4723_v32 = vmax.f32 %v4610_v22, 0.0  ;;  %v15506_v15 = vld [vmem:[#allocation4 + $0x40] sm:$0xff] }
 0x5ae   : > { %v5015_v56 = vcombine.low %v5007_v38, %v5014_v23  ;;  %v4724_v55 = vmax.f32 %v4612_v14, 0.0  ;;  %v4721_v54 = vmax.f32 %v4613_v41, 0.0  ;;  %v5018_v39 = vcombine.low %v4717_v51, %v4718_v34  ;;  %5148 = vst.msk [vmem:[#allocation5 + $0x60] sm:$0x7f] %vm2642_vm5, %v15506_v15  ;;  %v5139_v14 = vld [vmem:[#allocation4 + $0x68] sm:$0x1] }
 0x5af   : > { %v4725_v61 = vmax.f32 %v4614_v52, 0.0  ;;  %v5046_v18 = vrot.slane %v4719_v59, %v14900_v2  ;;  %v5065_v19 = vcombine.low %v4722_v12, %v4723_v32  ;;  %v4628_v9 = vrot.slane %v4621_v37, %v14900_v2  ;;  %v5453_v34 = vld [vmem:[%s17499_s5 + $0xf8] sm:$0xff]  ;;  %v5436_v32 = vld [vmem:[%s17499_s5 + $0x70] sm:$0xff] }
 0x5b0   : > { %5123 = vst.msk [vmem:[#allocation4 + $0x51] sm:$0x7f] %vm2642_vm5, %v5015_v56  ;;  %v5159_v40 = vrot.slane %v15442_v1, 1  ;;  %v5203_v53 = vrot.slane %v15442_v1, 2  ;;  %v5039_v5 = vrot.slane %v5018_v39, %v14900_v2  ;;  %v5064_v57 = vcombine.low %v4720_v49, %v4721_v54  ;;  %12819 = vmatprep.subr.mxu0 %v5453_v34  ;;  %v5437_v59 = vld [vmem:[%s17499_s5 + $0x78] sm:$0xff]  ;;  %v5452_v49 = vld [vmem:[%s17499_s5 + $0xf0] sm:$0xff] }
 0x5b1   : > { %v5066_v25 = vcombine.low %v4724_v55, %v4725_v61  ;;  %v5160_v27 = vrot.slane %v15457_v4, 1  ;;  %v5080_v29 = vrot.slane %v5065_v19, %v14900_v2  ;;  %v4726_v36 = vmax.f32 %v4628_v9, 0.0  ;;  %12820 = vmatpush3.msra.mxu0 %v5437_v59  ;;  %v5451_v55 = vld [vmem:[%s17499_s5 + $0xe8] sm:$0xff]  ;;  %v5457_v61 = vld [vmem:[%s17499_s5 + $0x118] sm:$0xff]  ;;  %v5450_v39 = vld [vmem:[%s17499_s5 + $0xe0] sm:$0xff] }
 0x5b2   : > { %5167 = vrot.lane.b32.xlu0 %v5159_v40, %s13290_s30  ;;  %5286 = vst.msk [vmem:[#allocation5 + $0x8] sm:$0x7f] %vm2642_vm5, %v5159_v40  ;;  %vm17729_vm12 = vcmask 1045504   ;;  %v5206_v28 = vrot.slane %v15457_v4, 2  ;;  %v5048_v1 = vcombine.low %v5039_v5, %v5046_v18  ;;  %v5073_v38 = vrot.slane %v5064_v57, %v14900_v2  ;;  %12821 = vmatprep.subr.mxu0 %v5452_v49  ;;  %v5435_v54 = vld [vmem:[%s17499_s5 + $0x68] sm:$0xff]  ;;  %v5456_v18 = vld [vmem:[%s17499_s5 + $0x110] sm:$0xff] }
 0x5b3   : > { %v5205_v30 = vsel %vm17729_vm12, %v5203_v53, %v5204_v26  ;;  %v5087_v8 = vrot.slane %v5066_v25, %v14900_v2  ;;  %5287 = vst.msk [vmem:[#allocation5 + $0x20] sm:$0x7f] %vm2642_vm5, %v5160_v27  ;;  %v15529_v43 = vrot.slane %v15496_v6, 1  ;;  %v5094_v20 = vrot.slane %v4726_v36, %v14900_v2  ;;  %vm17730_vm13 = vmmov %vm17729_vm12  ;;  %12822 = vmatpush3.msra.mxu0 %v5436_v32  ;;  %v5449_v19 = vld [vmem:[%s17499_s5 + $0xd8] sm:$0xff]  ;;  %v5455_v9 = vld [vmem:[%s17499_s5 + $0x108] sm:$0xff] }
 0x5b4   : > { %5297 = vrot.lane.b32.xlu1 %v5205_v30, %s13290_s30  ;;  %v5208_v33 = vsel %vm17730_vm13, %v5206_v28, %v5207_v42  ;;  %v5209_v26 = vrot.slane %v15496_v6, 2  ;;  %v15537_v47 = vrot.slane %v15506_v15, 1  ;;  %v5055_v45 = vrot.slane %v5047_v17, %v14900_v2  ;;  %vm17731_vm14 = vmmov %vm17729_vm12  ;;  %12823 = vmatprep.subr.mxu0 %v5451_v55  ;;  %v5454_v40 = vld [vmem:[%s17499_s5 + $0x100] sm:$0xff]  ;;  %v5433_v53 = vld [vmem:[%s17499_s5 + $0x58] sm:$0xff] }
 0x5b5   : > { %v5062_v44 = vrot.slane %v5048_v1, %v14900_v2  ;;  %v5095_v50 = vcombine.low %v5073_v38, %v5080_v29  ;;  %5394 = vst.msk [vmem:[#allocation5 + $0x10] sm:$0x7f] %vm2642_vm5, %v5208_v33  ;;  %5288 = vst.msk [vmem:[#allocation5 + $0x38] sm:$0x7f] %vm2642_vm5, %v15529_v43  ;;  %v5212_v16 = vrot.slane %v15506_v15, 2  ;;  %v5096_v42 = vcombine.low %v5087_v8, %v5094_v20  ;;  %v5448_v5 = vld [vmem:[%s17499_s5 + $0xd0] sm:$0xff] }
 0x5b6   : > { %5223 = vrot.lane.b32.xlu0 %v5205_v30, %s13291_s22  ;;  %v15551_v3 = vsel %vm17731_vm14, %v5209_v26, %v5210_v60  ;;  %5289 = vst.msk [vmem:[#allocation5 + $0x50] sm:$0x7f] %vm2642_vm5, %v15537_v47  ;;  %v5384_v58 = vrot.slane %v15545_v62, 2  ;;  %v5385_v7 = vrot.slane %v5143_v46, 2  ;;  %vm17732_vm15 = vmmov %vm17729_vm12  ;;  %v5219_v48 = vrot.slane %v5139_v14, 2  ;;  %13099 = vmatpush3.msra.mxu1 %v5457_v61  ;;  %v5432_v57 = vld [vmem:[%s17499_s5 + $0x50] sm:$0xff] }
 0x5b7   : > { %v5063_v11 = vcombine.low %v5055_v45, %v5062_v44  ;;  %v5103_v63 = vrot.slane %v5095_v50, %v14900_v2  ;;  %5395 = vst.msk [vmem:[#allocation5 + $0x28] sm:$0x7f] %vm2642_vm5, %v15551_v3  ;;  %v15564_v13 = vsel %vm17732_vm15, %v5212_v16, %v5213_v31  ;;  %v15566_v60 = vld [vmem:[#allocation4 + $0x50] sm:$0xff]  ;;  %v5110_v51 = vrot.slane %v5096_v42, %v14900_v2  ;;  %vm17733_vm8 = vmmov %vm17729_vm12  ;;  %v5447_v25 = vld [vmem:[%s17499_s5 + $0xc8] sm:$0xff] }
 0x5b8   : > { %5326 = vrot.lane.b32.xlu1 %v15457_v4, %s13291_s22  ;;  %5396 = vst.msk [vmem:[#allocation5 + $0x40] sm:$0x7f] %vm2642_vm5, %v15564_v13  ;;  %v5215_v35 = vrot.slane %v15566_v60, 2  ;;  %5149 = vst.msk [vmem:[#allocation5 + $0x78] sm:$0x7f] %vm2642_vm5, %v15566_v60  ;;  %v15575_v22 = vrot.slane %v15566_v60, 1  ;;  %v5386_v21 = vsel %vm17733_vm8, %v5384_v58, %v5385_v7  ;;  %12824 = vmatpush3.msra.mxu0 %v5435_v54 }
 0x5b9   : > { %5124 = vst.msk [vmem:[#allocation4 + $0x61] sm:$0x7f] %vm2642_vm5, %v5063_v11  ;;  %5400 = vst.msk [vmem:[#allocation5 + $0xa0] sm:$0x7f] %vm2642_vm5, %v5386_v21  ;;  %v5111_v31 = vcombine.low %v5103_v63, %v5110_v51  ;;  %13100 = vmatprep.subr.mxu1 %v13282_v0  ;;  %12825 = vmatprep.subr.mxu0 %v5450_v39  ;;  %v5446_v29 = vld [vmem:[%s17499_s5 + $0xc0] sm:$0xff]  ;;  %v559_v36 = vld [vmem:[#allocation2 + $0x198] sm:$0xff] }
 0x5ba   : > { %5252 = vrot.lane.b32.xlu0 %v15457_v4, %s13292_s16  ;;  %vm17734_vm6 = vmmov %vm17733_vm8  ;;  %5290 = vst.msk [vmem:[#allocation5 + $0x68] sm:$0x7f] %vm2642_vm5, %v15575_v22  ;;  %v5141_v4 = vld [vmem:[#allocation4 + $0x78] sm:$0x1]  ;;  %13101 = vmatpush3.msra.mxu1 %v5456_v18  ;;  %v560_v30 = vld [vmem:[#allocation2 + $0x1a0] sm:$0xff]  ;;  %v5354_v63 = vrot.slane %v15545_v62, 1 }
 0x5bb   : > { %v15585_v24 = vsel %vm17734_vm6, %v5215_v35, %v5216_v10  ;;  %5125 = vst.msk [vmem:[#allocation4 + $0x71] sm:$0x7f] %vm2642_vm5, %v5111_v31  ;;  %v5295_v37 = vrot.slane %v5141_v4, 2  ;;  %vm17735_vm11 = vmmov %vm17734_vm6  ;;  %13102 = vmatprep.subr.mxu1 %v13282_v0  ;;  %v5430_v28 = vld [vmem:[%s17499_s5 + $0x40] sm:$0xff]  ;;  %v5445_v1 = vld [vmem:[%s17499_s5 + $0xb8] sm:$0xff]  ;;  %vm17738_vm1 = vcmask 261120  }
 0x5bc   : > { %5355 = vrot.lane.b32.xlu1 %v5160_v27, %s13292_s16  ;;  %5397 = vst.msk [vmem:[#allocation5 + $0x58] sm:$0x7f] %vm2642_vm5, %v15585_v24  ;;  %vm17736_vm9 = vmmov %vm17734_vm6  ;;  %13103 = vmatpush3.msra.mxu1 %v5455_v9  ;;  %v5429_v38 = vld [vmem:[%s17499_s5 + $0x38] sm:$0xff]  ;;  %v5444_v8 = vld [vmem:[%s17499_s5 + $0xb0] sm:$0xff]  ;;  %vm17739_vm12 = vcmask 228544   ;;  %vm17744_vm15 = vcmask 294146  }
 0x5bd   : > { %13104 = vmatprep.subr.mxu1 %v13282_v0  ;;  %v5443_v46 = vld [vmem:[%s17499_s5 + $0xa8] sm:$0xff]  ;;  %v5426_v26 = vld [vmem:[%s17499_s5 + $0x20] sm:$0xff]  ;;  %v5441_v45 = vld [vmem:[%s17499_s5 + $0x98] sm:$0xff]  ;;  %vm17746_vm6 = vcmask 288000  }
 0x5be   : > { %5169 = vrot.lane.b32.xlu0 %v5160_v27, %s13290_s30  ;;  %13105 = vmatpush3.msra.mxu1 %v5454_v40  ;;  %v5431_v27 = vld [vmem:[%s17499_s5 + $0x48] sm:$0xff]  ;;  %v5425_v44 = vld [vmem:[%s17499_s5 + $0x18] sm:$0xff]  ;;  %v5440_v50 = vld [vmem:[%s17499_s5 + $0x90] sm:$0xff] }
 0x5bf   : > { %13127 = vmatprep.subr.mxu1 %v13282_v0  ;;  %v5427_v20 = vld [vmem:[%s17499_s5 + $0x28] sm:$0xff]  ;;  %v5424_v16 = vld [vmem:[%s17499_s5 + $0x10] sm:$0xff]  ;;  %v5438_v58 = vld [vmem:[%s17499_s5 + $0x80] sm:$0xff] }
 0x5c0   : > { %5328 = vrot.lane.b32.xlu1 %v15496_v6, %s13291_s22  ;;  %v15596_v10 = vld [vmem:[#allocation4 + $0x60] sm:$0xff]  ;;  %v5439_v42 = vld [vmem:[%s17499_s5 + $0x88] sm:$0xff]  ;;  %v5422_v7 = vld [vmem:[%s17499_s5] sm:$0xff] }
 0x5c1   : > { %5150 = vst.msk [vmem:[#allocation5 + $0x90] sm:$0x7f] %vm2642_vm5, %v15596_v10  ;;  %v5218_v23 = vrot.slane %v15596_v10, 2  ;;  %v15602_v17 = vrot.slane %v15596_v10, 1  ;;  %v5406_v54 = vld [vmem:[#allocation5 + $0x28] sm:$0x7f]  ;;  %vm17740_vm13 = vmmov %vm17739_vm12 }
 0x5c2   : > { %5299 = vrot.lane.b32.xlu0 %v5208_v33, %s13290_s30  ;;  %v15615_v52 = vld [vmem:[#allocation4 + $0x70] sm:$0xff]  ;;  %vm17741_vm14 = vmmov %vm17738_vm1 }
 0x5c3   : > { %v15611_v41 = vsel %vm17735_vm11, %v5218_v23, %v5219_v48  ;;  %5291 = vst.msk [vmem:[#allocation5 + $0x80] sm:$0x7f] %vm2642_vm5, %v15602_v17  ;;  %v5278_v12 = vrot.slane %v15615_v52, 1  ;;  %v5294_v56 = vrot.slane %v15615_v52, 2  ;;  %v5403_v23 = vld [vmem:[#allocation5 + $0x10] sm:$0x7f]  ;;  %vm17745_vm8 = vmmov %vm17738_vm1 }
 0x5c4   : > { %5254 = vrot.lane.b32.xlu1 %v15496_v6, %s13292_s16  ;;  %5398 = vst.msk [vmem:[#allocation5 + $0x70] sm:$0x7f] %vm2642_vm5, %v15611_v41  ;;  %v5508_v59 = vrot.slane %v5403_v23, %v14900_v2  ;;  %vm17747_vm11 = vcmask 293888  }
 0x5c5   : > { %5292 = vst.msk [vmem:[#allocation5 + $0x98] sm:$0x7f] %vm2642_vm5, %v5278_v12  ;;  %v15629_v6 = vsel %vm17736_vm9, %v5294_v56, %v5295_v37  ;;  %vm17748_vm9 = vmmov %vm17738_vm1 }
 0x5c6   : > { %5225 = vrot.lane.b32.xlu0 %v5208_v33, %s13291_s22  ;;  %5399 = vst.msk [vmem:[#allocation5 + $0x88] sm:$0x7f] %vm2642_vm5, %v15629_v6  ;;  %v5442_v33 = vld [vmem:[%s17499_s5 + $0xa0] sm:$0xff] }
 0x5c8   : > { %5357 = vrot.lane.b32.xlu1 %v15529_v43, %s13292_s16 }
 0x5ca   : > { %5171 = vrot.lane.b32.xlu0 %v15529_v43, %s13290_s30  ;;  %v5428_v43 = vld [vmem:[%s17499_s5 + $0x30] sm:$0xff] }
 0x5cc   : > { %5330 = vrot.lane.b32.xlu1 %v15506_v15, %s13291_s22 }
 0x5ce   : > { %5256 = vrot.lane.b32.xlu0 %v15506_v15, %s13292_s16  ;;  %v5434_v15 = vld [vmem:[%s17499_s5 + $0x60] sm:$0xff] }
 0x5cf   : > { %12826 = vmatpush3.msra.mxu0 %v5434_v15 }
 0x5d0   : > { %5301 = vrot.lane.b32.xlu1 %v15551_v3, %s13290_s30  ;;  %12827 = vmatprep.subr.mxu0 %v5449_v19 }
 0x5d1   : > { %12828 = vmatpush3.msra.mxu0 %v5433_v53 }
 0x5d2   : > { %5227 = vrot.lane.b32.xlu0 %v15551_v3, %s13291_s22  ;;  %12829 = vmatprep.subr.mxu0 %v5448_v5  ;;  %v5423_v3 = vld [vmem:[%s17499_s5 + $0x8] sm:$0xff] }
 0x5d3   : > { %12830 = vmatpush3.msra.mxu0 %v5432_v57  ;;  %v5553_v57 = vcombine.high %v5406_v54, %v5406_v54 }
 0x5d4   : > { %5359 = vrot.lane.b32.xlu1 %v15537_v47, %s13292_s16  ;;  %12831 = vmatprep.subr.mxu0 %v5447_v25 }
 0x5d5   : > { %12832 = vmatpush3.msra.mxu0 %v5431_v27 }
 0x5d6   : > { %5303 = vrot.lane.b32.xlu0 %v15564_v13, %s13290_s30  ;;  %12833 = vmatprep.subr.mxu0 %v5446_v29  ;;  %v5574_v29 = vrot.slane %v5406_v54, %v14900_v2 }
 0x5d7   : > { %12834 = vmatpush3.msra.mxu0 %v5430_v28 }
 0x5d8   : > { %5173 = vrot.lane.b32.xlu1 %v15537_v47, %s13290_s30  ;;  %12835 = vmatprep.subr.mxu0 %v5445_v1  ;;  %v561_v47 = vld [vmem:[#allocation2 + $0x1a8] sm:$0x3] }
 0x5d9   : > { %12836 = vmatpush3.msra.mxu0 %v5429_v38 }
 0x5da   : > { %5305 = vrot.lane.b32.xlu0 %v15585_v24, %s13290_s30  ;;  %12837 = vmatprep.subr.mxu0 %v5444_v8 }
 0x5db   : > { %12838 = vmatpush3.msra.mxu0 %v5428_v43 }
 0x5dc   : > { %5332 = vrot.lane.b32.xlu1 %v15566_v60, %s13291_s22  ;;  %12839 = vmatprep.subr.mxu0 %v5443_v46 }
 0x5dd   : > { %12840 = vmatpush3.msra.mxu0 %v5427_v20  ;;  %v5581_v20 = vrot.slane %v5553_v57, %v14900_v2 }
 0x5de   : > { %5229 = vrot.lane.b32.xlu0 %v15564_v13, %s13291_s22  ;;  %12841 = vmatprep.subr.mxu0 %v5442_v33  ;;  %v15805_v13 = vld [vmem:[#allocation4] sm:$0xff] }
 0x5df   : > { %12842 = vmatpush3.msra.mxu0 %v5426_v26 }
 0x5e0   : > { %5361 = vrot.lane.b32.xlu1 %v15575_v22, %s13292_s16  ;;  %12843 = vmatprep.subr.mxu0 %v5441_v45 }
 0x5e1   : > { %12844 = vmatpush3.msra.mxu0 %v5425_v44 }
 0x5e2   : > { %1616 = vrot.lane.b32.xlu0 %v559_v36, %s13288_s28  ;;  %12845 = vmatprep.subr.mxu0 %v5440_v50 }
 0x5e3   : > { %12846 = vmatpush3.msra.mxu0 %v5424_v16 }
 0x5e4   : > { %5334 = vrot.lane.b32.xlu1 %v15596_v10, %s13291_s22  ;;  %12847 = vmatprep.subr.mxu0 %v5439_v42 }
 0x5e5   : > { %12848 = vmatpush3.msra.mxu0 %v5423_v3 }
 0x5e6   : > { %5175 = vrot.lane.b32.xlu0 %v15575_v22, %s13290_s30  ;;  %12849 = vmatprep.subr.mxu0 %v5438_v58 }
 0x5e7   : > { %12850 = vmatpush3.msra.mxu0 %v5422_v7 }
 0x5e8   : > { %1618 = vrot.lane.b32.xlu1 %v560_v30, %s13288_s28 }
 0x5ea   : > { %5307 = vrot.lane.b32.xlu0 %v15611_v41, %s13290_s30 }
 0x5ec   : > { %5258 = vrot.lane.b32.xlu1 %v15566_v60, %s13292_s16 }
 0x5ee   : > { %1776 = vrot.lane.b32.xlu0 %v559_v36, %s17737_s24 }
 0x5f0   : > { %5363 = vrot.lane.b32.xlu1 %v15602_v17, %s13292_s16 }
 0x5f2   : > { %5231 = vrot.lane.b32.xlu0 %v15585_v24, %s13291_s22 }
 0x5f4   : > { %1778 = vrot.lane.b32.xlu1 %v560_v30, %s17737_s24 }
 0x5f6   : > { %1780 = vrot.lane.b32.xlu0 %v561_v47, %s17737_s24 }
 0x5f8   : > { %5336 = vrot.lane.b32.xlu1 %v15615_v52, %s13291_s22 }
 0x5fa   : > { %1973 = vrot.lane.b32.xlu0 %v560_v30, %s13290_s30 }
 0x5fc   : > { %1971 = vrot.lane.b32.xlu1 %v559_v36, %s13290_s30 }
 0x5fe   : > { %5365 = vrot.lane.b32.xlu0 %v5278_v12, %s13292_s16  ;;  %v5487_v12 = vcombine.high %v5403_v23, %v5403_v23 }
 0x600   : > { %5260 = vrot.lane.b32.xlu1 %v15596_v10, %s13292_s16  ;;  %v5515_v61 = vrot.slane %v5487_v12, %v14900_v2 }
 0x602   : > { %5177 = vrot.lane.b32.xlu0 %v15602_v17, %s13290_s30 }
 0x604   : > { %1975 = vrot.lane.b32.xlu1 %v561_v47, %s13290_s30 }
 0x606   : > { %5233 = vrot.lane.b32.xlu0 %v15611_v41, %s13291_s22 }
 0x608   : > { %5309 = vrot.lane.b32.xlu1 %v15629_v6, %s13290_s30  ;;  %v5251_v11 = vpop.permute.xlu1 %5250 }
 0x609   : > { %5271 = vst.msk [vmem:[#allocation5] sm:$0x7f] %vm2797_vm3, %v5251_v11 }
 0x60a   : > { %5262 = vrot.lane.b32.xlu0 %v15615_v52, %s13292_s16 }
 0x60c   : > { %5338 = vrot.lane.b32.xlu1 %v15545_v62, %s13291_s22 }
 0x610   : > { %5367 = vrot.lane.b32.xlu1 %v5354_v63, %s13292_s16  ;;  %v5401_v60 = vld [vmem:[#allocation5] sm:$0x7f] }
 0x611   : > { %7631 = vst.msk [vmem:[#allocation5] sm:$0x7f] %vm2642_vm5, %v15805_v13 }
 0x624   : > { %v5168_v51 = vpop.permute.xlu0 %5167 }
 0x625   : > { %5187 = vst.msk [vmem:[#allocation5 + $0x18] sm:$0x7f] %vm2710_vm4, %v5168_v51 }
 0x626   : > { %v5298_v35 = vpop.permute.xlu1 %5297 }
 0x627   : > { %5318 = vst.msk [vmem:[#allocation5 + $0x8] sm:$0x7f] %vm2710_vm4, %v5298_v35 }
 0x628   : > { %v5224_v22 = vpop.permute.xlu0 %5223 }
 0x629   : > { %5243 = vst.msk [vmem:[#allocation5 + $0x18] sm:$0x7f] %vm2767_vm7, %v5224_v22 }
 0x62a   : > { %v5327_v21 = vpop.permute.xlu1 %5326 }
 0x62b   : > { %5347 = vst.msk [vmem:[#allocation5 + $0x8] sm:$0x7f] %vm2767_vm7, %v5327_v21 }
 0x62c   : > { %v5253_v62 = vpop.permute.xlu0 %5252 }
 0x62d   : > { %5272 = vst.msk [vmem:[#allocation5 + $0x18] sm:$0x7f] %vm2797_vm3, %v5253_v62 }
 0x62e   : > { %v5356_v31 = vpop.permute.xlu1 %5355 }
 0x62f   : > { %5376 = vst.msk [vmem:[#allocation5 + $0x8] sm:$0x7f] %vm2797_vm3, %v5356_v31 }
 0x630   : > { %v5170_v24 = vpop.permute.xlu0 %5169 }
 0x631   : > { %5188 = vst.msk [vmem:[#allocation5 + $0x30] sm:$0x7f] %vm2710_vm4, %v5170_v24 }
 0x632   : > { %v5329_v14 = vpop.permute.xlu1 %5328 }
 0x634   : > { %v5300_v48 = vpop.permute.xlu0 %5299  ;;  %v5404_v40 = vld [vmem:[#allocation5 + $0x18] sm:$0x7f] }
 0x635   : > { %5319 = vst.msk [vmem:[#allocation5 + $0x20] sm:$0x7f] %vm2710_vm4, %v5300_v48 }
 0x636   : > { %v5402_v4 = vld [vmem:[#allocation5 + $0x8] sm:$0x7f]  ;;  %v5255_v10 = vpop.permute.xlu1 %5254  ;;  %5348 = vst.msk [vmem:[#allocation5 + $0x20] sm:$0x7f] %vm2767_vm7, %v5329_v14 }
 0x637   : > { %v5485_v17 = vcombine.low %v5401_v60, %v5402_v4  ;;  %v5486_v37 = vcombine.high %v5401_v60, %v5402_v4  ;;  %v5409_v60 = vld [vmem:[#allocation5 + $0x40] sm:$0x7f] }
 0x638   : > { %v5226_v34 = vpop.permute.xlu0 %5225 }
 0x639   : > { %v5494_v41 = vrot.slane %v5485_v17, %v14900_v2  ;;  %5244 = vst.msk [vmem:[#allocation5 + $0x30] sm:$0x7f] %vm2767_vm7, %v5226_v34  ;;  %v5501_v32 = vrot.slane %v5486_v37, %v14900_v2  ;;  %v5640_v17 = vrot.slane %v5409_v60, %v14900_v2 }
 0x63a   : > { %v5358_v52 = vpop.permute.xlu1 %5357  ;;  %5273 = vst.msk [vmem:[#allocation5 + $0x30] sm:$0x7f] %vm2797_vm3, %v5255_v10 }
 0x63b   : > { %5377 = vst.msk [vmem:[#allocation5 + $0x20] sm:$0x7f] %vm2797_vm3, %v5358_v52  ;;  %v5516_v56 = vcombine.low %v5494_v41, %v5508_v59  ;;  %v5517_v6 = vcombine.high %v5494_v41, %v5508_v59  ;;  %v5518_v19 = vcombine.low %v5501_v32, %v5515_v61  ;;  %v5519_v9 = vcombine.high %v5501_v32, %v5515_v61 }
 0x63c   : > { %v5172_v49 = vpop.permute.xlu0 %5171  ;;  %v5619_v52 = vcombine.high %v5409_v60, %v5409_v60 }
 0x63d   : > { %5189 = vst.msk [vmem:[#allocation5 + $0x48] sm:$0x7f] %vm2710_vm4, %v5172_v49  ;;  %v5526_v39 = vrot.slane %v5516_v56, %v14900_v2  ;;  %v5540_v15 = vrot.slane %v5517_v6, %v14900_v2  ;;  %v5533_v1 = vrot.slane %v5518_v19, %v14900_v2  ;;  %v5547_v38 = vrot.slane %v5519_v9, %v14900_v2 }
 0x63e   : > { %v5331_v55 = vpop.permute.xlu1 %5330  ;;  %v5647_v19 = vrot.slane %v5619_v52, %v14900_v2 }
 0x63f   : > { %v5995_v36 = vcombine.low %v5526_v39, %v5540_v15  ;;  %v12677_v30 = vcombine.high %v5526_v39, %v5540_v15  ;;  %v5549_v16 = vcombine.high %v5533_v1, %v5533_v1  ;;  %v5997_v3 = vcombine.low %v5533_v1, %v5547_v38 }
 0x640   : > { %v5257_v18 = vpop.permute.xlu0 %5256 }
 0x641   : > { %v15840_v47 = vrot.slane %v5995_v36, %v14900_v2  ;;  %v15843_v45 = vrot.slane %v12677_v30, %v14900_v2  ;;  %v15853_v22 = vrot.slane %v5997_v3, %v14900_v2  ;;  %v5407_v24 = vld [vmem:[#allocation5 + $0x30] sm:$0x7f]  ;;  %v5412_v36 = vld [vmem:[#allocation5 + $0x58] sm:$0x7f] }
 0x642   : > { %v5405_v53 = vld [vmem:[#allocation5 + $0x20] sm:$0x7f]  ;;  %v5302_v5 = vpop.permute.xlu1 %5301  ;;  %v5706_v3 = vrot.slane %v5412_v36, %v14900_v2 }
 0x643   : > { %5320 = vst.msk [vmem:[#allocation5 + $0x38] sm:$0x7f] %vm2710_vm4, %v5302_v5  ;;  %v5551_v25 = vcombine.low %v5404_v40, %v5405_v53  ;;  %v5552_v27 = vcombine.high %v5404_v40, %v5405_v53  ;;  %v6027_v63 = vcombine.low %v15840_v47, %v15843_v45 }
 0x644   : > { %5349 = vst.msk [vmem:[#allocation5 + $0x38] sm:$0x7f] %vm2767_vm7, %v5331_v55  ;;  %v5228_v28 = vpop.permute.xlu0 %5227 }
 0x645   : > { %v5560_v8 = vrot.slane %v5551_v25, %v14900_v2  ;;  %v5567_v43 = vrot.slane %v5552_v27, %v14900_v2  ;;  %5245 = vst.msk [vmem:[#allocation5 + $0x48] sm:$0x7f] %vm2767_vm7, %v5228_v28  ;;  %v15864_v34 = vrot.slane %v6027_v63, %v14900_v2 }
 0x646   : > { %v5360_v46 = vpop.permute.xlu1 %5359  ;;  %5274 = vst.msk [vmem:[#allocation5 + $0x48] sm:$0x7f] %vm2797_vm3, %v5257_v18 }
 0x647   : > { %5378 = vst.msk [vmem:[#allocation5 + $0x38] sm:$0x7f] %vm2797_vm3, %v5360_v46  ;;  %v5582_v33 = vcombine.low %v5560_v8, %v5574_v29  ;;  %v5583_v26 = vcombine.high %v5560_v8, %v5574_v29  ;;  %v5584_v44 = vcombine.low %v5567_v43, %v5581_v20  ;;  %v5585_v4 = vcombine.high %v5567_v43, %v5581_v20 }
 0x648   : > { %v5304_v50 = vpop.permute.xlu0 %5303 }
 0x649   : > { %v5592_v42 = vrot.slane %v5582_v33, %v14900_v2  ;;  %v5606_v58 = vrot.slane %v5583_v26, %v14900_v2  ;;  %5321 = vst.msk [vmem:[#allocation5 + $0x50] sm:$0x7f] %vm2710_vm4, %v5304_v50  ;;  %v5599_v51 = vrot.slane %v5584_v44, %v14900_v2  ;;  %v5613_v55 = vrot.slane %v5585_v4, %v14900_v2 }
 0x64a   : > { %v5174_v7 = vpop.permute.xlu1 %5173  ;;  %v5685_v26 = vcombine.high %v5412_v36, %v5412_v36  ;;  %v5415_v36 = vld [vmem:[#allocation5 + $0x70] sm:$0x7f] }
 0x64b   : > { %5190 = vst.msk [vmem:[#allocation5 + $0x60] sm:$0x7f] %vm2710_vm4, %v5174_v7  ;;  %v5998_v11 = vcombine.low %v5549_v16, %v5592_v42  ;;  %v5614_v62 = vcombine.high %v5592_v42, %v5592_v42  ;;  %v5616_v31 = vcombine.high %v5606_v58, %v5606_v58  ;;  %v5615_v37 = vcombine.high %v5599_v51, %v5599_v51 }
 0x64c   : > { %v5306_v35 = vpop.permute.xlu0 %5305 }
 0x64d   : > { %v15856_v21 = vrot.slane %v5998_v11, %v14900_v2  ;;  %5322 = vst.msk [vmem:[#allocation5 + $0x68] sm:$0x7f] %vm2710_vm4, %v5306_v35  ;;  %v6062_v6 = vcombine.low %v5606_v58, %v5614_v62  ;;  %v6063_v49 = vcombine.low %v5616_v31, %v5599_v51  ;;  %v6064_v18 = vcombine.low %v5613_v55, %v5615_v37  ;;  %v5410_v43 = vld [vmem:[#allocation5 + $0x48] sm:$0x7f] }
 0x64e   : > { %v5408_v14 = vld [vmem:[#allocation5 + $0x38] sm:$0x7f]  ;;  %v5333_v48 = vpop.permute.xlu1 %5332  ;;  %v5713_v62 = vrot.slane %v5685_v26, %v14900_v2 }
 0x64f   : > { %5350 = vst.msk [vmem:[#allocation5 + $0x50] sm:$0x7f] %vm2767_vm7, %v5333_v48  ;;  %v6029_v10 = vcombine.low %v15853_v22, %v15856_v21  ;;  %v5617_v23 = vcombine.low %v5407_v24, %v5408_v14  ;;  %v5618_v41 = vcombine.high %v5407_v24, %v5408_v14  ;;  %v15881_v5 = vrot.slane %v6062_v6, %v14900_v2 }
 0x650   : > { %v5230_v59 = vpop.permute.xlu0 %5229  ;;  %v15884_v57 = vrot.slane %v6063_v49, %v14900_v2  ;;  %v15891_v1 = vrot.slane %v6064_v18, %v14900_v2 }
 0x651   : > { %v15867_v12 = vrot.slane %v6029_v10, %v14900_v2  ;;  %v5626_v56 = vrot.slane %v5617_v23, %v14900_v2  ;;  %5246 = vst.msk [vmem:[#allocation5 + $0x60] sm:$0x7f] %vm2767_vm7, %v5230_v59  ;;  %v5633_v54 = vrot.slane %v5618_v41, %v14900_v2 }
 0x652   : > { %v5362_v32 = vpop.permute.xlu1 %5361  ;;  %v6094_v8 = vcombine.low %v15881_v5, %v15884_v57 }
 0x653   : > { %5379 = vst.msk [vmem:[#allocation5 + $0x50] sm:$0x7f] %vm2797_vm3, %v5362_v32  ;;  %v6060_v61 = vcombine.high %v15864_v34, %v15867_v12  ;;  %v5648_v39 = vcombine.low %v5626_v56, %v5640_v17  ;;  %v5649_v15 = vcombine.high %v5626_v56, %v5640_v17  ;;  %v5650_v27 = vcombine.low %v5633_v54, %v5647_v19 }
 0x654   : > { %v1617_v9 = vpop.permute.xlu0 %1616  ;;  %v5651_v30 = vcombine.high %v5633_v54, %v5647_v19  ;;  %v15906_v7 = vrot.slane %v6094_v8, %v14900_v2 }
 0x655   : > { %13107 = vmatmul.mubr.msk.f32.vlgmr.msra.gmra.mxu1 %vm17738_vm1, %v6060_v61  ;;  %v5658_v40 = vrot.slane %v5648_v39, %v14900_v2  ;;  %v5672_v53 = vrot.slane %v5649_v15, %v14900_v2  ;;  %1683 = vst.msk [vmem:[#allocation3 + $0xf0] sm:$0xff] %vm17739_vm12, %v1617_v9  ;;  %v5665_v33 = vrot.slane %v5650_v27, %v14900_v2  ;;  %vm17749_vm1 = vmmov %vm17747_vm11 }
 0x656   : > { %v5335_v25 = vpop.permute.xlu1 %5334  ;;  %13109 = vmatprep.mubr.msk.f32.mxu1 %vm13294_vm10, %v13282_v0  ;;  %v5679_v50 = vrot.slane %v5651_v30, %v14900_v2  ;;  %vm17750_vm12 = vmmov %vm17745_vm8 }
 0x657   : > { %5351 = vst.msk [vmem:[#allocation5 + $0x68] sm:$0x7f] %vm2767_vm7, %v5335_v25  ;;  %v6065_v29 = vcombine.low %v5658_v40, %v5672_v53  ;;  %v12678_v35 = vcombine.high %v5658_v40, %v5672_v53  ;;  %v5681_v10 = vcombine.high %v5665_v33, %v5665_v33 }
 0x658   : > { %v5176_v28 = vpop.permute.xlu0 %5175  ;;  %v6130_v48 = vcombine.low %v5665_v33, %v5679_v50 }
 0x659   : > { %v15894_v38 = vrot.slane %v6065_v29, %v14900_v2  ;;  %5191 = vst.msk [vmem:[#allocation5 + $0x78] sm:$0x7f] %vm2710_vm4, %v5176_v28  ;;  %v15924_v41 = vrot.slane %v12678_v35, %v14900_v2 }
 0x65a   : > { %v5411_v46 = vld [vmem:[#allocation5 + $0x50] sm:$0x7f]  ;;  %v1619_v20 = vpop.permute.xlu1 %1618  ;;  %v15929_v6 = vrot.slane %v6130_v48, %v14900_v2  ;;  %v5751_v48 = vcombine.high %v5415_v36, %v5415_v36 }
 0x65b   : > { %1684 = vst.msk [vmem:[#allocation3 + $0xf8] sm:$0xff] %vm17740_vm13, %v1619_v20  ;;  %v6096_v44 = vcombine.low %v15891_v1, %v15894_v38  ;;  %v5683_v16 = vcombine.low %v5410_v43, %v5411_v46  ;;  %v5684_v42 = vcombine.high %v5410_v43, %v5411_v46  ;;  %vm17751_vm13 = vmmov %vm17745_vm8 }
 0x65c   : > { %v5308_v58 = vpop.permute.xlu0 %5307  ;;  %v6161_v15 = vcombine.low %v15924_v41, %v15929_v6 }
 0x65d   : > { %v15909_v11 = vrot.slane %v6096_v44, %v14900_v2  ;;  %v5692_v63 = vrot.slane %v5683_v16, %v14900_v2  ;;  %v5699_v60 = vrot.slane %v5684_v42, %v14900_v2  ;;  %5323 = vst.msk [vmem:[#allocation5 + $0x80] sm:$0x7f] %vm2710_vm4, %v5308_v58  ;;  %v5772_v44 = vrot.slane %v5415_v36, %v14900_v2 }
 0x65e   : > { %v5259_v51 = vpop.permute.xlu1 %5258  ;;  %v15947_v30 = vrot.slane %v6161_v15, %v14900_v2 }
 0x65f   : > { %5275 = vst.msk [vmem:[#allocation5 + $0x60] sm:$0x7f] %vm2797_vm3, %v5259_v51  ;;  %v6127_v31 = vcombine.high %v15906_v7, %v15909_v11  ;;  %v5714_v24 = vcombine.low %v5692_v63, %v5706_v3  ;;  %v5715_v14 = vcombine.high %v5692_v63, %v5706_v3  ;;  %v5716_v17 = vcombine.low %v5699_v60, %v5713_v62 }
 0x660   : > { %v1777_v4 = vpop.permute.xlu0 %1776  ;;  %v5717_v18 = vcombine.high %v5699_v60, %v5713_v62 }
 0x661   : > { %13110 = vmatmul.mubr.msk.f32.gmra.mxu1 %vm17741_vm14, %v6127_v31  ;;  %v5724_v23 = vrot.slane %v5714_v24, %v14900_v2  ;;  %1878 = vst.msk [vmem:[#allocation3 + $0xef] sm:$0xfe] %vm1830_vm0, %v1777_v4  ;;  %v5738_v52 = vrot.slane %v5715_v14, %v14900_v2  ;;  %v5731_v55 = vrot.slane %v5716_v17, %v14900_v2  ;;  %vm17742_vm0 = vcmask 261344   ;;  %vm17752_vm14 = vmmov %vm17745_vm8 }
 0x662   : > { %v5364_v37 = vpop.permute.xlu1 %5363  ;;  %13112 = vmatprep.mubr.msk.f32.mxu1 %vm13294_vm10, %v13282_v0  ;;  %v5745_v8 = vrot.slane %v5717_v18, %v14900_v2 }
 0x663   : > { %5380 = vst.msk [vmem:[#allocation5 + $0x68] sm:$0x7f] %vm2797_vm3, %v5364_v37  ;;  %v5746_v59 = vcombine.high %v5724_v23, %v5724_v23  ;;  %v6131_v56 = vcombine.low %v5681_v10, %v5724_v23  ;;  %v5748_v19 = vcombine.high %v5738_v52, %v5738_v52  ;;  %v5747_v53 = vcombine.high %v5731_v55, %v5731_v55  ;;  %v5418_v37 = vld [vmem:[#allocation5 + $0x88] sm:$0x7f] }
 0x664   : > { %v5232_v49 = vpop.permute.xlu0 %5231  ;;  %v5817_v15 = vcombine.high %v5418_v37, %v5418_v37 }
 0x665   : > { %v6132_v32 = vcombine.low %v5738_v52, %v5746_v59  ;;  %5247 = vst.msk [vmem:[#allocation5 + $0x78] sm:$0x7f] %vm2767_vm7, %v5232_v49  ;;  %v15935_v61 = vrot.slane %v6131_v56, %v14900_v2  ;;  %v6196_v46 = vcombine.low %v5748_v19, %v5731_v55  ;;  %v6197_v50 = vcombine.low %v5745_v8, %v5747_v53 }
 0x666   : > { %v1779_v54 = vpop.permute.xlu1 %1778  ;;  %v5413_v25 = vld [vmem:[#allocation5 + $0x60] sm:$0x7f]  ;;  %v6030_v49 = vcombine.high %v15853_v22, %v15856_v21  ;;  %v5779_v55 = vrot.slane %v5751_v48, %v14900_v2  ;;  %v6095_v8 = vcombine.high %v15881_v5, %v15884_v57 }
 0x667   : > { %1879 = vst.msk [vmem:[#allocation3 + $0xf7] sm:$0xff] %vm17742_vm0, %v1779_v54  ;;  %v15938_v39 = vrot.slane %v6132_v32, %v14900_v2  ;;  %v15963_v58 = vrot.slane %v6196_v46, %v14900_v2  ;;  %v15968_v35 = vrot.slane %v6197_v50, %v14900_v2  ;;  %v6028_v54 = vcombine.high %v15840_v47, %v15843_v45 }
 0x668   : > { %v1781_v9 = vpop.permute.xlu0 %1780  ;;  %v6097_v47 = vcombine.high %v15891_v1, %v15894_v38  ;;  %v5838_v46 = vrot.slane %v5418_v37, %v14900_v2  ;;  %vm17753_vm0 = vcmask 1045504  }
 0x669   : > { %v6163_v40 = vcombine.low %v15935_v61, %v15938_v39  ;;  %1880 = vst.msk [vmem:[#allocation3 + $0xff] sm:$0x1] %vm1834_vm2, %v1781_v9  ;;  %vm17743_vm2 = vcmask 294144   ;;  %v6228_v17 = vcombine.low %v15963_v58, %v15968_v35  ;;  %v6044_v36 = vrot.slane %v6028_v54, %v14900_v2 }
 0x66a   : > { %v5414_v27 = vld [vmem:[#allocation5 + $0x68] sm:$0x7f]  ;;  %v5337_v29 = vpop.permute.xlu1 %5336  ;;  %v6125_v57 = vrot.slane %v6097_v47, %v14900_v2 }
 0x66b   : > { %5352 = vst.msk [vmem:[#allocation5 + $0x80] sm:$0x7f] %vm2767_vm7, %v5337_v29  ;;  %v15950_v28 = vrot.slane %v6163_v40, %v14900_v2  ;;  %v5749_v43 = vcombine.low %v5413_v25, %v5414_v27  ;;  %v5750_v62 = vcombine.high %v5413_v25, %v5414_v27  ;;  %v15992_v19 = vrot.slane %v6228_v17, %v14900_v2 }
 0x66c   : > { %v1974_v20 = vpop.permute.xlu0 %1973  ;;  %v6058_v27 = vrot.slane %v6030_v49, %v14900_v2 }
 0x66d   : > { %v6194_v33 = vcombine.high %v15947_v30, %v15950_v28  ;;  %v5758_v26 = vrot.slane %v5749_v43, %v14900_v2  ;;  %2074 = vst.msk [vmem:[#allocation3 + $0xf6] sm:$0xff] %vm17743_vm2, %v1974_v20  ;;  %v5765_v52 = vrot.slane %v5750_v62, %v14900_v2  ;;  %vm17754_vm2 = vmmov %vm17753_vm0 }
 0x66e   : > { %v1972_v16 = vpop.permute.xlu1 %1971  ;;  %v6061_v5 = vcombine.low %v6044_v36, %v6058_v27 }
 0x66f   : > { %2073 = vst.msk [vmem:[#allocation3 + $0xee] sm:$0xfc] %vm17744_vm15, %v1972_v16  ;;  %13113 = vmatmul.mubr.msk.f32.gmra.mxu1 %vm17745_vm8, %v6194_v33  ;;  %v5780_v42 = vcombine.low %v5758_v26, %v5772_v44  ;;  %v5781_v3 = vcombine.high %v5758_v26, %v5772_v44  ;;  %v5782_v22 = vcombine.low %v5765_v52, %v5779_v55  ;;  %vm17755_vm15 = vmmov %vm17753_vm0 }
 0x670   : > { %13115 = vmatprep.mubr.msk.f32.mxu1 %vm13294_vm10, %v13282_v0  ;;  %v5366_v63 = vpop.permute.xlu0 %5365  ;;  %v5783_v21 = vcombine.high %v5765_v52, %v5779_v55  ;;  %v16013_v26 = vrot.slane %v5817_v15, %v14900_v2  ;;  %v6164_v16 = vcombine.high %v15935_v61, %v15938_v39  ;;  %v6162_v61 = vcombine.high %v15924_v41, %v15929_v6  ;;  %v5421_v55 = vld [vmem:[#allocation5 + $0xa0] sm:$0x7f]  ;;  %vm17756_vm8 = vmmov %vm17753_vm0 }
 0x671   : > { %v5790_v60 = vrot.slane %v5780_v42, %v14900_v2  ;;  %v5804_v51 = vrot.slane %v5781_v3, %v14900_v2  ;;  %5381 = vst.msk [vmem:[#allocation5 + $0x80] sm:$0x7f] %vm2797_vm3, %v5366_v63  ;;  %v5797_v33 = vrot.slane %v5782_v22, %v14900_v2  ;;  %v6126_v52 = vcombine.low %v15906_v7, %v15909_v11 }
 0x672   : > { %v5261_v31 = vpop.permute.xlu1 %5260  ;;  %v5811_v1 = vrot.slane %v5783_v21, %v14900_v2  ;;  %v6192_v17 = vrot.slane %v6164_v16, %v14900_v2  ;;  %v6193_v21 = vcombine.low %v15947_v30, %v15950_v28 }
 0x673   : > { %5276 = vst.msk [vmem:[#allocation5 + $0x78] sm:$0x7f] %vm2797_vm3, %v5261_v31  ;;  %v6198_v24 = vcombine.low %v5790_v60, %v5804_v51  ;;  %v12679_v14 = vcombine.high %v5790_v60, %v5804_v51  ;;  %v6059_v60 = vcombine.low %v15864_v34, %v15867_v12  ;;  %v6111_v51 = vrot.slane %v6095_v8, %v14900_v2 }
 0x674   : > { %v5178_v4 = vpop.permute.xlu0 %5177  ;;  %v5813_v62 = vcombine.high %v5797_v33, %v5797_v33 }
 0x675   : > { %v15973_v10 = vrot.slane %v6198_v24, %v14900_v2  ;;  %v15976_v23 = vrot.slane %v12679_v14, %v14900_v2  ;;  %5192 = vst.msk [vmem:[#allocation5 + $0x90] sm:$0x7f] %vm2710_vm4, %v5178_v4  ;;  %v6263_v14 = vcombine.low %v5797_v33, %v5811_v1  ;;  %v6128_v4 = vcombine.low %v6111_v51, %v6125_v57 }
 0x676   : > { %v1976_v59 = vpop.permute.xlu1 %1975  ;;  %v2106_v56 = vld [vmem:[#allocation3 + $0xf0] sm:$0xff] }
 0x677   : > { %2075 = vst.msk [vmem:[#allocation3 + $0xfe] sm:$0x3] %vm17746_vm6, %v1976_v59  ;;  %13066 = vmatprep.mubr.msk.f32.mxu0 %vm17747_vm11, %v2106_v56  ;;  %v6230_v32 = vcombine.low %v15973_v10, %v15976_v23  ;;  %v6231_v34 = vcombine.high %v15973_v10, %v15976_v23  ;;  %v6178_v59 = vrot.slane %v6162_v61, %v14900_v2  ;;  %vm17757_vm6 = vmmov %vm17753_vm0 }
 0x678   : > { %v5234_v18 = vpop.permute.xlu0 %5233  ;;  %v5417_v40 = vld [vmem:[#allocation5 + $0x80] sm:$0x7f]  ;;  %v6229_v56 = vcombine.high %v15963_v58, %v15968_v35  ;;  %v6273_v10 = vrot.slane %v6263_v14, %v14900_v2  ;;  %v5883_v35 = vcombine.high %v5421_v55, %v5421_v55  ;;  %vm17758_vm11 = vmmov %vm17753_vm0 }
 0x679   : > { %v15995_v9 = vrot.slane %v6230_v32, %v14900_v2  ;;  %5248 = vst.msk [vmem:[#allocation5 + $0x90] sm:$0x7f] %vm2767_vm7, %v5234_v18  ;;  %v6195_v54 = vcombine.low %v6178_v59, %v6192_v17  ;;  %v6259_v15 = vrot.slane %v6231_v34, %v14900_v2 }
 0x67a   : > { %v5416_v53 = vld [vmem:[#allocation5 + $0x78] sm:$0x7f]  ;;  %v5310_v25 = vpop.permute.xlu1 %5309  ;;  %v6245_v58 = vrot.slane %v6229_v56, %v14900_v2  ;;  %v5911_v33 = vrot.slane %v5883_v35, %v14900_v2 }
 0x67b   : > { %5324 = vst.msk [vmem:[#allocation5 + $0x98] sm:$0x7f] %vm2710_vm4, %v5310_v25  ;;  %v6261_v45 = vcombine.high %v15992_v19, %v15995_v9  ;;  %v5815_v29 = vcombine.low %v5416_v53, %v5417_v40  ;;  %v5816_v43 = vcombine.high %v5416_v53, %v5417_v40  ;;  %v5904_v25 = vrot.slane %v5421_v55, %v14900_v2 }
 0x67c   : > { %v5263_v20 = vpop.permute.xlu0 %5262 }
 0x67d   : > { %13116 = vmatmul.mubr.msk.f32.gmra.mxu1 %vm17748_vm9, %v6261_v45  ;;  %v5824_v38 = vrot.slane %v5815_v29, %v14900_v2  ;;  %5277 = vst.msk [vmem:[#allocation5 + $0x90] sm:$0x7f] %vm2797_vm3, %v5263_v20  ;;  %v16022_v42 = vrot.slane %v5816_v43, %v14900_v2  ;;  %v6262_v45 = vcombine.low %v6245_v58, %v6259_v15  ;;  %v7687_v58 = vrot.slane %v15805_v13, 2  ;;  %vm17759_vm9 = vmmov %vm17753_vm0 }
 0x67e   : > { %v5339_v44 = vpop.permute.xlu1 %5338  ;;  %v2107_v50 = vld [vmem:[#allocation3 + $0xf8] sm:$0xff]  ;;  %13118 = vmatprep.mubr.msk.f32.mxu1 %vm13294_vm10, %v13282_v0  ;;  %v6260_v20 = vcombine.low %v15992_v19, %v15995_v9 }
 0x67f   : > { %5353 = vst.msk [vmem:[#allocation5 + $0x98] sm:$0x7f] %vm2767_vm7, %v5339_v44  ;;  %13067 = vmatmul.mubr.msk.f32.gmra.mxu0 %vm17749_vm1, %v2107_v50  ;;  %v5846_v3 = vcombine.low %v5824_v38, %v5838_v46  ;;  %v5847_v63 = vcombine.high %v5824_v38, %v5838_v46  ;;  %v5848_v39 = vcombine.low %v16022_v42, %v16013_v26  ;;  %vm17760_vm1 = vmmov %vm17753_vm0 }
 0x680   : > { %6651 = vmatprep.mubr.f32.mxu0 %v6061_v5  ;;  %v5849_v8 = vcombine.high %v16022_v42, %v16013_v26 }
 0x681   : > { %v5856_v31 = vrot.slane %v5846_v3, %v14900_v2  ;;  %v5870_v24 = vrot.slane %v5847_v63, %v14900_v2  ;;  %v5863_v12 = vrot.slane %v5848_v39, %v14900_v2 }
 0x682   : > { %v5368_v48 = vpop.permute.xlu1 %5367  ;;  %v5877_v5 = vrot.slane %v5849_v8, %v14900_v2 }
 0x683   : > { %5382 = vst.msk [vmem:[#allocation5 + $0x98] sm:$0x7f] %vm2797_vm3, %v5368_v48  ;;  %6652 = vmatmul.mubr.f32.vlgmr.msra.gmra.mxu0 %v6059_v60  ;;  %v5878_v41 = vcombine.high %v5856_v31, %v5856_v31  ;;  %v5880_v6 = vcombine.high %v5870_v24, %v5870_v24  ;;  %v6264_v37 = vcombine.low %v5813_v62, %v5856_v31 }
 0x684   : > { %6656 = vmatprep.mubr.f32.mxu0 %v6128_v4  ;;  %v5419_v27 = vld [vmem:[#allocation5 + $0x90] sm:$0x7f]  ;;  %v5879_v44 = vcombine.high %v5863_v12, %v5863_v12 }
 0x685   : > { %v6265_v49 = vcombine.low %v5870_v24, %v5878_v41  ;;  %v6266_v32 = vcombine.low %v5880_v6, %v5863_v12  ;;  %v6280_v23 = vrot.slane %v6264_v37, %v14900_v2 }
 0x686   : > { %v6330_v60 = vcombine.low %v5877_v5, %v5879_v44 }
 0x687   : > { %6657 = vmatmul.mubr.f32.gmra.mxu0 %v6126_v52  ;;  %v6287_v18 = vrot.slane %v6265_v49, %v14900_v2  ;;  %v6294_v7 = vrot.slane %v6266_v32, %v14900_v2  ;;  %v6295_v11 = vcombine.low %v6273_v10, %v6280_v23  ;;  %v6296_v22 = vcombine.high %v6273_v10, %v6280_v23 }
 0x688   : > { %6661 = vmatprep.mubr.f32.mxu0 %v6195_v54  ;;  %v6340_v14 = vrot.slane %v6330_v60, %v14900_v2 }
 0x689   : > { %v6297_v40 = vcombine.low %v6287_v18, %v6294_v7  ;;  %v6298_v53 = vcombine.high %v6287_v18, %v6294_v7  ;;  %v6305_v29 = vrot.slane %v6295_v11, %v14900_v2  ;;  %v6312_v36 = vrot.slane %v6296_v22, %v14900_v2  ;;  %v7614_v11 = vld [vmem:[#allocation4 + $0x8] sm:$0x1]  ;;  %v7629_v22 = vld [vmem:[#allocation4 + $0x80] sm:$0xff] }
 0x68a   : > { %v5420_v47 = vld [vmem:[#allocation5 + $0x98] sm:$0x7f]  ;;  %v7645_v7 = vrot.slane %v15805_v13, 1  ;;  %v7688_v35 = vrot.slane %v7614_v11, 2  ;;  %7825 = vrot.lane.b32.xlu1 %v7629_v22, %s13291_s22 }
 0x68b   : > { %6662 = vmatmul.mubr.f32.gmra.mxu0 %v6193_v21  ;;  %v6319_v43 = vrot.slane %v6297_v40, %v14900_v2  ;;  %v6326_v46 = vrot.slane %v6298_v53, %v14900_v2  ;;  %v5881_v30 = vcombine.low %v5419_v27, %v5420_v47  ;;  %v5882_v28 = vcombine.high %v5419_v27, %v5420_v47 }
 0x68c   : > { %6666 = vmatprep.mubr.f32.mxu0 %v6262_v45  ;;  %7652 = vrot.lane.b32.xlu0 %v7645_v7, %s13290_s30  ;;  %v7689_v21 = vsel %vm17753_vm0, %v7687_v58, %v7688_v35  ;;  %v7871_v27 = vrot.slane %v7629_v22, 2 }
 0x68d   : > { %v6328_v1 = vcombine.high %v6305_v29, %v6319_v43  ;;  %v6329_v38 = vcombine.low %v6312_v36, %v6326_v46  ;;  %v5890_v50 = vrot.slane %v5881_v30, %v14900_v2  ;;  %v5897_v26 = vrot.slane %v5882_v28, %v14900_v2 }
 0x68e   : > { %v6327_v42 = vcombine.low %v6305_v29, %v6319_v43  ;;  %v12676_v29 = vld [vmem:[%s17500_s6] ss:$0 sm:$0xff] }
 0x68f   : > { %6667 = vmatmul.mubr.f32.gmra.mxu0 %v6260_v20  ;;  %13119 = vmatmul.mubr.msk.f32.gmra.mxu1 %vm17750_vm12, %v6328_v1  ;;  %v5912_v57 = vcombine.low %v5890_v50, %v5904_v25  ;;  %v5913_v16 = vcombine.high %v5890_v50, %v5904_v25  ;;  %v5914_v19 = vcombine.low %v5897_v26, %v5911_v33  ;;  %v7630_v25 = vld [vmem:[#allocation4 + $0x88] sm:$0x1]  ;;  %vm17761_vm12 = vmmov %vm17753_vm0 }
 0x690   : > { %6671 = vmatprep.mubr.f32.mxu0 %v6329_v38  ;;  %13121 = vmatprep.mubr.msk.f32.mxu1 %vm13294_vm10, %v13282_v0  ;;  %v5915_v9 = vcombine.high %v5897_v26, %v5911_v33  ;;  %v7872_v47 = vrot.slane %v7630_v25, 2  ;;  %v5947_v8 = vcombine.high %v12676_v29, %v12676_v29  ;;  %v5954_v43 = vrot.slane %v12676_v29, %v14900_v2  ;;  %vm17763_vm0 = vmmov %vm17751_vm13 }
 0x691   : > { %v5922_v3 = vrot.slane %v5912_v57, %v14900_v2  ;;  %v5936_v63 = vrot.slane %v5913_v16, %v14900_v2  ;;  %v5929_v51 = vrot.slane %v5914_v19, %v14900_v2  ;;  %7708 = vrot.lane.b32.xlu0 %v7689_v21, %s13291_s22 }
 0x692   : > { %v5943_v61 = vrot.slane %v5915_v9, %v14900_v2  ;;  %v7873_v45 = vsel %vm17754_vm2, %v7871_v27, %v7872_v47  ;;  %v5961_v46 = vrot.slane %v5947_v8, %v14900_v2  ;;  %v5962_v30 = vcombine.high %v5954_v43, %v5954_v43  ;;  %vm17764_vm2 = vmmov %vm17763_vm0 }
 0x693   : > { %6672 = vmatmul.mubr.f32.gmra.mxu0 %v6327_v42  ;;  %v6331_v39 = vcombine.low %v5922_v3, %v5936_v63  ;;  %v12680_v62 = vcombine.high %v5922_v3, %v5936_v63  ;;  %v5945_v24 = vcombine.high %v5929_v51, %v5929_v51  ;;  %7887 = vst.msk [vmem:[#allocation5 + $0xa0] sm:$0x7f] %vm2642_vm5, %v7873_v45 }
 0x694   : > { %v6333_v31 = vcombine.low %v5929_v51, %v5943_v61  ;;  %v5963_v28 = vcombine.high %v5961_v46, %v5961_v46  ;;  %v5977_v20 = vrot.slane %v5961_v46, %v14900_v2  ;;  %v5970_v1 = vrot.slane %v5954_v43, %v14900_v2 }
 0x695   : > { %v6347_v48 = vrot.slane %v6331_v39, %v14900_v2  ;;  %v6354_v4 = vrot.slane %v12680_v62, %v14900_v2  ;;  %v6403_v34 = vrot.slane %v5945_v24, %v14900_v2  ;;  %v5984_v38 = vrot.slane %v5962_v30, %v14900_v2 }
 0x696   : > { %v6361_v17 = vrot.slane %v6333_v31, %v14900_v2  ;;  %v5991_v44 = vrot.slane %v5963_v28, %v14900_v2  ;;  %v16113_v50 = vcombine.high %v5977_v20, %v5977_v20  ;;  %v5992_v9 = vcombine.high %v5970_v1, %v5970_v1 }
 0x697   : > { %v6363_v12 = vcombine.high %v6340_v14, %v6347_v48  ;;  %v6362_v41 = vcombine.low %v6340_v14, %v6347_v48  ;;  %v6404_v32 = vcombine.high %v6403_v34, %v6403_v34  ;;  %v6411_v54 = vrot.slane %v6403_v34, %v14900_v2 }
 0x698   : > { %v6365_v6 = vcombine.high %v6354_v4, %v6361_v17  ;;  %v6364_v37 = vcombine.low %v6354_v4, %v6361_v17  ;;  %v6434_v5 = vcombine.low %v5970_v1, %v5984_v38  ;;  %v12681_v57 = vcombine.high %v5970_v1, %v5984_v38 }
 0x699   : > { %v6379_v52 = vrot.slane %v6363_v12, %v14900_v2  ;;  %v6372_v59 = vrot.slane %v6362_v41, %v14900_v2  ;;  %v6418_v15 = vrot.slane %v6404_v32, %v14900_v2  ;;  %v6419_v18 = vcombine.high %v6411_v54, %v6411_v54 }
 0x69a   : > { %v6393_v56 = vrot.slane %v6365_v6, %v14900_v2  ;;  %v6386_v49 = vrot.slane %v6364_v37, %v14900_v2  ;;  %v6436_v16 = vcombine.low %v5977_v20, %v5991_v44  ;;  %v6437_v19 = vcombine.low %v16113_v50, %v5970_v1 }
 0x69b   : > { %v5994_v42 = vcombine.high %v5984_v38, %v5984_v38  ;;  %v6444_v3 = vrot.slane %v6434_v5, %v14900_v2  ;;  %v6451_v63 = vrot.slane %v12681_v57, %v14900_v2  ;;  %v6483_v61 = vcombine.low %v5984_v38, %v5992_v9 }
 0x69c   : > { %v6396_v10 = vcombine.low %v6379_v52, %v6393_v56  ;;  %v6395_v23 = vcombine.high %v6372_v59, %v6386_v49  ;;  %v6394_v55 = vcombine.low %v6372_v59, %v6386_v49  ;;  %v6458_v60 = vrot.slane %v6436_v16, %v14900_v2 }
 0x69d   : > { %v6465_v51 = vrot.slane %v6437_v19, %v14900_v2  ;;  %v6484_v39 = vcombine.low %v5994_v42, %v5977_v20  ;;  %v6485_v62 = vcombine.low %v5991_v44, %v16113_v50  ;;  %v6466_v31 = vcombine.low %v6444_v3, %v6451_v63 }
 0x69e   : > { %6676 = vmatprep.mubr.f32.mxu0 %v6396_v10  ;;  %13122 = vmatmul.mubr.msk.f32.gmra.mxu1 %vm17751_vm13, %v6395_v23  ;;  %v6492_v14 = vrot.slane %v6483_v61, %v14900_v2  ;;  %v6558_v5 = vrot.slane %v16113_v50, %v14900_v2 }
 0x69f   : > { %6677 = vmatmul.mubr.f32.gmra.mxu0 %v6394_v55  ;;  %13124 = vmatprep.mubr.msk.f32.mxu1 %vm13294_vm10, %v13282_v0  ;;  %v6467_v24 = vcombine.low %v6458_v60, %v6465_v51  ;;  %v6499_v48 = vrot.slane %v6484_v39, %v14900_v2  ;;  %v6506_v4 = vrot.slane %v6485_v62, %v14900_v2 }
 0x6a0   : > { %6681 = vmatprep.mubr.f32.mxu0 %v6418_v15  ;;  %v16127_v41 = vrot.slane %v6466_v31, %v14900_v2  ;;  %v6524_v55 = vcombine.low %v6451_v63, %v6458_v60 }
 0x6a1   : > { %v16130_v6 = vrot.slane %v6467_v24, %v14900_v2  ;;  %v6507_v37 = vcombine.low %v6492_v14, %v6499_v48  ;;  %v6508_v52 = vcombine.low %v6506_v4, %v6444_v3  ;;  %v6541_v15 = vcombine.low %v6499_v48, %v6506_v4 }
 0x6a2   : > { %13125 = vmatmul.mubr.msk.f32.gmra.mxu1 %vm17752_vm14, %v6419_v18  ;;  %v16143_v35 = vrot.slane %v6524_v55, %v14900_v2  ;;  %vm17762_vm14 = vmmov %vm17751_vm13 }
 0x6a3   : > { %6682 = vmatmul.mubr.f32.gmra.mxu0 %v6411_v54  ;;  %13135 = vmatprep.mubr.msk.f32.mxu1 %vm13294_vm10, %v13282_v0  ;;  %v6482_v49 = vcombine.low %v16127_v41, %v16130_v6  ;;  %v16135_v32 = vrot.slane %v6507_v37, %v14900_v2  ;;  %v16138_v10 = vrot.slane %v6508_v52, %v14900_v2 }
 0x6a4   : > { %v6525_v54 = vcombine.low %v6465_v51, %v6492_v14 }
 0x6a5   : > { %v6523_v22 = vcombine.low %v16135_v32, %v16138_v10  ;;  %v6550_v44 = vcombine.low %v16130_v6, %v16135_v32 }
 0x6a6   : > { %v6539_v21 = vrot.slane %v6525_v54, %v14900_v2 }
 0x6a8   : > { %v6540_v8 = vcombine.low %v16143_v35, %v6539_v21 }
 0x715   : > { %v16096_v40 = vpop.f32.mrf.mxu1 }
 0x717   : > { %v13108_v53 = vpop.f32.mrf.mxu1 }
 0x718   : > { %v16147_v53 = vrot.slane %v6541_v15, %v14900_v2 }
 0x71a   : > { %v6549_v46 = vcombine.low %v16147_v53, %v16127_v41 }
 0x721   : > { %v16103_v13 = vpop.f32.mrf.mxu1 }
 0x723   : > { %v13111_v36 = vpop.f32.mrf.mxu1 }
 0x72f   : > { %v16108_v33 = vpop.f32.mrf.mxu1 }
 0x731   : > { %v13114_v26 = vpop.f32.mrf.mxu1 }
 0x732   : > { %v6551_v26 = vcombine.low %v16138_v10, %v16143_v35 }
 0x73d   : > { %v16124_v17 = vpop.f32.mrf.mxu1 }
 0x73f   : > { %v13068_v34 = vpop.f32.mrf.mxu0  ;;  %v13117_v12 = vpop.f32.mrf.mxu1 }
 0x741   : > { %v2437_v59 = vpop.f32.mrf.mxu0 }
 0x743   : > { %v12851_v56 = vpop.f32.mrf.mxu0 }
 0x745   : > { %v12852_v23 = vpop.f32.mrf.mxu0 }
 0x746   : > { %v12853_v18 = vadd.f32 %v12852_v23, %v12851_v56 }
 0x747   : > { %v12854_v7 = vpop.f32.mrf.mxu0 }
 0x748   : > { %v6654_v11 = vadd.f32 %v12853_v18, %v6482_v49 }
 0x749   : > { %v12855_v58 = vpop.f32.mrf.mxu0 }
 0x74a   : > { %v6754_v25 = vadd.f32 %v16096_v40, %v6654_v11  ;;  %v12856_v27 = vadd.f32 %v12855_v58, %v12854_v7 }
 0x74b   : > { %v12857_v47 = vpop.f32.mrf.mxu0 }
 0x74c   : > { %v6794_v45 = vcombine.high %v6754_v25, %v6754_v25  ;;  %v6801_v29 = vrot.slane %v6754_v25, %v14900_v2  ;;  %v6659_v36 = vadd.f32 %v12856_v27, %v6523_v22 }
 0x74d   : > { %v12858_v43 = vpop.f32.mrf.mxu0 }
 0x74e   : > { %v6808_v30 = vrot.slane %v6794_v45, %v14900_v2  ;;  %v6809_v28 = vcombine.high %v6801_v29, %v6801_v29  ;;  %v6817_v20 = vrot.slane %v6801_v29, %v14900_v2  ;;  %v6759_v1 = vadd.f32 %v16103_v13, %v6659_v36 }
 0x74f   : > { %v12859_v40 = vadd.f32 %v12858_v43, %v12857_v47  ;;  %v16157_v38 = vpop.f32.mrf.mxu1  ;;  %v12860_v42 = vpop.f32.mrf.mxu0 }
 0x750   : > { %v6810_v57 = vcombine.high %v6808_v30, %v6808_v30  ;;  %v6824_v16 = vrot.slane %v6808_v30, %v14900_v2  ;;  %v6831_v19 = vrot.slane %v6809_v28, %v14900_v2  ;;  %v6839_v9 = vcombine.high %v6817_v20, %v6817_v20 }
 0x751   : > { %v7151_v13 = vmax.f32 %v6817_v20, 0.0  ;;  %v6843_v3 = vcombine.high %v6759_v1, %v6759_v1  ;;  %v6850_v63 = vrot.slane %v6759_v1, %v14900_v2  ;;  %v6664_v60 = vadd.f32 %v12859_v40, %v6540_v8  ;;  %v13120_v51 = vpop.f32.mrf.mxu1  ;;  %v12861_v59 = vpop.f32.mrf.mxu0 }
 0x752   : > { %v6838_v61 = vrot.slane %v6810_v57, %v14900_v2  ;;  %v6840_v39 = vcombine.high %v6824_v16, %v6824_v16  ;;  %v6841_v62 = vcombine.high %v6831_v19, %v6831_v19  ;;  %v7152_v31 = vmax.f32 %v6831_v19, 0.0 }
 0x753   : > { %v7153_v24 = vmax.f32 %v6839_v9, 0.0  ;;  %v7155_v14 = vmax.f32 %v6824_v16, 0.0  ;;  %v6857_v48 = vrot.slane %v6843_v3, %v14900_v2  ;;  %v6858_v4 = vcombine.high %v6850_v63, %v6850_v63  ;;  %v12863_v29 = vpop.f32.mrf.mxu0 }
 0x754   : > { %v6842_v34 = vcombine.high %v6838_v61, %v6838_v61  ;;  %v7154_v12 = vmax.f32 %v6841_v62, 0.0  ;;  %v7156_v37 = vmax.f32 %v6838_v61, 0.0  ;;  %v7157_v52 = vmax.f32 %v6840_v39, 0.0 }
 0x755   : > { %v7249_v56 = vcombine.low %v7151_v13, %v7152_v31  ;;  %v6859_v49 = vcombine.high %v6857_v48, %v6857_v48  ;;  %v6866_v23 = vrot.slane %v6850_v63, %v14900_v2  ;;  %v6873_v55 = vrot.slane %v6857_v48, %v14900_v2  ;;  %v12864_v61 = vpop.f32.mrf.mxu0 }
 0x756   : > { %v7250_v54 = vcombine.low %v7153_v24, %v7154_v12  ;;  %v7251_v15 = vcombine.low %v7155_v14, %v7156_v37  ;;  %v7279_v18 = vrot.slane %v7157_v52, %v14900_v2  ;;  %v6880_v7 = vrot.slane %v6858_v4, %v14900_v2 }
 0x757   : > { %v7258_v11 = vrot.slane %v7249_v56, %v14900_v2  ;;  %v6887_v22 = vrot.slane %v6859_v49, %v14900_v2  ;;  %v6888_v58 = vcombine.high %v6866_v23, %v6866_v23  ;;  %v6889_v21 = vcombine.high %v6873_v55, %v6873_v55 }
 0x758   : > { %v7265_v25 = vrot.slane %v7250_v54, %v14900_v2  ;;  %v7272_v27 = vrot.slane %v7251_v15, %v14900_v2  ;;  %v6890_v47 = vcombine.high %v6880_v7, %v6880_v7  ;;  %v7158_v45 = vmax.f32 %v6842_v34, 0.0 }
 0x759   : > { %v6891_v36 = vcombine.high %v6887_v22, %v6887_v22  ;;  %v7159_v8 = vmax.f32 %v6866_v23, 0.0  ;;  %v7160_v43 = vmax.f32 %v6880_v7, 0.0  ;;  %v7161_v30 = vmax.f32 %v6888_v58, 0.0  ;;  %v13266_v23 = vld [vmem:[#allocation6] ss:$2 sm:$0x7f] }
 0x75a   : > { %v7280_v28 = vcombine.low %v7258_v11, %v7265_v25  ;;  %v7281_v20 = vcombine.low %v7272_v27, %v7279_v18  ;;  %v7162_v1 = vmax.f32 %v6890_v47, 0.0  ;;  %v7163_v40 = vmax.f32 %v6873_v55, 0.0 }
 0x75b   : > { %v7164_v57 = vmax.f32 %v6887_v22, 0.0  ;;  %v7165_v16 = vmax.f32 %v6889_v21, 0.0  ;;  %v7166_v19 = vmax.f32 %v6891_v36, 0.0  ;;  %v7297_v9 = vcombine.low %v7158_v45, %v7159_v8 }
 0x75c   : > { %v7288_v13 = vrot.slane %v7280_v28, %v14900_v2  ;;  %v7295_v3 = vrot.slane %v7281_v20, %v14900_v2  ;;  %v7298_v63 = vcombine.low %v7160_v43, %v7161_v30  ;;  %v7299_v51 = vcombine.low %v7162_v1, %v7163_v40  ;;  %v13267_v43 = vld [vmem:[#allocation6 + $0x10] ss:$2 sm:$0x7f] }
 0x75d   : > { %v7306_v39 = vrot.slane %v7297_v9, %v14900_v2  ;;  %v7327_v62 = vrot.slane %v7164_v57, %v14900_v2  ;;  %v7345_v31 = vcombine.low %v7165_v16, %v7166_v19  ;;  %v6764_v24 = vadd.f32 %v16108_v33, %v6664_v60 }
 0x75e   : > { %v7296_v14 = vcombine.low %v7288_v13, %v7295_v3  ;;  %v7313_v48 = vrot.slane %v7298_v63, %v14900_v2  ;;  %v7320_v4 = vrot.slane %v7299_v51, %v14900_v2  ;;  %v12862_v34 = vadd.f32 %v12861_v59, %v12860_v42  ;;  %v16185_v12 = vpop.f32.mrf.mxu1 }
 0x75f   : > { %v7354_v37 = vrot.slane %v7345_v31, %v14900_v2  ;;  %v6892_v52 = vcombine.high %v6764_v24, %v6764_v24  ;;  %v6899_v56 = vrot.slane %v6764_v24, %v14900_v2  ;;  %v12865_v49 = vadd.f32 %v12864_v61, %v12863_v29 }
 0x760   : > { %v16189_v55 = vadd.f32 %v13266_v23, %v7296_v14  ;;  %v7328_v54 = vcombine.low %v7306_v39, %v7313_v48  ;;  %v7329_v15 = vcombine.low %v7320_v4, %v7327_v62  ;;  %v6669_v33 = vadd.f32 %v12862_v34, %v6549_v46  ;;  %v13123_v60 = vpop.f32.mrf.mxu1  ;;  %v12866_v4 = vpop.f32.mrf.mxu0 }
 0x761   : > { %v6906_v42 = vrot.slane %v6892_v52, %v14900_v2  ;;  %v6907_v59 = vcombine.high %v6899_v56, %v6899_v56  ;;  %v6915_v18 = vrot.slane %v6899_v56, %v14900_v2  ;;  %v16199_v7 = vadd.f32 %v12865_v49, %v6550_v44 }
 0x762   : > { %v7599_v11 = vmax.f32 %v16189_v55, 0.0  ;;  %v7336_v22 = vrot.slane %v7328_v54, %v14900_v2  ;;  %v7343_v58 = vrot.slane %v7329_v15, %v14900_v2  ;;  %v6769_v41 = vadd.f32 %v16124_v17, %v6669_v33  ;;  %v16205_v53 = vpop.f32.mrf.mxu1 }
 0x763   : > { %v6908_v46 = vcombine.high %v6906_v42, %v6906_v42  ;;  %v6922_v21 = vrot.slane %v6906_v42, %v14900_v2  ;;  %v6929_v25 = vrot.slane %v6907_v59, %v14900_v2  ;;  %v6937_v27 = vcombine.high %v6915_v18, %v6915_v18 }
 0x764   : > { %7606 = vst.msk [vmem:[#allocation4 + $0x11] sm:$0x7f] %vm2642_vm5, %v7599_v11  ;;  %v7344_v6 = vcombine.low %v7336_v22, %v7343_v58  ;;  %v7167_v32 = vmax.f32 %v6915_v18, 0.0  ;;  %v6941_v44 = vcombine.high %v6769_v41, %v6769_v41  ;;  %v6948_v47 = vrot.slane %v6769_v41, %v14900_v2  ;;  %v13126_v45 = vpop.f32.mrf.mxu1 }
 0x765   : > { %v6936_v29 = vrot.slane %v6908_v46, %v14900_v2  ;;  %v6938_v36 = vcombine.high %v6922_v21, %v6922_v21  ;;  %v6939_v17 = vcombine.high %v6929_v25, %v6929_v25  ;;  %v7168_v8 = vmax.f32 %v6929_v25, 0.0 }
 0x766   : > { %v16212_v30 = vadd.f32 %v13267_v43, %v7344_v6  ;;  %v7169_v28 = vmax.f32 %v6937_v27, 0.0  ;;  %v7171_v20 = vmax.f32 %v6922_v21, 0.0  ;;  %v6955_v1 = vrot.slane %v6941_v44, %v14900_v2  ;;  %v12867_v21 = vpop.f32.mrf.mxu0 }
 0x767   : > { %v6940_v40 = vcombine.high %v6936_v29, %v6936_v29  ;;  %v7170_v57 = vmax.f32 %v6939_v17, 0.0  ;;  %v7172_v16 = vmax.f32 %v6936_v29, 0.0  ;;  %v7173_v19 = vmax.f32 %v6938_v36, 0.0 }
 0x768   : > { %v7600_v9 = vmax.f32 %v16212_v30, 0.0  ;;  %v7346_v13 = vcombine.low %v7167_v32, %v7168_v8  ;;  %v7375_v3 = vrot.slane %v7171_v20, %v14900_v2  ;;  %v6956_v63 = vcombine.high %v6948_v47, %v6948_v47 }
 0x769   : > { %v7347_v51 = vcombine.low %v7169_v28, %v7170_v57  ;;  %v7393_v61 = vcombine.low %v7172_v16, %v7173_v19  ;;  %v6957_v39 = vcombine.high %v6955_v1, %v6955_v1  ;;  %v6964_v62 = vrot.slane %v6948_v47, %v14900_v2 }
 0x76a   : > { %7607 = vst.msk [vmem:[#allocation4 + $0x21] sm:$0x7f] %vm2642_vm5, %v7600_v9  ;;  %v7361_v31 = vrot.slane %v7346_v13, %v14900_v2  ;;  %v6971_v24 = vrot.slane %v6955_v1, %v14900_v2  ;;  %v6978_v14 = vrot.slane %v6956_v63, %v14900_v2  ;;  %v7174_v48 = vmax.f32 %v6940_v40, 0.0 }
 0x76b   : > { %v7368_v34 = vrot.slane %v7347_v51, %v14900_v2  ;;  %v7402_v52 = vrot.slane %v7393_v61, %v14900_v2  ;;  %v6985_v56 = vrot.slane %v6957_v39, %v14900_v2  ;;  %v6986_v49 = vcombine.high %v6964_v62, %v6964_v62  ;;  %v16225_v23 = vld [vmem:[#allocation4 + $0x10] sm:$0xff] }
 0x76c   : > { %v7376_v54 = vcombine.low %v7354_v37, %v7361_v31  ;;  %v6987_v15 = vcombine.high %v6971_v24, %v6971_v24  ;;  %v6988_v33 = vcombine.high %v6978_v14, %v6978_v14  ;;  %v7175_v60 = vmax.f32 %v6964_v62, 0.0  ;;  %7737 = vrot.lane.b32.xlu1 %v16225_v23, %s13292_s16  ;;  %7632 = vst.msk [vmem:[#allocation5 + $0x18] sm:$0x7f] %vm2642_vm5, %v16225_v23 }
 0x76d   : > { %v7377_v42 = vcombine.low %v7368_v34, %v7375_v3  ;;  %v6989_v59 = vcombine.high %v6985_v56, %v6985_v56  ;;  %v7176_v18 = vmax.f32 %v6978_v14, 0.0  ;;  %v7177_v11 = vmax.f32 %v6986_v49, 0.0 }
 0x76e   : > { %v7384_v22 = vrot.slane %v7376_v54, %v14900_v2  ;;  %v7178_v58 = vmax.f32 %v6988_v33, 0.0  ;;  %v7179_v41 = vmax.f32 %v6971_v24, 0.0  ;;  %v7180_v46 = vmax.f32 %v6985_v56, 0.0  ;;  %v13269_v33 = vld [vmem:[#allocation6 + $0x30] ss:$2 sm:$0x7f] }
 0x76f   : > { %v7391_v37 = vrot.slane %v7377_v42, %v14900_v2  ;;  %v7181_v25 = vmax.f32 %v6987_v15, 0.0  ;;  %v7182_v27 = vmax.f32 %v6989_v59, 0.0  ;;  %v7394_v6 = vcombine.low %v7174_v48, %v7175_v60  ;;  %v7653_v48 = vpop.permute.xlu0 %7652 }
 0x770   : > { %v7395_v32 = vcombine.low %v7176_v18, %v7177_v11  ;;  %v7423_v44 = vrot.slane %v7178_v58, %v14900_v2  ;;  %v7441_v47 = vcombine.low %v7179_v41, %v7180_v46  ;;  %v6774_v45 = vadd.f32 %v16157_v38, %v16199_v7  ;;  %v13268_v38 = vld [vmem:[#allocation6 + $0x20] ss:$2 sm:$0x7f]  ;;  %7673 = vst.msk [vmem:[#allocation5] sm:$0x7f] %vm2710_vm4, %v7653_v48 }
 0x771   : > { %v7392_v29 = vcombine.low %v7384_v22, %v7391_v37  ;;  %v7409_v36 = vrot.slane %v7394_v6, %v14900_v2  ;;  %v7442_v17 = vcombine.low %v7181_v25, %v7182_v27  ;;  %v12868_v8 = vadd.f32 %v12867_v21, %v12866_v4  ;;  %v16237_v43 = vld [vmem:[#allocation4 + $0x20] sm:$0xff]  ;;  %v16274_v46 = vld [vmem:[#allocation4 + $0x18] sm:$0x1] }
 0x772   : > { %v7416_v28 = vrot.slane %v7395_v32, %v14900_v2  ;;  %v6990_v20 = vcombine.high %v6774_v45, %v6774_v45  ;;  %v6997_v1 = vrot.slane %v6774_v45, %v14900_v2  ;;  %v16245_v40 = vrot.slane %v6558_v5, %v14900_v2  ;;  %7633 = vst.msk [vmem:[#allocation5 + $0x30] sm:$0x7f] %vm2642_vm5, %v16237_v43 }
 0x773   : > { %v16249_v7 = vadd.f32 %v13268_v38, %v7392_v29  ;;  %v7424_v57 = vcombine.low %v7402_v52, %v7409_v36  ;;  %v7457_v16 = vrot.slane %v7442_v17, %v14900_v2  ;;  %v6679_v19 = vadd.f32 %v12868_v8, %v6551_v26  ;;  %v7709_v21 = vpop.permute.xlu0 %7708  ;;  %v12869_v29 = vpop.f32.mrf.mxu0  ;;  %v16289_v38 = vld [vmem:[#allocation4 + $0x38] sm:$0x1] }
 0x774   : > { %v7425_v9 = vcombine.low %v7416_v28, %v7423_v44  ;;  %v7004_v13 = vrot.slane %v6990_v20, %v14900_v2  ;;  %v7005_v3 = vcombine.high %v6997_v1, %v6997_v1  ;;  %v7013_v50 = vrot.slane %v6997_v1, %v14900_v2  ;;  %7729 = vst.msk [vmem:[#allocation5] sm:$0x7f] %vm2767_vm7, %v7709_v21  ;;  %v7618_v1 = vld [vmem:[#allocation4 + $0x28] sm:$0x1] }
 0x775   : > { %v7601_v5 = vmax.f32 %v16249_v7, 0.0  ;;  %v7432_v63 = vrot.slane %v7424_v57, %v14900_v2  ;;  %v7450_v51 = vrot.slane %v7441_v47, %v14900_v2  ;;  %v6779_v61 = vadd.f32 %v16185_v12, %v6679_v19 }
 0x776   : > { %v7439_v39 = vrot.slane %v7425_v9, %v14900_v2  ;;  %v7006_v62 = vcombine.high %v7004_v13, %v7004_v13  ;;  %v7020_v10 = vrot.slane %v7004_v13, %v14900_v2  ;;  %v7027_v35 = vrot.slane %v7005_v3, %v14900_v2  ;;  %v7622_v13 = vld [vmem:[#allocation4 + $0x48] sm:$0x1] }
 0x777   : > { %7608 = vst.msk [vmem:[#allocation4 + $0x31] sm:$0x7f] %vm2642_vm5, %v7601_v5  ;;  %v16265_v26 = vcombine.low %v7450_v51, %v7457_v16  ;;  %v7035_v31 = vcombine.high %v7013_v50, %v7013_v50  ;;  %v7183_v24 = vmax.f32 %v7013_v50, 0.0  ;;  %v7039_v14 = vcombine.high %v6779_v61, %v6779_v61 }
 0x778   : > { %v7440_v4 = vcombine.low %v7432_v63, %v7439_v39  ;;  %v7034_v34 = vrot.slane %v7006_v62, %v14900_v2  ;;  %v7036_v52 = vcombine.high %v7020_v10, %v7020_v10  ;;  %v7037_v12 = vcombine.high %v7027_v35, %v7027_v35  ;;  %v12870_v39 = vpop.f32.mrf.mxu0 }
 0x779   : > { %v7184_v56 = vmax.f32 %v7027_v35, 0.0  ;;  %v7185_v49 = vmax.f32 %v7035_v31, 0.0  ;;  %v7187_v54 = vmax.f32 %v7020_v10, 0.0  ;;  %v7046_v15 = vrot.slane %v6779_v61, %v14900_v2 }
 0x77a   : > { %v16270_v60 = vadd.f32 %v13269_v33, %v7440_v4  ;;  %v7038_v42 = vcombine.high %v7034_v34, %v7034_v34  ;;  %v7186_v59 = vmax.f32 %v7037_v12, 0.0  ;;  %v7188_v18 = vmax.f32 %v7034_v34, 0.0 }
 0x77b   : > { %v7189_v11 = vmax.f32 %v7036_v52, 0.0  ;;  %v7443_v22 = vcombine.low %v7183_v24, %v7184_v56  ;;  %v7471_v58 = vrot.slane %v7185_v49, %v14900_v2  ;;  %v7053_v41 = vrot.slane %v7039_v14, %v14900_v2 }
 0x77c   : > { %v7602_v37 = vmax.f32 %v16270_v60, 0.0  ;;  %v7489_v25 = vcombine.low %v7186_v59, %v7187_v54  ;;  %v7054_v27 = vcombine.high %v7046_v15, %v7046_v15  ;;  %v7062_v6 = vrot.slane %v7046_v15, %v14900_v2  ;;  %v13270_v54 = vld [vmem:[#allocation6 + $0x40] ss:$2 sm:$0x7f] }
 0x77d   : > { %v7464_v32 = vrot.slane %v7443_v22, %v14900_v2  ;;  %v7490_v44 = vcombine.low %v7188_v18, %v7189_v11  ;;  %v7055_v47 = vcombine.high %v7053_v41, %v7053_v41  ;;  %v7069_v45 = vrot.slane %v7053_v41, %v14900_v2 }
 0x77e   : > { %v7480_v36 = vrot.slane %v16265_v26, %v14900_v2  ;;  %7609 = vst.msk [vmem:[#allocation4 + $0x41] sm:$0x7f] %vm2642_vm5, %v7602_v37  ;;  %v7498_v17 = vrot.slane %v7489_v25, %v14900_v2  ;;  %v7076_v8 = vrot.slane %v7054_v27, %v14900_v2  ;;  %v7691_v28 = vrot.slane %v16274_v46, 2  ;;  %v16287_v20 = vld [vmem:[#allocation4 + $0x30] sm:$0xff] }
 0x77f   : > { %v7473_v57 = vcombine.low %v7464_v32, %v7471_v58  ;;  %v7505_v16 = vrot.slane %v7490_v44, %v14900_v2  ;;  %v7083_v19 = vrot.slane %v7055_v47, %v14900_v2  ;;  %v7084_v9 = vcombine.high %v7062_v6, %v7062_v6  ;;  %7634 = vst.msk [vmem:[#allocation5 + $0x48] sm:$0x7f] %vm2642_vm5, %v16287_v20 }
 0x780   : > { %v7086_v3 = vcombine.high %v7076_v8, %v7076_v8  ;;  %v7190_v50 = vmax.f32 %v7038_v42, 0.0  ;;  %v7191_v5 = vmax.f32 %v7062_v6, 0.0  ;;  %v7192_v63 = vmax.f32 %v7076_v8, 0.0 }
 0x781   : > { %v7487_v51 = vrot.slane %v7473_v57, %v14900_v2  ;;  %v7085_v61 = vcombine.high %v7069_v45, %v7069_v45  ;;  %v7694_v62 = vrot.slane %v7618_v1, 2  ;;  %v7697_v10 = vrot.slane %v16289_v38, 2  ;;  %v7940_v38 = vld [vmem:[%s17501_s7 + $0xf8] sm:$0xff] }
 0x782   : > { %v7520_v35 = vcombine.low %v7498_v17, %v7505_v16  ;;  %v7087_v26 = vcombine.high %v7083_v19, %v7083_v19  ;;  %v7491_v31 = vcombine.low %v7190_v50, %v7191_v5  ;;  %v7700_v24 = vrot.slane %v7622_v13, 2  ;;  %v7924_v57 = vld [vmem:[%s17501_s7 + $0x78] sm:$0xff]  ;;  %v7939_v16 = vld [vmem:[%s17501_s7 + $0xf0] sm:$0xff]  ;;  %v7624_v50 = vld [vmem:[#allocation4 + $0x58] sm:$0x1]  ;;  %12883 = vmatprep.subr.mxu0 %v7940_v38 }
 0x783   : > { %v7488_v14 = vcombine.low %v7480_v36, %v7487_v51  ;;  %v7193_v48 = vmax.f32 %v7084_v9, 0.0  ;;  %v7194_v4 = vmax.f32 %v7086_v3, 0.0  ;;  %v7519_v34 = vrot.slane %v7192_v63, %v14900_v2  ;;  %v13271_v9 = vld [vmem:[#allocation6 + $0x50] ss:$2 sm:$0x7f]  ;;  %12884 = vmatpush3.msra.mxu0 %v7924_v57 }
 0x784   : > { %v7195_v52 = vmax.f32 %v7069_v45, 0.0  ;;  %v7196_v12 = vmax.f32 %v7083_v19, 0.0  ;;  %v7512_v56 = vrot.slane %v7491_v31, %v14900_v2  ;;  %v12871_v49 = vadd.f32 %v12870_v39, %v12869_v29  ;;  %12885 = vmatprep.subr.mxu0 %v7939_v16  ;;  %v7923_v39 = vld [vmem:[%s17501_s7 + $0x70] sm:$0xff]  ;;  %v7937_v31 = vld [vmem:[%s17501_s7 + $0xe0] sm:$0xff] }
 0x785   : > { %v16299_v15 = vadd.f32 %v13270_v54, %v7488_v14  ;;  %v7197_v33 = vmax.f32 %v7085_v61, 0.0  ;;  %v7646_v42 = vrot.slane %v16225_v23, 1  ;;  %v7690_v59 = vrot.slane %v16225_v23, 2  ;;  %v16303_v18 = vld [vmem:[#allocation4 + $0x40] sm:$0xff]  ;;  %12886 = vmatpush3.msra.mxu0 %v7923_v39  ;;  %v7929_v38 = vld [vmem:[%s17501_s7 + $0xa0] sm:$0xff]  ;;  %v7942_v39 = vld [vmem:[%s17501_s7 + $0x108] sm:$0xff] }
 0x786   : > { %v7528_v11 = vrot.slane %v7520_v35, %v14900_v2  ;;  %v7198_v22 = vmax.f32 %v7087_v26, 0.0  ;;  %v7521_v58 = vcombine.low %v7512_v56, %v7519_v34  ;;  %v6684_v41 = vadd.f32 %v12871_v49, %v16245_v40  ;;  %7635 = vst.msk [vmem:[#allocation5 + $0x60] sm:$0x7f] %vm2642_vm5, %v16303_v18  ;;  %v7936_v34 = vld [vmem:[%s17501_s7 + $0xd8] sm:$0xff]  ;;  %v7913_v16 = vld [vmem:[%s17501_s7 + $0x20] sm:$0xff] }
 0x787   : > { %v7603_v46 = vmax.f32 %v16299_v15, 0.0  ;;  %v7537_v21 = vcombine.low %v7193_v48, %v7194_v4  ;;  %7654 = vrot.lane.b32.xlu0 %v7646_v42, %s13290_s30  ;;  %7773 = vst.msk [vmem:[#allocation5 + $0x8] sm:$0x7f] %vm2642_vm5, %v7646_v42  ;;  %v7692_v23 = vsel %vm17755_vm15, %v7690_v59, %v7691_v28  ;;  %v7647_v37 = vrot.slane %v16237_v43, 1  ;;  %v7921_v4 = vld [vmem:[%s17501_s7 + $0x60] sm:$0xff]  ;;  %v7920_v56 = vld [vmem:[%s17501_s7 + $0x58] sm:$0xff]  ;;  %vm17765_vm15 = vmmov %vm17763_vm0 }
 0x788   : > { %v7535_v25 = vrot.slane %v7521_v58, %v14900_v2  ;;  %v7538_v27 = vcombine.low %v7195_v52, %v7196_v12  ;;  %v6784_v6 = vadd.f32 %v16205_v53, %v6684_v41  ;;  %7784 = vrot.lane.b32.xlu1 %v7692_v23, %s13290_s30  ;;  %v7693_v40 = vrot.slane %v16237_v43, 2  ;;  %v7626_v12 = vld [vmem:[#allocation4 + $0x68] sm:$0x1]  ;;  %v7919_v42 = vld [vmem:[%s17501_s7 + $0x50] sm:$0xff] }
 0x789   : > { %7610 = vst.msk [vmem:[#allocation4 + $0x51] sm:$0x7f] %vm2642_vm5, %v7603_v46  ;;  %7774 = vst.msk [vmem:[#allocation5 + $0x20] sm:$0x7f] %vm2642_vm5, %v7647_v37  ;;  %v16321_v32 = vrot.slane %v16287_v20, 1  ;;  %v7696_v44 = vrot.slane %v16287_v20, 2  ;;  %v7539_v53 = vcombine.low %v7197_v33, %v7198_v22  ;;  %v7546_v8 = vrot.slane %v7537_v21, %v14900_v2 }
 0x78a   : > { %v16325_v47 = vrot.slane %v16303_v18, 1  ;;  %v7699_v45 = vrot.slane %v16303_v18, 2  ;;  %v7536_v29 = vcombine.low %v7528_v11, %v7535_v25  ;;  %v7094_v36 = vrot.slane %v6784_v6, %v14900_v2  ;;  %v7935_v33 = vld [vmem:[%s17501_s7 + $0xd0] sm:$0xff]  ;;  %v7934_v22 = vld [vmem:[%s17501_s7 + $0xc8] sm:$0xff]  ;;  %v7933_v25 = vld [vmem:[%s17501_s7 + $0xc0] sm:$0xff] }
 0x78b   : > { %v16330_v17 = vsel %vm17756_vm8, %v7693_v40, %v7694_v62  ;;  %7710 = vrot.lane.b32.xlu0 %v7692_v23, %s13291_s22  ;;  %7775 = vst.msk [vmem:[#allocation5 + $0x38] sm:$0x7f] %vm2642_vm5, %v16321_v32  ;;  %v16339_v28 = vsel %vm17757_vm6, %v7696_v44, %v7697_v10  ;;  %v7553_v19 = vrot.slane %v7538_v27, %v14900_v2  ;;  %v7703_v61 = vrot.slane %v7624_v50, 2  ;;  %v7938_v62 = vld [vmem:[%s17501_s7 + $0xe8] sm:$0xff]  ;;  %v7917_v6 = vld [vmem:[%s17501_s7 + $0x40] sm:$0xff]  ;;  %v7932_v40 = vld [vmem:[%s17501_s7 + $0xb8] sm:$0xff] }
 0x78c   : > { %7881 = vst.msk [vmem:[#allocation5 + $0x10] sm:$0x7f] %vm2642_vm5, %v16330_v17  ;;  %7776 = vst.msk [vmem:[#allocation5 + $0x50] sm:$0x7f] %vm2642_vm5, %v16325_v47  ;;  %v16344_v1 = vsel %vm17758_vm11, %v7699_v45, %v7700_v24  ;;  %v16356_v13 = vadd.f32 %v13271_v9, %v7536_v29  ;;  %v7101_v3 = vrot.slane %v7094_v36, %v14900_v2  ;;  %7813 = vrot.lane.b32.xlu1 %v16237_v43, %s13291_s22  ;;  %v7922_v10 = vld [vmem:[%s17501_s7 + $0x68] sm:$0xff]  ;;  %v7916_v44 = vld [vmem:[%s17501_s7 + $0x38] sm:$0xff] }
 0x78d   : > { %7882 = vst.msk [vmem:[#allocation5 + $0x28] sm:$0x7f] %vm2642_vm5, %v16339_v28  ;;  %7883 = vst.msk [vmem:[#allocation5 + $0x40] sm:$0x7f] %vm2642_vm5, %v16344_v1  ;;  %v7560_v51 = vrot.slane %v7539_v53, %v14900_v2  ;;  %v7568_v35 = vcombine.low %v7546_v8, %v7553_v19  ;;  %12887 = vmatprep.subr.mxu0 %v7938_v62  ;;  %v7706_v11 = vrot.slane %v7626_v12, 2  ;;  %v7931_v45 = vld [vmem:[%s17501_s7 + $0xb0] sm:$0xff] }
 0x78e   : > { %v7604_v5 = vmax.f32 %v16356_v13, 0.0  ;;  %v7199_v63 = vmax.f32 %v7101_v3, 0.0  ;;  %12888 = vmatpush3.msra.mxu0 %v7922_v10  ;;  %v13272_v41 = vld [vmem:[#allocation6 + $0x60] ss:$2 sm:$0x7f]  ;;  %v7944_v36 = vld [vmem:[%s17501_s7 + $0x118] sm:$0xff]  ;;  %vm17766_vm8 = vmmov %vm17763_vm0 }
 0x78f   : > { %7739 = vrot.lane.b32.xlu0 %v16237_v43, %s13292_s16  ;;  %12889 = vmatprep.subr.mxu0 %v7937_v31  ;;  %v7576_v49 = vrot.slane %v7568_v35, %v14900_v2  ;;  %v7915_v29 = vld [vmem:[%s17501_s7 + $0x30] sm:$0xff]  ;;  %v7930_v53 = vld [vmem:[%s17501_s7 + $0xa8] sm:$0xff]  ;;  %v7928_v19 = vld [vmem:[%s17501_s7 + $0x98] sm:$0xff] }
 0x790   : > { %7611 = vst.msk [vmem:[#allocation4 + $0x61] sm:$0x7f] %vm2642_vm5, %v7604_v5  ;;  %v7567_v26 = vrot.slane %v7199_v63, %v14900_v2  ;;  %7842 = vrot.lane.b32.xlu1 %v7647_v37, %s13292_s16  ;;  %v16381_v43 = vld [vmem:[#allocation4 + $0x50] sm:$0xff]  ;;  %12890 = vmatpush3.msra.mxu0 %v7921_v4  ;;  %v7914_v8 = vld [vmem:[%s17501_s7 + $0x28] sm:$0xff]  ;;  %v7927_v50 = vld [vmem:[%s17501_s7 + $0x90] sm:$0xff] }
 0x791   : > { %7636 = vst.msk [vmem:[#allocation5 + $0x78] sm:$0x7f] %vm2642_vm5, %v16381_v43  ;;  %v16389_v24 = vrot.slane %v16381_v43, 1  ;;  %v7702_v14 = vrot.slane %v16381_v43, 2  ;;  %12891 = vmatprep.subr.mxu0 %v7936_v34  ;;  %13128 = vmatpush3.msra.mxu1 %v7944_v36  ;;  %v7943_v5 = vld [vmem:[%s17501_s7 + $0x110] sm:$0xff]  ;;  %v7925_v62 = vld [vmem:[%s17501_s7 + $0x80] sm:$0xff]  ;;  %vm17767_vm6 = vmmov %vm17763_vm0 }
 0x792   : > { %v7569_v48 = vcombine.low %v7560_v51, %v7567_v26  ;;  %12892 = vmatpush3.msra.mxu0 %v7920_v56  ;;  %13129 = vmatprep.subr.mxu1 %v13282_v0  ;;  %v7911_v51 = vld [vmem:[%s17501_s7 + $0x10] sm:$0xff]  ;;  %v7941_v10 = vld [vmem:[%s17501_s7 + $0x100] sm:$0xff]  ;;  %v16572_v26 = vpop.permute.xlu1 %7825  ;;  %vm17768_vm11 = vmmov %vm17760_vm1 }
 0x793   : > { %7656 = vrot.lane.b32.xlu0 %v7647_v37, %s13290_s30  ;;  %7777 = vst.msk [vmem:[#allocation5 + $0x68] sm:$0x7f] %vm2642_vm5, %v16389_v24  ;;  %v16402_v52 = vsel %vm17759_vm9, %v7702_v14, %v7703_v61  ;;  %12893 = vmatprep.subr.mxu0 %v7935_v33  ;;  %v7918_v37 = vld [vmem:[%s17501_s7 + $0x48] sm:$0xff]  ;;  %v7909_v35 = vld [vmem:[%s17501_s7] sm:$0xff]  ;;  %vm17769_vm9 = vmmov %vm17760_vm1 }
 0x794   : > { %v7583_v54 = vrot.slane %v7569_v48, %v14900_v2  ;;  %7815 = vrot.lane.b32.xlu1 %v16287_v20, %s13291_s22  ;;  %7884 = vst.msk [vmem:[#allocation5 + $0x58] sm:$0x7f] %vm2642_vm5, %v16402_v52  ;;  %12894 = vmatpush3.msra.mxu0 %v7919_v42  ;;  %v7926_v61 = vld [vmem:[%s17501_s7 + $0x88] sm:$0xff] }
 0x795   : > { %12895 = vmatprep.subr.mxu0 %v7934_v22  ;;  %13130 = vmatpush3.msra.mxu1 %v7943_v5 }
 0x796   : > { %v7584_v59 = vcombine.low %v7576_v49, %v7583_v54  ;;  %12896 = vmatpush3.msra.mxu0 %v7918_v37  ;;  %13131 = vmatprep.subr.mxu1 %v13282_v0  ;;  %v7890_v49 = vld [vmem:[#allocation5 + $0x10] sm:$0x7f] }
 0x797   : > { %7786 = vrot.lane.b32.xlu0 %v16330_v17, %s13290_s30  ;;  %v16424_v58 = vld [vmem:[#allocation4 + $0x60] sm:$0xff]  ;;  %12897 = vmatprep.subr.mxu0 %v7933_v25 }
 0x798   : > { %v16426_v46 = vadd.f32 %v13272_v41, %v7584_v59  ;;  %7741 = vrot.lane.b32.xlu1 %v16287_v20, %s13292_s16  ;;  %7637 = vst.msk [vmem:[#allocation5 + $0x90] sm:$0x7f] %vm2642_vm5, %v16424_v58  ;;  %v16433_v21 = vrot.slane %v16424_v58, 1  ;;  %v7705_v23 = vrot.slane %v16424_v58, 2  ;;  %12898 = vmatpush3.msra.mxu0 %v7917_v6  ;;  %v7974_v41 = vcombine.high %v7890_v49, %v7890_v49 }
 0x799   : > { %12899 = vmatprep.subr.mxu0 %v7932_v40  ;;  %13132 = vmatpush3.msra.mxu1 %v7942_v39 }
 0x79a   : > { %v7605_v20 = vmax.f32 %v16426_v46, 0.0  ;;  %7778 = vst.msk [vmem:[#allocation5 + $0x80] sm:$0x7f] %vm2642_vm5, %v16433_v21  ;;  %v16446_v27 = vsel %vm17760_vm1, %v7705_v23, %v7706_v11  ;;  %12900 = vmatpush3.msra.mxu0 %v7916_v44  ;;  %13133 = vmatprep.subr.mxu1 %v13282_v0  ;;  %v7995_v11 = vrot.slane %v7890_v49, %v14900_v2 }
 0x79b   : > { %7712 = vrot.lane.b32.xlu0 %v16330_v17, %s13291_s22  ;;  %7885 = vst.msk [vmem:[#allocation5 + $0x70] sm:$0x7f] %vm2642_vm5, %v16446_v27  ;;  %v7628_v17 = vld [vmem:[#allocation4 + $0x78] sm:$0x1]  ;;  %12901 = vmatprep.subr.mxu0 %v7931_v45  ;;  %v8002_v6 = vrot.slane %v7974_v41, %v14900_v2 }
 0x79c   : > { %7612 = vst.msk [vmem:[#allocation4 + $0x71] sm:$0x7f] %vm2642_vm5, %v7605_v20  ;;  %7844 = vrot.lane.b32.xlu1 %v16321_v32, %s13292_s16  ;;  %12902 = vmatpush3.msra.mxu0 %v7915_v29  ;;  %v7782_v57 = vrot.slane %v7628_v17, 2 }
 0x79d   : > { %12903 = vmatprep.subr.mxu0 %v7930_v53  ;;  %13134 = vmatpush3.msra.mxu1 %v7941_v10 }
 0x79e   : > { %12904 = vmatpush3.msra.mxu0 %v7914_v8  ;;  %13156 = vmatprep.subr.mxu1 %v13282_v0 }
 0x79f   : > { %7658 = vrot.lane.b32.xlu0 %v16321_v32, %s13290_s30  ;;  %12905 = vmatprep.subr.mxu0 %v7929_v38 }
 0x7a0   : > { %7817 = vrot.lane.b32.xlu1 %v16303_v18, %s13291_s22  ;;  %12906 = vmatpush3.msra.mxu0 %v7913_v16 }
 0x7a1   : > { %12907 = vmatprep.subr.mxu0 %v7928_v19 }
 0x7a3   : > { %7743 = vrot.lane.b32.xlu0 %v16303_v18, %s13292_s16  ;;  %v7627_v32 = vld [vmem:[#allocation4 + $0x70] sm:$0xff]  ;;  %v7912_v18 = vld [vmem:[%s17501_s7 + $0x18] sm:$0xff] }
 0x7a4   : > { %7788 = vrot.lane.b32.xlu1 %v16339_v28, %s13290_s30  ;;  %v7765_v9 = vrot.slane %v7627_v32, 1  ;;  %v7781_v3 = vrot.slane %v7627_v32, 2  ;;  %12908 = vmatpush3.msra.mxu0 %v7912_v18 }
 0x7a5   : > { %12909 = vmatprep.subr.mxu0 %v7927_v50 }
 0x7a6   : > { %7779 = vst.msk [vmem:[#allocation5 + $0x98] sm:$0x7f] %vm2642_vm5, %v7765_v9  ;;  %v7783_v63 = vsel %vm17761_vm12, %v7781_v3, %v7782_v57  ;;  %12910 = vmatpush3.msra.mxu0 %v7911_v51  ;;  %vm17770_vm12 = vmmov %vm17760_vm1 }
 0x7a7   : > { %7714 = vrot.lane.b32.xlu0 %v16339_v28, %s13291_s22  ;;  %7886 = vst.msk [vmem:[#allocation5 + $0x88] sm:$0x7f] %vm2642_vm5, %v7783_v63  ;;  %v7910_v28 = vld [vmem:[%s17501_s7 + $0x8] sm:$0xff]  ;;  %12911 = vmatprep.subr.mxu0 %v7926_v61 }
 0x7a8   : > { %7846 = vrot.lane.b32.xlu1 %v16325_v47, %s13292_s16  ;;  %12912 = vmatpush3.msra.mxu0 %v7910_v28 }
 0x7a9   : > { %12913 = vmatprep.subr.mxu0 %v7925_v62 }
 0x7aa   : > { %12914 = vmatpush3.msra.mxu0 %v7909_v35 }
 0x7ab   : > { %7660 = vrot.lane.b32.xlu0 %v16325_v47, %s13290_s30  ;;  %v13273_v47 = vld [vmem:[#allocation4 + $0x80] sm:$0xff] }
 0x7ac   : > { %7819 = vrot.lane.b32.xlu1 %v16381_v43, %s13291_s22 }
 0x7af   : > { %7790 = vrot.lane.b32.xlu0 %v16344_v1, %s13290_s30 }
 0x7b0   : > { %7745 = vrot.lane.b32.xlu1 %v16381_v43, %s13292_s16 }
 0x7b3   : > { %7716 = vrot.lane.b32.xlu0 %v16344_v1, %s13291_s22  ;;  %v7841_v1 = vrot.slane %v13273_v47, 1 }
 0x7b4   : > { %7848 = vrot.lane.b32.xlu1 %v16389_v24, %s13292_s16 }
 0x7b7   : > { %7662 = vrot.lane.b32.xlu0 %v16389_v24, %s13290_s30 }
 0x7b8   : > { %7792 = vrot.lane.b32.xlu1 %v16402_v52, %s13290_s30 }
 0x7bb   : > { %7718 = vrot.lane.b32.xlu0 %v16402_v52, %s13291_s22 }
 0x7bc   : > { %7821 = vrot.lane.b32.xlu1 %v16424_v58, %s13291_s22 }
 0x7bf   : > { %7747 = vrot.lane.b32.xlu0 %v16424_v58, %s13292_s16 }
 0x7c0   : > { %7850 = vrot.lane.b32.xlu1 %v16433_v21, %s13292_s16 }
 0x7c3   : > { %7664 = vrot.lane.b32.xlu0 %v16433_v21, %s13290_s30 }
 0x7c4   : > { %7823 = vrot.lane.b32.xlu1 %v7627_v32, %s13291_s22 }
 0x7c7   : > { %7794 = vrot.lane.b32.xlu0 %v16446_v27, %s13290_s30 }
 0x7c8   : > { %7852 = vrot.lane.b32.xlu1 %v7765_v9, %s13292_s16 }
 0x7cb   : > { %7720 = vrot.lane.b32.xlu0 %v16446_v27, %s13291_s22  ;;  %v7893_v27 = vld [vmem:[#allocation5 + $0x28] sm:$0x7f] }
 0x7cc   : > { %7796 = vrot.lane.b32.xlu1 %v7783_v63, %s13290_s30  ;;  %v8040_v36 = vcombine.high %v7893_v27, %v7893_v27  ;;  %v8061_v50 = vrot.slane %v7893_v27, %v14900_v2 }
 0x7ce   : > { %v8068_v51 = vrot.slane %v8040_v36, %v14900_v2 }
 0x7cf   : > { %7749 = vrot.lane.b32.xlu0 %v7627_v32, %s13292_s16 }
 0x7d0   : > { %7854 = vrot.lane.b32.xlu1 %v7841_v1, %s13292_s16 }
 0x7de   : > { %v7738_v43 = vpop.permute.xlu1 %7737 }
 0x7df   : > { %7758 = vst.msk [vmem:[#allocation5] sm:$0x7f] %vm2797_vm3, %v7738_v43 }
 0x7f9   : > { %v7655_v31 = vpop.permute.xlu0 %7654 }
 0x7fa   : > { %7674 = vst.msk [vmem:[#allocation5 + $0x18] sm:$0x7f] %vm2710_vm4, %v7655_v31  ;;  %v7785_v24 = vpop.permute.xlu1 %7784 }
 0x7fb   : > { %7805 = vst.msk [vmem:[#allocation5 + $0x8] sm:$0x7f] %vm2710_vm4, %v7785_v24 }
 0x7fd   : > { %v7711_v14 = vpop.permute.xlu0 %7710 }
 0x7fe   : > { %7730 = vst.msk [vmem:[#allocation5 + $0x18] sm:$0x7f] %vm2767_vm7, %v7711_v14  ;;  %v7814_v48 = vpop.permute.xlu1 %7813 }
 0x7ff   : > { %7834 = vst.msk [vmem:[#allocation5 + $0x8] sm:$0x7f] %vm2767_vm7, %v7814_v48 }
 0x801   : > { %v7740_v4 = vpop.permute.xlu0 %7739 }
 0x802   : > { %7759 = vst.msk [vmem:[#allocation5 + $0x18] sm:$0x7f] %vm2797_vm3, %v7740_v4  ;;  %v7843_v34 = vpop.permute.xlu1 %7842 }
 0x803   : > { %7863 = vst.msk [vmem:[#allocation5 + $0x8] sm:$0x7f] %vm2797_vm3, %v7843_v34  ;;  %v7896_v34 = vld [vmem:[#allocation5 + $0x40] sm:$0x7f] }
 0x805   : > { %v7657_v52 = vpop.permute.xlu0 %7656 }
 0x806   : > { %7675 = vst.msk [vmem:[#allocation5 + $0x30] sm:$0x7f] %vm2710_vm4, %v7657_v52  ;;  %v7816_v12 = vpop.permute.xlu1 %7815 }
 0x809   : > { %v7787_v56 = vpop.permute.xlu0 %7786  ;;  %v7891_v8 = vld [vmem:[#allocation5 + $0x18] sm:$0x7f] }
 0x80a   : > { %7806 = vst.msk [vmem:[#allocation5 + $0x20] sm:$0x7f] %vm2710_vm4, %v7787_v56  ;;  %v7742_v54 = vpop.permute.xlu1 %7741  ;;  %v13213_v33 = vld [vmem:[#allocation5] ss:$8 sps:$4 sm:$0xff]  }
 0x80b   : > { %7835 = vst.msk [vmem:[#allocation5 + $0x20] sm:$0x7f] %vm2767_vm7, %v7816_v12  ;;  %v13215_v42 = vld [vmem:[#allocation5 + $0x4] ss:$8 sps:$4 sm:$0x77]   ;;  %v7981_v59 = vrot.slane %v13213_v33, %v14900_v2 }
 0x80c   : > { %v7988_v37 = vrot.slane %v13215_v42, %v14900_v2 }
 0x80d   : > { %v7713_v22 = vpop.permute.xlu0 %7712  ;;  %v8003_v21 = vcombine.low %v7981_v59, %v7995_v11  ;;  %v8004_v23 = vcombine.high %v7981_v59, %v7995_v11 }
 0x80e   : > { %7731 = vst.msk [vmem:[#allocation5 + $0x30] sm:$0x7f] %vm2767_vm7, %v7713_v22  ;;  %v7845_v58 = vpop.permute.xlu1 %7844  ;;  %v8005_v45 = vcombine.low %v7988_v37, %v8002_v6  ;;  %v8006_v29 = vcombine.high %v7988_v37, %v8002_v6  ;;  %v8127_v22 = vrot.slane %v7896_v34, %v14900_v2 }
 0x80f   : > { %7760 = vst.msk [vmem:[#allocation5 + $0x30] sm:$0x7f] %vm2797_vm3, %v7742_v54  ;;  %7864 = vst.msk [vmem:[#allocation5 + $0x20] sm:$0x7f] %vm2797_vm3, %v7845_v58  ;;  %v8013_v40 = vrot.slane %v8003_v21, %v14900_v2  ;;  %v8027_v44 = vrot.slane %v8004_v23, %v14900_v2 }
 0x810   : > { %v8020_v9 = vrot.slane %v8005_v45, %v14900_v2  ;;  %v8034_v3 = vrot.slane %v8006_v29, %v14900_v2 }
 0x811   : > { %v7659_v25 = vpop.permute.xlu0 %7658  ;;  %v8482_v32 = vcombine.low %v8013_v40, %v8027_v44  ;;  %v12690_v16 = vcombine.high %v8013_v40, %v8027_v44 }
 0x812   : > { %7676 = vst.msk [vmem:[#allocation5 + $0x48] sm:$0x7f] %vm2710_vm4, %v7659_v25  ;;  %v7818_v20 = vpop.permute.xlu1 %7817  ;;  %v8036_v47 = vcombine.high %v8020_v9, %v8020_v9  ;;  %v8484_v43 = vcombine.low %v8020_v9, %v8034_v3 }
 0x813   : > { %v8492_v28 = vrot.slane %v8482_v32, %v14900_v2  ;;  %v8499_v62 = vrot.slane %v12690_v16, %v14900_v2 }
 0x814   : > { %v8506_v49 = vrot.slane %v8484_v43, %v14900_v2 }
 0x815   : > { %v7744_v53 = vpop.permute.xlu0 %7743  ;;  %v8514_v4 = vcombine.low %v8492_v28, %v8499_v62  ;;  %v8515_v52 = vcombine.high %v8492_v28, %v8499_v62 }
 0x816   : > { %v7789_v17 = vpop.permute.xlu1 %7788  ;;  %v7892_v38 = vld [vmem:[#allocation5 + $0x20] sm:$0x7f]  ;;  %v7894_v59 = vld [vmem:[#allocation5 + $0x30] sm:$0x7f] }
 0x817   : > { %v13217_v57 = vld [vmem:[#allocation5 + $0x18] ss:$8 sps:$4 sm:$0xff]   ;;  %7807 = vst.msk [vmem:[#allocation5 + $0x38] sm:$0x7f] %vm2710_vm4, %v7789_v17  ;;  %v8039_v19 = vcombine.high %v7891_v8, %v7892_v38  ;;  %v8524_v23 = vrot.slane %v8514_v4, %v14900_v2  ;;  %v8531_v27 = vrot.slane %v8515_v52, %v14900_v2 }
 0x818   : > { %7836 = vst.msk [vmem:[#allocation5 + $0x38] sm:$0x7f] %vm2767_vm7, %v7818_v20  ;;  %v8047_v18 = vrot.slane %v13217_v57, %v14900_v2  ;;  %v8106_v20 = vcombine.high %v7896_v34, %v7896_v34 }
 0x819   : > { %v7715_v5 = vpop.permute.xlu0 %7714  ;;  %v8054_v63 = vrot.slane %v8039_v19, %v14900_v2 }
 0x81a   : > { %7732 = vst.msk [vmem:[#allocation5 + $0x48] sm:$0x7f] %vm2767_vm7, %v7715_v5  ;;  %v7847_v61 = vpop.permute.xlu1 %7846  ;;  %v8069_v39 = vcombine.low %v8047_v18, %v8061_v50  ;;  %v8070_v10 = vcombine.high %v8047_v18, %v8061_v50  ;;  %v8134_v50 = vrot.slane %v8106_v20, %v14900_v2 }
 0x81b   : > { %7761 = vst.msk [vmem:[#allocation5 + $0x48] sm:$0x7f] %vm2797_vm3, %v7744_v53  ;;  %7865 = vst.msk [vmem:[#allocation5 + $0x38] sm:$0x7f] %vm2797_vm3, %v7847_v61  ;;  %v8071_v35 = vcombine.low %v8054_v63, %v8068_v51  ;;  %v8072_v11 = vcombine.high %v8054_v63, %v8068_v51  ;;  %v7899_v61 = vld [vmem:[#allocation5 + $0x58] sm:$0x7f] }
 0x81c   : > { %v8079_v1 = vrot.slane %v8069_v39, %v14900_v2  ;;  %v8093_v31 = vrot.slane %v8070_v10, %v14900_v2 }
 0x81d   : > { %v7661_v24 = vpop.permute.xlu0 %7660  ;;  %v8086_v12 = vrot.slane %v8071_v35, %v14900_v2  ;;  %v8100_v8 = vrot.slane %v8072_v11, %v14900_v2 }
 0x81e   : > { %7677 = vst.msk [vmem:[#allocation5 + $0x60] sm:$0x7f] %vm2710_vm4, %v7661_v24  ;;  %v7820_v14 = vpop.permute.xlu1 %7819  ;;  %v8485_v48 = vcombine.low %v8036_v47, %v8079_v1  ;;  %v8101_v56 = vcombine.high %v8079_v1, %v8079_v1  ;;  %v8103_v33 = vcombine.high %v8093_v31, %v8093_v31  ;;  %v8172_v1 = vcombine.high %v7899_v61, %v7899_v61 }
 0x81f   : > { %v8102_v6 = vcombine.high %v8086_v12, %v8086_v12 }
 0x820   : > { %v8513_v54 = vrot.slane %v8485_v48, %v14900_v2  ;;  %v8549_v40 = vcombine.low %v8093_v31, %v8101_v56  ;;  %v8550_v36 = vcombine.low %v8103_v33, %v8086_v12 }
 0x821   : > { %v7791_v42 = vpop.permute.xlu0 %7790  ;;  %v8551_v18 = vcombine.low %v8100_v8, %v8102_v6 }
 0x822   : > { %7808 = vst.msk [vmem:[#allocation5 + $0x50] sm:$0x7f] %vm2710_vm4, %v7791_v42  ;;  %v7746_v58 = vpop.permute.xlu1 %7745  ;;  %v8516_v41 = vcombine.low %v8506_v49, %v8513_v54  ;;  %v8517_v21 = vcombine.high %v8506_v49, %v8513_v54  ;;  %v7895_v37 = vld [vmem:[#allocation5 + $0x38] sm:$0x7f]  ;;  %v8559_v63 = vrot.slane %v8549_v40, %v14900_v2  ;;  %v8566_v51 = vrot.slane %v8550_v36, %v14900_v2 }
 0x823   : > { %v13219_v25 = vld [vmem:[#allocation5 + $0x30] ss:$8 sps:$4 sm:$0xff]   ;;  %7837 = vst.msk [vmem:[#allocation5 + $0x50] sm:$0x7f] %vm2767_vm7, %v7820_v14  ;;  %v8105_v44 = vcombine.high %v7894_v59, %v7895_v37  ;;  %v8573_v14 = vrot.slane %v8551_v18, %v14900_v2  ;;  %v8193_v54 = vrot.slane %v7899_v61, %v14900_v2  ;;  %v8200_v42 = vrot.slane %v8172_v1, %v14900_v2 }
 0x824   : > { %v8538_v45 = vrot.slane %v8516_v41, %v14900_v2  ;;  %v8545_v29 = vrot.slane %v8517_v21, %v14900_v2  ;;  %v8113_v53 = vrot.slane %v13219_v25, %v14900_v2  ;;  %v8582_v43 = vcombine.high %v8559_v63, %v8566_v51  ;;  %v7902_v18 = vld [vmem:[#allocation5 + $0x70] sm:$0x7f] }
 0x825   : > { %v7717_v17 = vpop.permute.xlu0 %7716  ;;  %v8120_v38 = vrot.slane %v8105_v44, %v14900_v2  ;;  %v8581_v31 = vcombine.low %v8559_v63, %v8566_v51 }
 0x826   : > { %7733 = vst.msk [vmem:[#allocation5 + $0x60] sm:$0x7f] %vm2767_vm7, %v7717_v17  ;;  %v7849_v57 = vpop.permute.xlu1 %7848  ;;  %v8547_v32 = vcombine.high %v8524_v23, %v8538_v45  ;;  %v8548_v16 = vcombine.low %v8531_v27, %v8545_v29  ;;  %v8546_v19 = vcombine.low %v8524_v23, %v8538_v45  ;;  %v8135_v9 = vcombine.low %v8113_v53, %v8127_v22 }
 0x827   : > { %7762 = vst.msk [vmem:[#allocation5 + $0x60] sm:$0x7f] %vm2797_vm3, %v7746_v58  ;;  %7866 = vst.msk [vmem:[#allocation5 + $0x50] sm:$0x7f] %vm2797_vm3, %v7849_v57  ;;  %v8136_v3 = vcombine.high %v8113_v53, %v8127_v22  ;;  %v8137_v62 = vcombine.low %v8120_v38, %v8134_v50  ;;  %v8138_v10 = vcombine.high %v8120_v38, %v8134_v50 }
 0x828   : > { %9138 = vmatprep.mubr.f32.mxu0 %v8548_v16  ;;  %13136 = vmatmul.mubr.msk.f32.vlgmr.msra.gmra.mxu1 %vm17751_vm13, %v8547_v32  ;;  %v8145_v5 = vrot.slane %v8135_v9, %v14900_v2  ;;  %v8598_v59 = vrot.slane %v8582_v43, %v14900_v2  ;;  %v8591_v11 = vrot.slane %v8581_v31, %v14900_v2  ;;  %vm17771_vm13 = vmmov %vm17760_vm1 }
 0x829   : > { %v7663_v39 = vpop.permute.xlu0 %7662  ;;  %9139 = vmatmul.mubr.f32.vlgmr.msra.gmra.mxu0 %v8546_v19  ;;  %13138 = vmatprep.mubr.msk.f32.mxu1 %vm13294_vm10, %v13282_v0  ;;  %v8159_v28 = vrot.slane %v8136_v3, %v14900_v2  ;;  %v8152_v4 = vrot.slane %v8137_v62, %v14900_v2  ;;  %v8166_v34 = vrot.slane %v8138_v10, %v14900_v2 }
 0x82a   : > { %7678 = vst.msk [vmem:[#allocation5 + $0x78] sm:$0x7f] %vm2710_vm4, %v7663_v39  ;;  %v7793_v35 = vpop.permute.xlu1 %7792  ;;  %v8238_v62 = vcombine.high %v7902_v18, %v7902_v18 }
 0x82b   : > { %7809 = vst.msk [vmem:[#allocation5 + $0x68] sm:$0x7f] %vm2710_vm4, %v7793_v35  ;;  %v8552_v47 = vcombine.low %v8145_v5, %v8159_v28  ;;  %v12691_v58 = vcombine.high %v8145_v5, %v8159_v28  ;;  %v8617_v37 = vcombine.low %v8152_v4, %v8166_v34  ;;  %v8168_v53 = vcombine.high %v8152_v4, %v8152_v4 }
 0x82c   : > { %v8259_v34 = vrot.slane %v7902_v18, %v14900_v2 }
 0x82d   : > { %v7719_v24 = vpop.permute.xlu0 %7718  ;;  %v8580_v48 = vrot.slane %v8552_v47, %v14900_v2  ;;  %v8626_v8 = vrot.slane %v12691_v58, %v14900_v2  ;;  %v8633_v57 = vrot.slane %v8617_v37, %v14900_v2  ;;  %v7905_v58 = vld [vmem:[#allocation5 + $0x88] sm:$0x7f] }
 0x82e   : > { %7734 = vst.msk [vmem:[#allocation5 + $0x78] sm:$0x7f] %vm2767_vm7, %v7719_v24  ;;  %v7822_v52 = vpop.permute.xlu1 %7821  ;;  %v13221_v12 = vld [vmem:[#allocation5 + $0x48] ss:$8 sps:$4 sm:$0xff]  }
 0x82f   : > { %7838 = vst.msk [vmem:[#allocation5 + $0x68] sm:$0x7f] %vm2767_vm7, %v7822_v52  ;;  %v8584_v56 = vcombine.high %v8573_v14, %v8580_v48  ;;  %v8583_v49 = vcombine.low %v8573_v14, %v8580_v48  ;;  %v13223_v33 = vld [vmem:[#allocation5 + $0x4c] ss:$8 sps:$4 sm:$0x77]   ;;  %v8179_v22 = vrot.slane %v13221_v12, %v14900_v2  ;;  %v8649_v61 = vcombine.high %v8626_v8, %v8633_v57 }
 0x830   : > { %v8186_v25 = vrot.slane %v13223_v33, %v14900_v2  ;;  %v8648_v39 = vcombine.low %v8626_v8, %v8633_v57 }
 0x831   : > { %v7748_v41 = vpop.permute.xlu0 %7747  ;;  %v8612_v21 = vrot.slane %v8584_v56, %v14900_v2  ;;  %v8605_v23 = vrot.slane %v8583_v49, %v14900_v2  ;;  %v8201_v27 = vcombine.low %v8179_v22, %v8193_v54  ;;  %v8202_v6 = vcombine.high %v8179_v22, %v8193_v54 }
 0x832   : > { %7763 = vst.msk [vmem:[#allocation5 + $0x78] sm:$0x7f] %vm2797_vm3, %v7748_v41  ;;  %v7851_v20 = vpop.permute.xlu1 %7850  ;;  %v8203_v29 = vcombine.low %v8186_v25, %v8200_v42  ;;  %v8204_v32 = vcombine.high %v8186_v25, %v8200_v42  ;;  %v8665_v12 = vrot.slane %v8649_v61, %v14900_v2  ;;  %v8658_v56 = vrot.slane %v8648_v39, %v14900_v2 }
 0x833   : > { %7867 = vst.msk [vmem:[#allocation5 + $0x68] sm:$0x7f] %vm2797_vm3, %v7851_v20  ;;  %v8615_v40 = vcombine.low %v8598_v59, %v8612_v21  ;;  %v8614_v44 = vcombine.high %v8591_v11, %v8605_v23  ;;  %v8613_v45 = vcombine.low %v8591_v11, %v8605_v23  ;;  %v8211_v36 = vrot.slane %v8201_v27, %v14900_v2 }
 0x834   : > { %v8225_v17 = vrot.slane %v8202_v6, %v14900_v2  ;;  %v8218_v16 = vrot.slane %v8203_v29, %v14900_v2  ;;  %v8232_v28 = vrot.slane %v8204_v32, %v14900_v2  ;;  %v8266_v54 = vrot.slane %v8238_v62, %v14900_v2 }
 0x835   : > { %v7665_v38 = vpop.permute.xlu0 %7664  ;;  %9143 = vmatprep.mubr.f32.mxu0 %v8615_v40  ;;  %13139 = vmatmul.mubr.msk.f32.gmra.mxu1 %vm17762_vm14, %v8614_v44  ;;  %v8233_v9 = vcombine.high %v8211_v36, %v8211_v36  ;;  %v8618_v3 = vcombine.low %v8168_v53, %v8211_v36  ;;  %vm17772_vm14 = vmmov %vm17760_vm1 }
 0x836   : > { %7679 = vst.msk [vmem:[#allocation5 + $0x90] sm:$0x7f] %vm2710_vm4, %v7665_v38  ;;  %9144 = vmatmul.mubr.f32.gmra.mxu0 %v8613_v45  ;;  %v7824_v19 = vpop.permute.xlu1 %7823  ;;  %13141 = vmatprep.mubr.msk.f32.mxu1 %vm13294_vm10, %v13282_v0  ;;  %v8234_v50 = vcombine.high %v8218_v16, %v8218_v16  ;;  %v8235_v5 = vcombine.high %v8225_v17, %v8225_v17  ;;  %v7908_v38 = vld [vmem:[#allocation5 + $0xa0] sm:$0x7f] }
 0x837   : > { %v8619_v63 = vcombine.low %v8225_v17, %v8233_v9  ;;  %v8640_v35 = vrot.slane %v8618_v3, %v14900_v2  ;;  %v8304_v45 = vcombine.high %v7905_v58, %v7905_v58  ;;  %v8391_v61 = vrot.slane %v7908_v38, %v14900_v2 }
 0x838   : > { %v8683_v43 = vcombine.low %v8235_v5, %v8218_v16  ;;  %v8684_v31 = vcombine.low %v8232_v28, %v8234_v50 }
 0x839   : > { %v7795_v51 = vpop.permute.xlu0 %7794  ;;  %v8647_v47 = vrot.slane %v8619_v63, %v14900_v2  ;;  %v8332_v50 = vrot.slane %v8304_v45, %v14900_v2 }
 0x83a   : > { %7810 = vst.msk [vmem:[#allocation5 + $0x80] sm:$0x7f] %vm2710_vm4, %v7795_v51  ;;  %v7853_v10 = vpop.permute.xlu1 %7852  ;;  %v13225_v1 = vld [vmem:[#allocation5 + $0x60] ss:$8 sps:$4 sm:$0xff]   ;;  %v8693_v41 = vrot.slane %v8683_v43, %v14900_v2  ;;  %v8700_v21 = vrot.slane %v8684_v31, %v14900_v2  ;;  %v8370_v51 = vcombine.high %v7908_v38, %v7908_v38 }
 0x83b   : > { %7839 = vst.msk [vmem:[#allocation5 + $0x80] sm:$0x7f] %vm2767_vm7, %v7824_v19  ;;  %v13227_v24 = vld [vmem:[#allocation5 + $0x64] ss:$8 sps:$4 sm:$0x77]   ;;  %v8651_v14 = vcombine.high %v8640_v35, %v8647_v47  ;;  %v8650_v48 = vcombine.low %v8640_v35, %v8647_v47  ;;  %v8245_v4 = vrot.slane %v13225_v1, %v14900_v2  ;;  %v8325_v19 = vrot.slane %v7905_v58, %v14900_v2 }
 0x83c   : > { %7868 = vst.msk [vmem:[#allocation5 + $0x80] sm:$0x7f] %vm2797_vm3, %v7853_v10  ;;  %v8252_v49 = vrot.slane %v13227_v24, %v14900_v2  ;;  %v8716_v57 = vcombine.high %v8693_v41, %v8700_v21  ;;  %v8715_v32 = vcombine.low %v8693_v41, %v8700_v21 }
 0x83d   : > { %v7721_v52 = vpop.permute.xlu0 %7720  ;;  %v8679_v42 = vrot.slane %v8651_v14, %v14900_v2  ;;  %v8672_v59 = vrot.slane %v8650_v48, %v14900_v2  ;;  %v8267_v11 = vcombine.low %v8245_v4, %v8259_v34  ;;  %v8268_v22 = vcombine.high %v8245_v4, %v8259_v34 }
 0x83e   : > { %7735 = vst.msk [vmem:[#allocation5 + $0x90] sm:$0x7f] %vm2767_vm7, %v7721_v52  ;;  %v7797_v33 = vpop.permute.xlu1 %7796  ;;  %v8269_v23 = vcombine.low %v8252_v49, %v8266_v54  ;;  %v8270_v37 = vcombine.high %v8252_v49, %v8266_v54  ;;  %v8732_v35 = vrot.slane %v8716_v57, %v14900_v2  ;;  %v8725_v47 = vrot.slane %v8715_v32, %v14900_v2 }
 0x83f   : > { %7811 = vst.msk [vmem:[#allocation5 + $0x98] sm:$0x7f] %vm2710_vm4, %v7797_v33  ;;  %v8682_v25 = vcombine.low %v8665_v12, %v8679_v42  ;;  %v8681_v20 = vcombine.high %v8658_v56, %v8672_v59  ;;  %v8680_v27 = vcombine.low %v8658_v56, %v8672_v59  ;;  %v8277_v6 = vrot.slane %v8267_v11, %v14900_v2 }
 0x840   : > { %7840 = vst.msk [vmem:[#allocation5 + $0x98] sm:$0x7f] %vm2767_vm7, %v16572_v26  ;;  %v8291_v44 = vrot.slane %v8268_v22, %v14900_v2  ;;  %v8284_v53 = vrot.slane %v8269_v23, %v14900_v2  ;;  %v8298_v36 = vrot.slane %v8270_v37, %v14900_v2  ;;  %v8398_v56 = vrot.slane %v8370_v51, %v14900_v2 }
 0x841   : > { %v7750_v40 = vpop.permute.xlu0 %7749  ;;  %9148 = vmatprep.mubr.f32.mxu0 %v8682_v25  ;;  %13142 = vmatmul.mubr.msk.f32.gmra.mxu1 %vm17763_vm0, %v8681_v20  ;;  %vm17773_vm0 = vmmov %vm17760_vm1 }
 0x842   : > { %7764 = vst.msk [vmem:[#allocation5 + $0x90] sm:$0x7f] %vm2797_vm3, %v7750_v40  ;;  %v7855_v29 = vpop.permute.xlu1 %7854  ;;  %9149 = vmatmul.mubr.f32.gmra.mxu0 %v8680_v27  ;;  %13144 = vmatprep.mubr.msk.f32.mxu1 %vm13294_vm10, %v13282_v0  ;;  %v8685_v26 = vcombine.low %v8277_v6, %v8291_v44  ;;  %v12692_v17 = vcombine.high %v8277_v6, %v8291_v44 }
 0x843   : > { %7869 = vst.msk [vmem:[#allocation5 + $0x98] sm:$0x7f] %vm2797_vm3, %v7855_v29  ;;  %v13229_v8 = vld [vmem:[#allocation5 + $0x78] ss:$8 sps:$4 sm:$0xff]   ;;  %v8750_v63 = vcombine.low %v8284_v53, %v8298_v36  ;;  %v8300_v4 = vcombine.high %v8284_v53, %v8284_v53 }
 0x844   : > { %v13231_v16 = vld [vmem:[#allocation5 + $0x7c] ss:$8 sps:$4 sm:$0x77]   ;;  %v8707_v9 = vrot.slane %v8685_v26, %v14900_v2  ;;  %v8714_v3 = vrot.slane %v12692_v17, %v14900_v2  ;;  %v8311_v18 = vrot.slane %v13229_v8, %v14900_v2 }
 0x845   : > { %v8318_v5 = vrot.slane %v13231_v16, %v14900_v2  ;;  %v8760_v52 = vrot.slane %v8750_v63, %v14900_v2 }
 0x846   : > { %v8718_v39 = vcombine.high %v8707_v9, %v8714_v3  ;;  %v8717_v28 = vcombine.low %v8707_v9, %v8714_v3  ;;  %v8333_v62 = vcombine.low %v8311_v18, %v8325_v19  ;;  %v8334_v10 = vcombine.high %v8311_v18, %v8325_v19 }
 0x847   : > { %v8335_v1 = vcombine.low %v8318_v5, %v8332_v50  ;;  %v8336_v43 = vcombine.high %v8318_v5, %v8332_v50 }
 0x848   : > { %v8746_v31 = vrot.slane %v8718_v39, %v14900_v2  ;;  %v8739_v24 = vrot.slane %v8717_v28, %v14900_v2  ;;  %v8343_v14 = vrot.slane %v8333_v62, %v14900_v2  ;;  %v8357_v48 = vrot.slane %v8334_v10, %v14900_v2 }
 0x849   : > { %v8350_v34 = vrot.slane %v8335_v1, %v14900_v2  ;;  %v8364_v58 = vrot.slane %v8336_v43, %v14900_v2 }
 0x84a   : > { %v13233_v12 = vld [vmem:[#allocation5 + $0x90] ss:$8 sps:$4 sm:$0xff]   ;;  %v8749_v49 = vcombine.low %v8732_v35, %v8746_v31  ;;  %v8748_v54 = vcombine.high %v8725_v47, %v8739_v24  ;;  %v8747_v33 = vcombine.low %v8725_v47, %v8739_v24  ;;  %v8365_v42 = vcombine.high %v8343_v14, %v8343_v14  ;;  %v13235_v59 = vld [vmem:[#allocation5 + $0x94] ss:$8 sps:$4 sm:$0x77]  }
 0x84b   : > { %v8367_v11 = vcombine.high %v8357_v48, %v8357_v48  ;;  %v8751_v22 = vcombine.low %v8300_v4, %v8343_v14  ;;  %v8377_v41 = vrot.slane %v13233_v12, %v14900_v2  ;;  %v8366_v23 = vcombine.high %v8350_v34, %v8350_v34 }
 0x84c   : > { %9153 = vmatprep.mubr.f32.mxu0 %v8749_v49  ;;  %13145 = vmatmul.mubr.msk.f32.gmra.mxu1 %vm17764_vm2, %v8748_v54  ;;  %v8752_v21 = vcombine.low %v8357_v48, %v8365_v42  ;;  %v8384_v37 = vrot.slane %v13235_v59, %v14900_v2  ;;  %vm17774_vm2 = vmmov %vm17773_vm0 }
 0x84d   : > { %9154 = vmatmul.mubr.f32.gmra.mxu0 %v8747_v33  ;;  %13147 = vmatprep.mubr.msk.f32.mxu1 %vm13294_vm10, %v13282_v0  ;;  %v8753_v25 = vcombine.low %v8367_v11, %v8350_v34  ;;  %v8767_v20 = vrot.slane %v8751_v22, %v14900_v2  ;;  %v8399_v27 = vcombine.low %v8377_v41, %v8391_v61  ;;  %v10086_v11 = vld [vmem:[#allocation4] sm:$0xff] }
 0x84e   : > { %v8774_v6 = vrot.slane %v8752_v21, %v14900_v2  ;;  %v8400_v40 = vcombine.high %v8377_v41, %v8391_v61  ;;  %v8401_v44 = vcombine.low %v8384_v37, %v8398_v56  ;;  %v8402_v45 = vcombine.high %v8384_v37, %v8398_v56  ;;  %10104 = vst.msk [vmem:[#allocation5] sm:$0x7f] %vm2642_vm5, %v10086_v11  ;;  %v16745_v41 = vld [vmem:[#allocation4 + $0x80] sm:$0xff] }
 0x84f   : > { %v8781_v29 = vrot.slane %v8753_v25, %v14900_v2  ;;  %v8783_v53 = vcombine.high %v8760_v52, %v8767_v20  ;;  %v8782_v36 = vcombine.low %v8760_v52, %v8767_v20  ;;  %v8409_v26 = vrot.slane %v8399_v27, %v14900_v2  ;;  %10298 = vrot.lane.b32.xlu1 %v16745_v41, %s13291_s22  ;;  %v10103_v25 = vld [vmem:[#allocation4 + $0x88] sm:$0x1] }
 0x850   : > { %v8416_v17 = vrot.slane %v8401_v44, %v14900_v2  ;;  %v8423_v8 = vrot.slane %v8400_v40, %v14900_v2  ;;  %v8430_v38 = vrot.slane %v8402_v45, %v14900_v2  ;;  %v8817_v57 = vcombine.low %v8364_v58, %v8366_v23  ;;  %v10087_v58 = vld [vmem:[#allocation4 + $0x8] sm:$0x1]  ;;  %v12689_v40 = vld [vmem:[%s17502_s8] ss:$0 sm:$0xff] }
 0x851   : > { %v8785_v32 = vcombine.high %v8774_v6, %v8781_v29  ;;  %v8784_v16 = vcombine.low %v8774_v6, %v8781_v29  ;;  %v8799_v19 = vrot.slane %v8783_v53, %v14900_v2  ;;  %v8792_v5 = vrot.slane %v8782_v36, %v14900_v2 }
 0x852   : > { %v8818_v9 = vcombine.low %v8409_v26, %v8423_v8  ;;  %v12693_v3 = vcombine.high %v8409_v26, %v8423_v8  ;;  %v8820_v18 = vcombine.low %v8416_v17, %v8430_v38  ;;  %v8432_v51 = vcombine.high %v8416_v17, %v8416_v17 }
 0x853   : > { %v8813_v50 = vrot.slane %v8785_v32, %v14900_v2  ;;  %v8806_v63 = vrot.slane %v8784_v16, %v14900_v2  ;;  %v8827_v61 = vrot.slane %v8817_v57, %v14900_v2  ;;  %v10118_v22 = vrot.slane %v10086_v11, 1 }
 0x854   : > { %v8834_v39 = vrot.slane %v8818_v9, %v14900_v2  ;;  %v8841_v28 = vrot.slane %v12693_v3, %v14900_v2  ;;  %v8848_v62 = vrot.slane %v8820_v18, %v14900_v2  ;;  %v8890_v1 = vrot.slane %v8432_v51, %v14900_v2 }
 0x855   : > { %v8816_v10 = vcombine.low %v8799_v19, %v8813_v50  ;;  %v8815_v35 = vcombine.high %v8792_v5, %v8806_v63  ;;  %v8814_v47 = vcombine.low %v8792_v5, %v8806_v63  ;;  %10125 = vrot.lane.b32.xlu0 %v10118_v22, %s13290_s30  ;;  %v10160_v21 = vrot.slane %v10086_v11, 2 }
 0x856   : > { %v8850_v43 = vcombine.high %v8827_v61, %v8834_v39  ;;  %v8852_v31 = vcombine.high %v8841_v28, %v8848_v62  ;;  %v8849_v24 = vcombine.low %v8827_v61, %v8834_v39  ;;  %v8851_v14 = vcombine.low %v8841_v28, %v8848_v62 }
 0x857   : > { %9158 = vmatprep.mubr.f32.mxu0 %v8816_v10  ;;  %13148 = vmatmul.mubr.msk.f32.gmra.mxu1 %vm17765_vm15, %v8815_v35  ;;  %v8891_v48 = vcombine.high %v8890_v1, %v8890_v1  ;;  %v8898_v33 = vrot.slane %v8890_v1, %v14900_v2  ;;  %v10161_v23 = vrot.slane %v10087_v58, 2  ;;  %v10344_v20 = vrot.slane %v16745_v41, 2  ;;  %vm17775_vm15 = vmmov %vm17773_vm0 }
 0x858   : > { %9159 = vmatmul.mubr.f32.gmra.mxu0 %v8814_v47  ;;  %13150 = vmatprep.mubr.msk.f32.mxu1 %vm13294_vm10, %v13282_v0  ;;  %v8866_v4 = vrot.slane %v8850_v43, %v14900_v2  ;;  %v8880_v34 = vrot.slane %v8852_v31, %v14900_v2  ;;  %v8859_v52 = vrot.slane %v8849_v24, %v14900_v2  ;;  %v10345_v27 = vrot.slane %v10103_v25, 2 }
 0x859   : > { %v8873_v12 = vrot.slane %v8851_v14, %v14900_v2  ;;  %v8905_v42 = vrot.slane %v8891_v48, %v14900_v2  ;;  %v8906_v59 = vcombine.high %v8898_v33, %v8898_v33  ;;  %v10162_v37 = vsel %vm17768_vm11, %v10160_v21, %v10161_v23 }
 0x85a   : > { %v8883_v56 = vcombine.low %v8866_v4, %v8880_v34  ;;  %10181 = vrot.lane.b32.xlu0 %v10162_v37, %s13291_s22  ;;  %v10346_v6 = vsel %vm17769_vm9, %v10344_v20, %v10345_v27  ;;  %v8434_v44 = vcombine.high %v12689_v40, %v12689_v40  ;;  %v8441_v45 = vrot.slane %v12689_v40, %v14900_v2 }
 0x85b   : > { %v8882_v49 = vcombine.high %v8859_v52, %v8873_v12  ;;  %v8881_v54 = vcombine.low %v8859_v52, %v8873_v12  ;;  %10360 = vst.msk [vmem:[#allocation5 + $0xa0] sm:$0x7f] %vm2642_vm5, %v10346_v6 }
 0x85c   : > { %9163 = vmatprep.mubr.f32.mxu0 %v8883_v56  ;;  %v8448_v29 = vrot.slane %v8434_v44, %v14900_v2  ;;  %v8449_v53 = vcombine.high %v8441_v45, %v8441_v45  ;;  %v8457_v17 = vrot.slane %v8441_v45, %v14900_v2 }
 0x85d   : > { %13151 = vmatmul.mubr.msk.f32.gmra.mxu1 %vm17766_vm8, %v8882_v49  ;;  %9164 = vmatmul.mubr.f32.gmra.mxu0 %v8881_v54  ;;  %vm17776_vm8 = vmmov %vm17767_vm6 }
 0x85e   : > { %9168 = vmatprep.mubr.f32.mxu0 %v8905_v42  ;;  %13153 = vmatprep.mubr.msk.f32.mxu1 %vm13294_vm10, %v13282_v0  ;;  %v8450_v36 = vcombine.high %v8448_v29, %v8448_v29  ;;  %v8464_v26 = vrot.slane %v8448_v29, %v14900_v2  ;;  %v8471_v8 = vrot.slane %v8449_v53, %v14900_v2 }
 0x85f   : > { %v8479_v61 = vcombine.high %v8457_v17, %v8457_v17 }
 0x860   : > { %v8478_v38 = vrot.slane %v8450_v36, %v14900_v2  ;;  %v16763_v57 = vcombine.high %v8464_v26, %v8464_v26  ;;  %v8921_v32 = vcombine.low %v8457_v17, %v8471_v8  ;;  %v12694_v16 = vcombine.high %v8457_v17, %v8471_v8 }
 0x861   : > { %13154 = vmatmul.mubr.msk.f32.gmra.mxu1 %vm17767_vm6, %v8906_v59  ;;  %9169 = vmatmul.mubr.f32.gmra.mxu0 %v8898_v33  ;;  %v8481_v39 = vcombine.high %v8471_v8, %v8471_v8  ;;  %v8970_v10 = vcombine.low %v8471_v8, %v8479_v61 }
 0x862   : > { %13164 = vmatprep.mubr.msk.f32.mxu1 %vm13294_vm10, %v13282_v0  ;;  %v8923_v19 = vcombine.low %v8464_v26, %v8478_v38  ;;  %v8924_v9 = vcombine.low %v16763_v57, %v8457_v17  ;;  %v8931_v3 = vrot.slane %v8921_v32, %v14900_v2  ;;  %v16768_v18 = vrot.slane %v12694_v16, %v14900_v2 }
 0x863   : > { %v8971_v35 = vcombine.low %v8481_v39, %v8464_v26  ;;  %v8972_v47 = vcombine.low %v8478_v38, %v16763_v57  ;;  %v8979_v48 = vrot.slane %v8970_v10, %v14900_v2 }
 0x864   : > { %v16771_v50 = vrot.slane %v8923_v19, %v14900_v2  ;;  %v16774_v5 = vrot.slane %v8924_v9, %v14900_v2  ;;  %v8953_v63 = vcombine.low %v8931_v3, %v16768_v18 }
 0x865   : > { %v16790_v4 = vrot.slane %v8971_v35, %v14900_v2  ;;  %v16793_v34 = vrot.slane %v8972_v47, %v14900_v2 }
 0x866   : > { %v8954_v51 = vcombine.low %v16771_v50, %v16774_v5  ;;  %v16780_v28 = vrot.slane %v8953_v63, %v14900_v2  ;;  %v9012_v10 = vcombine.low %v16774_v5, %v8979_v48 }
 0x867   : > { %v8994_v56 = vcombine.low %v8979_v48, %v16790_v4  ;;  %v8995_v49 = vcombine.low %v16793_v34, %v8931_v3 }
 0x868   : > { %v16783_v62 = vrot.slane %v8954_v51, %v14900_v2  ;;  %v9011_v51 = vcombine.low %v16768_v18, %v16771_v50  ;;  %v9026_v5 = vrot.slane %v9012_v10, %v14900_v2 }
 0x869   : > { %v16799_v59 = vrot.slane %v8994_v56, %v14900_v2  ;;  %v16802_v11 = vrot.slane %v8995_v49, %v14900_v2 }
 0x86a   : > { %v8969_v24 = vcombine.low %v16780_v28, %v16783_v62 }
 0x86b   : > { %v9010_v44 = vcombine.low %v16799_v59, %v16802_v11 }
 0x8e8   : > { %v9240_v1 = vpop.f32.mrf.mxu1 }
 0x8e9   : > { %v12915_v43 = vpop.f32.mrf.mxu0 }
 0x8ea   : > { %v13137_v31 = vpop.f32.mrf.mxu1 }
 0x8eb   : > { %v12916_v14 = vpop.f32.mrf.mxu0 }
 0x8ec   : > { %v12917_v52 = vadd.f32 %v12916_v14, %v12915_v43 }
 0x8ee   : > { %v9141_v12 = vadd.f32 %v12917_v52, %v8969_v24  ;;  %v16820_v52 = vrot.slane %v9011_v51, %v14900_v2 }
 0x8f0   : > { %v9241_v54 = vadd.f32 %v9240_v1, %v9141_v12 }
 0x8f2   : > { %v9281_v33 = vcombine.high %v9241_v54, %v9241_v54  ;;  %v9288_v42 = vrot.slane %v9241_v54, %v14900_v2  ;;  %v10126_v54 = vpop.permute.xlu0 %10125 }
 0x8f3   : > { %10146 = vst.msk [vmem:[#allocation5] sm:$0x7f] %vm2710_vm4, %v10126_v54 }
 0x8f4   : > { %v9295_v22 = vrot.slane %v9281_v33, %v14900_v2  ;;  %v9296_v58 = vcombine.high %v9288_v42, %v9288_v42  ;;  %v9304_v21 = vrot.slane %v9288_v42, %v14900_v2 }
 0x8f5   : > { %v9245_v23 = vpop.f32.mrf.mxu1 }
 0x8f6   : > { %v9297_v37 = vcombine.high %v9295_v22, %v9295_v22  ;;  %v9311_v25 = vrot.slane %v9295_v22, %v14900_v2  ;;  %v9318_v20 = vrot.slane %v9296_v58, %v14900_v2  ;;  %v9326_v27 = vcombine.high %v9304_v21, %v9304_v21  ;;  %v12918_v6 = vpop.f32.mrf.mxu0 }
 0x8f7   : > { %v13140_v40 = vpop.f32.mrf.mxu1  ;;  %v9638_v17 = vmax.f32 %v9304_v21, 0.0 }
 0x8f8   : > { %v9325_v45 = vrot.slane %v9297_v37, %v14900_v2  ;;  %v9327_v29 = vcombine.high %v9311_v25, %v9311_v25  ;;  %v9328_v53 = vcombine.high %v9318_v20, %v9318_v20  ;;  %v9639_v36 = vmax.f32 %v9318_v20, 0.0  ;;  %v12919_v26 = vpop.f32.mrf.mxu0 }
 0x8f9   : > { %v9640_v8 = vmax.f32 %v9326_v27, 0.0  ;;  %v12920_v38 = vadd.f32 %v12919_v26, %v12918_v6  ;;  %v9642_v16 = vmax.f32 %v9311_v25, 0.0  ;;  %v9028_v26 = vcombine.low %v16790_v4, %v16793_v34 }
 0x8fa   : > { %v9641_v32 = vmax.f32 %v9328_v53, 0.0  ;;  %v9643_v19 = vmax.f32 %v9325_v45, 0.0  ;;  %v9644_v9 = vmax.f32 %v9327_v29, 0.0  ;;  %v9736_v3 = vcombine.low %v9638_v17, %v9639_v36  ;;  %v10182_v17 = vpop.permute.xlu0 %10181 }
 0x8fb   : > { %v9146_v63 = vadd.f32 %v12920_v38, %v9010_v44  ;;  %v9329_v18 = vcombine.high %v9325_v45, %v9325_v45  ;;  %v9027_v44 = vcombine.low %v16820_v52, %v9026_v5  ;;  %10202 = vst.msk [vmem:[#allocation5] sm:$0x7f] %vm2767_vm7, %v10182_v17 }
 0x8fc   : > { %v9737_v61 = vcombine.low %v9640_v8, %v9641_v32  ;;  %v9738_v39 = vcombine.low %v9642_v16, %v9643_v19  ;;  %v9745_v47 = vrot.slane %v9736_v3, %v14900_v2  ;;  %v9766_v31 = vrot.slane %v9644_v9, %v14900_v2 }
 0x8fd   : > { %v9246_v35 = vadd.f32 %v9245_v23, %v9146_v63  ;;  %v9645_v27 = vmax.f32 %v9329_v18, 0.0 }
 0x8fe   : > { %v9752_v1 = vrot.slane %v9737_v61, %v14900_v2  ;;  %v9759_v43 = vrot.slane %v9738_v39, %v14900_v2  ;;  %v9035_v61 = vrot.slane %v9028_v26, %v14900_v2 }
 0x8ff   : > { %v9330_v24 = vcombine.high %v9246_v35, %v9246_v35  ;;  %v9337_v14 = vrot.slane %v9246_v35, %v14900_v2  ;;  %v10089_v35 = vld [vmem:[#allocation4 + $0x18] sm:$0x1] }
 0x900   : > { %v9767_v50 = vcombine.low %v9745_v47, %v9752_v1  ;;  %v9768_v12 = vcombine.low %v9759_v43, %v9766_v31  ;;  %v9036_v5 = vcombine.low %v9035_v61, %v16780_v28  ;;  %v16860_v61 = vld [vmem:[#allocation4 + $0x28] sm:$0x1] }
 0x901   : > { %v9344_v48 = vrot.slane %v9330_v24, %v14900_v2  ;;  %v9345_v56 = vcombine.high %v9337_v14, %v9337_v14  ;;  %v9353_v49 = vrot.slane %v9337_v14, %v14900_v2  ;;  %v9250_v22 = vpop.f32.mrf.mxu1 }
 0x902   : > { %v9775_v33 = vrot.slane %v9767_v50, %v14900_v2  ;;  %v9782_v42 = vrot.slane %v9768_v12, %v14900_v2  ;;  %v12921_v25 = vpop.f32.mrf.mxu0 }
 0x903   : > { %v9346_v58 = vcombine.high %v9344_v48, %v9344_v48  ;;  %v9360_v21 = vrot.slane %v9344_v48, %v14900_v2  ;;  %v9367_v23 = vrot.slane %v9345_v56, %v14900_v2  ;;  %v9375_v37 = vcombine.high %v9353_v49, %v9353_v49  ;;  %v13143_v40 = vpop.f32.mrf.mxu1 }
 0x904   : > { %v9783_v20 = vcombine.low %v9775_v33, %v9782_v42  ;;  %v9646_v6 = vmax.f32 %v9353_v49, 0.0  ;;  %v12922_v36 = vpop.f32.mrf.mxu0  ;;  %v10164_v48 = vrot.slane %v10089_v35, 2 }
 0x905   : > { %v9374_v45 = vrot.slane %v9346_v58, %v14900_v2  ;;  %v9377_v29 = vcombine.high %v9367_v23, %v9367_v23  ;;  %v9647_v53 = vmax.f32 %v9367_v23, 0.0  ;;  %v9648_v8 = vmax.f32 %v9375_v37, 0.0 }
 0x906   : > { %10079 = vst.msk [vmem:[#allocation4 + $0x11] sm:$0x7f] %vm2642_vm5, %v9783_v20  ;;  %v9784_v38 = vcombine.low %v9645_v27, %v9646_v6  ;;  %v12923_v32 = vadd.f32 %v12922_v36, %v12921_v25  ;;  %v9650_v19 = vmax.f32 %v9360_v21, 0.0  ;;  %v9376_v14 = vcombine.high %v9360_v21, %v9360_v21 }
 0x907   : > { %v9649_v16 = vmax.f32 %v9377_v29, 0.0  ;;  %v9651_v9 = vmax.f32 %v9374_v45, 0.0  ;;  %v9785_v3 = vcombine.low %v9647_v53, %v9648_v8  ;;  %v9378_v39 = vcombine.high %v9374_v45, %v9374_v45 }
 0x908   : > { %v9151_v63 = vadd.f32 %v12923_v32, %v9027_v44  ;;  %v9793_v10 = vrot.slane %v9784_v38, %v14900_v2  ;;  %v9652_v40 = vmax.f32 %v9376_v14, 0.0 }
 0x909   : > { %v9786_v51 = vcombine.low %v9649_v16, %v9650_v19  ;;  %v9800_v4 = vrot.slane %v9785_v3, %v14900_v2  ;;  %v9814_v1 = vrot.slane %v9651_v9, %v14900_v2  ;;  %v9653_v56 = vmax.f32 %v9378_v39, 0.0 }
 0x90a   : > { %v9251_v34 = vadd.f32 %v9250_v22, %v9151_v63 }
 0x90b   : > { %v9807_v47 = vrot.slane %v9786_v51, %v14900_v2  ;;  %v9815_v43 = vcombine.low %v9793_v10, %v9800_v4  ;;  %v9832_v8 = vcombine.low %v9652_v40, %v9653_v56  ;;  %v9037_v51 = vcombine.low %v16783_v62, %v16799_v59 }
 0x90c   : > { %v9379_v31 = vcombine.high %v9251_v34, %v9251_v34  ;;  %v9386_v24 = vrot.slane %v9251_v34, %v14900_v2  ;;  %v9255_v50 = vpop.f32.mrf.mxu1  ;;  %v9038_v62 = vcombine.low %v16802_v11, %v16820_v52  ;;  %v10167_v59 = vrot.slane %v16860_v61, 2 }
 0x90d   : > { %v9816_v18 = vcombine.low %v9807_v47, %v9814_v1  ;;  %v10088_v12 = vld [vmem:[#allocation4 + $0x10] sm:$0xff]  ;;  %v12924_v42 = vpop.f32.mrf.mxu0  ;;  %v9823_v22 = vrot.slane %v9815_v43, %v14900_v2  ;;  %v9841_v35 = vrot.slane %v9832_v8, %v14900_v2 }
 0x90e   : > { %v9393_v49 = vrot.slane %v9379_v31, %v14900_v2  ;;  %v9394_v54 = vcombine.high %v9386_v24, %v9386_v24  ;;  %v9402_v33 = vrot.slane %v9386_v24, %v14900_v2  ;;  %10105 = vst.msk [vmem:[#allocation5 + $0x18] sm:$0x7f] %vm2642_vm5, %v10088_v12  ;;  %10210 = vrot.lane.b32.xlu1 %v10088_v12, %s13292_s16  ;;  %v10163_v21 = vrot.slane %v10088_v12, 2  ;;  %v13146_v23 = vpop.f32.mrf.mxu1 }
 0x90f   : > { %v9830_v58 = vrot.slane %v9816_v18, %v14900_v2  ;;  %v10119_v37 = vrot.slane %v10088_v12, 1  ;;  %v12925_v6 = vpop.f32.mrf.mxu0 }
 0x910   : > { %v9395_v28 = vcombine.high %v9393_v49, %v9393_v49  ;;  %v9409_v25 = vrot.slane %v9393_v49, %v14900_v2  ;;  %v9416_v20 = vrot.slane %v9394_v54, %v14900_v2  ;;  %v9424_v27 = vcombine.high %v9402_v33, %v9402_v33 }
 0x911   : > { %v9831_v44 = vcombine.low %v9823_v22, %v9830_v58  ;;  %v12926_v45 = vadd.f32 %v12925_v6, %v12924_v42  ;;  %10127 = vrot.lane.b32.xlu0 %v10119_v37, %s13290_s30  ;;  %10246 = vst.msk [vmem:[#allocation5 + $0x8] sm:$0x7f] %vm2642_vm5, %v10119_v37  ;;  %v10165_v29 = vsel %vm17760_vm1, %v10163_v21, %v10164_v48  ;;  %v9654_v38 = vmax.f32 %v9402_v33, 0.0 }
 0x912   : > { %v9423_v53 = vrot.slane %v9395_v28, %v14900_v2  ;;  %v9425_v36 = vcombine.high %v9409_v25, %v9409_v25  ;;  %v9426_v26 = vcombine.high %v9416_v20, %v9416_v20  ;;  %v9655_v17 = vmax.f32 %v9416_v20, 0.0  ;;  %10257 = vrot.lane.b32.xlu1 %v10165_v29, %s13290_s30 }
 0x913   : > { %10080 = vst.msk [vmem:[#allocation4 + $0x21] sm:$0x7f] %vm2642_vm5, %v9831_v44  ;;  %v9156_v32 = vadd.f32 %v12926_v45, %v9036_v5  ;;  %v9656_v16 = vmax.f32 %v9424_v27, 0.0  ;;  %v9658_v9 = vmax.f32 %v9409_v25, 0.0  ;;  %v9045_v22 = vrot.slane %v16763_v57, %v14900_v2 }
 0x914   : > { %v9657_v19 = vmax.f32 %v9426_v26, 0.0  ;;  %v9833_v3 = vcombine.low %v9654_v38, %v9655_v17  ;;  %v9427_v39 = vcombine.high %v9423_v53, %v9423_v53  ;;  %v9659_v10 = vmax.f32 %v9423_v53, 0.0 }
 0x915   : > { %v9256_v63 = vadd.f32 %v9255_v50, %v9156_v32  ;;  %10183 = vrot.lane.b32.xlu0 %v10165_v29, %s13291_s22  ;;  %v9660_v4 = vmax.f32 %v9425_v36, 0.0  ;;  %v9862_v24 = vrot.slane %v9658_v9, %v14900_v2 }
 0x916   : > { %v9834_v34 = vcombine.low %v9656_v16, %v9657_v19  ;;  %v9848_v47 = vrot.slane %v9833_v3, %v14900_v2  ;;  %v9661_v54 = vmax.f32 %v9427_v39, 0.0 }
 0x917   : > { %v9428_v1 = vcombine.high %v9256_v63, %v9256_v63  ;;  %v9435_v43 = vrot.slane %v9256_v63, %v14900_v2  ;;  %v9260_v14 = vpop.f32.mrf.mxu1  ;;  %v9880_v49 = vcombine.low %v9659_v10, %v9660_v4 }
 0x918   : > { %v9855_v31 = vrot.slane %v9834_v34, %v14900_v2  ;;  %v9863_v18 = vcombine.low %v9841_v35, %v9848_v47  ;;  %v12927_v48 = vpop.f32.mrf.mxu0  ;;  %v16892_v47 = vld [vmem:[#allocation4 + $0x38] sm:$0x1] }
 0x919   : > { %v9442_v50 = vrot.slane %v9428_v1, %v14900_v2  ;;  %v9443_v12 = vcombine.high %v9435_v43, %v9435_v43  ;;  %v9451_v5 = vrot.slane %v9435_v43, %v14900_v2  ;;  %v13149_v33 = vpop.f32.mrf.mxu1  ;;  %v9889_v45 = vrot.slane %v9880_v49, %v14900_v2 }
 0x91a   : > { %v9864_v56 = vcombine.low %v9855_v31, %v9862_v24  ;;  %v16872_v42 = vld [vmem:[#allocation4 + $0x20] sm:$0xff]  ;;  %v9871_v11 = vrot.slane %v9863_v18, %v14900_v2  ;;  %v12928_v23 = vpop.f32.mrf.mxu0 }
 0x91b   : > { %v9444_v52 = vcombine.high %v9442_v50, %v9442_v50  ;;  %v9458_v58 = vrot.slane %v9442_v50, %v14900_v2  ;;  %v9465_v21 = vrot.slane %v9443_v12, %v14900_v2  ;;  %10212 = vrot.lane.b32.xlu0 %v16872_v42, %s13292_s16  ;;  %10106 = vst.msk [vmem:[#allocation5 + $0x30] sm:$0x7f] %vm2642_vm5, %v16872_v42  ;;  %v9662_v25 = vmax.f32 %v9451_v5, 0.0 }
 0x91c   : > { %v9878_v37 = vrot.slane %v9864_v56, %v14900_v2  ;;  %v9473_v28 = vcombine.high %v9451_v5, %v9451_v5  ;;  %v12929_v20 = vadd.f32 %v12928_v23, %v12927_v48  ;;  %10286 = vrot.lane.b32.xlu1 %v16872_v42, %s13291_s22  ;;  %v10120_v3 = vrot.slane %v16872_v42, 1 }
 0x91d   : > { %v9472_v57 = vrot.slane %v9444_v52, %v14900_v2  ;;  %v9474_v27 = vcombine.high %v9458_v58, %v9458_v58  ;;  %v9475_v6 = vcombine.high %v9465_v21, %v9465_v21  ;;  %v9663_v40 = vmax.f32 %v9465_v21, 0.0  ;;  %v9265_v36 = vpop.f32.mrf.mxu1  ;;  %v12930_v26 = vpop.f32.mrf.mxu0 }
 0x91e   : > { %v9879_v44 = vcombine.low %v9871_v11, %v9878_v37  ;;  %v9664_v29 = vmax.f32 %v9473_v28, 0.0  ;;  %v9881_v53 = vcombine.low %v9661_v54, %v9662_v25  ;;  %v9666_v38 = vmax.f32 %v9458_v58, 0.0  ;;  %10247 = vst.msk [vmem:[#allocation5 + $0x20] sm:$0x7f] %vm2642_vm5, %v10120_v3 }
 0x91f   : > { %v9476_v17 = vcombine.high %v9472_v57, %v9472_v57  ;;  %v9665_v8 = vmax.f32 %v9475_v6, 0.0  ;;  %v9667_v32 = vmax.f32 %v9472_v57, 0.0  ;;  %v9161_v9 = vadd.f32 %v12929_v20, %v9037_v51  ;;  %v13152_v63 = vpop.f32.mrf.mxu1  ;;  %v12931_v39 = vpop.f32.mrf.mxu0  ;;  %10129 = vrot.lane.b32.xlu0 %v10120_v3, %s13290_s30 }
 0x920   : > { %10081 = vst.msk [vmem:[#allocation4 + $0x31] sm:$0x7f] %vm2642_vm5, %v9879_v44  ;;  %v9882_v16 = vcombine.low %v9663_v40, %v9664_v29  ;;  %v9896_v19 = vrot.slane %v9881_v53, %v14900_v2  ;;  %v9668_v10 = vmax.f32 %v9474_v27, 0.0  ;;  %v12932_v35 = vadd.f32 %v12931_v39, %v12930_v26  ;;  %10315 = vrot.lane.b32.xlu1 %v10120_v3, %s13292_s16  ;;  %v10397_v3 = vld [vmem:[%s17503_s9 + $0x78] sm:$0xff]  ;;  %v10412_v63 = vld [vmem:[%s17503_s9 + $0xf0] sm:$0xff] }
 0x921   : > { %v9669_v4 = vmax.f32 %v9476_v17, 0.0  ;;  %v9910_v34 = vrot.slane %v9665_v8, %v14900_v2  ;;  %v9261_v31 = vadd.f32 %v9260_v14, %v9161_v9  ;;  %v16898_v51 = vpop.f32.mrf.mxu1  ;;  %v12933_v24 = vpop.f32.mrf.mxu0  ;;  %v10166_v18 = vrot.slane %v16872_v42, 2  ;;  %v10396_v39 = vld [vmem:[%s17503_s9 + $0x70] sm:$0xff] }
 0x922   : > { %v9903_v1 = vrot.slane %v9882_v16, %v14900_v2  ;;  %v9911_v43 = vcombine.low %v9889_v45, %v9896_v19  ;;  %v9928_v50 = vcombine.low %v9666_v38, %v9667_v32  ;;  %v9166_v5 = vadd.f32 %v12932_v35, %v9038_v62  ;;  %v10413_v38 = vld [vmem:[%s17503_s9 + $0xf8] sm:$0xff] }
 0x923   : > { %v9929_v12 = vcombine.low %v9668_v10, %v9669_v4  ;;  %v16902_v48 = vrot.slane %v9045_v22, %v14900_v2  ;;  %v9477_v49 = vcombine.high %v9261_v31, %v9261_v31  ;;  %v9484_v14 = vrot.slane %v9261_v31, %v14900_v2  ;;  %v13155_v54 = vpop.f32.mrf.mxu1  ;;  %v12934_v33 = vpop.f32.mrf.mxu0  ;;  %12947 = vmatprep.subr.mxu0 %v10413_v38 }
 0x924   : > { %v9912_v56 = vcombine.low %v9903_v1, %v9910_v34  ;;  %v10170_v11 = vrot.slane %v16892_v47, 2  ;;  %v9919_v52 = vrot.slane %v9911_v43, %v14900_v2  ;;  %v9266_v21 = vadd.f32 %v9265_v36, %v9166_v5  ;;  %12948 = vmatpush3.msra.mxu0 %v10397_v3  ;;  %v10411_v1 = vld [vmem:[%s17503_s9 + $0xe8] sm:$0xff] }
 0x925   : > { %v9944_v58 = vrot.slane %v9929_v12, %v14900_v2  ;;  %v10168_v62 = vsel %vm17770_vm12, %v10166_v18, %v10167_v59  ;;  %v9491_v22 = vrot.slane %v9477_v49, %v14900_v2  ;;  %v9492_v23 = vcombine.high %v9484_v14, %v9484_v14  ;;  %12949 = vmatprep.subr.mxu0 %v10412_v63  ;;  %v10395_v49 = vld [vmem:[%s17503_s9 + $0x68] sm:$0xff] }
 0x926   : > { %v9926_v42 = vrot.slane %v9912_v56, %v14900_v2  ;;  %v9500_v37 = vrot.slane %v9484_v14, %v14900_v2  ;;  %10354 = vst.msk [vmem:[#allocation5 + $0x10] sm:$0x7f] %vm2642_vm5, %v10168_v62  ;;  %10259 = vrot.lane.b32.xlu0 %v10168_v62, %s13290_s30  ;;  %v9937_v28 = vrot.slane %v9928_v50, %v14900_v2  ;;  %v10410_v14 = vld [vmem:[%s17503_s9 + $0xe0] sm:$0xff] }
 0x927   : > { %v9526_v25 = vcombine.high %v9266_v21, %v9266_v21  ;;  %v9533_v20 = vrot.slane %v9266_v21, %v14900_v2  ;;  %v12935_v57 = vadd.f32 %v12934_v33, %v12933_v24  ;;  %v16918_v61 = vld [vmem:[#allocation4 + $0x30] sm:$0xff]  ;;  %v9493_v27 = vcombine.high %v9491_v22, %v9491_v22  ;;  %12950 = vmatpush3.msra.mxu0 %v10396_v39 }
 0x928   : > { %v9927_v59 = vcombine.low %v9919_v52, %v9926_v42  ;;  %v9507_v6 = vrot.slane %v9491_v22, %v14900_v2  ;;  %v9514_v40 = vrot.slane %v9492_v23, %v14900_v2  ;;  %10288 = vrot.lane.b32.xlu1 %v16918_v61, %s13291_s22  ;;  %10107 = vst.msk [vmem:[#allocation5 + $0x48] sm:$0x7f] %vm2642_vm5, %v16918_v61  ;;  %v9670_v29 = vmax.f32 %v9500_v37, 0.0  ;;  %v10394_v21 = vld [vmem:[%s17503_s9 + $0x60] sm:$0xff] }
 0x929   : > { %v16926_v44 = vcombine.low %v9937_v28, %v9944_v58  ;;  %v9522_v45 = vcombine.high %v9500_v37, %v9500_v37  ;;  %v9540_v53 = vrot.slane %v9526_v25, %v14900_v2  ;;  %v9521_v36 = vrot.slane %v9493_v27, %v14900_v2  ;;  %12951 = vmatprep.subr.mxu0 %v10411_v1  ;;  %v10409_v37 = vld [vmem:[%s17503_s9 + $0xd8] sm:$0xff] }
 0x92a   : > { %10082 = vst.msk [vmem:[#allocation4 + $0x41] sm:$0x7f] %vm2642_vm5, %v9927_v59  ;;  %v9523_v26 = vcombine.high %v9507_v6, %v9507_v6  ;;  %v9524_v17 = vcombine.high %v9514_v40, %v9514_v40  ;;  %v9671_v8 = vmax.f32 %v9514_v40, 0.0  ;;  %10185 = vrot.lane.b32.xlu0 %v10168_v62, %s13291_s22  ;;  %v9674_v16 = vmax.f32 %v9507_v6, 0.0  ;;  %12952 = vmatpush3.msra.mxu0 %v10395_v49 }
 0x92b   : > { %v9672_v32 = vmax.f32 %v9522_v45, 0.0  ;;  %v9541_v19 = vcombine.high %v9533_v20, %v9533_v20  ;;  %v9542_v9 = vcombine.high %v9540_v53, %v9540_v53  ;;  %v9525_v10 = vcombine.high %v9521_v36, %v9521_v36  ;;  %12953 = vmatprep.subr.mxu0 %v10410_v14 }
 0x92c   : > { %v9673_v4 = vmax.f32 %v9524_v17, 0.0  ;;  %v9675_v34 = vmax.f32 %v9521_v36, 0.0  ;;  %v9676_v35 = vmax.f32 %v9523_v26, 0.0  ;;  %10214 = vrot.lane.b32.xlu1 %v16918_v61, %s13292_s16  ;;  %v9930_v43 = vcombine.low %v9670_v29, %v9671_v8  ;;  %12954 = vmatpush3.msra.mxu0 %v10394_v21  ;;  %v10095_v8 = vld [vmem:[#allocation4 + $0x48] sm:$0x1] }
 0x92d   : > { %v9958_v31 = vrot.slane %v9672_v32, %v14900_v2  ;;  %v9549_v24 = vrot.slane %v9533_v20, %v14900_v2  ;;  %v9556_v18 = vrot.slane %v9540_v53, %v14900_v2  ;;  %v9563_v5 = vrot.slane %v9541_v19, %v14900_v2  ;;  %12955 = vmatprep.subr.mxu0 %v10409_v37  ;;  %v10392_v19 = vld [vmem:[%s17503_s9 + $0x50] sm:$0xff] }
 0x92e   : > { %v9976_v50 = vcombine.low %v9673_v4, %v9674_v16  ;;  %v9977_v12 = vcombine.low %v9675_v34, %v9676_v35  ;;  %v9570_v56 = vrot.slane %v9542_v9, %v14900_v2  ;;  %v9951_v54 = vrot.slane %v9930_v43, %v14900_v2  ;;  %v10408_v16 = vld [vmem:[%s17503_s9 + $0xd0] sm:$0xff]  ;;  %v10407_v9 = vld [vmem:[%s17503_s9 + $0xc8] sm:$0xff] }
 0x92f   : > { %v9571_v33 = vcombine.high %v9549_v24, %v9549_v24  ;;  %v9572_v52 = vcombine.high %v9556_v18, %v9556_v18  ;;  %v9677_v58 = vmax.f32 %v9525_v10, 0.0  ;;  %v9573_v22 = vcombine.high %v9563_v5, %v9563_v5 }
 0x930   : > { %v9985_v62 = vrot.slane %v9976_v50, %v14900_v2  ;;  %v9992_v42 = vrot.slane %v9977_v12, %v14900_v2  ;;  %v9574_v23 = vcombine.high %v9570_v56, %v9570_v56  ;;  %v9960_v28 = vcombine.low %v9951_v54, %v9958_v31 }
 0x931   : > { %v9678_v25 = vmax.f32 %v9549_v24, 0.0  ;;  %v9679_v20 = vmax.f32 %v9563_v5, 0.0  ;;  %v9171_v59 = vadd.f32 %v12935_v57, %v16902_v48  ;;  %v16970_v27 = vld [vmem:[#allocation4 + $0x40] sm:$0xff]  ;;  %v9967_v6 = vrot.slane %v16926_v44, %v14900_v2  ;;  %v10393_v48 = vld [vmem:[%s17503_s9 + $0x58] sm:$0xff]  ;;  %v10390_v5 = vld [vmem:[%s17503_s9 + $0x40] sm:$0xff] }
 0x932   : > { %v9680_v40 = vmax.f32 %v9571_v33, 0.0  ;;  %v9681_v45 = vmax.f32 %v9573_v22, 0.0  ;;  %v9683_v29 = vmax.f32 %v9570_v56, 0.0  ;;  %10108 = vst.msk [vmem:[#allocation5 + $0x60] sm:$0x7f] %vm2642_vm5, %v16970_v27  ;;  %v9974_v53 = vrot.slane %v9960_v28, %v14900_v2  ;;  %12956 = vmatpush3.msra.mxu0 %v10393_v48  ;;  %v10405_v33 = vld [vmem:[%s17503_s9 + $0xb8] sm:$0xff] }
 0x933   : > { %v9682_v36 = vmax.f32 %v9556_v18, 0.0  ;;  %v9685_v26 = vmax.f32 %v9574_v23, 0.0  ;;  %v9978_v17 = vcombine.low %v9677_v58, %v9678_v25  ;;  %v10007_v57 = vcombine.low %v9985_v62, %v9992_v42  ;;  %12957 = vmatprep.subr.mxu0 %v10408_v16  ;;  %v10389_v62 = vld [vmem:[%s17503_s9 + $0x38] sm:$0xff]  ;;  %v10404_v42 = vld [vmem:[%s17503_s9 + $0xb0] sm:$0xff] }
 0x934   : > { %v9684_v44 = vmax.f32 %v9572_v52, 0.0  ;;  %v10006_v38 = vrot.slane %v9679_v20, %v14900_v2  ;;  %v10024_v32 = vcombine.low %v9680_v40, %v9681_v45  ;;  %v9975_v3 = vcombine.low %v9967_v6, %v9974_v53  ;;  %12958 = vmatpush3.msra.mxu0 %v10392_v19  ;;  %v10388_v25 = vld [vmem:[%s17503_s9 + $0x30] sm:$0xff]  ;;  %v10403_v6 = vld [vmem:[%s17503_s9 + $0xa8] sm:$0xff]  ;;  %v10099_v40 = vld [vmem:[#allocation4 + $0x68] sm:$0x1] }
 0x935   : > { %v9999_v63 = vrot.slane %v9978_v17, %v14900_v2  ;;  %v10025_v39 = vcombine.low %v9682_v36, %v9683_v29  ;;  %v9271_v10 = vadd.f32 %v16898_v51, %v9171_v59  ;;  %v10121_v4 = vrot.slane %v16918_v61, 1  ;;  %12959 = vmatprep.subr.mxu0 %v10407_v9  ;;  %v10391_v51 = vld [vmem:[%s17503_s9 + $0x48] sm:$0xff]  ;;  %v10417_v29 = vld [vmem:[%s17503_s9 + $0x118] sm:$0xff]  ;;  %v10402_v17 = vld [vmem:[%s17503_s9 + $0xa0] sm:$0xff] }
 0x936   : > { %v10169_v34 = vrot.slane %v16918_v61, 2  ;;  %v10173_v35 = vrot.slane %v10095_v8, 2  ;;  %10083 = vst.msk [vmem:[#allocation4 + $0x51] sm:$0x7f] %vm2642_vm5, %v9975_v3  ;;  %v10026_v43 = vcombine.low %v9684_v44, %v9685_v26  ;;  %v16997_v24 = vrot.slane %v16970_v27, 1  ;;  %v10406_v61 = vld [vmem:[%s17503_s9 + $0xc0] sm:$0xff]  ;;  %12960 = vmatpush3.msra.mxu0 %v10391_v51  ;;  %13157 = vmatpush3.msra.mxu1 %v10417_v29 }
 0x937   : > { %v10008_v1 = vcombine.low %v9999_v63, %v10006_v38  ;;  %v9581_v31 = vrot.slane %v9271_v10, %v14900_v2  ;;  %v10015_v18 = vrot.slane %v10007_v57, %v14900_v2  ;;  %10131 = vrot.lane.b32.xlu0 %v10121_v4, %s13290_s30  ;;  %10248 = vst.msk [vmem:[#allocation5 + $0x38] sm:$0x7f] %vm2642_vm5, %v10121_v4  ;;  %v10172_v12 = vrot.slane %v16970_v27, 2  ;;  %v10387_v45 = vld [vmem:[%s17503_s9 + $0x28] sm:$0xff]  ;;  %v10386_v57 = vld [vmem:[%s17503_s9 + $0x20] sm:$0xff]  ;;  %v10416_v44 = vld [vmem:[%s17503_s9 + $0x110] sm:$0xff] }
 0x938   : > { %10317 = vrot.lane.b32.xlu1 %v10121_v4, %s13292_s16  ;;  %v10171_v50 = vsel %vm17771_vm13, %v10169_v34, %v10170_v11  ;;  %v10033_v49 = vrot.slane %v10024_v32, %v14900_v2  ;;  %v10040_v14 = vrot.slane %v10025_v39, %v14900_v2  ;;  %10249 = vst.msk [vmem:[#allocation5 + $0x50] sm:$0x7f] %vm2642_vm5, %v16997_v24  ;;  %v10097_v11 = vld [vmem:[#allocation4 + $0x58] sm:$0x1]  ;;  %v10179_v48 = vrot.slane %v10099_v40, 2  ;;  %v10401_v32 = vld [vmem:[%s17503_s9 + $0x98] sm:$0xff] }
 0x939   : > { %v10022_v56 = vrot.slane %v10008_v1, %v14900_v2  ;;  %v9588_v54 = vrot.slane %v9581_v31, %v14900_v2  ;;  %10355 = vst.msk [vmem:[#allocation5 + $0x28] sm:$0x7f] %vm2642_vm5, %v10171_v50  ;;  %v17024_v47 = vsel %vm17772_vm14, %v10172_v12, %v10173_v35  ;;  %12961 = vmatprep.subr.mxu0 %v10406_v61  ;;  %v10176_v37 = vrot.slane %v10097_v11, 2  ;;  %v10415_v9 = vld [vmem:[%s17503_s9 + $0x108] sm:$0xff]  ;;  %v10385_v3 = vld [vmem:[%s17503_s9 + $0x18] sm:$0xff]  ;;  %v10400_v39 = vld [vmem:[%s17503_s9 + $0x90] sm:$0xff] }
 0x93a   : > { %v10047_v21 = vrot.slane %v10026_v43, %v14900_v2  ;;  %10356 = vst.msk [vmem:[#allocation5 + $0x40] sm:$0x7f] %vm2642_vm5, %v17024_v47  ;;  %12962 = vmatpush3.msra.mxu0 %v10390_v5  ;;  %v10055_v22 = vcombine.low %v10033_v49, %v10040_v14  ;;  %13158 = vmatprep.subr.mxu1 %v13282_v0  ;;  %v10414_v10 = vld [vmem:[%s17503_s9 + $0x100] sm:$0xff]  ;;  %v10101_v4 = vld [vmem:[#allocation4 + $0x78] sm:$0x1]  ;;  %v10384_v34 = vld [vmem:[%s17503_s9 + $0x10] sm:$0xff]  ;;  %v17145_v5 = vpop.permute.xlu1 %10298 }
 0x93b   : > { %v10023_v52 = vcombine.low %v10015_v18, %v10022_v56  ;;  %v9686_v58 = vmax.f32 %v9588_v54, 0.0  ;;  %10216 = vrot.lane.b32.xlu0 %v16970_v27, %s13292_s16  ;;  %12963 = vmatprep.subr.mxu0 %v10405_v33  ;;  %v10399_v35 = vld [vmem:[%s17503_s9 + $0x88] sm:$0xff]  ;;  %v10255_v1 = vrot.slane %v10101_v4, 2  ;;  %v10382_v18 = vld [vmem:[%s17503_s9] sm:$0xff]  ;;  %v10314_v12 = vrot.slane %v16745_v41, 1 }
 0x93c   : > { %10290 = vrot.lane.b32.xlu1 %v16970_v27, %s13291_s22  ;;  %12964 = vmatpush3.msra.mxu0 %v10389_v62  ;;  %v10063_v53 = vrot.slane %v10055_v22, %v14900_v2  ;;  %v10383_v43 = vld [vmem:[%s17503_s9 + $0x8] sm:$0xff]  ;;  %v10363_v22 = vld [vmem:[#allocation5 + $0x10] sm:$0x7f] }
 0x93d   : > { %10084 = vst.msk [vmem:[#allocation4 + $0x61] sm:$0x7f] %vm2642_vm5, %v10023_v52  ;;  %v10054_v23 = vrot.slane %v9686_v58, %v14900_v2  ;;  %v10096_v28 = vld [vmem:[#allocation4 + $0x50] sm:$0xff]  ;;  %12965 = vmatprep.subr.mxu0 %v10404_v42  ;;  %13159 = vmatpush3.msra.mxu1 %v10416_v44 }
 0x93e   : > { %10109 = vst.msk [vmem:[#allocation5 + $0x78] sm:$0x7f] %vm2642_vm5, %v10096_v28  ;;  %v17048_v59 = vrot.slane %v10096_v28, 1  ;;  %v10175_v27 = vrot.slane %v10096_v28, 2  ;;  %12966 = vmatpush3.msra.mxu0 %v10388_v25  ;;  %13160 = vmatprep.subr.mxu1 %v13282_v0 }
 0x93f   : > { %v10056_v20 = vcombine.low %v10047_v21, %v10054_v23  ;;  %10187 = vrot.lane.b32.xlu0 %v10171_v50, %s13291_s22  ;;  %12967 = vmatprep.subr.mxu0 %v10403_v6 }
 0x940   : > { %10261 = vrot.lane.b32.xlu1 %v10171_v50, %s13290_s30  ;;  %10250 = vst.msk [vmem:[#allocation5 + $0x68] sm:$0x7f] %vm2642_vm5, %v17048_v59  ;;  %v10177_v26 = vsel %vm17773_vm0, %v10175_v27, %v10176_v37  ;;  %12968 = vmatpush3.msra.mxu0 %v10387_v45 }
 0x941   : > { %v10070_v36 = vrot.slane %v10056_v20, %v14900_v2  ;;  %10357 = vst.msk [vmem:[#allocation5 + $0x58] sm:$0x7f] %vm2642_vm5, %v10177_v26  ;;  %12969 = vmatprep.subr.mxu0 %v10402_v17  ;;  %13161 = vmatpush3.msra.mxu1 %v10415_v9 }
 0x942   : > { %12970 = vmatpush3.msra.mxu0 %v10386_v57  ;;  %13162 = vmatprep.subr.mxu1 %v13282_v0 }
 0x943   : > { %v10071_v8 = vcombine.low %v10063_v53, %v10070_v36  ;;  %10133 = vrot.lane.b32.xlu0 %v16997_v24, %s13290_s30  ;;  %12971 = vmatprep.subr.mxu0 %v10401_v32  ;;  %v10366_v53 = vld [vmem:[#allocation5 + $0x28] sm:$0x7f] }
 0x944   : > { %10319 = vrot.lane.b32.xlu1 %v16997_v24, %s13292_s16  ;;  %v10098_v38 = vld [vmem:[#allocation4 + $0x60] sm:$0xff]  ;;  %12972 = vmatpush3.msra.mxu0 %v10385_v3  ;;  %v10398_v24 = vld [vmem:[%s17503_s9 + $0x80] sm:$0xff]  ;;  %v10513_v57 = vcombine.high %v10366_v53, %v10366_v53 }
 0x945   : > { %10085 = vst.msk [vmem:[#allocation4 + $0x71] sm:$0x7f] %vm2642_vm5, %v10071_v8  ;;  %10110 = vst.msk [vmem:[#allocation5 + $0x90] sm:$0x7f] %vm2642_vm5, %v10098_v38  ;;  %v10124_v16 = vrot.slane %v10098_v38, 1  ;;  %v10178_v19 = vrot.slane %v10098_v38, 2  ;;  %12973 = vmatprep.subr.mxu0 %v10400_v39  ;;  %13163 = vmatpush3.msra.mxu1 %v10414_v10 }
 0x946   : > { %12974 = vmatpush3.msra.mxu0 %v10384_v34  ;;  %v10534_v34 = vrot.slane %v10366_v53, %v14900_v2 }
 0x947   : > { %10251 = vst.msk [vmem:[#allocation5 + $0x80] sm:$0x7f] %vm2642_vm5, %v10124_v16  ;;  %v10180_v63 = vsel %vm17774_vm2, %v10178_v19, %v10179_v48  ;;  %10263 = vrot.lane.b32.xlu0 %v17024_v47, %s13290_s30  ;;  %12975 = vmatprep.subr.mxu0 %v10399_v35 }
 0x948   : > { %10292 = vrot.lane.b32.xlu1 %v10096_v28, %s13291_s22  ;;  %10358 = vst.msk [vmem:[#allocation5 + $0x70] sm:$0x7f] %vm2642_vm5, %v10180_v63  ;;  %12976 = vmatpush3.msra.mxu0 %v10383_v43 }
 0x949   : > { %12977 = vmatprep.subr.mxu0 %v10398_v24 }
 0x94a   : > { %12978 = vmatpush3.msra.mxu0 %v10382_v18 }
 0x94b   : > { %10189 = vrot.lane.b32.xlu0 %v17024_v47, %s13291_s22 }
 0x94c   : > { %10218 = vrot.lane.b32.xlu1 %v10096_v28, %s13292_s16  ;;  %v10100_v31 = vld [vmem:[#allocation4 + $0x70] sm:$0xff]  ;;  %v10468_v28 = vrot.slane %v10363_v22, %v14900_v2 }
 0x94d   : > { %v10254_v51 = vrot.slane %v10100_v31, 2  ;;  %v10238_v61 = vrot.slane %v10100_v31, 1 }
 0x94f   : > { %10252 = vst.msk [vmem:[#allocation5 + $0x98] sm:$0x7f] %vm2642_vm5, %v10238_v61  ;;  %v10256_v50 = vsel %vm17775_vm15, %v10254_v51, %v10255_v1  ;;  %10135 = vrot.lane.b32.xlu0 %v17048_v59, %s13290_s30  ;;  %v10541_v1 = vrot.slane %v10513_v57, %v14900_v2 }
 0x950   : > { %10321 = vrot.lane.b32.xlu1 %v17048_v59, %s13292_s16  ;;  %10359 = vst.msk [vmem:[#allocation5 + $0x88] sm:$0x7f] %vm2642_vm5, %v10256_v50  ;;  %v10447_v59 = vcombine.high %v10363_v22, %v10363_v22 }
 0x952   : > { %v10475_v36 = vrot.slane %v10447_v59, %v14900_v2 }
 0x953   : > { %10191 = vrot.lane.b32.xlu0 %v10177_v26, %s13291_s22 }
 0x954   : > { %10265 = vrot.lane.b32.xlu1 %v10177_v26, %s13290_s30 }
 0x957   : > { %10220 = vrot.lane.b32.xlu0 %v10098_v38, %s13292_s16 }
 0x958   : > { %10294 = vrot.lane.b32.xlu1 %v10098_v38, %s13291_s22 }
 0x95b   : > { %10137 = vrot.lane.b32.xlu0 %v10124_v16, %s13290_s30 }
 0x95c   : > { %10323 = vrot.lane.b32.xlu1 %v10124_v16, %s13292_s16 }
 0x95f   : > { %10267 = vrot.lane.b32.xlu0 %v10180_v63, %s13290_s30 }
 0x960   : > { %10296 = vrot.lane.b32.xlu1 %v10100_v31, %s13291_s22 }
 0x963   : > { %10193 = vrot.lane.b32.xlu0 %v10180_v63, %s13291_s22 }
 0x964   : > { %10325 = vrot.lane.b32.xlu1 %v10238_v61, %s13292_s16 }
 0x967   : > { %10222 = vrot.lane.b32.xlu0 %v10100_v31, %s13292_s16 }
 0x968   : > { %10269 = vrot.lane.b32.xlu1 %v10256_v50, %s13290_s30 }
 0x96c   : > { %10327 = vrot.lane.b32.xlu1 %v10314_v12, %s13292_s16  ;;  %s13185_s16 = smul.u32 56, %s17783_s18 }
 0x96e   : > { %s17393_s24 = scalar_lea.vmem %s17505_s11, %s13185_s16 }
 0x980   : > { %v10211_v56 = vpop.permute.xlu1 %10210 }
 0x981   : > { %10231 = vst.msk [vmem:[#allocation5] sm:$0x7f] %vm2797_vm3, %v10211_v56 }
 0x983   : > { %v10128_v49 = vpop.permute.xlu0 %10127 }
 0x984   : > { %10147 = vst.msk [vmem:[#allocation5 + $0x18] sm:$0x7f] %vm2710_vm4, %v10128_v49  ;;  %v10258_v14 = vpop.permute.xlu1 %10257 }
 0x985   : > { %10278 = vst.msk [vmem:[#allocation5 + $0x8] sm:$0x7f] %vm2710_vm4, %v10258_v14 }
 0x987   : > { %v10184_v54 = vpop.permute.xlu0 %10183 }
 0x988   : > { %10203 = vst.msk [vmem:[#allocation5 + $0x18] sm:$0x7f] %vm2767_vm7, %v10184_v54 }
 0x98d   : > { %v10213_v41 = vpop.permute.xlu0 %10212 }
 0x98e   : > { %10232 = vst.msk [vmem:[#allocation5 + $0x18] sm:$0x7f] %vm2797_vm3, %v10213_v41  ;;  %v10287_v47 = vpop.permute.xlu1 %10286 }
 0x98f   : > { %10307 = vst.msk [vmem:[#allocation5 + $0x8] sm:$0x7f] %vm2767_vm7, %v10287_v47 }
 0x991   : > { %v10130_v11 = vpop.permute.xlu0 %10129 }
 0x992   : > { %v10316_v33 = vpop.permute.xlu1 %10315  ;;  %10148 = vst.msk [vmem:[#allocation5 + $0x30] sm:$0x7f] %vm2710_vm4, %v10130_v11 }
 0x993   : > { %10336 = vst.msk [vmem:[#allocation5 + $0x8] sm:$0x7f] %vm2797_vm3, %v10316_v33  ;;  %v10369_v33 = vld [vmem:[#allocation5 + $0x40] sm:$0x7f] }
 0x995   : > { %v10364_v32 = vld [vmem:[#allocation5 + $0x18] sm:$0x7f] }
 0x998   : > { %v10260_v52 = vpop.permute.xlu0 %10259 }
 0x999   : > { %10279 = vst.msk [vmem:[#allocation5 + $0x20] sm:$0x7f] %vm2710_vm4, %v10260_v52 }
 0x99a   : > { %v10289_v58 = vpop.permute.xlu1 %10288  ;;  %v13237_v42 = vld [vmem:[#allocation5] ss:$8 sps:$4 sm:$0xff]   ;;  %v13239_v37 = vld [vmem:[#allocation5 + $0x4] ss:$8 sps:$4 sm:$0x77]  }
 0x99b   : > { %10308 = vst.msk [vmem:[#allocation5 + $0x20] sm:$0x7f] %vm2767_vm7, %v10289_v58  ;;  %v10454_v23 = vrot.slane %v13237_v42, %v14900_v2  ;;  %v10461_v40 = vrot.slane %v13239_v37, %v14900_v2  ;;  %v10600_v37 = vrot.slane %v10369_v33, %v14900_v2 }
 0x99c   : > { %v10186_v21 = vpop.permute.xlu0 %10185 }
 0x99d   : > { %10204 = vst.msk [vmem:[#allocation5 + $0x30] sm:$0x7f] %vm2767_vm7, %v10186_v21  ;;  %v10476_v27 = vcombine.low %v10454_v23, %v10468_v28  ;;  %v10477_v6 = vcombine.high %v10454_v23, %v10468_v28  ;;  %v10478_v8 = vcombine.low %v10461_v40, %v10475_v36  ;;  %v10479_v48 = vcombine.high %v10461_v40, %v10475_v36 }
 0x99e   : > { %v10215_v62 = vpop.permute.xlu1 %10214 }
 0x99f   : > { %10233 = vst.msk [vmem:[#allocation5 + $0x30] sm:$0x7f] %vm2797_vm3, %v10215_v62  ;;  %v10486_v26 = vrot.slane %v10476_v27, %v14900_v2  ;;  %v10500_v17 = vrot.slane %v10477_v6, %v14900_v2  ;;  %v10493_v39 = vrot.slane %v10478_v8, %v14900_v2  ;;  %v10507_v10 = vrot.slane %v10479_v48, %v14900_v2 }
 0x9a1   : > { %v10955_v9 = vcombine.low %v10486_v26, %v10500_v17  ;;  %v12703_v3 = vcombine.high %v10486_v26, %v10500_v17  ;;  %v10509_v12 = vcombine.high %v10493_v39, %v10493_v39  ;;  %v10957_v49 = vcombine.low %v10493_v39, %v10507_v10 }
 0x9a3   : > { %v10965_v51 = vrot.slane %v10955_v9, %v14900_v2  ;;  %v10972_v61 = vrot.slane %v12703_v3, %v14900_v2  ;;  %v10979_v62 = vrot.slane %v10957_v49, %v14900_v2 }
 0x9a5   : > { %v10987_v11 = vcombine.low %v10965_v51, %v10972_v61  ;;  %v10988_v52 = vcombine.high %v10965_v51, %v10972_v61 }
 0x9a6   : > { %v10367_v6 = vld [vmem:[#allocation5 + $0x30] sm:$0x7f] }
 0x9a7   : > { %v10997_v27 = vrot.slane %v10987_v11, %v14900_v2  ;;  %v11004_v53 = vrot.slane %v10988_v52, %v14900_v2 }
 0x9a9   : > { %v10132_v25 = vpop.permute.xlu0 %10131 }
 0x9aa   : > { %v10318_v20 = vpop.permute.xlu1 %10317  ;;  %10149 = vst.msk [vmem:[#allocation5 + $0x48] sm:$0x7f] %vm2710_vm4, %v10132_v25 }
 0x9ab   : > { %10337 = vst.msk [vmem:[#allocation5 + $0x20] sm:$0x7f] %vm2797_vm3, %v10318_v20 }
 0x9ad   : > { %v10217_v45 = vpop.permute.xlu0 %10216 }
 0x9ae   : > { %v10291_v29 = vpop.permute.xlu1 %10290 }
 0x9b1   : > { %v10188_v44 = vpop.permute.xlu0 %10187 }
 0x9b2   : > { %v10262_v38 = vpop.permute.xlu1 %10261  ;;  %v10365_v16 = vld [vmem:[#allocation5 + $0x20] sm:$0x7f]  ;;  %10205 = vst.msk [vmem:[#allocation5 + $0x48] sm:$0x7f] %vm2767_vm7, %v10188_v44 }
 0x9b3   : > { %v13241_v19 = vld [vmem:[#allocation5 + $0x18] ss:$8 sps:$4 sm:$0xff]   ;;  %10280 = vst.msk [vmem:[#allocation5 + $0x38] sm:$0x7f] %vm2710_vm4, %v10262_v38  ;;  %v10512_v63 = vcombine.high %v10364_v32, %v10365_v16 }
 0x9b4   : > { %10234 = vst.msk [vmem:[#allocation5 + $0x48] sm:$0x7f] %vm2797_vm3, %v10217_v45  ;;  %v10520_v4 = vrot.slane %v13241_v19, %v14900_v2 }
 0x9b5   : > { %10309 = vst.msk [vmem:[#allocation5 + $0x38] sm:$0x7f] %vm2767_vm7, %v10291_v29  ;;  %v10527_v35 = vrot.slane %v10512_v63, %v14900_v2  ;;  %v10134_v43 = vpop.permute.xlu0 %10133  ;;  %v10579_v29 = vcombine.high %v10369_v33, %v10369_v33 }
 0x9b6   : > { %v10320_v31 = vpop.permute.xlu1 %10319  ;;  %v10542_v24 = vcombine.low %v10520_v4, %v10534_v34  ;;  %v10543_v18 = vcombine.high %v10520_v4, %v10534_v34  ;;  %10150 = vst.msk [vmem:[#allocation5 + $0x60] sm:$0x7f] %vm2710_vm4, %v10134_v43 }
 0x9b7   : > { %10338 = vst.msk [vmem:[#allocation5 + $0x38] sm:$0x7f] %vm2797_vm3, %v10320_v31  ;;  %v10544_v50 = vcombine.low %v10527_v35, %v10541_v1  ;;  %v10545_v23 = vcombine.high %v10527_v35, %v10541_v1  ;;  %v10607_v34 = vrot.slane %v10579_v29, %v14900_v2  ;;  %v10372_v31 = vld [vmem:[#allocation5 + $0x58] sm:$0x7f] }
 0x9b8   : > { %v10552_v56 = vrot.slane %v10542_v24, %v14900_v2  ;;  %v10566_v14 = vrot.slane %v10543_v18, %v14900_v2 }
 0x9b9   : > { %v10264_v54 = vpop.permute.xlu0 %10263  ;;  %v10559_v58 = vrot.slane %v10544_v50, %v14900_v2  ;;  %v10573_v38 = vrot.slane %v10545_v23, %v14900_v2 }
 0x9ba   : > { %v10293_v41 = vpop.permute.xlu1 %10292  ;;  %v10958_v47 = vcombine.low %v10509_v12, %v10552_v56  ;;  %10281 = vst.msk [vmem:[#allocation5 + $0x50] sm:$0x7f] %vm2710_vm4, %v10264_v54  ;;  %v10574_v21 = vcombine.high %v10552_v56, %v10552_v56  ;;  %v10576_v22 = vcombine.high %v10566_v14, %v10566_v14  ;;  %v10645_v56 = vcombine.high %v10372_v31, %v10372_v31 }
 0x9bb   : > { %10310 = vst.msk [vmem:[#allocation5 + $0x50] sm:$0x7f] %vm2767_vm7, %v10293_v41  ;;  %v10575_v36 = vcombine.high %v10559_v58, %v10559_v58 }
 0x9bc   : > { %v10986_v42 = vrot.slane %v10958_v47, %v14900_v2  ;;  %v11022_v26 = vcombine.low %v10566_v14, %v10574_v21  ;;  %v11023_v44 = vcombine.low %v10576_v22, %v10559_v58  ;;  %v10673_v23 = vrot.slane %v10645_v56, %v14900_v2 }
 0x9bd   : > { %v10190_v28 = vpop.permute.xlu0 %10189  ;;  %v11024_v4 = vcombine.low %v10573_v38, %v10575_v36 }
 0x9be   : > { %v10219_v25 = vpop.permute.xlu1 %10218  ;;  %v10989_v20 = vcombine.low %v10979_v62, %v10986_v42  ;;  %v10990_v59 = vcombine.high %v10979_v62, %v10986_v42  ;;  %v10368_v40 = vld [vmem:[#allocation5 + $0x38] sm:$0x7f]  ;;  %10206 = vst.msk [vmem:[#allocation5 + $0x60] sm:$0x7f] %vm2767_vm7, %v10190_v28  ;;  %v11032_v1 = vrot.slane %v11022_v26, %v14900_v2  ;;  %v11039_v43 = vrot.slane %v11023_v44, %v14900_v2 }
 0x9bf   : > { %v13243_v45 = vld [vmem:[#allocation5 + $0x30] ss:$8 sps:$4 sm:$0xff]   ;;  %v10578_v17 = vcombine.high %v10367_v6, %v10368_v40  ;;  %10235 = vst.msk [vmem:[#allocation5 + $0x60] sm:$0x7f] %vm2797_vm3, %v10219_v25  ;;  %v11046_v54 = vrot.slane %v11024_v4, %v14900_v2  ;;  %v10666_v42 = vrot.slane %v10372_v31, %v14900_v2 }
 0x9c0   : > { %v11011_v8 = vrot.slane %v10989_v20, %v14900_v2  ;;  %v11018_v48 = vrot.slane %v10990_v59, %v14900_v2  ;;  %v10586_v57 = vrot.slane %v13243_v45, %v14900_v2  ;;  %v11055_v49 = vcombine.high %v11032_v1, %v11039_v43 }
 0x9c1   : > { %v10593_v32 = vrot.slane %v10578_v17, %v14900_v2  ;;  %v10136_v16 = vpop.permute.xlu0 %10135  ;;  %v11054_v14 = vcombine.low %v11032_v1, %v11039_v43 }
 0x9c2   : > { %v10322_v19 = vpop.permute.xlu1 %10321  ;;  %v11020_v9 = vcombine.high %v10997_v27, %v11011_v8  ;;  %v11021_v3 = vcombine.low %v11004_v53, %v11018_v48  ;;  %v11019_v63 = vcombine.low %v10997_v27, %v11011_v8  ;;  %v10608_v39 = vcombine.low %v10586_v57, %v10600_v37  ;;  %10151 = vst.msk [vmem:[#allocation5 + $0x78] sm:$0x7f] %vm2710_vm4, %v10136_v16 }
 0x9c3   : > { %10339 = vst.msk [vmem:[#allocation5 + $0x50] sm:$0x7f] %vm2797_vm3, %v10322_v19  ;;  %v10609_v10 = vcombine.high %v10586_v57, %v10600_v37  ;;  %v10610_v51 = vcombine.low %v10593_v32, %v10607_v34  ;;  %v10611_v61 = vcombine.high %v10593_v32, %v10607_v34  ;;  %v11071_v37 = vrot.slane %v11055_v49, %v14900_v2  ;;  %v10375_v19 = vld [vmem:[#allocation5 + $0x70] sm:$0x7f]  ;;  %v10378_v49 = vld [vmem:[#allocation5 + $0x88] sm:$0x7f] }
 0x9c4   : > { %11611 = vmatprep.mubr.f32.mxu0 %v11021_v3  ;;  %13165 = vmatmul.mubr.msk.f32.vlgmr.msra.gmra.mxu1 %vm17776_vm8, %v11020_v9  ;;  %v10618_v35 = vrot.slane %v10608_v39, %v14900_v2  ;;  %v11064_v28 = vrot.slane %v11054_v14, %v14900_v2  ;;  %v10711_v43 = vcombine.high %v10375_v19, %v10375_v19 }
 0x9c5   : > { %11612 = vmatmul.mubr.f32.vlgmr.msra.gmra.mxu0 %v11019_v63  ;;  %13167 = vmatprep.mubr.msk.f32.mxu1 %vm13294_vm10, %v13282_v0  ;;  %v10632_v24 = vrot.slane %v10609_v10, %v14900_v2  ;;  %v10192_v18 = vpop.permute.xlu0 %10191  ;;  %v10625_v47 = vrot.slane %v10610_v51, %v14900_v2  ;;  %v10639_v11 = vrot.slane %v10611_v61, %v14900_v2 }
 0x9c6   : > { %v10266_v50 = vpop.permute.xlu1 %10265  ;;  %10207 = vst.msk [vmem:[#allocation5 + $0x78] sm:$0x7f] %vm2767_vm7, %v10192_v18  ;;  %v10732_v14 = vrot.slane %v10375_v19, %v14900_v2 }
 0x9c7   : > { %10282 = vst.msk [vmem:[#allocation5 + $0x68] sm:$0x7f] %vm2710_vm4, %v10266_v50  ;;  %v11025_v12 = vcombine.low %v10618_v35, %v10632_v24  ;;  %v12704_v20 = vcombine.high %v10618_v35, %v10632_v24  ;;  %v11090_v6 = vcombine.low %v10625_v47, %v10639_v11  ;;  %v10641_v57 = vcombine.high %v10625_v47, %v10625_v47 }
 0x9c9   : > { %v11053_v41 = vrot.slane %v11025_v12, %v14900_v2  ;;  %v10221_v33 = vpop.permute.xlu0 %10220  ;;  %v11099_v32 = vrot.slane %v12704_v20, %v14900_v2  ;;  %v11106_v16 = vrot.slane %v11090_v6, %v14900_v2 }
 0x9ca   : > { %v10295_v52 = vpop.permute.xlu1 %10294  ;;  %v13245_v58 = vld [vmem:[#allocation5 + $0x48] ss:$8 sps:$4 sm:$0xff]   ;;  %10236 = vst.msk [vmem:[#allocation5 + $0x78] sm:$0x7f] %vm2797_vm3, %v10221_v33 }
 0x9cb   : > { %10311 = vst.msk [vmem:[#allocation5 + $0x68] sm:$0x7f] %vm2767_vm7, %v10295_v52  ;;  %v11057_v21 = vcombine.high %v11046_v54, %v11053_v41  ;;  %v11056_v62 = vcombine.low %v11046_v54, %v11053_v41  ;;  %v13247_v22 = vld [vmem:[#allocation5 + $0x4c] ss:$8 sps:$4 sm:$0x77]   ;;  %v10652_v25 = vrot.slane %v13245_v58, %v14900_v2  ;;  %v11122_v31 = vcombine.high %v11099_v32, %v11106_v16 }
 0x9cc   : > { %v10659_v40 = vrot.slane %v13247_v22, %v14900_v2  ;;  %v11121_v24 = vcombine.low %v11099_v32, %v11106_v16  ;;  %v10739_v58 = vrot.slane %v10711_v43, %v14900_v2  ;;  %v10777_v22 = vcombine.high %v10378_v49, %v10378_v49 }
 0x9cd   : > { %v11085_v59 = vrot.slane %v11057_v21, %v14900_v2  ;;  %v11078_v27 = vrot.slane %v11056_v62, %v14900_v2  ;;  %v10138_v45 = vpop.permute.xlu0 %10137  ;;  %v10674_v53 = vcombine.low %v10652_v25, %v10666_v42  ;;  %v10675_v36 = vcombine.high %v10652_v25, %v10666_v42 }
 0x9ce   : > { %v10324_v29 = vpop.permute.xlu1 %10323  ;;  %10152 = vst.msk [vmem:[#allocation5 + $0x90] sm:$0x7f] %vm2710_vm4, %v10138_v45  ;;  %v10676_v48 = vcombine.low %v10659_v40, %v10673_v23  ;;  %v10677_v9 = vcombine.high %v10659_v40, %v10673_v23  ;;  %v11138_v21 = vrot.slane %v11122_v31, %v14900_v2  ;;  %v11131_v62 = vrot.slane %v11121_v24, %v14900_v2 }
 0x9cf   : > { %10340 = vst.msk [vmem:[#allocation5 + $0x68] sm:$0x7f] %vm2797_vm3, %v10324_v29  ;;  %v11088_v26 = vcombine.low %v11071_v37, %v11085_v59  ;;  %v11087_v17 = vcombine.high %v11064_v28, %v11078_v27  ;;  %v11086_v8 = vcombine.low %v11064_v28, %v11078_v27  ;;  %v10684_v44 = vrot.slane %v10674_v53, %v14900_v2  ;;  %v10381_v29 = vld [vmem:[#allocation5 + $0xa0] sm:$0x7f] }
 0x9d0   : > { %v10698_v38 = vrot.slane %v10675_v36, %v14900_v2  ;;  %v10691_v3 = vrot.slane %v10676_v48, %v14900_v2  ;;  %v10705_v51 = vrot.slane %v10677_v9, %v14900_v2  ;;  %v10843_v32 = vcombine.high %v10381_v29, %v10381_v29 }
 0x9d1   : > { %11616 = vmatprep.mubr.f32.mxu0 %v11088_v26  ;;  %13168 = vmatmul.mubr.msk.f32.gmra.mxu1 %vm17767_vm6, %v11087_v17  ;;  %v10268_v63 = vpop.permute.xlu0 %10267  ;;  %v10706_v10 = vcombine.high %v10684_v44, %v10684_v44  ;;  %v11091_v4 = vcombine.low %v10641_v57, %v10684_v44 }
 0x9d2   : > { %11617 = vmatmul.mubr.f32.gmra.mxu0 %v11086_v8  ;;  %v10297_v39 = vpop.permute.xlu1 %10296  ;;  %13170 = vmatprep.mubr.msk.f32.mxu1 %vm13294_vm10, %v13282_v0  ;;  %10283 = vst.msk [vmem:[#allocation5 + $0x80] sm:$0x7f] %vm2710_vm4, %v10268_v63  ;;  %v10707_v34 = vcombine.high %v10691_v3, %v10691_v3  ;;  %v10708_v35 = vcombine.high %v10698_v38, %v10698_v38 }
 0x9d3   : > { %10312 = vst.msk [vmem:[#allocation5 + $0x80] sm:$0x7f] %vm2767_vm7, %v10297_v39  ;;  %v11092_v1 = vcombine.low %v10698_v38, %v10706_v10  ;;  %v11113_v50 = vrot.slane %v11091_v4, %v14900_v2  ;;  %v10798_v39 = vrot.slane %v10378_v49, %v14900_v2  ;;  %v10805_v10 = vrot.slane %v10777_v22, %v14900_v2 }
 0x9d4   : > { %v11156_v54 = vcombine.low %v10708_v35, %v10691_v3  ;;  %v11157_v41 = vcombine.low %v10705_v51, %v10707_v34  ;;  %v10871_v51 = vrot.slane %v10843_v32, %v14900_v2 }
 0x9d5   : > { %v10194_v61 = vpop.permute.xlu0 %10193  ;;  %v11120_v12 = vrot.slane %v11092_v1, %v14900_v2  ;;  %v10864_v1 = vrot.slane %v10381_v29, %v14900_v2 }
 0x9d6   : > { %v10326_v18 = vpop.permute.xlu1 %10325  ;;  %v13249_v56 = vld [vmem:[#allocation5 + $0x60] ss:$8 sps:$4 sm:$0xff]   ;;  %10208 = vst.msk [vmem:[#allocation5 + $0x90] sm:$0x7f] %vm2767_vm7, %v10194_v61  ;;  %v11166_v27 = vrot.slane %v11156_v54, %v14900_v2  ;;  %v11173_v6 = vrot.slane %v11157_v41, %v14900_v2 }
 0x9d7   : > { %10341 = vst.msk [vmem:[#allocation5 + $0x80] sm:$0x7f] %vm2797_vm3, %v10326_v18  ;;  %v13251_v47 = vld [vmem:[#allocation5 + $0x64] ss:$8 sps:$4 sm:$0x77]   ;;  %v11124_v11 = vcombine.high %v11113_v50, %v11120_v12  ;;  %v11123_v33 = vcombine.low %v11113_v50, %v11120_v12  ;;  %v10718_v52 = vrot.slane %v13249_v56, %v14900_v2 }
 0x9d8   : > { %v10725_v42 = vrot.slane %v13251_v47, %v14900_v2  ;;  %v11189_v19 = vcombine.high %v11166_v27, %v11173_v6  ;;  %v11188_v3 = vcombine.low %v11166_v27, %v11173_v6 }
 0x9d9   : > { %v10223_v23 = vpop.permute.xlu0 %10222  ;;  %v11152_v28 = vrot.slane %v11124_v11, %v14900_v2  ;;  %v11145_v25 = vrot.slane %v11123_v33, %v14900_v2  ;;  %v10740_v20 = vcombine.low %v10718_v52, %v10732_v14  ;;  %v10741_v59 = vcombine.high %v10718_v52, %v10732_v14 }
 0x9da   : > { %v10270_v37 = vpop.permute.xlu1 %10269  ;;  %10237 = vst.msk [vmem:[#allocation5 + $0x90] sm:$0x7f] %vm2797_vm3, %v10223_v23  ;;  %v10742_v40 = vcombine.low %v10725_v42, %v10739_v58  ;;  %v10743_v45 = vcombine.high %v10725_v42, %v10739_v58  ;;  %v11205_v18 = vrot.slane %v11189_v19, %v14900_v2  ;;  %v11198_v56 = vrot.slane %v11188_v3, %v14900_v2 }
 0x9db   : > { %10284 = vst.msk [vmem:[#allocation5 + $0x98] sm:$0x7f] %vm2710_vm4, %v10270_v37  ;;  %v11155_v53 = vcombine.low %v11138_v21, %v11152_v28  ;;  %v11154_v36 = vcombine.high %v11131_v62, %v11145_v25  ;;  %v11153_v26 = vcombine.low %v11131_v62, %v11145_v25  ;;  %v10750_v17 = vrot.slane %v10740_v20, %v14900_v2  ;;  %vm17777_vm4 = vmmov %vm17767_vm6 }
 0x9dc   : > { %10313 = vst.msk [vmem:[#allocation5 + $0x98] sm:$0x7f] %vm2767_vm7, %v17145_v5  ;;  %v10764_v8 = vrot.slane %v10741_v59, %v14900_v2  ;;  %v10757_v57 = vrot.slane %v10742_v40, %v14900_v2  ;;  %v10771_v44 = vrot.slane %v10743_v45, %v14900_v2  ;;  %vm17778_vm7 = vmmov %vm17777_vm4 }
 0x9dd   : > { %11621 = vmatprep.mubr.f32.mxu0 %v11155_v53  ;;  %13171 = vmatmul.mubr.msk.f32.gmra.mxu1 %vm17777_vm4, %v11154_v36 }
 0x9de   : > { %v10328_v48 = vpop.permute.xlu1 %10327  ;;  %v13253_v38 = vld [vmem:[#allocation5 + $0x78] ss:$8 sps:$4 sm:$0xff]   ;;  %11622 = vmatmul.mubr.f32.gmra.mxu0 %v11153_v26  ;;  %13173 = vmatprep.mubr.msk.f32.mxu1 %vm13294_vm10, %v13282_v0  ;;  %v11158_v5 = vcombine.low %v10750_v17, %v10764_v8  ;;  %v12705_v16 = vcombine.high %v10750_v17, %v10764_v8  ;;  %v13255_v9 = vld [vmem:[#allocation5 + $0x7c] ss:$8 sps:$4 sm:$0x77]   ;;  %v11223_v24 = vcombine.low %v10757_v57, %v10771_v44 }
 0x9df   : > { %10342 = vst.msk [vmem:[#allocation5 + $0x98] sm:$0x7f] %vm2797_vm3, %v10328_v48  ;;  %v10784_v63 = vrot.slane %v13253_v38, %v14900_v2  ;;  %v10791_v35 = vrot.slane %v13255_v9, %v14900_v2  ;;  %v10773_v49 = vcombine.high %v10757_v57, %v10757_v57  ;;  %vm17779_vm3 = vmmov %vm17777_vm4 }
 0x9e0   : > { %v11180_v4 = vrot.slane %v11158_v5, %v14900_v2  ;;  %v11187_v34 = vrot.slane %v12705_v16, %v14900_v2  ;;  %v11233_v62 = vrot.slane %v11223_v24, %v14900_v2  ;;  %vm17780_vm11 = vmmov %vm17779_vm3 }
 0x9e1   : > { %v10806_v43 = vcombine.low %v10784_v63, %v10798_v39  ;;  %v10807_v31 = vcombine.high %v10784_v63, %v10798_v39  ;;  %v10808_v12 = vcombine.low %v10791_v35, %v10805_v10  ;;  %v10809_v33 = vcombine.high %v10791_v35, %v10805_v10  ;;  %vm17781_vm9 = vmmov %vm17779_vm3 }
 0x9e2   : > { %v11191_v61 = vcombine.high %v11180_v4, %v11187_v34  ;;  %v11190_v50 = vcombine.low %v11180_v4, %v11187_v34 }
 0x9e3   : > { %v10816_v14 = vrot.slane %v10806_v43, %v14900_v2  ;;  %v10830_v54 = vrot.slane %v10807_v31, %v14900_v2  ;;  %v10823_v11 = vrot.slane %v10808_v12, %v14900_v2  ;;  %v10837_v40 = vrot.slane %v10809_v33, %v14900_v2 }
 0x9e4   : > { %v11219_v41 = vrot.slane %v11191_v61, %v14900_v2  ;;  %v11212_v47 = vrot.slane %v11190_v50, %v14900_v2 }
 0x9e5   : > { %v10838_v52 = vcombine.high %v10816_v14, %v10816_v14  ;;  %v10840_v58 = vcombine.high %v10830_v54, %v10830_v54  ;;  %v11224_v21 = vcombine.low %v10773_v49, %v10816_v14  ;;  %v10839_v28 = vcombine.high %v10823_v11, %v10823_v11 }
 0x9e6   : > { %v13257_v42 = vld [vmem:[#allocation5 + $0x90] ss:$8 sps:$4 sm:$0xff]   ;;  %v11222_v22 = vcombine.low %v11205_v18, %v11219_v41  ;;  %v11221_v23 = vcombine.high %v11198_v56, %v11212_v47  ;;  %v11220_v37 = vcombine.low %v11198_v56, %v11212_v47  ;;  %v13259_v25 = vld [vmem:[#allocation5 + $0x94] ss:$8 sps:$4 sm:$0x77]  }
 0x9e7   : > { %v11225_v20 = vcombine.low %v10830_v54, %v10838_v52  ;;  %v11226_v59 = vcombine.low %v10840_v58, %v10823_v11  ;;  %v11240_v27 = vrot.slane %v11224_v21, %v14900_v2  ;;  %v10850_v6 = vrot.slane %v13257_v42, %v14900_v2 }
 0x9e8   : > { %11626 = vmatprep.mubr.f32.mxu0 %v11222_v22  ;;  %13174 = vmatmul.mubr.msk.f32.gmra.mxu1 %vm17778_vm7, %v11221_v23  ;;  %v10857_v45 = vrot.slane %v13259_v25, %v14900_v2  ;;  %v11290_v32 = vcombine.low %v10837_v40, %v10839_v28 }
 0x9e9   : > { %11627 = vmatmul.mubr.f32.gmra.mxu0 %v11220_v37  ;;  %13176 = vmatprep.mubr.msk.f32.mxu1 %vm13294_vm10, %v13282_v0  ;;  %v11247_v29 = vrot.slane %v11225_v20, %v14900_v2  ;;  %v11254_v53 = vrot.slane %v11226_v59, %v14900_v2  ;;  %v11256_v36 = vcombine.high %v11233_v62, %v11240_v27  ;;  %v12702_v37 = vld [vmem:[%s17504_s10] ss:$0 sm:$0xff] }
 0x9ea   : > { %v11255_v26 = vcombine.low %v11233_v62, %v11240_v27  ;;  %v10872_v17 = vcombine.low %v10850_v6, %v10864_v1  ;;  %v10873_v8 = vcombine.high %v10850_v6, %v10864_v1  ;;  %v10874_v48 = vcombine.low %v10857_v45, %v10871_v51 }
 0x9eb   : > { %v11258_v57 = vcombine.high %v11247_v29, %v11254_v53  ;;  %v11257_v44 = vcombine.low %v11247_v29, %v11254_v53  ;;  %v10875_v38 = vcombine.high %v10857_v45, %v10871_v51  ;;  %v11272_v5 = vrot.slane %v11256_v36, %v14900_v2 }
 0x9ec   : > { %v10882_v16 = vrot.slane %v10872_v17, %v14900_v2  ;;  %v10889_v19 = vrot.slane %v10874_v48, %v14900_v2  ;;  %v10896_v9 = vrot.slane %v10873_v8, %v14900_v2  ;;  %v11265_v63 = vrot.slane %v11255_v26, %v14900_v2 }
 0x9ed   : > { %v11286_v3 = vrot.slane %v11258_v57, %v14900_v2  ;;  %v11279_v39 = vrot.slane %v11257_v44, %v14900_v2  ;;  %v10903_v10 = vrot.slane %v10875_v38, %v14900_v2  ;;  %v11300_v51 = vrot.slane %v11290_v32, %v14900_v2 }
 0x9ee   : > { %v11291_v4 = vcombine.low %v10882_v16, %v10896_v9  ;;  %v12706_v34 = vcombine.high %v10882_v16, %v10896_v9  ;;  %v10905_v35 = vcombine.high %v10889_v19, %v10889_v19  ;;  %v10907_v28 = vcombine.high %v12702_v37, %v12702_v37 }
 0x9ef   : > { %v11289_v1 = vcombine.low %v11272_v5, %v11286_v3  ;;  %v11288_v43 = vcombine.high %v11265_v63, %v11279_v39  ;;  %v11287_v31 = vcombine.low %v11265_v63, %v11279_v39  ;;  %v11293_v24 = vcombine.low %v10889_v19, %v10903_v10 }
 0x9f0   : > { %v11307_v61 = vrot.slane %v11291_v4, %v14900_v2  ;;  %v11314_v18 = vrot.slane %v12706_v34, %v14900_v2  ;;  %v11363_v12 = vrot.slane %v10905_v35, %v14900_v2  ;;  %v10914_v25 = vrot.slane %v12702_v37, %v14900_v2 }
 0x9f1   : > { %11631 = vmatprep.mubr.f32.mxu0 %v11289_v1  ;;  %13177 = vmatmul.mubr.msk.f32.gmra.mxu1 %vm17779_vm3, %v11288_v43  ;;  %v11321_v50 = vrot.slane %v11293_v24, %v14900_v2  ;;  %v10921_v20 = vrot.slane %v10907_v28, %v14900_v2 }
 0x9f2   : > { %11632 = vmatmul.mubr.f32.gmra.mxu0 %v11287_v31  ;;  %13179 = vmatprep.mubr.msk.f32.mxu1 %vm13294_vm10, %v13282_v0  ;;  %v11323_v56 = vcombine.high %v11300_v51, %v11307_v61  ;;  %v11322_v49 = vcombine.low %v11300_v51, %v11307_v61  ;;  %v11364_v52 = vcombine.high %v11363_v12, %v11363_v12 }
 0x9f3   : > { %v11325_v14 = vcombine.high %v11314_v18, %v11321_v50  ;;  %v11324_v54 = vcombine.low %v11314_v18, %v11321_v50  ;;  %v11371_v42 = vrot.slane %v11363_v12, %v14900_v2  ;;  %v10922_v59 = vcombine.high %v10914_v25, %v10914_v25 }
 0x9f4   : > { %v11339_v41 = vrot.slane %v11323_v56, %v14900_v2  ;;  %v11332_v47 = vrot.slane %v11322_v49, %v14900_v2  ;;  %v11378_v22 = vrot.slane %v11364_v52, %v14900_v2  ;;  %v10923_v27 = vcombine.high %v10921_v20, %v10921_v20 }
 0x9f5   : > { %v11353_v11 = vrot.slane %v11325_v14, %v14900_v2  ;;  %v11346_v33 = vrot.slane %v11324_v54, %v14900_v2  ;;  %v11379_v23 = vcombine.high %v11371_v42, %v11371_v42  ;;  %v10937_v6 = vrot.slane %v10921_v20, %v14900_v2 }
 0x9f6   : > { %v10944_v40 = vrot.slane %v10922_v59, %v14900_v2  ;;  %v10951_v45 = vrot.slane %v10923_v27, %v14900_v2 }
 0x9f7   : > { %v11356_v58 = vcombine.low %v11339_v41, %v11353_v11  ;;  %v11355_v21 = vcombine.high %v11332_v47, %v11346_v33  ;;  %v11354_v62 = vcombine.low %v11332_v47, %v11346_v33  ;;  %v17323_v29 = vcombine.high %v10937_v6, %v10937_v6 }
 0x9f8   : > { %v11396_v26 = vcombine.low %v10937_v6, %v10951_v45  ;;  %v10954_v16 = vcombine.high %v10944_v40, %v10944_v40 }
 0x9f9   : > { %11636 = vmatprep.mubr.f32.mxu0 %v11356_v58  ;;  %13180 = vmatmul.mubr.msk.f32.gmra.mxu1 %vm17780_vm11, %v11355_v21  ;;  %v11445_v39 = vcombine.low %v10951_v45, %v17323_v29 }
 0x9fa   : > { %11637 = vmatmul.mubr.f32.gmra.mxu0 %v11354_v62  ;;  %13182 = vmatprep.mubr.msk.f32.mxu1 %vm13294_vm10, %v13282_v0  ;;  %v10930_v0 = vrot.slane %v10914_v25, %v14900_v2  ;;  %v17331_v57 = vrot.slane %v11396_v26, %v14900_v2  ;;  %v11444_v63 = vcombine.low %v10954_v16, %v10937_v6 }
 0x9fb   : > { %11641 = vmatprep.mubr.f32.mxu0 %v11378_v22  ;;  %v17353_v24 = vrot.slane %v11445_v39, %v14900_v2 }
 0x9fc   : > { %v11394_v53 = vcombine.low %v10930_v0, %v10944_v40  ;;  %v12707_v36 = vcombine.high %v10930_v0, %v10944_v40  ;;  %v11397_v17 = vcombine.low %v17323_v29, %v10930_v0  ;;  %v10952_v5 = vcombine.high %v10930_v0, %v10930_v0 }
 0x9fd   : > { %13183 = vmatmul.mubr.msk.f32.gmra.mxu1 %vm17781_vm9, %v11379_v23  ;;  %v17350_v31 = vrot.slane %v11444_v63, %v14900_v2 }
 0x9fe   : > { %11642 = vmatmul.mubr.f32.gmra.mxu0 %v11371_v42  ;;  %v11404_v8 = vrot.slane %v11394_v53, %v14900_v2  ;;  %v17328_v48 = vrot.slane %v12707_v36, %v14900_v2  ;;  %v17334_v44 = vrot.slane %v11397_v17, %v14900_v2  ;;  %v11443_v3 = vcombine.low %v10944_v40, %v10952_v5 }
 0xa00   : > { %v11426_v38 = vcombine.low %v11404_v8, %v17328_v48  ;;  %v11427_v32 = vcombine.low %v17331_v57, %v17334_v44  ;;  %v11452_v43 = vrot.slane %v11443_v3, %v14900_v2  ;;  %v11468_v50 = vcombine.low %v17353_v24, %v11404_v8 }
 0xa01   : > { %v11484_v5 = vcombine.low %v17328_v48, %v17331_v57 }
 0xa02   : > { %v17340_v19 = vrot.slane %v11426_v38, %v14900_v2  ;;  %v17343_v9 = vrot.slane %v11427_v32, %v14900_v2  ;;  %v11467_v18 = vcombine.low %v11452_v43, %v17350_v31  ;;  %v17362_v54 = vrot.slane %v11468_v50, %v14900_v2 }
 0xa03   : > { %v11485_v16 = vcombine.low %v17334_v44, %v11452_v43  ;;  %v17385_v50 = vrot.slane %v11484_v5, %v14900_v2 }
 0xa04   : > { %v11442_v35 = vcombine.low %v17340_v19, %v17343_v9  ;;  %v17359_v14 = vrot.slane %v11467_v18, %v14900_v2 }
 0xa06   : > { %v11483_v23 = vcombine.low %v17359_v14, %v17362_v54 }
 0xa84   : > { %v11713_v10 = vpop.f32.mrf.mxu1 }
 0xa85   : > { %v12979_v4 = vpop.f32.mrf.mxu0 }
 0xa86   : > { %v13166_v34 = vpop.f32.mrf.mxu1 }
 0xa87   : > { %v12980_v1 = vpop.f32.mrf.mxu0 }
 0xa88   : > { %v12981_v51 = vadd.f32 %v12980_v1, %v12979_v4 }
 0xa8a   : > { %v11614_v61 = vadd.f32 %v12981_v51, %v11442_v35 }
 0xa8c   : > { %v11714_v12 = vadd.f32 %v11713_v10, %v11614_v61 }
 0xa8e   : > { %v11754_v56 = vcombine.high %v11714_v12, %v11714_v12  ;;  %v11761_v49 = vrot.slane %v11714_v12, %v14900_v2  ;;  %v11499_v12 = vrot.slane %v11485_v16, %v14900_v2 }
 0xa90   : > { %v11768_v41 = vrot.slane %v11754_v56, %v14900_v2  ;;  %v11769_v47 = vcombine.high %v11761_v49, %v11761_v49  ;;  %v11777_v11 = vrot.slane %v11761_v49, %v14900_v2 }
 0xa91   : > { %v11718_v33 = vpop.f32.mrf.mxu1 }
 0xa92   : > { %v11770_v52 = vcombine.high %v11768_v41, %v11768_v41  ;;  %v11784_v58 = vrot.slane %v11768_v41, %v14900_v2  ;;  %v11791_v21 = vrot.slane %v11769_v47, %v14900_v2  ;;  %v11799_v62 = vcombine.high %v11777_v11, %v11777_v11  ;;  %v12982_v42 = vpop.f32.mrf.mxu0 }
 0xa93   : > { %v13169_v22 = vpop.f32.mrf.mxu1  ;;  %v12111_v27 = vmax.f32 %v11777_v11, 0.0 }
 0xa94   : > { %v11798_v37 = vrot.slane %v11770_v52, %v14900_v2  ;;  %v11800_v28 = vcombine.high %v11784_v58, %v11784_v58  ;;  %v11801_v25 = vcombine.high %v11791_v21, %v11791_v21  ;;  %v12112_v20 = vmax.f32 %v11791_v21, 0.0  ;;  %v12983_v59 = vpop.f32.mrf.mxu0 }
 0xa95   : > { %v12113_v6 = vmax.f32 %v11799_v62, 0.0  ;;  %v12984_v0 = vadd.f32 %v12983_v59, %v12982_v42  ;;  %v12115_v45 = vmax.f32 %v11784_v58, 0.0 }
 0xa96   : > { %v12114_v40 = vmax.f32 %v11801_v25, 0.0  ;;  %v12116_v53 = vmax.f32 %v11798_v37, 0.0  ;;  %v12117_v36 = vmax.f32 %v11800_v28, 0.0  ;;  %v12209_v26 = vcombine.low %v12111_v27, %v12112_v20 }
 0xa97   : > { %v11619_v17 = vadd.f32 %v12984_v0, %v11483_v23  ;;  %v11802_v35 = vcombine.high %v11798_v37, %v11798_v37  ;;  %v11500_v20 = vcombine.low %v17385_v50, %v11499_v12  ;;  %v11501_v0 = vcombine.low %v17350_v31, %v17353_v24 }
 0xa98   : > { %v12210_v8 = vcombine.low %v12113_v6, %v12114_v40  ;;  %v12211_v38 = vcombine.low %v12115_v45, %v12116_v53  ;;  %v12218_v3 = vrot.slane %v12209_v26, %v14900_v2  ;;  %v12239_v10 = vrot.slane %v12117_v36, %v14900_v2 }
 0xa99   : > { %v11719_v32 = vadd.f32 %v11718_v33, %v11619_v17  ;;  %v12118_v52 = vmax.f32 %v11802_v35, 0.0 }
 0xa9a   : > { %v12225_v63 = vrot.slane %v12210_v8, %v14900_v2  ;;  %v12232_v39 = vrot.slane %v12211_v38, %v14900_v2 }
 0xa9b   : > { %v11803_v4 = vcombine.high %v11719_v32, %v11719_v32  ;;  %v11810_v34 = vrot.slane %v11719_v32, %v14900_v2  ;;  %v11508_v32 = vrot.slane %v11501_v0, %v14900_v2 }
 0xa9c   : > { %v12240_v1 = vcombine.low %v12218_v3, %v12225_v63  ;;  %v12241_v51 = vcombine.low %v12232_v39, %v12239_v10 }
 0xa9d   : > { %v11817_v61 = vrot.slane %v11803_v4, %v14900_v2  ;;  %v11818_v48 = vcombine.high %v11810_v34, %v11810_v34  ;;  %v11826_v57 = vrot.slane %v11810_v34, %v14900_v2  ;;  %v11723_v18 = vpop.f32.mrf.mxu1 }
 0xa9e   : > { %v12248_v44 = vrot.slane %v12240_v1, %v14900_v2  ;;  %v12255_v43 = vrot.slane %v12241_v51, %v14900_v2  ;;  %v12985_v11 = vpop.f32.mrf.mxu0  ;;  %v11509_v51 = vcombine.low %v11508_v32, %v17340_v19 }
 0xa9f   : > { %v11819_v56 = vcombine.high %v11817_v61, %v11817_v61  ;;  %v11833_v49 = vrot.slane %v11817_v61, %v14900_v2  ;;  %v11840_v41 = vrot.slane %v11818_v48, %v14900_v2  ;;  %v11848_v47 = vcombine.high %v11826_v57, %v11826_v57  ;;  %v13172_v21 = vpop.f32.mrf.mxu1 }
 0xaa0   : > { %v12256_v33 = vcombine.low %v12248_v44, %v12255_v43  ;;  %v12119_v58 = vmax.f32 %v11826_v57, 0.0  ;;  %v12986_v23 = vpop.f32.mrf.mxu0 }
 0xaa1   : > { %v11847_v62 = vrot.slane %v11819_v56, %v14900_v2  ;;  %v11850_v42 = vcombine.high %v11840_v41, %v11840_v41  ;;  %v12120_v22 = vmax.f32 %v11840_v41, 0.0  ;;  %v12121_v28 = vmax.f32 %v11848_v47, 0.0 }
 0xaa2   : > { %v12552_v37 = vadd.f32 %v12256_v33, %v16189_v55  ;;  %v12257_v25 = vcombine.low %v12118_v52, %v12119_v58  ;;  %v12123_v27 = vmax.f32 %v11833_v49, 0.0  ;;  %v12987_v45 = vadd.f32 %v12986_v23, %v12985_v11 }
 0xaa3   : > { %v12122_v59 = vmax.f32 %v11850_v42, 0.0  ;;  %v12124_v6 = vmax.f32 %v11847_v62, 0.0  ;;  %v12258_v40 = vcombine.low %v12120_v22, %v12121_v28  ;;  %v11851_v17 = vcombine.high %v11847_v62, %v11847_v62 }
 0xaa4   : > { %12559 = vst.msk [vmem:[%s17393_s24] sm:$0x7f] %vm2642_vm5, %v12552_v37  ;;  %v12266_v36 = vrot.slane %v12257_v25, %v14900_v2  ;;  %v11624_v55 = vadd.f32 %v12987_v45, %v11500_v20  ;;  %v11849_v31 = vcombine.high %v11833_v49, %v11833_v49 }
 0xaa5   : > { %v12259_v53 = vcombine.low %v12122_v59, %v12123_v27  ;;  %v12273_v26 = vrot.slane %v12258_v40, %v14900_v2  ;;  %v12287_v38 = vrot.slane %v12124_v6, %v14900_v2  ;;  %v12126_v4 = vmax.f32 %v11851_v17, 0.0 }
 0xaa6   : > { %v11724_v16 = vadd.f32 %v11723_v18, %v11624_v55  ;;  %v12125_v43 = vmax.f32 %v11849_v31, 0.0 }
 0xaa7   : > { %v12280_v8 = vrot.slane %v12259_v53, %v14900_v2  ;;  %v12288_v5 = vcombine.low %v12266_v36, %v12273_v26  ;;  %v11510_v26 = vcombine.low %v17343_v9, %v17359_v14 }
 0xaa8   : > { %v11728_v3 = vpop.f32.mrf.mxu1  ;;  %v11852_v63 = vcombine.high %v11724_v16, %v11724_v16  ;;  %v11859_v39 = vrot.slane %v11724_v16, %v14900_v2  ;;  %v12305_v11 = vcombine.low %v12125_v43, %v12126_v4 }
 0xaa9   : > { %v12289_v24 = vcombine.low %v12280_v8, %v12287_v38  ;;  %v12988_v10 = vpop.f32.mrf.mxu0  ;;  %v12296_v34 = vrot.slane %v12288_v5, %v14900_v2 }
 0xaaa   : > { %v13175_v1 = vpop.f32.mrf.mxu1  ;;  %v11866_v61 = vrot.slane %v11852_v63, %v14900_v2  ;;  %v11867_v48 = vcombine.high %v11859_v39, %v11859_v39  ;;  %v11875_v57 = vrot.slane %v11859_v39, %v14900_v2  ;;  %v12314_v40 = vrot.slane %v12305_v11, %v14900_v2 }
 0xaab   : > { %v12303_v35 = vrot.slane %v12289_v24, %v14900_v2  ;;  %v12989_v44 = vpop.f32.mrf.mxu0 }
 0xaac   : > { %v12990_v12 = vadd.f32 %v12989_v44, %v12988_v10  ;;  %v11868_v56 = vcombine.high %v11866_v61, %v11866_v61  ;;  %v11882_v49 = vrot.slane %v11866_v61, %v14900_v2  ;;  %v11889_v41 = vrot.slane %v11867_v48, %v14900_v2 }
 0xaad   : > { %v12304_v18 = vcombine.low %v12296_v34, %v12303_v35  ;;  %v11897_v47 = vcombine.high %v11875_v57, %v11875_v57  ;;  %v12127_v42 = vmax.f32 %v11875_v57, 0.0 }
 0xaae   : > { %v11629_v19 = vadd.f32 %v12990_v12, %v11509_v51  ;;  %v11896_v52 = vrot.slane %v11868_v56, %v14900_v2  ;;  %v11898_v58 = vcombine.high %v11882_v49, %v11882_v49  ;;  %v11899_v21 = vcombine.high %v11889_v41, %v11889_v41 }
 0xaaf   : > { %v12553_v33 = vadd.f32 %v12304_v18, %v16212_v30  ;;  %v12128_v62 = vmax.f32 %v11889_v41, 0.0  ;;  %v12129_v22 = vmax.f32 %v11897_v47, 0.0  ;;  %v12131_v28 = vmax.f32 %v11882_v49, 0.0 }
 0xab0   : > { %v11729_v23 = vadd.f32 %v11728_v3, %v11629_v19  ;;  %v12130_v37 = vmax.f32 %v11899_v21, 0.0  ;;  %v12132_v25 = vmax.f32 %v11896_v52, 0.0  ;;  %v12133_v20 = vmax.f32 %v11898_v58, 0.0 }
 0xab1   : > { %12560 = vst.msk [vmem:[%s17393_s24 + $0x8] sm:$0x7f] %vm2642_vm5, %v12553_v33  ;;  %v11733_v59 = vpop.f32.mrf.mxu1  ;;  %v12306_v27 = vcombine.low %v12127_v42, %v12128_v62  ;;  %v11900_v45 = vcombine.high %v11896_v52, %v11896_v52  ;;  %v12335_v16 = vrot.slane %v12131_v28, %v14900_v2 }
 0xab2   : > { %v11901_v6 = vcombine.high %v11729_v23, %v11729_v23  ;;  %v11908_v30 = vrot.slane %v11729_v23, %v14900_v2  ;;  %v12991_v0 = vpop.f32.mrf.mxu0  ;;  %v12307_v53 = vcombine.low %v12129_v22, %v12130_v37  ;;  %v12353_v31 = vcombine.low %v12132_v25, %v12133_v20 }
 0xab3   : > { %v13178_v36 = vpop.f32.mrf.mxu1  ;;  %v12321_v55 = vrot.slane %v12306_v27, %v14900_v2  ;;  %v12134_v61 = vmax.f32 %v11900_v45, 0.0 }
 0xab4   : > { %v11915_v17 = vrot.slane %v11901_v6, %v14900_v2  ;;  %v11916_v8 = vcombine.high %v11908_v30, %v11908_v30  ;;  %v11924_v38 = vrot.slane %v11908_v30, %v14900_v2  ;;  %v12992_v32 = vpop.f32.mrf.mxu0  ;;  %v12328_v5 = vrot.slane %v12307_v53, %v14900_v2 }
 0xab5   : > { %v12993_v24 = vadd.f32 %v12992_v32, %v12991_v0  ;;  %v12336_v3 = vcombine.low %v12314_v40, %v12321_v55  ;;  %v12362_v12 = vrot.slane %v12353_v31, %v14900_v2 }
 0xab6   : > { %v11917_v63 = vcombine.high %v11915_v17, %v11915_v17  ;;  %v11931_v39 = vrot.slane %v11915_v17, %v14900_v2  ;;  %v11938_v9 = vrot.slane %v11916_v8, %v14900_v2  ;;  %v12337_v14 = vcombine.low %v12328_v5, %v12335_v16 }
 0xab7   : > { %v11946_v10 = vcombine.high %v11924_v38, %v11924_v38  ;;  %v12135_v4 = vmax.f32 %v11924_v38, 0.0  ;;  %v11634_v34 = vadd.f32 %v12993_v24, %v11510_v26  ;;  %v12344_v48 = vrot.slane %v12336_v3, %v14900_v2 }
 0xab8   : > { %v11945_v35 = vrot.slane %v11917_v63, %v14900_v2  ;;  %v11947_v1 = vcombine.high %v11931_v39, %v11931_v39  ;;  %v11948_v51 = vcombine.high %v11938_v9, %v11938_v9  ;;  %v12351_v57 = vrot.slane %v12337_v14, %v14900_v2 }
 0xab9   : > { %v12136_v44 = vmax.f32 %v11938_v9, 0.0  ;;  %v12137_v43 = vmax.f32 %v11946_v10, 0.0  ;;  %v11738_v18 = vpop.f32.mrf.mxu1  ;;  %v12354_v11 = vcombine.low %v12134_v61, %v12135_v4  ;;  %v11734_v19 = vadd.f32 %v11733_v59, %v11634_v34 }
 0xaba   : > { %v11949_v56 = vcombine.high %v11945_v35, %v11945_v35  ;;  %v12138_v49 = vmax.f32 %v11948_v51, 0.0  ;;  %v12994_v41 = vpop.f32.mrf.mxu0  ;;  %v12352_v47 = vcombine.low %v12344_v48, %v12351_v57  ;;  %v12140_v58 = vmax.f32 %v11945_v35, 0.0 }
 0xabb   : > { %v12355_v33 = vcombine.low %v12136_v44, %v12137_v43  ;;  %v13181_v52 = vpop.f32.mrf.mxu1  ;;  %v12141_v21 = vmax.f32 %v11947_v1, 0.0  ;;  %v12369_v37 = vrot.slane %v12354_v11, %v14900_v2  ;;  %v11950_v25 = vcombine.high %v11734_v19, %v11734_v19 }
 0xabc   : > { %v12142_v62 = vmax.f32 %v11949_v56, 0.0  ;;  %v12383_v42 = vrot.slane %v12138_v49, %v14900_v2  ;;  %v12995_v22 = vpop.f32.mrf.mxu0  ;;  %v12554_v23 = vadd.f32 %v12352_v47, %v16249_v7  ;;  %v12139_v27 = vmax.f32 %v11931_v39, 0.0 }
 0xabd   : > { %v12376_v28 = vrot.slane %v12355_v33, %v14900_v2  ;;  %v11743_v20 = vpop.f32.mrf.mxu1  ;;  %v11957_v6 = vrot.slane %v11734_v19, %v14900_v2  ;;  %v11511_v59 = vcombine.low %v17362_v54, %v17385_v50  ;;  %v12996_v30 = vadd.f32 %v12995_v22, %v12994_v41 }
 0xabe   : > { %12561 = vst.msk [vmem:[%s17393_s24 + $0x10] sm:$0x7f] %vm2642_vm5, %v12554_v23  ;;  %v12384_v0 = vcombine.low %v12362_v12, %v12369_v37  ;;  %v12402_v45 = vcombine.low %v12141_v21, %v12142_v62  ;;  %v11964_v7 = vrot.slane %v11950_v25, %v14900_v2  ;;  %v12401_v36 = vcombine.low %v12139_v27, %v12140_v58  ;;  %v12997_v17 = vpop.f32.mrf.mxu0 }
 0xabf   : > { %v12385_v40 = vcombine.low %v12376_v28, %v12383_v42  ;;  %v13184_v53 = vpop.f32.mrf.mxu1  ;;  %v11965_v26 = vcombine.high %v11957_v6, %v11957_v6  ;;  %v11973_v55 = vrot.slane %v11957_v6, %v14900_v2  ;;  %v11518_v8 = vrot.slane %v17323_v29, %v14900_v2 }
 0xac0   : > { %v12392_v38 = vrot.slane %v12384_v0, %v14900_v2  ;;  %v11966_v50 = vcombine.high %v11964_v7, %v11964_v7  ;;  %v11980_v32 = vrot.slane %v11964_v7, %v14900_v2  ;;  %v11639_v31 = vadd.f32 %v12996_v30, %v11511_v59  ;;  %v12998_v4 = vpop.f32.mrf.mxu0 }
 0xac1   : > { %v12399_v54 = vrot.slane %v12385_v40, %v14900_v2  ;;  %v11987_v5 = vrot.slane %v11965_v26, %v14900_v2  ;;  %v11995_v16 = vcombine.high %v11973_v55, %v11973_v55  ;;  %v12417_v3 = vrot.slane %v12402_v45, %v14900_v2 }
 0xac2   : > { %v11994_v63 = vrot.slane %v11966_v50, %v14900_v2  ;;  %v11996_v39 = vcombine.high %v11980_v32, %v11980_v32  ;;  %v12143_v29 = vmax.f32 %v11973_v55, 0.0  ;;  %v12410_v34 = vrot.slane %v12401_v36, %v14900_v2 }
 0xac3   : > { %v12400_v24 = vcombine.low %v12392_v38, %v12399_v54  ;;  %v11997_v9 = vcombine.high %v11987_v5, %v11987_v5  ;;  %v12144_v14 = vmax.f32 %v11987_v5, 0.0  ;;  %v12145_v10 = vmax.f32 %v11995_v16, 0.0 }
 0xac4   : > { %v11525_v1 = vrot.slane %v11518_v8, %v14900_v2  ;;  %v12148_v51 = vmax.f32 %v11994_v63, 0.0  ;;  %v12149_v61 = vmax.f32 %v11996_v39, 0.0  ;;  %v11739_v57 = vadd.f32 %v11738_v18, %v11639_v31 }
 0xac5   : > { %v12555_v35 = vadd.f32 %v12400_v24, %v16270_v60  ;;  %v12403_v48 = vcombine.low %v12143_v29, %v12144_v14  ;;  %v12432_v44 = vcombine.low %v12410_v34, %v12417_v3  ;;  %v11998_v43 = vcombine.high %v11994_v63, %v11994_v63 }
 0xac6   : > { %v12146_v12 = vmax.f32 %v11997_v9, 0.0  ;;  %v12999_v56 = vadd.f32 %v12998_v4, %v12997_v17  ;;  %v12431_v41 = vrot.slane %v12145_v10, %v14900_v2  ;;  %v11999_v47 = vcombine.high %v11739_v57, %v11739_v57 }
 0xac7   : > { %12562 = vst.msk [vmem:[%s17393_s24 + $0x18] sm:$0x7f] %vm2642_vm5, %v12555_v35  ;;  %v12424_v49 = vrot.slane %v12403_v48, %v14900_v2  ;;  %v12006_v11 = vrot.slane %v11739_v57, %v14900_v2  ;;  %v12147_v60 = vmax.f32 %v11980_v32, 0.0  ;;  %v12450_v52 = vcombine.low %v12148_v51, %v12149_v61 }
 0xac8   : > { %v11644_v33 = vadd.f32 %v12999_v56, %v11525_v1  ;;  %v12013_v58 = vrot.slane %v11999_v47, %v14900_v2  ;;  %v12440_v21 = vrot.slane %v12432_v44, %v14900_v2  ;;  %v12150_v25 = vmax.f32 %v11998_v43, 0.0 }
 0xac9   : > { %v12433_v19 = vcombine.low %v12424_v49, %v12431_v41  ;;  %v12014_v18 = vcombine.high %v12006_v11, %v12006_v11  ;;  %v12449_v62 = vcombine.low %v12146_v12, %v12147_v60  ;;  %v12022_v42 = vrot.slane %v12006_v11, %v14900_v2 }
 0xaca   : > { %v11744_v22 = vadd.f32 %v11743_v20, %v11644_v33  ;;  %v12015_v37 = vcombine.high %v12013_v58, %v12013_v58  ;;  %v12029_v28 = vrot.slane %v12013_v58, %v14900_v2  ;;  %v12465_v40 = vrot.slane %v12450_v52, %v14900_v2 }
 0xacb   : > { %v12447_v23 = vrot.slane %v12433_v19, %v14900_v2  ;;  %v12036_v27 = vrot.slane %v12014_v18, %v14900_v2  ;;  %v12044_v6 = vcombine.high %v12022_v42, %v12022_v42  ;;  %v12151_v59 = vmax.f32 %v12022_v42, 0.0 }
 0xacc   : > { %v12054_v30 = vrot.slane %v11744_v22, %v14900_v2  ;;  %v12043_v45 = vrot.slane %v12015_v37, %v14900_v2  ;;  %v12045_v7 = vcombine.high %v12029_v28, %v12029_v28  ;;  %v12458_v20 = vrot.slane %v12449_v62, %v14900_v2 }
 0xacd   : > { %v12448_v0 = vcombine.low %v12440_v21, %v12447_v23  ;;  %v12046_v53 = vcombine.high %v12036_v27, %v12036_v27  ;;  %v12152_v36 = vmax.f32 %v12036_v27, 0.0  ;;  %v12153_v26 = vmax.f32 %v12044_v6, 0.0 }
 0xace   : > { %v12047_v17 = vcombine.high %v12043_v45, %v12043_v45  ;;  %v12155_v8 = vmax.f32 %v12029_v28, 0.0  ;;  %v12156_v38 = vmax.f32 %v12043_v45, 0.0  ;;  %v12451_v50 = vcombine.low %v12150_v25, %v12151_v59 }
 0xacf   : > { %v12556_v55 = vadd.f32 %v12448_v0, %v16299_v15  ;;  %v12154_v54 = vmax.f32 %v12046_v53, 0.0  ;;  %v12479_v32 = vrot.slane %v12152_v36, %v14900_v2  ;;  %v12061_v5 = vrot.slane %v12054_v30, %v14900_v2 }
 0xad0   : > { %v12157_v16 = vmax.f32 %v12045_v7, 0.0  ;;  %v12158_v31 = vmax.f32 %v12047_v17, 0.0  ;;  %v12498_v24 = vcombine.low %v12155_v8, %v12156_v38  ;;  %v12480_v3 = vcombine.low %v12458_v20, %v12465_v40 }
 0xad1   : > { %12563 = vst.msk [vmem:[%s17393_s24 + $0x20] sm:$0x7f] %vm2642_vm5, %v12556_v55  ;;  %v12472_v63 = vrot.slane %v12451_v50, %v14900_v2  ;;  %v12497_v39 = vcombine.low %v12153_v26, %v12154_v54  ;;  %v12159_v9 = vmax.f32 %v12061_v5, 0.0 }
 0xad2   : > { %v12499_v15 = vcombine.low %v12157_v16, %v12158_v31  ;;  %v12513_v29 = vrot.slane %v12498_v24, %v14900_v2  ;;  %v12488_v35 = vrot.slane %v12480_v3, %v14900_v2 }
 0xad3   : > { %v12481_v14 = vcombine.low %v12472_v63, %v12479_v32  ;;  %v12506_v10 = vrot.slane %v12497_v39, %v14900_v2  ;;  %v12527_v34 = vrot.slane %v12159_v9, %v14900_v2 }
 0xad4   : > { %v12520_v4 = vrot.slane %v12499_v15, %v14900_v2 }
 0xad5   : > { %v12495_v1 = vrot.slane %v12481_v14, %v14900_v2  ;;  %v12528_v51 = vcombine.low %v12506_v10, %v12513_v29 }
 0xad6   : > { %v12529_v61 = vcombine.low %v12520_v4, %v12527_v34 }
 0xad7   : > { %v12496_v48 = vcombine.low %v12488_v35, %v12495_v1  ;;  %v12536_v57 = vrot.slane %v12528_v51, %v14900_v2 }
 0xad8   : > { %v12543_v44 = vrot.slane %v12529_v61, %v14900_v2 }
 0xad9   : > { %v12557_v43 = vadd.f32 %v12496_v48, %v16356_v13 }
 0xada   : > { %v12544_v12 = vcombine.low %v12536_v57, %v12543_v44 }
 0xadb   : > { %12564 = vst.msk [vmem:[%s17393_s24 + $0x28] sm:$0x7f] %vm2642_vm5, %v12557_v43 }
 0xadc   : > { %v12558_v56 = vadd.f32 %v12544_v12, %v16426_v46 }
 0xade   : > { %12565 = vst.msk [vmem:[%s17393_s24 + $0x30] sm:$0x7f] %vm2642_vm5, %v12558_v56 }
 0xadf PF: > { %s21_s17 = sadd.s32 1, %s13280_s17  }
 0xae0   : > { %p18_p4 = scmp.ge.s32.totalorder %s21_s17, 4  }
 0xae2   :  { %20 = sbr.rel (!%p18_p4) target bundleno = 1 (0x1), region = 102 }

</bundles_post_ra>
